<compile_context>
chip_gen: v7x
topology: tpu7x:2x2x1
jax: 0.10.0
libtpu: 0.0.40
codegen_flags: <defaults>
</compile_context>

<pallas_src>
import functools
import math

import numpy as np
import jax
import jax.numpy as jnp
from jax.experimental import pallas as pl
from jax.experimental.pallas import tpu as pltpu


# ----------------------------------------------------------------------------
# helpers
# ----------------------------------------------------------------------------
def _round_up(x, m):
    return ((x + m - 1) // m) * m


def _pad_to(a, shape):
    pads = [(0, t - s) for s, t in zip(a.shape, shape)]
    if all(p == (0, 0) for p in pads):
        return a
    return jnp.pad(a, pads)


# ----------------------------------------------------------------------------
# Pallas kernel 1: K-tiled matmul, fused bias + ReLU + optional 2nd projection
#   y = relu?(x @ w + b)            (has_proj=False)
#   y = relu?(x @ w + b) @ w2 + b2  (has_proj=True, e.g. conv3x3+BN+ReLU+conv1x1)
# ----------------------------------------------------------------------------
def _mm_kernel(*refs, relu, has_bias, has_proj):
    idx = 0
    x_ref = refs[idx]; idx += 1
    w_ref = refs[idx]; idx += 1
    b_ref = None
    if has_bias:
        b_ref = refs[idx]; idx += 1
    w2_ref = b2_ref = None
    if has_proj:
        w2_ref = refs[idx]; idx += 1
        b2_ref = refs[idx]; idx += 1
    o_ref = refs[idx]; idx += 1
    acc_ref = refs[idx]

    @pl.when(pl.program_id(1) == 0)
    def _init():
        acc_ref[...] = jnp.zeros_like(acc_ref)

    acc_ref[...] += jnp.dot(x_ref[...], w_ref[...],
                            preferred_element_type=jnp.float32)

    @pl.when(pl.program_id(1) == pl.num_programs(1) - 1)
    def _finalize():
        acc = acc_ref[...]
        if has_bias:
            acc = acc + b_ref[...]
        if relu:
            acc = jnp.maximum(acc, 0.0)
        if has_proj:
            acc = jnp.dot(acc.astype(w2_ref.dtype), w2_ref[...],
                          preferred_element_type=jnp.float32) + b2_ref[...]
        o_ref[...] = acc.astype(o_ref.dtype)


def pallas_matmul(x, w, b=None, relu=False, w2=None, b2=None,
                  tm=512, tk=512, compute_dtype=jnp.bfloat16,
                  out_dtype=jnp.float32):
    """relu?(x @ w + b) [@ w2 + b2].  x:(M,K), w:(K,N), w2:(N,N2)."""
    x = jnp.asarray(x)
    w = jnp.asarray(w)
    M, K = x.shape
    K2, N = w.shape
    assert K == K2, (K, K2)
    has_bias = b is not None
    has_proj = w2 is not None

    Kp0 = _round_up(K, 128)
    tk_eff = min(tk, Kp0)
    Kp = _round_up(K, tk_eff)
    Np = _round_up(N, 128)
    tm_eff = min(tm, _round_up(M, 8))
    Mp = _round_up(M, tm_eff)

    args = [_pad_to(x.astype(compute_dtype), (Mp, Kp)),
            _pad_to(w.astype(compute_dtype), (Kp, Np))]
    in_specs = [pl.BlockSpec((tm_eff, tk_eff), lambda i, k: (i, k)),
                pl.BlockSpec((tk_eff, Np), lambda i, k: (k, 0))]
    if has_bias:
        args.append(_pad_to(jnp.asarray(b, jnp.float32).reshape(1, N), (1, Np)))
        in_specs.append(pl.BlockSpec((1, Np), lambda i, k: (0, 0)))
    if has_proj:
        w2 = jnp.asarray(w2)
        N2 = w2.shape[1]
        Np2 = _round_up(N2, 128)
        args.append(_pad_to(w2.astype(compute_dtype), (Np, Np2)))
        in_specs.append(pl.BlockSpec((Np, Np2), lambda i, k: (0, 0)))
        b2v = jnp.zeros((N2,), jnp.float32) if b2 is None else jnp.asarray(b2, jnp.float32)
        args.append(_pad_to(b2v.reshape(1, N2), (1, Np2)))
        in_specs.append(pl.BlockSpec((1, Np2), lambda i, k: (0, 0)))
        Nout, Nfinal = Np2, N2
    else:
        Nout, Nfinal = Np, N

    out = pl.pallas_call(
        functools.partial(_mm_kernel, relu=relu, has_bias=has_bias,
                          has_proj=has_proj),
        out_shape=jax.ShapeDtypeStruct((Mp, Nout), out_dtype),
        grid=(Mp // tm_eff, Kp // tk_eff),
        in_specs=in_specs,
        out_specs=pl.BlockSpec((tm_eff, Nout), lambda i, k: (i, 0)),
        scratch_shapes=[pltpu.VMEM((tm_eff, Np), jnp.float32)],
        compiler_params=pltpu.CompilerParams(
            dimension_semantics=("parallel", "arbitrary"),
            vmem_limit_bytes=64 * 1024 * 1024),
    )(*args)

    if Mp != M or Nout != Nfinal:
        out = out[:M, :Nfinal]
    return out


# ----------------------------------------------------------------------------
# Pallas kernel 2: fused single-head cross-attention decoder layer
#   per batch: Q/K/V proj -> QK^T -> masked softmax -> P.V -> out proj -> +tgt
# ----------------------------------------------------------------------------
def _attn_kernel(tgt_ref, qe_ref, src_ref, pos_ref, w_ref, b_ref, o_ref,
                 *, s_valid, scale):
    f32 = jnp.float32
    bf16 = jnp.bfloat16

    tgt = tgt_ref[0]                                    # (Lp, dp) f32
    src = src_ref[0]                                    # (Sp, dp) f32
    q_in = (tgt + qe_ref[...]).astype(bf16)
    k_in = (src + pos_ref[0]).astype(bf16)
    v_in = src.astype(bf16)

    q = jnp.dot(q_in, w_ref[0], preferred_element_type=f32) + b_ref[0]
    k = jnp.dot(k_in, w_ref[1], preferred_element_type=f32) + b_ref[1]
    v = jnp.dot(v_in, w_ref[2], preferred_element_type=f32) + b_ref[2]

    s = jax.lax.dot_general(q.astype(bf16), k.astype(bf16),
                            (((1,), (1,)), ((), ())),
                            preferred_element_type=f32) * scale   # (Lp, Sp)
    col = jax.lax.broadcasted_iota(jnp.int32, s.shape, 1)
    s = jnp.where(col < s_valid, s, -1e30)                # mask padded keys

    m = jnp.max(s, axis=-1, keepdims=True)                # softmax in f32
    p = jnp.exp(s - m)
    l = jnp.sum(p, axis=-1, keepdims=True)
    ctx = jnp.dot(p.astype(bf16), v.astype(bf16), preferred_element_type=f32)
    ctx = ctx * pl.reciprocal(l, approx=True)

    out = jnp.dot(ctx.astype(bf16), w_ref[3], preferred_element_type=f32) + b_ref[3]
    o_ref[0] = (out + tgt).astype(o_ref.dtype)


def fused_cross_attention(tgt, query_embed, src, pos,
                          wq, wk, wv, wo, bq, bk, bv, bo):
    """tgt:(n,L,d) query_embed:(L,d) src/pos:(n,S,d) -> (n,L,d)."""
    n, L, d = tgt.shape
    S = src.shape[1]
    Lp = _round_up(L, 8)
    Sp = _round_up(S, 8)
    dp = _round_up(d, 128)

    tgt_p = _pad_to(tgt.astype(jnp.float32), (n, Lp, dp))
    qe_p = _pad_to(query_embed.astype(jnp.float32), (Lp, dp))
    src_p = _pad_to(src.astype(jnp.float32), (n, Sp, dp))
    pos_p = _pad_to(pos.astype(jnp.float32), (n, Sp, dp))
    w_p = _pad_to(jnp.stack([wq, wk, wv, wo], 0), (4, dp, dp)).astype(jnp.bfloat16)
    b_p = _pad_to(jnp.stack([bq, bk, bv, bo], 0).reshape(4, 1, d),
                  (4, 1, dp)).astype(jnp.float32)

    out = pl.pallas_call(
        functools.partial(_attn_kernel, s_valid=S, scale=1.0 / math.sqrt(d)),
        out_shape=jax.ShapeDtypeStruct((n, Lp, dp), jnp.float32),
        grid=(n,),
        in_specs=[
            pl.BlockSpec((1, Lp, dp), lambda b: (b, 0, 0)),
            pl.BlockSpec((Lp, dp), lambda b: (0, 0)),
            pl.BlockSpec((1, Sp, dp), lambda b: (b, 0, 0)),
            pl.BlockSpec((1, Sp, dp), lambda b: (b, 0, 0)),
            pl.BlockSpec((4, dp, dp), lambda b: (0, 0, 0)),
            pl.BlockSpec((4, 1, dp), lambda b: (0, 0, 0)),
        ],
        out_specs=pl.BlockSpec((1, Lp, dp), lambda b: (b, 0, 0)),
        compiler_params=pltpu.CompilerParams(
            dimension_semantics=("parallel",),
            vmem_limit_bytes=64 * 1024 * 1024),
    )(tgt_p, qe_p, src_p, pos_p, w_p, b_p)
    return out[:, :L, :d]


# ----------------------------------------------------------------------------
# Exact 1-D linear operators (adaptive avg-pool / bilinear align_corners) and
# a separable (H-then-W) application through the Pallas matmul.
# ----------------------------------------------------------------------------
def adaptive_pool_matrix(in_size, out_size):
    P = np.zeros((out_size, in_size), np.float32)
    for o in range(out_size):
        start = (o * in_size) // out_size
        end = -(-((o + 1) * in_size) // out_size)  # ceil
        P[o, start:end] = 1.0 / (end - start)
    return P


def bilinear_matrix_1d(in_size, out_size):
    R = np.zeros((out_size, in_size), np.float32)
    if in_size == 1:
        R[:, 0] = 1.0
        return R
    if out_size == 1:
        R[0, 0] = 1.0
        return R
    scale = (in_size - 1) / (out_size - 1)
    for o in range(out_size):
        pos = o * scale
        i0 = int(math.floor(pos))
        i1 = min(i0 + 1, in_size - 1)
        frac = pos - i0
        R[o, i0] += 1.0 - frac
        R[o, i1] += frac
    return R


def separable_resize_nhwc(x, Rh, Rw):
    """x:(n,H,W,c) channels-last; Rh:(Ho,H), Rw:(Wo,W) -> (n,Ho,Wo,c).
    Equivalent to applying kron(Rh, Rw) on the flattened spatial axis, but
    separable: two small 1-D matmuls instead of an O(H*W*Ho*Wo) dense matrix,
    and the long (n*spatial*c) dimension lands on M.  Kept in f32."""
    Rh = jnp.asarray(Rh, jnp.float32)
    Rw = jnp.asarray(Rw, jnp.float32)
    n, H, W, c = x.shape
    Ho, Wo = Rh.shape[0], Rw.shape[0]
    t = x.transpose(0, 2, 3, 1).reshape(n * W * c, H)            # contract H
    t = pallas_matmul(t, Rh.T, compute_dtype=jnp.float32)
    t = t.reshape(n, W, c, Ho).transpose(0, 3, 2, 1).reshape(n * Ho * c, W)
    t = pallas_matmul(t, Rw.T, compute_dtype=jnp.float32)        # contract W
    return t.reshape(n, Ho, c, Wo).transpose(0, 1, 3, 2)         # (n,Ho,Wo,c)


def position_embedding_sine(n, h, w, num_pos_feats, temperature=10000.0,
                            scale=2.0 * math.pi):
    """PositionEmbeddingSine(normalize=True), all-valid mask. Returns NHWC."""
    y_embed = jnp.broadcast_to(
        jnp.arange(1, h + 1, dtype=jnp.float32)[None, :, None], (n, h, w))
    x_embed = jnp.broadcast_to(
        jnp.arange(1, w + 1, dtype=jnp.float32)[None, None, :], (n, h, w))
    eps = 1e-6
    y_embed = y_embed / (y_embed[:, -1:, :] + eps) * scale
    x_embed = x_embed / (x_embed[:, :, -1:] + eps) * scale
    dim_t = jnp.arange(num_pos_feats, dtype=jnp.float32)
    dim_t = temperature ** (2.0 * (dim_t // 2) / num_pos_feats)
    pos_x = x_embed[..., None] / dim_t
    pos_y = y_embed[..., None] / dim_t
    pos_x = jnp.stack([jnp.sin(pos_x[..., 0::2]), jnp.cos(pos_x[..., 1::2])],
                      axis=4).reshape(n, h, w, -1)
    pos_y = jnp.stack([jnp.sin(pos_y[..., 0::2]), jnp.cos(pos_y[..., 1::2])],
                      axis=4).reshape(n, h, w, -1)
    return jnp.concatenate([pos_y, pos_x], axis=3)       # (n, h, w, hidden)


def im2col3x3_nhwc(x):
    """NHWC -> (N*H*W, 9*C), padding=1, stride=1.  Built directly in NHWC so
    no big transpose precedes the matmul; tap order = (kh, kw, channel)."""
    n, h, w, c = x.shape
    xp = jnp.pad(x, ((0, 0), (1, 1), (1, 1), (0, 0)))
    taps = [xp[:, dh:dh + h, dw:dw + w, :] for dh in range(3) for dw in range(3)]
    return jnp.concatenate(taps, axis=-1).reshape(n * h * w, 9 * c)


# ----------------------------------------------------------------------------
# Parameters (deterministic synthetic init) and forward pass
# ----------------------------------------------------------------------------
class Cfg:
    c_in = 3
    inplanes = 64          # stand-in for 2048 (small shapes)
    hidden = 32            # stand-in for hidden_dim=256
    bins = (1, 3, 6, 8)
    classes = 2
    zoom_factor = 8
    cls_mid = 64           # stand-in for 512 in the cls head
    im_length = sum(i * i for i in bins)   # 110, matches ImLength default


def init_params(key, cfg):
    ks = jax.random.split(key, 12)

    def nrm(k, shape, s=0.05):
        return jax.random.normal(k, shape, jnp.float32) * s

    p = {}
    # TODO(synk): ResNet-50 backbone (layer0..layer4) is defined outside this
    # file; substituted by a deterministic 8x spatial avg-downsample followed
    # by this pointwise projection + ReLU.
    p["backbone_w"] = nrm(ks[0], (cfg.c_in, cfg.inplanes))
    p["backbone_b"] = jnp.zeros((cfg.inplanes,), jnp.float32)
    # feat_proj: Conv2d(inplanes, hidden, kernel_size=1)
    p["feat_proj_w"] = nrm(ks[1], (cfg.inplanes, cfg.hidden))
    p["feat_proj_b"] = nrm(ks[2], (cfg.hidden,), 0.01)
    # query_embed: nn.Embedding(ImLength, hidden)
    p["query_embed"] = nrm(ks[3], (cfg.im_length, cfg.hidden), 1.0)
    # TODO(synk): external 6-layer DETR Transformer definition unavailable;
    # substituted one single-head cross-attention decoder layer (same I/O shapes).
    p["wq"], p["bq"] = nrm(ks[4], (cfg.hidden, cfg.hidden)), jnp.zeros((cfg.hidden,))
    p["wk"], p["bk"] = nrm(ks[5], (cfg.hidden, cfg.hidden)), jnp.zeros((cfg.hidden,))
    p["wv"], p["bv"] = nrm(ks[6], (cfg.hidden, cfg.hidden)), jnp.zeros((cfg.hidden,))
    p["wo"], p["bo"] = nrm(ks[7], (cfg.hidden, cfg.hidden)), jnp.zeros((cfg.hidden,))
    # cls head: Conv2d(hidden*(1+len(bins)), cls_mid, 3, bias=False) + BN + ReLU
    #           + Dropout(eval=id) + Conv2d(cls_mid, classes, 1)
    c_cat = cfg.hidden * (1 + len(cfg.bins))
    p["cls_conv3_w"] = nrm(ks[8], (cfg.cls_mid, c_cat, 3, 3))
    p["cls_bn_gamma"] = jnp.ones((cfg.cls_mid,), jnp.float32)
    p["cls_bn_beta"] = jnp.zeros((cfg.cls_mid,), jnp.float32)
    p["cls_bn_mean"] = jnp.zeros((cfg.cls_mid,), jnp.float32)
    p["cls_bn_var"] = jnp.ones((cfg.cls_mid,), jnp.float32)
    p["cls_conv1_w"] = nrm(ks[9], (cfg.cls_mid, cfg.classes))
    p["cls_conv1_b"] = jnp.zeros((cfg.classes,), jnp.float32)
    return p


def transform_net_forward(params, x, cfg):
    """Eval-mode forward of TransformNet.  x: (N, C, H, W) float32 (NCHW)."""
    n, c, H, W = x.shape
    h_out = int((H - 1) / 8 * cfg.zoom_factor + 1)
    w_out = int((W - 1) / 8 * cfg.zoom_factor + 1)
    Hf, Wf = H // 8, W // 8          # output_stride = 8 feature resolution
    S = Hf * Wf
    d = cfg.hidden
    nb = len(cfg.bins)

    # ---- backbone stand-in (layer0..layer4): 8x adaptive pool + projection ----
    x_nhwc = x.transpose(0, 2, 3, 1)                               # (n, H, W, c)
    pooled = separable_resize_nhwc(x_nhwc,
                                   adaptive_pool_matrix(H, Hf),
                                   adaptive_pool_matrix(W, Wf))    # (n, Hf, Wf, c)
    f4 = pallas_matmul(pooled.reshape(n * S, c),
                       params["backbone_w"], params["backbone_b"], relu=True)

    # ---- feat_proj: 1x1 conv -> proj_f4 (channels-last) ----
    proj = pallas_matmul(f4, params["feat_proj_w"], params["feat_proj_b"])
    proj_seq = proj.reshape(n, S, d)                               # (n, S, d)
    proj_chan = proj_seq.transpose(0, 2, 1).reshape(n * d, S)      # (n*d, S)

    # ---- PSPModule: adaptive avg pools (1,3,6,8) concatenated ----
    # (the per-bin pool operator is tiny even at production scale — kept as one
    #  dense (L, S) matrix so all bins run in a single matmul call)
    A = np.concatenate(
        [np.kron(adaptive_pool_matrix(Hf, i), adaptive_pool_matrix(Wf, i))
         for i in cfg.bins], axis=0)                               # (L, S)
    L = A.shape[0]
    spp = pallas_matmul(proj_chan, jnp.asarray(A).T,
                        compute_dtype=jnp.float32)                 # (n*d, L)
    tgt = spp.reshape(n, d, L).transpose(0, 2, 1)                  # (n, L, d)

    # ---- proj_f4_half = interpolate(scale_factor=1.0) == identity ----
    # ---- positional encoding; mask is all-False -> no masking ----
    pos_seq = position_embedding_sine(n, Hf, Wf, d // 2).reshape(n, S, d)

    # ---- transformer stand-in: fused single-head cross-attention decoder ----
    tr = fused_cross_attention(tgt, params["query_embed"], proj_seq, pos_seq,
                               params["wq"], params["wk"], params["wv"],
                               params["wo"], params["bq"], params["bk"],
                               params["bv"], params["bo"])         # (n, L, d)

    # ---- per-bin slice -> view(i,i) -> bilinear resize -> concat ----
    # all 4 bins batched into ONE matmul via a block-diagonal resize operator.
    Bblk = np.zeros((L, nb * S), np.float32)
    off = 0
    for bi, i in enumerate(cfg.bins):
        sq = i * i
        Bi = np.kron(bilinear_matrix_1d(i, Hf), bilinear_matrix_1d(i, Wf))  # (S, sq)
        Bblk[off:off + sq, bi * S:(bi + 1) * S] = Bi.T
        off += sq
    tr_chan = tr.transpose(0, 2, 1).reshape(n * d, L)
    resized = pallas_matmul(tr_chan, jnp.asarray(Bblk),
                            compute_dtype=jnp.float32)             # (n*d, nb*S)
    resized_nhwc = (resized.reshape(n, d, nb, Hf, Wf)
                    .transpose(0, 3, 4, 2, 1).reshape(n, Hf, Wf, nb * d))
    psp_cat = jnp.concatenate([proj.reshape(n, Hf, Wf, d), resized_nhwc],
                              axis=-1)                             # (n,Hf,Wf,5d)
    c_cat = psp_cat.shape[-1]

    # ---- cls head: conv3x3(no bias)+BN(eval)+ReLU fused with the 1x1 conv ----
    col = im2col3x3_nhwc(psp_cat)                                  # (n*S, 9*c_cat)
    w3 = params["cls_conv3_w"].transpose(2, 3, 1, 0).reshape(9 * c_cat, cfg.cls_mid)
    bn_scale = params["cls_bn_gamma"] / jnp.sqrt(params["cls_bn_var"] + 1e-5)
    bn_bias = params["cls_bn_beta"] - params["cls_bn_mean"] * bn_scale
    # Dropout2d(p=0.2): eval mode -> identity.  1x1 conv runs in the epilogue.
    logits = pallas_matmul(col, w3 * bn_scale[None, :], bn_bias, relu=True,
                           w2=params["cls_conv1_w"], b2=params["cls_conv1_b"],
                           tm=256, tk=512)                         # (n*S, classes)
    logits = logits.reshape(n, Hf, Wf, cfg.classes)

    # ---- final bilinear upsample to (h_out, w_out), align_corners=True ----
    if cfg.zoom_factor != 1:
        logits = separable_resize_nhwc(logits,
                                       bilinear_matrix_1d(Hf, h_out),
                                       bilinear_matrix_1d(Wf, w_out))
    return logits.transpose(0, 3, 1, 2)                            # NCHW


# ----------------------------------------------------------------------------
if __name__ == "__main__":
    cfg = Cfg()
    key = jax.random.PRNGKey(0)
    k_param, k_x = jax.random.split(key)
    params = init_params(k_param, cfg)

    N, H, W = 2, 64, 64
    x = jax.random.normal(k_x, (N, cfg.c_in, H, W), jnp.float32)

    fwd = jax.jit(transform_net_forward, static_argnums=2)
    out = fwd(params, x, cfg)
    out = jax.block_until_ready(out)

    assert out.shape == (N, cfg.classes, H, W), out.shape
    assert jnp.all(jnp.isfinite(out))
    print("KERNEL_OK")
</pallas_src>

<mosaic_0001>
module attributes {stable_mosaic.version = 11 : i64} {
  func.func @_mm_kernel(%arg0: i32, %arg1: i32, %arg2: memref<384x128xf32, #tpu.memory_space<vmem>>, %arg3: memref<128x128xf32, #tpu.memory_space<vmem>>, %arg4: memref<384x128xf32, #tpu.memory_space<vmem>>, %arg5: memref<384x128xf32, #tpu.memory_space<vmem>>) attributes {dimension_semantics = [#tpu.dimension_semantics<parallel>, #tpu.dimension_semantics<arbitrary>], iteration_bounds = array<i64: 1, 1>, scalar_prefetch = 0 : i64, scratch_operands = 1 : i64, tpu.core_type = #tpu.core_type<tc>, window_params = [{transform_indices = @transform_0, window_bounds = array<i64: 384, 128>}, {transform_indices = @transform_1, window_bounds = array<i64: 128, 128>}, {transform_indices = @transform_2, window_bounds = array<i64: 384, 128>}]} {
    %c0_i32 = arith.constant 0 : i32
    %0 = arith.cmpi eq, %arg1, %c0_i32 : i32
    %1 = arith.extui %0 : i1 to i32
    %c0_i32_0 = arith.constant 0 : i32
    %2 = arith.cmpi ne, %1, %c0_i32_0 : i32
    scf.if %2 {
      %cst_10 = arith.constant 0.000000e+00 : f32
      %12 = vector.broadcast %cst_10 : f32 to vector<384x128xf32>
      %c0_11 = arith.constant 0 : index
      %c0_12 = arith.constant 0 : index
      %13 = vector.load %arg5[%c0_11, %c0_12] : memref<384x128xf32, #tpu.memory_space<vmem>>, vector<384x128xf32>
      tpu.vector_store %arg5[%c0_11, %c0_12], %12 {strides = array<i32>} : memref<384x128xf32, #tpu.memory_space<vmem>>, vector<384x128xf32>,
    } else {
    }
    %c0 = arith.constant 0 : index
    %c0_1 = arith.constant 0 : index
    %3 = vector.load %arg5[%c0, %c0_1] : memref<384x128xf32, #tpu.memory_space<vmem>>, vector<384x128xf32>
    %c0_2 = arith.constant 0 : index
    %c0_3 = arith.constant 0 : index
    %4 = vector.load %arg2[%c0_2, %c0_3] : memref<384x128xf32, #tpu.memory_space<vmem>>, vector<384x128xf32>
    %c0_4 = arith.constant 0 : index
    %c0_5 = arith.constant 0 : index
    %5 = vector.load %arg3[%c0_4, %c0_5] : memref<128x128xf32, #tpu.memory_space<vmem>>, vector<128x128xf32>
    %cst = arith.constant dense<0.000000e+00> : vector<384x128xf32>
    %6 = tpu.matmul %4, %5, %cst {dimension_numbers = #tpu.dot_dimension_numbers<[1], [0], [0], [1], [0, 0, 1, 1], [], []>} : vector<384x128xf32>, vector<128x128xf32>, vector<384x128xf32> -> vector<384x128xf32>
    %7 = arith.addf %3, %6 : vector<384x128xf32>
    %c0_6 = arith.constant 0 : index
    %c0_7 = arith.constant 0 : index
    %8 = vector.load %arg5[%c0_6, %c0_7] : memref<384x128xf32, #tpu.memory_space<vmem>>, vector<384x128xf32>
    tpu.vector_store %arg5[%c0_6, %c0_7], %7 {strides = array<i32>} : memref<384x128xf32, #tpu.memory_space<vmem>>, vector<384x128xf32>,
    %c0_i32_8 = arith.constant 0 : i32
    %9 = arith.cmpi eq, %arg1, %c0_i32_8 : i32
    %10 = arith.extui %9 : i1 to i32
    %c0_i32_9 = arith.constant 0 : i32
    %11 = arith.cmpi ne, %10, %c0_i32_9 : i32
    scf.if %11 {
      %c0_10 = arith.constant 0 : index
      %c0_11 = arith.constant 0 : index
      %12 = vector.load %arg5[%c0_10, %c0_11] : memref<384x128xf32, #tpu.memory_space<vmem>>, vector<384x128xf32>
      %c0_12 = arith.constant 0 : index
      %c0_13 = arith.constant 0 : index
      %13 = vector.load %arg4[%c0_12, %c0_13] : memref<384x128xf32, #tpu.memory_space<vmem>>, vector<384x128xf32>
      tpu.vector_store %arg4[%c0_12, %c0_13], %12 {strides = array<i32>} : memref<384x128xf32, #tpu.memory_space<vmem>>, vector<384x128xf32>,
    } else {
    }
    return
  }
  func.func @transform_0(%arg0: i32, %arg1: i32) -> (i32, i32) {
    %c0_i32 = arith.constant 0 : i32
    return %arg0, %arg1 : i32, i32
  }
  func.func @transform_1(%arg0: i32, %arg1: i32) -> (i32, i32) {
    %c0_i32 = arith.constant 0 : i32
    %c0_i32_0 = arith.constant 0 : i32
    return %arg1, %c0_i32 : i32, i32
  }
  func.func @transform_2(%arg0: i32, %arg1: i32) -> (i32, i32) {
    %c0_i32 = arith.constant 0 : i32
    %c0_i32_0 = arith.constant 0 : i32
    return %arg0, %c0_i32 : i32, i32
  }
}

module attributes {stable_mosaic.version = 11 : i64} {
  func.func @_mm_kernel(%arg0: i32, %arg1: i32, %arg2: memref<48x128xf32, #tpu.memory_space<vmem>>, %arg3: memref<128x128xf32, #tpu.memory_space<vmem>>, %arg4: memref<48x128xf32, #tpu.memory_space<vmem>>, %arg5: memref<48x128xf32, #tpu.memory_space<vmem>>) attributes {dimension_semantics = [#tpu.dimension_semantics<parallel>, #tpu.dimension_semantics<arbitrary>], iteration_bounds = array<i64: 1, 1>, scalar_prefetch = 0 : i64, scratch_operands = 1 : i64, tpu.core_type = #tpu.core_type<tc>, window_params = [{transform_indices = @transform_0, window_bounds = array<i64: 48, 128>}, {transform_indices = @transform_1, window_bounds = array<i64: 128, 128>}, {transform_indices = @transform_2, window_bounds = array<i64: 48, 128>}]} {
    %c0_i32 = arith.constant 0 : i32
    %0 = arith.cmpi eq, %arg1, %c0_i32 : i32
    %1 = arith.extui %0 : i1 to i32
    %c0_i32_0 = arith.constant 0 : i32
    %2 = arith.cmpi ne, %1, %c0_i32_0 : i32
    scf.if %2 {
      %cst_10 = arith.constant 0.000000e+00 : f32
      %12 = vector.broadcast %cst_10 : f32 to vector<48x128xf32>
      %c0_11 = arith.constant 0 : index
      %c0_12 = arith.constant 0 : index
      %13 = vector.load %arg5[%c0_11, %c0_12] : memref<48x128xf32, #tpu.memory_space<vmem>>, vector<48x128xf32>
      tpu.vector_store %arg5[%c0_11, %c0_12], %12 {strides = array<i32>} : memref<48x128xf32, #tpu.memory_space<vmem>>, vector<48x128xf32>,
    } else {
    }
    %c0 = arith.constant 0 : index
    %c0_1 = arith.constant 0 : index
    %3 = vector.load %arg5[%c0, %c0_1] : memref<48x128xf32, #tpu.memory_space<vmem>>, vector<48x128xf32>
    %c0_2 = arith.constant 0 : index
    %c0_3 = arith.constant 0 : index
    %4 = vector.load %arg2[%c0_2, %c0_3] : memref<48x128xf32, #tpu.memory_space<vmem>>, vector<48x128xf32>
    %c0_4 = arith.constant 0 : index
    %c0_5 = arith.constant 0 : index
    %5 = vector.load %arg3[%c0_4, %c0_5] : memref<128x128xf32, #tpu.memory_space<vmem>>, vector<128x128xf32>
    %cst = arith.constant dense<0.000000e+00> : vector<48x128xf32>
    %6 = tpu.matmul %4, %5, %cst {dimension_numbers = #tpu.dot_dimension_numbers<[1], [0], [0], [1], [0, 0, 1, 1], [], []>} : vector<48x128xf32>, vector<128x128xf32>, vector<48x128xf32> -> vector<48x128xf32>
    %7 = arith.addf %3, %6 : vector<48x128xf32>
    %c0_6 = arith.constant 0 : index
    %c0_7 = arith.constant 0 : index
    %8 = vector.load %arg5[%c0_6, %c0_7] : memref<48x128xf32, #tpu.memory_space<vmem>>, vector<48x128xf32>
    tpu.vector_store %arg5[%c0_6, %c0_7], %7 {strides = array<i32>} : memref<48x128xf32, #tpu.memory_space<vmem>>, vector<48x128xf32>,
    %c0_i32_8 = arith.constant 0 : i32
    %9 = arith.cmpi eq, %arg1, %c0_i32_8 : i32
    %10 = arith.extui %9 : i1 to i32
    %c0_i32_9 = arith.constant 0 : i32
    %11 = arith.cmpi ne, %10, %c0_i32_9 : i32
    scf.if %11 {
      %c0_10 = arith.constant 0 : index
      %c0_11 = arith.constant 0 : index
      %12 = vector.load %arg5[%c0_10, %c0_11] : memref<48x128xf32, #tpu.memory_space<vmem>>, vector<48x128xf32>
      %c0_12 = arith.constant 0 : index
      %c0_13 = arith.constant 0 : index
      %13 = vector.load %arg4[%c0_12, %c0_13] : memref<48x128xf32, #tpu.memory_space<vmem>>, vector<48x128xf32>
      tpu.vector_store %arg4[%c0_12, %c0_13], %12 {strides = array<i32>} : memref<48x128xf32, #tpu.memory_space<vmem>>, vector<48x128xf32>,
    } else {
    }
    return
  }
  func.func @transform_0(%arg0: i32, %arg1: i32) -> (i32, i32) {
    %c0_i32 = arith.constant 0 : i32
    return %arg0, %arg1 : i32, i32
  }
  func.func @transform_1(%arg0: i32, %arg1: i32) -> (i32, i32) {
    %c0_i32 = arith.constant 0 : i32
    %c0_i32_0 = arith.constant 0 : i32
    return %arg1, %c0_i32 : i32, i32
  }
  func.func @transform_2(%arg0: i32, %arg1: i32) -> (i32, i32) {
    %c0_i32 = arith.constant 0 : i32
    %c0_i32_0 = arith.constant 0 : i32
    return %arg0, %c0_i32 : i32, i32
  }
}

module attributes {stable_mosaic.version = 11 : i64} {
  func.func @_mm_kernel(%arg0: i32, %arg1: i32, %arg2: memref<128x128xbf16, #tpu.memory_space<vmem>>, %arg3: memref<128x128xbf16, #tpu.memory_space<vmem>>, %arg4: memref<1x128xf32, #tpu.memory_space<vmem>>, %arg5: memref<128x128xf32, #tpu.memory_space<vmem>>, %arg6: memref<128x128xf32, #tpu.memory_space<vmem>>) attributes {dimension_semantics = [#tpu.dimension_semantics<parallel>, #tpu.dimension_semantics<arbitrary>], iteration_bounds = array<i64: 1, 1>, scalar_prefetch = 0 : i64, scratch_operands = 1 : i64, tpu.core_type = #tpu.core_type<tc>, window_params = [{transform_indices = @transform_0, window_bounds = array<i64: 128, 128>}, {transform_indices = @transform_1, window_bounds = array<i64: 128, 128>}, {pipeline_mode = #tpu.pipeline_mode<synchronous>, transform_indices = @transform_2, window_bounds = array<i64: 1, 128>}, {transform_indices = @transform_3, window_bounds = array<i64: 128, 128>}]} {
    %c0_i32 = arith.constant 0 : i32
    %0 = arith.cmpi eq, %arg1, %c0_i32 : i32
    %1 = arith.extui %0 : i1 to i32
    %c0_i32_0 = arith.constant 0 : i32
    %2 = arith.cmpi ne, %1, %c0_i32_0 : i32
    scf.if %2 {
      %cst_10 = arith.constant 0.000000e+00 : f32
      %12 = vector.broadcast %cst_10 : f32 to vector<128x128xf32>
      %c0_11 = arith.constant 0 : index
      %c0_12 = arith.constant 0 : index
      %13 = vector.load %arg6[%c0_11, %c0_12] : memref<128x128xf32, #tpu.memory_space<vmem>>, vector<128x128xf32>
      tpu.vector_store %arg6[%c0_11, %c0_12], %12 {strides = array<i32>} : memref<128x128xf32, #tpu.memory_space<vmem>>, vector<128x128xf32>,
    } else {
    }
    %c0 = arith.constant 0 : index
    %c0_1 = arith.constant 0 : index
    %3 = vector.load %arg6[%c0, %c0_1] : memref<128x128xf32, #tpu.memory_space<vmem>>, vector<128x128xf32>
    %c0_2 = arith.constant 0 : index
    %c0_3 = arith.constant 0 : index
    %4 = vector.load %arg2[%c0_2, %c0_3] : memref<128x128xbf16, #tpu.memory_space<vmem>>, vector<128x128xbf16>
    %c0_4 = arith.constant 0 : index
    %c0_5 = arith.constant 0 : index
    %5 = vector.load %arg3[%c0_4, %c0_5] : memref<128x128xbf16, #tpu.memory_space<vmem>>, vector<128x128xbf16>
    %cst = arith.constant dense<0.000000e+00> : vector<128x128xf32>
    %6 = tpu.matmul %4, %5, %cst {dimension_numbers = #tpu.dot_dimension_numbers<[1], [0], [0], [1], [0, 0, 1, 1], [], []>} : vector<128x128xbf16>, vector<128x128xbf16>, vector<128x128xf32> -> vector<128x128xf32>
    %7 = arith.addf %3, %6 : vector<128x128xf32>
    %c0_6 = arith.constant 0 : index
    %c0_7 = arith.constant 0 : index
    %8 = vector.load %arg6[%c0_6, %c0_7] : memref<128x128xf32, #tpu.memory_space<vmem>>, vector<128x128xf32>
    tpu.vector_store %arg6[%c0_6, %c0_7], %7 {strides = array<i32>} : memref<128x128xf32, #tpu.memory_space<vmem>>, vector<128x128xf32>,
    %c0_i32_8 = arith.constant 0 : i32
    %9 = arith.cmpi eq, %arg1, %c0_i32_8 : i32
    %10 = arith.extui %9 : i1 to i32
    %c0_i32_9 = arith.constant 0 : i32
    %11 = arith.cmpi ne, %10, %c0_i32_9 : i32
    scf.if %11 {
      %c0_10 = arith.constant 0 : index
      %c0_11 = arith.constant 0 : index
      %12 = vector.load %arg6[%c0_10, %c0_11] : memref<128x128xf32, #tpu.memory_space<vmem>>, vector<128x128xf32>
      %c0_12 = arith.constant 0 : index
      %c0_13 = arith.constant 0 : index
      %13 = vector.load %arg4[%c0_12, %c0_13] : memref<1x128xf32, #tpu.memory_space<vmem>>, vector<1x128xf32>
      %14 = vector.broadcast %13 : vector<1x128xf32> to vector<128x128xf32>
      %15 = arith.addf %12, %14 : vector<128x128xf32>
      %cst_14 = arith.constant 0.000000e+00 : f32
      %16 = vector.broadcast %cst_14 : f32 to vector<128x128xf32>
      %17 = arith.maximumf %15, %16 : vector<128x128xf32>
      %c0_15 = arith.constant 0 : index
      %c0_16 = arith.constant 0 : index
      %18 = vector.load %arg5[%c0_15, %c0_16] : memref<128x128xf32, #tpu.memory_space<vmem>>, vector<128x128xf32>
      tpu.vector_store %arg5[%c0_15, %c0_16], %17 {strides = array<i32>} : memref<128x128xf32, #tpu.memory_space<vmem>>, vector<128x128xf32>,
    } else {
    }
    return
  }
  func.func @transform_0(%arg0: i32, %arg1: i32) -> (i32, i32) {
    %c0_i32 = arith.constant 0 : i32
    return %arg0, %arg1 : i32, i32
  }
  func.func @transform_1(%arg0: i32, %arg1: i32) -> (i32, i32) {
    %c0_i32 = arith.constant 0 : i32
    %c0_i32_0 = arith.constant 0 : i32
    return %arg1, %c0_i32 : i32, i32
  }
  func.func @transform_2(%arg0: i32, %arg1: i32) -> (i32, i32) {
    %c0_i32 = arith.constant 0 : i32
    %c0_i32_0 = arith.constant 0 : i32
    %c0_i32_1 = arith.constant 0 : i32
    return %c0_i32, %c0_i32_0 : i32, i32
  }
  func.func @transform_3(%arg0: i32, %arg1: i32) -> (i32, i32) {
    %c0_i32 = arith.constant 0 : i32
    %c0_i32_0 = arith.constant 0 : i32
    return %arg0, %c0_i32 : i32, i32
  }
}

module attributes {stable_mosaic.version = 11 : i64} {
  func.func @_mm_kernel(%arg0: i32, %arg1: i32, %arg2: memref<64x128xf32, #tpu.memory_space<vmem>>, %arg3: memref<128x128xf32, #tpu.memory_space<vmem>>, %arg4: memref<64x128xf32, #tpu.memory_space<vmem>>, %arg5: memref<64x128xf32, #tpu.memory_space<vmem>>) attributes {dimension_semantics = [#tpu.dimension_semantics<parallel>, #tpu.dimension_semantics<arbitrary>], iteration_bounds = array<i64: 1, 1>, scalar_prefetch = 0 : i64, scratch_operands = 1 : i64, tpu.core_type = #tpu.core_type<tc>, window_params = [{transform_indices = @transform_0, window_bounds = array<i64: 64, 128>}, {transform_indices = @transform_1, window_bounds = array<i64: 128, 128>}, {transform_indices = @transform_2, window_bounds = array<i64: 64, 128>}]} {
    %c0_i32 = arith.constant 0 : i32
    %0 = arith.cmpi eq, %arg1, %c0_i32 : i32
    %1 = arith.extui %0 : i1 to i32
    %c0_i32_0 = arith.constant 0 : i32
    %2 = arith.cmpi ne, %1, %c0_i32_0 : i32
    scf.if %2 {
      %cst_10 = arith.constant 0.000000e+00 : f32
      %12 = vector.broadcast %cst_10 : f32 to vector<64x128xf32>
      %c0_11 = arith.constant 0 : index
      %c0_12 = arith.constant 0 : index
      %13 = vector.load %arg5[%c0_11, %c0_12] : memref<64x128xf32, #tpu.memory_space<vmem>>, vector<64x128xf32>
      tpu.vector_store %arg5[%c0_11, %c0_12], %12 {strides = array<i32>} : memref<64x128xf32, #tpu.memory_space<vmem>>, vector<64x128xf32>,
    } else {
    }
    %c0 = arith.constant 0 : index
    %c0_1 = arith.constant 0 : index
    %3 = vector.load %arg5[%c0, %c0_1] : memref<64x128xf32, #tpu.memory_space<vmem>>, vector<64x128xf32>
    %c0_2 = arith.constant 0 : index
    %c0_3 = arith.constant 0 : index
    %4 = vector.load %arg2[%c0_2, %c0_3] : memref<64x128xf32, #tpu.memory_space<vmem>>, vector<64x128xf32>
    %c0_4 = arith.constant 0 : index
    %c0_5 = arith.constant 0 : index
    %5 = vector.load %arg3[%c0_4, %c0_5] : memref<128x128xf32, #tpu.memory_space<vmem>>, vector<128x128xf32>
    %cst = arith.constant dense<0.000000e+00> : vector<64x128xf32>
    %6 = tpu.matmul %4, %5, %cst {dimension_numbers = #tpu.dot_dimension_numbers<[1], [0], [0], [1], [0, 0, 1, 1], [], []>} : vector<64x128xf32>, vector<128x128xf32>, vector<64x128xf32> -> vector<64x128xf32>
    %7 = arith.addf %3, %6 : vector<64x128xf32>
    %c0_6 = arith.constant 0 : index
    %c0_7 = arith.constant 0 : index
    %8 = vector.load %arg5[%c0_6, %c0_7] : memref<64x128xf32, #tpu.memory_space<vmem>>, vector<64x128xf32>
    tpu.vector_store %arg5[%c0_6, %c0_7], %7 {strides = array<i32>} : memref<64x128xf32, #tpu.memory_space<vmem>>, vector<64x128xf32>,
    %c0_i32_8 = arith.constant 0 : i32
    %9 = arith.cmpi eq, %arg1, %c0_i32_8 : i32
    %10 = arith.extui %9 : i1 to i32
    %c0_i32_9 = arith.constant 0 : i32
    %11 = arith.cmpi ne, %10, %c0_i32_9 : i32
    scf.if %11 {
      %c0_10 = arith.constant 0 : index
      %c0_11 = arith.constant 0 : index
      %12 = vector.load %arg5[%c0_10, %c0_11] : memref<64x128xf32, #tpu.memory_space<vmem>>, vector<64x128xf32>
      %c0_12 = arith.constant 0 : index
      %c0_13 = arith.constant 0 : index
      %13 = vector.load %arg4[%c0_12, %c0_13] : memref<64x128xf32, #tpu.memory_space<vmem>>, vector<64x128xf32>
      tpu.vector_store %arg4[%c0_12, %c0_13], %12 {strides = array<i32>} : memref<64x128xf32, #tpu.memory_space<vmem>>, vector<64x128xf32>,
    } else {
    }
    return
  }
  func.func @transform_0(%arg0: i32, %arg1: i32) -> (i32, i32) {
    %c0_i32 = arith.constant 0 : i32
    return %arg0, %arg1 : i32, i32
  }
  func.func @transform_1(%arg0: i32, %arg1: i32) -> (i32, i32) {
    %c0_i32 = arith.constant 0 : i32
    %c0_i32_0 = arith.constant 0 : i32
    return %arg1, %c0_i32 : i32, i32
  }
  func.func @transform_2(%arg0: i32, %arg1: i32) -> (i32, i32) {
    %c0_i32 = arith.constant 0 : i32
    %c0_i32_0 = arith.constant 0 : i32
    return %arg0, %c0_i32 : i32, i32
  }
}

module attributes {stable_mosaic.version = 11 : i64} {
  func.func @_mm_kernel(%arg0: i32, %arg1: i32, %arg2: memref<128x128xbf16, #tpu.memory_space<vmem>>, %arg3: memref<128x128xbf16, #tpu.memory_space<vmem>>, %arg4: memref<1x128xf32, #tpu.memory_space<vmem>>, %arg5: memref<128x128xf32, #tpu.memory_space<vmem>>, %arg6: memref<128x128xf32, #tpu.memory_space<vmem>>) attributes {dimension_semantics = [#tpu.dimension_semantics<parallel>, #tpu.dimension_semantics<arbitrary>], iteration_bounds = array<i64: 1, 1>, scalar_prefetch = 0 : i64, scratch_operands = 1 : i64, tpu.core_type = #tpu.core_type<tc>, window_params = [{transform_indices = @transform_0, window_bounds = array<i64: 128, 128>}, {transform_indices = @transform_1, window_bounds = array<i64: 128, 128>}, {pipeline_mode = #tpu.pipeline_mode<synchronous>, transform_indices = @transform_2, window_bounds = array<i64: 1, 128>}, {transform_indices = @transform_3, window_bounds = array<i64: 128, 128>}]} {
    %c0_i32 = arith.constant 0 : i32
    %0 = arith.cmpi eq, %arg1, %c0_i32 : i32
    %1 = arith.extui %0 : i1 to i32
    %c0_i32_0 = arith.constant 0 : i32
    %2 = arith.cmpi ne, %1, %c0_i32_0 : i32
    scf.if %2 {
      %cst_10 = arith.constant 0.000000e+00 : f32
      %12 = vector.broadcast %cst_10 : f32 to vector<128x128xf32>
      %c0_11 = arith.constant 0 : index
      %c0_12 = arith.constant 0 : index
      %13 = vector.load %arg6[%c0_11, %c0_12] : memref<128x128xf32, #tpu.memory_space<vmem>>, vector<128x128xf32>
      tpu.vector_store %arg6[%c0_11, %c0_12], %12 {strides = array<i32>} : memref<128x128xf32, #tpu.memory_space<vmem>>, vector<128x128xf32>,
    } else {
    }
    %c0 = arith.constant 0 : index
    %c0_1 = arith.constant 0 : index
    %3 = vector.load %arg6[%c0, %c0_1] : memref<128x128xf32, #tpu.memory_space<vmem>>, vector<128x128xf32>
    %c0_2 = arith.constant 0 : index
    %c0_3 = arith.constant 0 : index
    %4 = vector.load %arg2[%c0_2, %c0_3] : memref<128x128xbf16, #tpu.memory_space<vmem>>, vector<128x128xbf16>
    %c0_4 = arith.constant 0 : index
    %c0_5 = arith.constant 0 : index
    %5 = vector.load %arg3[%c0_4, %c0_5] : memref<128x128xbf16, #tpu.memory_space<vmem>>, vector<128x128xbf16>
    %cst = arith.constant dense<0.000000e+00> : vector<128x128xf32>
    %6 = tpu.matmul %4, %5, %cst {dimension_numbers = #tpu.dot_dimension_numbers<[1], [0], [0], [1], [0, 0, 1, 1], [], []>} : vector<128x128xbf16>, vector<128x128xbf16>, vector<128x128xf32> -> vector<128x128xf32>
    %7 = arith.addf %3, %6 : vector<128x128xf32>
    %c0_6 = arith.constant 0 : index
    %c0_7 = arith.constant 0 : index
    %8 = vector.load %arg6[%c0_6, %c0_7] : memref<128x128xf32, #tpu.memory_space<vmem>>, vector<128x128xf32>
    tpu.vector_store %arg6[%c0_6, %c0_7], %7 {strides = array<i32>} : memref<128x128xf32, #tpu.memory_space<vmem>>, vector<128x128xf32>,
    %c0_i32_8 = arith.constant 0 : i32
    %9 = arith.cmpi eq, %arg1, %c0_i32_8 : i32
    %10 = arith.extui %9 : i1 to i32
    %c0_i32_9 = arith.constant 0 : i32
    %11 = arith.cmpi ne, %10, %c0_i32_9 : i32
    scf.if %11 {
      %c0_10 = arith.constant 0 : index
      %c0_11 = arith.constant 0 : index
      %12 = vector.load %arg6[%c0_10, %c0_11] : memref<128x128xf32, #tpu.memory_space<vmem>>, vector<128x128xf32>
      %c0_12 = arith.constant 0 : index
      %c0_13 = arith.constant 0 : index
      %13 = vector.load %arg4[%c0_12, %c0_13] : memref<1x128xf32, #tpu.memory_space<vmem>>, vector<1x128xf32>
      %14 = vector.broadcast %13 : vector<1x128xf32> to vector<128x128xf32>
      %15 = arith.addf %12, %14 : vector<128x128xf32>
      %c0_14 = arith.constant 0 : index
      %c0_15 = arith.constant 0 : index
      %16 = vector.load %arg5[%c0_14, %c0_15] : memref<128x128xf32, #tpu.memory_space<vmem>>, vector<128x128xf32>
      tpu.vector_store %arg5[%c0_14, %c0_15], %15 {strides = array<i32>} : memref<128x128xf32, #tpu.memory_space<vmem>>, vector<128x128xf32>,
    } else {
    }
    return
  }
  func.func @transform_0(%arg0: i32, %arg1: i32) -> (i32, i32) {
    %c0_i32 = arith.constant 0 : i32
    return %arg0, %arg1 : i32, i32
  }
  func.func @transform_1(%arg0: i32, %arg1: i32) -> (i32, i32) {
    %c0_i32 = arith.constant 0 : i32
    %c0_i32_0 = arith.constant 0 : i32
    return %arg1, %c0_i32 : i32, i32
  }
  func.func @transform_2(%arg0: i32, %arg1: i32) -> (i32, i32) {
    %c0_i32 = arith.constant 0 : i32
    %c0_i32_0 = arith.constant 0 : i32
    %c0_i32_1 = arith.constant 0 : i32
    return %c0_i32, %c0_i32_0 : i32, i32
  }
  func.func @transform_3(%arg0: i32, %arg1: i32) -> (i32, i32) {
    %c0_i32 = arith.constant 0 : i32
    %c0_i32_0 = arith.constant 0 : i32
    return %arg0, %c0_i32 : i32, i32
  }
}

module attributes {stable_mosaic.version = 11 : i64} {
  func.func @_attn_kernel(%arg0: i32, %arg1: memref<1x112x128xf32, #tpu.memory_space<vmem>>, %arg2: memref<112x128xf32, #tpu.memory_space<vmem>>, %arg3: memref<1x64x128xf32, #tpu.memory_space<vmem>>, %arg4: memref<1x64x128xf32, #tpu.memory_space<vmem>>, %arg5: memref<4x128x128xbf16, #tpu.memory_space<vmem>>, %arg6: memref<4x1x128xf32, #tpu.memory_space<vmem>>, %arg7: memref<1x112x128xf32, #tpu.memory_space<vmem>>) attributes {dimension_semantics = [#tpu.dimension_semantics<parallel>], iteration_bounds = array<i64: 2>, scalar_prefetch = 0 : i64, scratch_operands = 0 : i64, tpu.core_type = #tpu.core_type<tc>, window_params = [{transform_indices = @transform_0, window_bounds = array<i64: 1, 112, 128>}, {pipeline_mode = #tpu.pipeline_mode<synchronous>, transform_indices = @transform_1, window_bounds = array<i64: 112, 128>}, {transform_indices = @transform_2, window_bounds = array<i64: 1, 64, 128>}, {transform_indices = @transform_3, window_bounds = array<i64: 1, 64, 128>}, {pipeline_mode = #tpu.pipeline_mode<synchronous>, transform_indices = @transform_4, window_bounds = array<i64: 4, 128, 128>}, {pipeline_mode = #tpu.pipeline_mode<synchronous>, transform_indices = @transform_5, window_bounds = array<i64: 4, 1, 128>}, {transform_indices = @transform_6, window_bounds = array<i64: 1, 112, 128>}]} {
    %c0 = arith.constant 0 : index
    %c0_0 = arith.constant 0 : index
    %c0_1 = arith.constant 0 : index
    %0 = vector.load %arg1[%c0, %c0_0, %c0_1] : memref<1x112x128xf32, #tpu.memory_space<vmem>>, vector<1x112x128xf32>
    %1 = vector.shape_cast %0 : vector<1x112x128xf32> to vector<112x128xf32>
    %c0_2 = arith.constant 0 : index
    %c0_3 = arith.constant 0 : index
    %c0_4 = arith.constant 0 : index
    %2 = vector.load %arg3[%c0_2, %c0_3, %c0_4] : memref<1x64x128xf32, #tpu.memory_space<vmem>>, vector<1x64x128xf32>
    %3 = vector.shape_cast %2 : vector<1x64x128xf32> to vector<64x128xf32>
    %c0_5 = arith.constant 0 : index
    %c0_6 = arith.constant 0 : index
    %4 = vector.load %arg2[%c0_5, %c0_6] : memref<112x128xf32, #tpu.memory_space<vmem>>, vector<112x128xf32>
    %5 = arith.addf %1, %4 : vector<112x128xf32>
    %6 = arith.truncf %5 : vector<112x128xf32> to vector<112x128xbf16>
    %c0_7 = arith.constant 0 : index
    %c0_8 = arith.constant 0 : index
    %c0_9 = arith.constant 0 : index
    %7 = vector.load %arg4[%c0_7, %c0_8, %c0_9] : memref<1x64x128xf32, #tpu.memory_space<vmem>>, vector<1x64x128xf32>
    %8 = vector.shape_cast %7 : vector<1x64x128xf32> to vector<64x128xf32>
    %9 = arith.addf %3, %8 : vector<64x128xf32>
    %10 = arith.truncf %9 : vector<64x128xf32> to vector<64x128xbf16>
    %11 = arith.truncf %3 : vector<64x128xf32> to vector<64x128xbf16>
    %c0_10 = arith.constant 0 : index
    %c0_11 = arith.constant 0 : index
    %c0_12 = arith.constant 0 : index
    %12 = vector.load %arg5[%c0_10, %c0_11, %c0_12] : memref<4x128x128xbf16, #tpu.memory_space<vmem>>, vector<1x128x128xbf16>
    %13 = vector.shape_cast %12 : vector<1x128x128xbf16> to vector<128x128xbf16>
    %cst = arith.constant dense<0.000000e+00> : vector<112x128xf32>
    %14 = tpu.matmul %6, %13, %cst {dimension_numbers = #tpu.dot_dimension_numbers<[1], [0], [0], [1], [0, 0, 1, 1], [], []>} : vector<112x128xbf16>, vector<128x128xbf16>, vector<112x128xf32> -> vector<112x128xf32>
    %c0_13 = arith.constant 0 : index
    %c0_14 = arith.constant 0 : index
    %c0_15 = arith.constant 0 : index
    %15 = vector.load %arg6[%c0_13, %c0_14, %c0_15] : memref<4x1x128xf32, #tpu.memory_space<vmem>>, vector<1x1x128xf32>
    %16 = vector.shape_cast %15 : vector<1x1x128xf32> to vector<1x128xf32>
    %17 = vector.broadcast %16 : vector<1x128xf32> to vector<112x128xf32>
    %18 = arith.addf %14, %17 : vector<112x128xf32>
    %c1 = arith.constant 1 : index
    %c0_16 = arith.constant 0 : index
    %c0_17 = arith.constant 0 : index
    %19 = vector.load %arg5[%c1, %c0_16, %c0_17] : memref<4x128x128xbf16, #tpu.memory_space<vmem>>, vector<1x128x128xbf16>
    %20 = vector.shape_cast %19 : vector<1x128x128xbf16> to vector<128x128xbf16>
    %cst_18 = arith.constant dense<0.000000e+00> : vector<64x128xf32>
    %21 = tpu.matmul %10, %20, %cst_18 {dimension_numbers = #tpu.dot_dimension_numbers<[1], [0], [0], [1], [0, 0, 1, 1], [], []>} : vector<64x128xbf16>, vector<128x128xbf16>, vector<64x128xf32> -> vector<64x128xf32>
    %c1_19 = arith.constant 1 : index
    %c0_20 = arith.constant 0 : index
    %c0_21 = arith.constant 0 : index
    %22 = vector.load %arg6[%c1_19, %c0_20, %c0_21] : memref<4x1x128xf32, #tpu.memory_space<vmem>>, vector<1x1x128xf32>
    %23 = vector.shape_cast %22 : vector<1x1x128xf32> to vector<1x128xf32>
    %24 = vector.broadcast %23 : vector<1x128xf32> to vector<64x128xf32>
    %25 = arith.addf %21, %24 : vector<64x128xf32>
    %c2 = arith.constant 2 : index
    %c0_22 = arith.constant 0 : index
    %c0_23 = arith.constant 0 : index
    %26 = vector.load %arg5[%c2, %c0_22, %c0_23] : memref<4x128x128xbf16, #tpu.memory_space<vmem>>, vector<1x128x128xbf16>
    %27 = vector.shape_cast %26 : vector<1x128x128xbf16> to vector<128x128xbf16>
    %cst_24 = arith.constant dense<0.000000e+00> : vector<64x128xf32>
    %28 = tpu.matmul %11, %27, %cst_24 {dimension_numbers = #tpu.dot_dimension_numbers<[1], [0], [0], [1], [0, 0, 1, 1], [], []>} : vector<64x128xbf16>, vector<128x128xbf16>, vector<64x128xf32> -> vector<64x128xf32>
    %c2_25 = arith.constant 2 : index
    %c0_26 = arith.constant 0 : index
    %c0_27 = arith.constant 0 : index
    %29 = vector.load %arg6[%c2_25, %c0_26, %c0_27] : memref<4x1x128xf32, #tpu.memory_space<vmem>>, vector<1x1x128xf32>
    %30 = vector.shape_cast %29 : vector<1x1x128xf32> to vector<1x128xf32>
    %31 = vector.broadcast %30 : vector<1x128xf32> to vector<64x128xf32>
    %32 = arith.addf %28, %31 : vector<64x128xf32>
    %33 = arith.truncf %18 : vector<112x128xf32> to vector<112x128xbf16>
    %34 = arith.truncf %25 : vector<64x128xf32> to vector<64x128xbf16>
    %cst_28 = arith.constant dense<0.000000e+00> : vector<112x64xf32>
    %35 = tpu.matmul %33, %34, %cst_28 {dimension_numbers = #tpu.dot_dimension_numbers<[1], [1], [0], [0], [0, 0, 1, 0], [], []>} : vector<112x128xbf16>, vector<64x128xbf16>, vector<112x64xf32> -> vector<112x64xf32>
    %cst_29 = arith.constant 0.176776692 : f32
    %36 = vector.broadcast %cst_29 : f32 to vector<112x64xf32>
    %37 = arith.mulf %35, %36 : vector<112x64xf32>
    %38 = tpu.iota {dimensions = array<i32: 1>} : vector<112x64xi32>
    %c64_i32 = arith.constant 64 : i32
    %39 = vector.broadcast %c64_i32 : i32 to vector<112x64xi32>
    %40 = arith.cmpi slt, %38, %39 : vector<112x64xi32>
    %cst_30 = arith.constant -1.000000e+30 : f32
    %41 = vector.broadcast %cst_30 : f32 to vector<112x64xf32>
    %42 = arith.select %40, %37, %41 : vector<112x64xi1>, vector<112x64xf32>
    %cst_31 = arith.constant dense<0xFF800000> : vector<112xf32>
    %43 = vector.multi_reduction <maximumf>, %42, %cst_31 [1] : vector<112x64xf32> to vector<112xf32>
    %44 = vector.shape_cast %43 : vector<112xf32> to vector<112x1xf32>
    %45 = vector.broadcast %44 : vector<112x1xf32> to vector<112x64xf32>
    %46 = arith.subf %42, %45 : vector<112x64xf32>
    %47 = math.exp %46 : vector<112x64xf32>
    %cst_32 = arith.constant dense<0.000000e+00> : vector<112xf32>
    %48 = vector.multi_reduction <add>, %47, %cst_32 [1] : vector<112x64xf32> to vector<112xf32>
    %49 = vector.shape_cast %48 : vector<112xf32> to vector<112x1xf32>
    %50 = arith.truncf %47 : vector<112x64xf32> to vector<112x64xbf16>
    %51 = arith.truncf %32 : vector<64x128xf32> to vector<64x128xbf16>
    %cst_33 = arith.constant dense<0.000000e+00> : vector<112x128xf32>
    %52 = tpu.matmul %50, %51, %cst_33 {dimension_numbers = #tpu.dot_dimension_numbers<[1], [0], [0], [1], [0, 0, 1, 1], [], []>} : vector<112x64xbf16>, vector<64x128xbf16>, vector<112x128xf32> -> vector<112x128xf32>
    %53 = tpu.reciprocal %49 {approx = true} : vector<112x1xf32> -> vector<112x1xf32>
    %54 = vector.broadcast %53 : vector<112x1xf32> to vector<112x128xf32>
    %55 = arith.mulf %52, %54 : vector<112x128xf32>
    %56 = arith.truncf %55 : vector<112x128xf32> to vector<112x128xbf16>
    %c3 = arith.constant 3 : index
    %c0_34 = arith.constant 0 : index
    %c0_35 = arith.constant 0 : index
    %57 = vector.load %arg5[%c3, %c0_34, %c0_35] : memref<4x128x128xbf16, #tpu.memory_space<vmem>>, vector<1x128x128xbf16>
    %58 = vector.shape_cast %57 : vector<1x128x128xbf16> to vector<128x128xbf16>
    %cst_36 = arith.constant dense<0.000000e+00> : vector<112x128xf32>
    %59 = tpu.matmul %56, %58, %cst_36 {dimension_numbers = #tpu.dot_dimension_numbers<[1], [0], [0], [1], [0, 0, 1, 1], [], []>} : vector<112x128xbf16>, vector<128x128xbf16>, vector<112x128xf32> -> vector<112x128xf32>
    %c3_37 = arith.constant 3 : index
    %c0_38 = arith.constant 0 : index
    %c0_39 = arith.constant 0 : index
    %60 = vector.load %arg6[%c3_37, %c0_38, %c0_39] : memref<4x1x128xf32, #tpu.memory_space<vmem>>, vector<1x1x128xf32>
    %61 = vector.shape_cast %60 : vector<1x1x128xf32> to vector<1x128xf32>
    %62 = vector.broadcast %61 : vector<1x128xf32> to vector<112x128xf32>
    %63 = arith.addf %59, %62 : vector<112x128xf32>
    %64 = arith.addf %63, %1 : vector<112x128xf32>
    %c0_40 = arith.constant 0 : index
    %c0_41 = arith.constant 0 : index
    %c0_42 = arith.constant 0 : index
    %65 = vector.load %arg7[%c0_40, %c0_41, %c0_42] : memref<1x112x128xf32, #tpu.memory_space<vmem>>, vector<1x112x128xf32>
    %66 = vector.shape_cast %65 : vector<1x112x128xf32> to vector<112x128xf32>
    %67 = vector.shape_cast %64 : vector<112x128xf32> to vector<1x112x128xf32>
    tpu.vector_store %arg7[%c0_40, %c0_41, %c0_42], %67 {strides = array<i32>} : memref<1x112x128xf32, #tpu.memory_space<vmem>>, vector<1x112x128xf32>,
    return
  }
  func.func @transform_0(%arg0: i32) -> (i32, i32, i32) {
    %c0_i32 = arith.constant 0 : i32
    %c0_i32_0 = arith.constant 0 : i32
    %c0_i32_1 = arith.constant 0 : i32
    return %arg0, %c0_i32, %c0_i32_0 : i32, i32, i32
  }
  func.func @transform_1(%arg0: i32) -> (i32, i32) {
    %c0_i32 = arith.constant 0 : i32
    %c0_i32_0 = arith.constant 0 : i32
    %c0_i32_1 = arith.constant 0 : i32
    return %c0_i32, %c0_i32_0 : i32, i32
  }
  func.func @transform_2(%arg0: i32) -> (i32, i32, i32) {
    %c0_i32 = arith.constant 0 : i32
    %c0_i32_0 = arith.constant 0 : i32
    %c0_i32_1 = arith.constant 0 : i32
    return %arg0, %c0_i32, %c0_i32_0 : i32, i32, i32
  }
  func.func @transform_3(%arg0: i32) -> (i32, i32, i32) {
    %c0_i32 = arith.constant 0 : i32
    %c0_i32_0 = arith.constant 0 : i32
    %c0_i32_1 = arith.constant 0 : i32
    return %arg0, %c0_i32, %c0_i32_0 : i32, i32, i32
  }
  func.func @transform_4(%arg0: i32) -> (i32, i32, i32) {
    %c0_i32 = arith.constant 0 : i32
    %c0_i32_0 = arith.constant 0 : i32
    %c0_i32_1 = arith.constant 0 : i32
    %c0_i32_2 = arith.constant 0 : i32
    return %c0_i32, %c0_i32_0, %c0_i32_1 : i32, i32, i32
  }
  func.func @transform_5(%arg0: i32) -> (i32, i32, i32) {
    %c0_i32 = arith.constant 0 : i32
    %c0_i32_0 = arith.constant 0 : i32
    %c0_i32_1 = arith.constant 0 : i32
    %c0_i32_2 = arith.constant 0 : i32
    return %c0_i32, %c0_i32_0, %c0_i32_1 : i32, i32, i32
  }
  func.func @transform_6(%arg0: i32) -> (i32, i32, i32) {
    %c0_i32 = arith.constant 0 : i32
    %c0_i32_0 = arith.constant 0 : i32
    %c0_i32_1 = arith.constant 0 : i32
    return %arg0, %c0_i32, %c0_i32_0 : i32, i32, i32
  }
}

module attributes {stable_mosaic.version = 11 : i64} {
  func.func @_mm_kernel(%arg0: i32, %arg1: i32, %arg2: memref<64x128xf32, #tpu.memory_space<vmem>>, %arg3: memref<128x256xf32, #tpu.memory_space<vmem>>, %arg4: memref<64x256xf32, #tpu.memory_space<vmem>>, %arg5: memref<64x256xf32, #tpu.memory_space<vmem>>) attributes {dimension_semantics = [#tpu.dimension_semantics<parallel>, #tpu.dimension_semantics<arbitrary>], iteration_bounds = array<i64: 1, 1>, scalar_prefetch = 0 : i64, scratch_operands = 1 : i64, tpu.core_type = #tpu.core_type<tc>, window_params = [{transform_indices = @transform_0, window_bounds = array<i64: 64, 128>}, {transform_indices = @transform_1, window_bounds = array<i64: 128, 256>}, {transform_indices = @transform_2, window_bounds = array<i64: 64, 256>}]} {
    %c0_i32 = arith.constant 0 : i32
    %0 = arith.cmpi eq, %arg1, %c0_i32 : i32
    %1 = arith.extui %0 : i1 to i32
    %c0_i32_0 = arith.constant 0 : i32
    %2 = arith.cmpi ne, %1, %c0_i32_0 : i32
    scf.if %2 {
      %cst_10 = arith.constant 0.000000e+00 : f32
      %12 = vector.broadcast %cst_10 : f32 to vector<64x256xf32>
      %c0_11 = arith.constant 0 : index
      %c0_12 = arith.constant 0 : index
      %13 = vector.load %arg5[%c0_11, %c0_12] : memref<64x256xf32, #tpu.memory_space<vmem>>, vector<64x256xf32>
      tpu.vector_store %arg5[%c0_11, %c0_12], %12 {strides = array<i32>} : memref<64x256xf32, #tpu.memory_space<vmem>>, vector<64x256xf32>,
    } else {
    }
    %c0 = arith.constant 0 : index
    %c0_1 = arith.constant 0 : index
    %3 = vector.load %arg5[%c0, %c0_1] : memref<64x256xf32, #tpu.memory_space<vmem>>, vector<64x256xf32>
    %c0_2 = arith.constant 0 : index
    %c0_3 = arith.constant 0 : index
    %4 = vector.load %arg2[%c0_2, %c0_3] : memref<64x128xf32, #tpu.memory_space<vmem>>, vector<64x128xf32>
    %c0_4 = arith.constant 0 : index
    %c0_5 = arith.constant 0 : index
    %5 = vector.load %arg3[%c0_4, %c0_5] : memref<128x256xf32, #tpu.memory_space<vmem>>, vector<128x256xf32>
    %cst = arith.constant dense<0.000000e+00> : vector<64x256xf32>
    %6 = tpu.matmul %4, %5, %cst {dimension_numbers = #tpu.dot_dimension_numbers<[1], [0], [0], [1], [0, 0, 1, 1], [], []>} : vector<64x128xf32>, vector<128x256xf32>, vector<64x256xf32> -> vector<64x256xf32>
    %7 = arith.addf %3, %6 : vector<64x256xf32>
    %c0_6 = arith.constant 0 : index
    %c0_7 = arith.constant 0 : index
    %8 = vector.load %arg5[%c0_6, %c0_7] : memref<64x256xf32, #tpu.memory_space<vmem>>, vector<64x256xf32>
    tpu.vector_store %arg5[%c0_6, %c0_7], %7 {strides = array<i32>} : memref<64x256xf32, #tpu.memory_space<vmem>>, vector<64x256xf32>,
    %c0_i32_8 = arith.constant 0 : i32
    %9 = arith.cmpi eq, %arg1, %c0_i32_8 : i32
    %10 = arith.extui %9 : i1 to i32
    %c0_i32_9 = arith.constant 0 : i32
    %11 = arith.cmpi ne, %10, %c0_i32_9 : i32
    scf.if %11 {
      %c0_10 = arith.constant 0 : index
      %c0_11 = arith.constant 0 : index
      %12 = vector.load %arg5[%c0_10, %c0_11] : memref<64x256xf32, #tpu.memory_space<vmem>>, vector<64x256xf32>
      %c0_12 = arith.constant 0 : index
      %c0_13 = arith.constant 0 : index
      %13 = vector.load %arg4[%c0_12, %c0_13] : memref<64x256xf32, #tpu.memory_space<vmem>>, vector<64x256xf32>
      tpu.vector_store %arg4[%c0_12, %c0_13], %12 {strides = array<i32>} : memref<64x256xf32, #tpu.memory_space<vmem>>, vector<64x256xf32>,
    } else {
    }
    return
  }
  func.func @transform_0(%arg0: i32, %arg1: i32) -> (i32, i32) {
    %c0_i32 = arith.constant 0 : i32
    return %arg0, %arg1 : i32, i32
  }
  func.func @transform_1(%arg0: i32, %arg1: i32) -> (i32, i32) {
    %c0_i32 = arith.constant 0 : i32
    %c0_i32_0 = arith.constant 0 : i32
    return %arg1, %c0_i32 : i32, i32
  }
  func.func @transform_2(%arg0: i32, %arg1: i32) -> (i32, i32) {
    %c0_i32 = arith.constant 0 : i32
    %c0_i32_0 = arith.constant 0 : i32
    return %arg0, %c0_i32 : i32, i32
  }
}

module attributes {stable_mosaic.version = 11 : i64} {
  func.func @_mm_kernel(%arg0: i32, %arg1: i32, %arg2: memref<128x512xbf16, #tpu.memory_space<vmem>>, %arg3: memref<512x128xbf16, #tpu.memory_space<vmem>>, %arg4: memref<1x128xf32, #tpu.memory_space<vmem>>, %arg5: memref<128x128xbf16, #tpu.memory_space<vmem>>, %arg6: memref<1x128xf32, #tpu.memory_space<vmem>>, %arg7: memref<128x128xf32, #tpu.memory_space<vmem>>, %arg8: memref<128x128xf32, #tpu.memory_space<vmem>>) attributes {dimension_semantics = [#tpu.dimension_semantics<parallel>, #tpu.dimension_semantics<arbitrary>], iteration_bounds = array<i64: 1, 3>, scalar_prefetch = 0 : i64, scratch_operands = 1 : i64, tpu.core_type = #tpu.core_type<tc>, window_params = [{transform_indices = @transform_0, window_bounds = array<i64: 128, 512>}, {transform_indices = @transform_1, window_bounds = array<i64: 512, 128>}, {pipeline_mode = #tpu.pipeline_mode<synchronous>, transform_indices = @transform_2, window_bounds = array<i64: 1, 128>}, {pipeline_mode = #tpu.pipeline_mode<synchronous>, transform_indices = @transform_3, window_bounds = array<i64: 128, 128>}, {pipeline_mode = #tpu.pipeline_mode<synchronous>, transform_indices = @transform_4, window_bounds = array<i64: 1, 128>}, {transform_indices = @transform_5, window_bounds = array<i64: 128, 128>}]} {
    %c0_i32 = arith.constant 0 : i32
    %0 = arith.cmpi eq, %arg1, %c0_i32 : i32
    %1 = arith.extui %0 : i1 to i32
    %c0_i32_0 = arith.constant 0 : i32
    %2 = arith.cmpi ne, %1, %c0_i32_0 : i32
    scf.if %2 {
      %cst_9 = arith.constant 0.000000e+00 : f32
      %12 = vector.broadcast %cst_9 : f32 to vector<128x128xf32>
      %c0_10 = arith.constant 0 : index
      %c0_11 = arith.constant 0 : index
      %13 = vector.load %arg8[%c0_10, %c0_11] : memref<128x128xf32, #tpu.memory_space<vmem>>, vector<128x128xf32>
      tpu.vector_store %arg8[%c0_10, %c0_11], %12 {strides = array<i32>} : memref<128x128xf32, #tpu.memory_space<vmem>>, vector<128x128xf32>,
    } else {
    }
    %c0 = arith.constant 0 : index
    %c0_1 = arith.constant 0 : index
    %3 = vector.load %arg8[%c0, %c0_1] : memref<128x128xf32, #tpu.memory_space<vmem>>, vector<128x128xf32>
    %c0_2 = arith.constant 0 : index
    %c0_3 = arith.constant 0 : index
    %4 = vector.load %arg2[%c0_2, %c0_3] : memref<128x512xbf16, #tpu.memory_space<vmem>>, vector<128x512xbf16>
    %c0_4 = arith.constant 0 : index
    %c0_5 = arith.constant 0 : index
    %5 = vector.load %arg3[%c0_4, %c0_5] : memref<512x128xbf16, #tpu.memory_space<vmem>>, vector<512x128xbf16>
    %cst = arith.constant dense<0.000000e+00> : vector<128x128xf32>
    %6 = tpu.matmul %4, %5, %cst {dimension_numbers = #tpu.dot_dimension_numbers<[1], [0], [0], [1], [0, 0, 1, 1], [], []>} : vector<128x512xbf16>, vector<512x128xbf16>, vector<128x128xf32> -> vector<128x128xf32>
    %7 = arith.addf %3, %6 : vector<128x128xf32>
    %c0_6 = arith.constant 0 : index
    %c0_7 = arith.constant 0 : index
    %8 = vector.load %arg8[%c0_6, %c0_7] : memref<128x128xf32, #tpu.memory_space<vmem>>, vector<128x128xf32>
    tpu.vector_store %arg8[%c0_6, %c0_7], %7 {strides = array<i32>} : memref<128x128xf32, #tpu.memory_space<vmem>>, vector<128x128xf32>,
    %c2_i32 = arith.constant 2 : i32
    %9 = arith.cmpi eq, %arg1, %c2_i32 : i32
    %10 = arith.extui %9 : i1 to i32
    %c0_i32_8 = arith.constant 0 : i32
    %11 = arith.cmpi ne, %10, %c0_i32_8 : i32
    scf.if %11 {
      %c0_9 = arith.constant 0 : index
      %c0_10 = arith.constant 0 : index
      %12 = vector.load %arg8[%c0_9, %c0_10] : memref<128x128xf32, #tpu.memory_space<vmem>>, vector<128x128xf32>
      %c0_11 = arith.constant 0 : index
      %c0_12 = arith.constant 0 : index
      %13 = vector.load %arg4[%c0_11, %c0_12] : memref<1x128xf32, #tpu.memory_space<vmem>>, vector<1x128xf32>
      %14 = vector.broadcast %13 : vector<1x128xf32> to vector<128x128xf32>
      %15 = arith.addf %12, %14 : vector<128x128xf32>
      %cst_13 = arith.constant 0.000000e+00 : f32
      %16 = vector.broadcast %cst_13 : f32 to vector<128x128xf32>
      %17 = arith.maximumf %15, %16 : vector<128x128xf32>
      %18 = arith.truncf %17 : vector<128x128xf32> to vector<128x128xbf16>
      %c0_14 = arith.constant 0 : index
      %c0_15 = arith.constant 0 : index
      %19 = vector.load %arg5[%c0_14, %c0_15] : memref<128x128xbf16, #tpu.memory_space<vmem>>, vector<128x128xbf16>
      %cst_16 = arith.constant dense<0.000000e+00> : vector<128x128xf32>
      %20 = tpu.matmul %18, %19, %cst_16 {dimension_numbers = #tpu.dot_dimension_numbers<[1], [0], [0], [1], [0, 0, 1, 1], [], []>} : vector<128x128xbf16>, vector<128x128xbf16>, vector<128x128xf32> -> vector<128x128xf32>
      %c0_17 = arith.constant 0 : index
      %c0_18 = arith.constant 0 : index
      %21 = vector.load %arg6[%c0_17, %c0_18] : memref<1x128xf32, #tpu.memory_space<vmem>>, vector<1x128xf32>
      %22 = vector.broadcast %21 : vector<1x128xf32> to vector<128x128xf32>
      %23 = arith.addf %20, %22 : vector<128x128xf32>
      %c0_19 = arith.constant 0 : index
      %c0_20 = arith.constant 0 : index
      %24 = vector.load %arg7[%c0_19, %c0_20] : memref<128x128xf32, #tpu.memory_space<vmem>>, vector<128x128xf32>
      tpu.vector_store %arg7[%c0_19, %c0_20], %23 {strides = array<i32>} : memref<128x128xf32, #tpu.memory_space<vmem>>, vector<128x128xf32>,
    } else {
    }
    return
  }
  func.func @transform_0(%arg0: i32, %arg1: i32) -> (i32, i32) {
    %c0_i32 = arith.constant 0 : i32
    return %arg0, %arg1 : i32, i32
  }
  func.func @transform_1(%arg0: i32, %arg1: i32) -> (i32, i32) {
    %c0_i32 = arith.constant 0 : i32
    %c0_i32_0 = arith.constant 0 : i32
    return %arg1, %c0_i32 : i32, i32
  }
  func.func @transform_2(%arg0: i32, %arg1: i32) -> (i32, i32) {
    %c0_i32 = arith.constant 0 : i32
    %c0_i32_0 = arith.constant 0 : i32
    %c0_i32_1 = arith.constant 0 : i32
    return %c0_i32, %c0_i32_0 : i32, i32
  }
  func.func @transform_3(%arg0: i32, %arg1: i32) -> (i32, i32) {
    %c0_i32 = arith.constant 0 : i32
    %c0_i32_0 = arith.constant 0 : i32
    %c0_i32_1 = arith.constant 0 : i32
    return %c0_i32, %c0_i32_0 : i32, i32
  }
  func.func @transform_4(%arg0: i32, %arg1: i32) -> (i32, i32) {
    %c0_i32 = arith.constant 0 : i32
    %c0_i32_0 = arith.constant 0 : i32
    %c0_i32_1 = arith.constant 0 : i32
    return %c0_i32, %c0_i32_0 : i32, i32
  }
  func.func @transform_5(%arg0: i32, %arg1: i32) -> (i32, i32) {
    %c0_i32 = arith.constant 0 : i32
    %c0_i32_0 = arith.constant 0 : i32
    return %arg0, %c0_i32 : i32, i32
  }
}

module attributes {stable_mosaic.version = 11 : i64} {
  func.func @_mm_kernel(%arg0: i32, %arg1: i32, %arg2: memref<32x128xf32, #tpu.memory_space<vmem>>, %arg3: memref<128x128xf32, #tpu.memory_space<vmem>>, %arg4: memref<32x128xf32, #tpu.memory_space<vmem>>, %arg5: memref<32x128xf32, #tpu.memory_space<vmem>>) attributes {dimension_semantics = [#tpu.dimension_semantics<parallel>, #tpu.dimension_semantics<arbitrary>], iteration_bounds = array<i64: 1, 1>, scalar_prefetch = 0 : i64, scratch_operands = 1 : i64, tpu.core_type = #tpu.core_type<tc>, window_params = [{transform_indices = @transform_0, window_bounds = array<i64: 32, 128>}, {transform_indices = @transform_1, window_bounds = array<i64: 128, 128>}, {transform_indices = @transform_2, window_bounds = array<i64: 32, 128>}]} {
    %c0_i32 = arith.constant 0 : i32
    %0 = arith.cmpi eq, %arg1, %c0_i32 : i32
    %1 = arith.extui %0 : i1 to i32
    %c0_i32_0 = arith.constant 0 : i32
    %2 = arith.cmpi ne, %1, %c0_i32_0 : i32
    scf.if %2 {
      %cst_10 = arith.constant 0.000000e+00 : f32
      %12 = vector.broadcast %cst_10 : f32 to vector<32x128xf32>
      %c0_11 = arith.constant 0 : index
      %c0_12 = arith.constant 0 : index
      %13 = vector.load %arg5[%c0_11, %c0_12] : memref<32x128xf32, #tpu.memory_space<vmem>>, vector<32x128xf32>
      tpu.vector_store %arg5[%c0_11, %c0_12], %12 {strides = array<i32>} : memref<32x128xf32, #tpu.memory_space<vmem>>, vector<32x128xf32>,
    } else {
    }
    %c0 = arith.constant 0 : index
    %c0_1 = arith.constant 0 : index
    %3 = vector.load %arg5[%c0, %c0_1] : memref<32x128xf32, #tpu.memory_space<vmem>>, vector<32x128xf32>
    %c0_2 = arith.constant 0 : index
    %c0_3 = arith.constant 0 : index
    %4 = vector.load %arg2[%c0_2, %c0_3] : memref<32x128xf32, #tpu.memory_space<vmem>>, vector<32x128xf32>
    %c0_4 = arith.constant 0 : index
    %c0_5 = arith.constant 0 : index
    %5 = vector.load %arg3[%c0_4, %c0_5] : memref<128x128xf32, #tpu.memory_space<vmem>>, vector<128x128xf32>
    %cst = arith.constant dense<0.000000e+00> : vector<32x128xf32>
    %6 = tpu.matmul %4, %5, %cst {dimension_numbers = #tpu.dot_dimension_numbers<[1], [0], [0], [1], [0, 0, 1, 1], [], []>} : vector<32x128xf32>, vector<128x128xf32>, vector<32x128xf32> -> vector<32x128xf32>
    %7 = arith.addf %3, %6 : vector<32x128xf32>
    %c0_6 = arith.constant 0 : index
    %c0_7 = arith.constant 0 : index
    %8 = vector.load %arg5[%c0_6, %c0_7] : memref<32x128xf32, #tpu.memory_space<vmem>>, vector<32x128xf32>
    tpu.vector_store %arg5[%c0_6, %c0_7], %7 {strides = array<i32>} : memref<32x128xf32, #tpu.memory_space<vmem>>, vector<32x128xf32>,
    %c0_i32_8 = arith.constant 0 : i32
    %9 = arith.cmpi eq, %arg1, %c0_i32_8 : i32
    %10 = arith.extui %9 : i1 to i32
    %c0_i32_9 = arith.constant 0 : i32
    %11 = arith.cmpi ne, %10, %c0_i32_9 : i32
    scf.if %11 {
      %c0_10 = arith.constant 0 : index
      %c0_11 = arith.constant 0 : index
      %12 = vector.load %arg5[%c0_10, %c0_11] : memref<32x128xf32, #tpu.memory_space<vmem>>, vector<32x128xf32>
      %c0_12 = arith.constant 0 : index
      %c0_13 = arith.constant 0 : index
      %13 = vector.load %arg4[%c0_12, %c0_13] : memref<32x128xf32, #tpu.memory_space<vmem>>, vector<32x128xf32>
      tpu.vector_store %arg4[%c0_12, %c0_13], %12 {strides = array<i32>} : memref<32x128xf32, #tpu.memory_space<vmem>>, vector<32x128xf32>,
    } else {
    }
    return
  }
  func.func @transform_0(%arg0: i32, %arg1: i32) -> (i32, i32) {
    %c0_i32 = arith.constant 0 : i32
    return %arg0, %arg1 : i32, i32
  }
  func.func @transform_1(%arg0: i32, %arg1: i32) -> (i32, i32) {
    %c0_i32 = arith.constant 0 : i32
    %c0_i32_0 = arith.constant 0 : i32
    return %arg1, %c0_i32 : i32, i32
  }
  func.func @transform_2(%arg0: i32, %arg1: i32) -> (i32, i32) {
    %c0_i32 = arith.constant 0 : i32
    %c0_i32_0 = arith.constant 0 : i32
    return %arg0, %c0_i32 : i32, i32
  }
}

module attributes {stable_mosaic.version = 11 : i64} {
  func.func @_mm_kernel(%arg0: i32, %arg1: i32, %arg2: memref<256x128xf32, #tpu.memory_space<vmem>>, %arg3: memref<128x128xf32, #tpu.memory_space<vmem>>, %arg4: memref<256x128xf32, #tpu.memory_space<vmem>>, %arg5: memref<256x128xf32, #tpu.memory_space<vmem>>) attributes {dimension_semantics = [#tpu.dimension_semantics<parallel>, #tpu.dimension_semantics<arbitrary>], iteration_bounds = array<i64: 1, 1>, scalar_prefetch = 0 : i64, scratch_operands = 1 : i64, tpu.core_type = #tpu.core_type<tc>, window_params = [{transform_indices = @transform_0, window_bounds = array<i64: 256, 128>}, {transform_indices = @transform_1, window_bounds = array<i64: 128, 128>}, {transform_indices = @transform_2, window_bounds = array<i64: 256, 128>}]} {
    %c0_i32 = arith.constant 0 : i32
    %0 = arith.cmpi eq, %arg1, %c0_i32 : i32
    %1 = arith.extui %0 : i1 to i32
    %c0_i32_0 = arith.constant 0 : i32
    %2 = arith.cmpi ne, %1, %c0_i32_0 : i32
    scf.if %2 {
      %cst_10 = arith.constant 0.000000e+00 : f32
      %12 = vector.broadcast %cst_10 : f32 to vector<256x128xf32>
      %c0_11 = arith.constant 0 : index
      %c0_12 = arith.constant 0 : index
      %13 = vector.load %arg5[%c0_11, %c0_12] : memref<256x128xf32, #tpu.memory_space<vmem>>, vector<256x128xf32>
      tpu.vector_store %arg5[%c0_11, %c0_12], %12 {strides = array<i32>} : memref<256x128xf32, #tpu.memory_space<vmem>>, vector<256x128xf32>,
    } else {
    }
    %c0 = arith.constant 0 : index
    %c0_1 = arith.constant 0 : index
    %3 = vector.load %arg5[%c0, %c0_1] : memref<256x128xf32, #tpu.memory_space<vmem>>, vector<256x128xf32>
    %c0_2 = arith.constant 0 : index
    %c0_3 = arith.constant 0 : index
    %4 = vector.load %arg2[%c0_2, %c0_3] : memref<256x128xf32, #tpu.memory_space<vmem>>, vector<256x128xf32>
    %c0_4 = arith.constant 0 : index
    %c0_5 = arith.constant 0 : index
    %5 = vector.load %arg3[%c0_4, %c0_5] : memref<128x128xf32, #tpu.memory_space<vmem>>, vector<128x128xf32>
    %cst = arith.constant dense<0.000000e+00> : vector<256x128xf32>
    %6 = tpu.matmul %4, %5, %cst {dimension_numbers = #tpu.dot_dimension_numbers<[1], [0], [0], [1], [0, 0, 1, 1], [], []>} : vector<256x128xf32>, vector<128x128xf32>, vector<256x128xf32> -> vector<256x128xf32>
    %7 = arith.addf %3, %6 : vector<256x128xf32>
    %c0_6 = arith.constant 0 : index
    %c0_7 = arith.constant 0 : index
    %8 = vector.load %arg5[%c0_6, %c0_7] : memref<256x128xf32, #tpu.memory_space<vmem>>, vector<256x128xf32>
    tpu.vector_store %arg5[%c0_6, %c0_7], %7 {strides = array<i32>} : memref<256x128xf32, #tpu.memory_space<vmem>>, vector<256x128xf32>,
    %c0_i32_8 = arith.constant 0 : i32
    %9 = arith.cmpi eq, %arg1, %c0_i32_8 : i32
    %10 = arith.extui %9 : i1 to i32
    %c0_i32_9 = arith.constant 0 : i32
    %11 = arith.cmpi ne, %10, %c0_i32_9 : i32
    scf.if %11 {
      %c0_10 = arith.constant 0 : index
      %c0_11 = arith.constant 0 : index
      %12 = vector.load %arg5[%c0_10, %c0_11] : memref<256x128xf32, #tpu.memory_space<vmem>>, vector<256x128xf32>
      %c0_12 = arith.constant 0 : index
      %c0_13 = arith.constant 0 : index
      %13 = vector.load %arg4[%c0_12, %c0_13] : memref<256x128xf32, #tpu.memory_space<vmem>>, vector<256x128xf32>
      tpu.vector_store %arg4[%c0_12, %c0_13], %12 {strides = array<i32>} : memref<256x128xf32, #tpu.memory_space<vmem>>, vector<256x128xf32>,
    } else {
    }
    return
  }
  func.func @transform_0(%arg0: i32, %arg1: i32) -> (i32, i32) {
    %c0_i32 = arith.constant 0 : i32
    return %arg0, %arg1 : i32, i32
  }
  func.func @transform_1(%arg0: i32, %arg1: i32) -> (i32, i32) {
    %c0_i32 = arith.constant 0 : i32
    %c0_i32_0 = arith.constant 0 : i32
    return %arg1, %c0_i32 : i32, i32
  }
  func.func @transform_2(%arg0: i32, %arg1: i32) -> (i32, i32) {
    %c0_i32 = arith.constant 0 : i32
    %c0_i32_0 = arith.constant 0 : i32
    return %arg0, %c0_i32 : i32, i32
  }
}

</mosaic_0001>

<bundles_post_ra>
// kernel: transform_net_forward.10
= control target key start
LH: loop header
LB: loop body
LE: loop exit
PB: predicated region body
PF: predicated region fallthrough
CT: control target
= control target key end

     0   :  { %7 = vsyncpa [#allocation4], 0  ;;  %s1080_s0 = inlined_call_operand.hbm [shape: f32[384,128], index: 0, kind: input, shape index: {}]   ;;  %s1081_s1 = inlined_call_operand.hbm [shape: f32[128,128], index: 1, kind: input, shape index: {}]   ;;  %s1082_s2 = inlined_call_operand.hbm [shape: f32[384,128], index: 2, kind: output, shape index: {}]  }
   0x1   :  { %8 = vsyncpa [#allocation7], 0 }
   0x2   :  { %9 = vsyncpa [#allocation5], 0  ;;  %s1015_s9 = smov [#allocation3]   ;;  %s943_s13 = scalar_lea.hbm %s1080_s0, 6144 }
   0x3   :  { %s15_s10 = sshll.u32 %s1015_s9, 4  ;;  %p944_p0 = scmp.ne.s32.totalorder %s1080_s0, %s943_s13  ;;  %s16_s10 = int_to_ptr.vmem [resolvable:$true] %s15_s10 }
   0x4   :  { %p947_p1 = scmp.lt.u32.totalorder %s943_s13, %s1080_s0 }
   0x6   :  { %p949_p2 = pnand %p947_p1, %p944_p0 }
   0x8   :  { %952 = shalt.err (!%p949_p2)
}
   0x9   :  { %s953_s18 = scalar_lea.vmem %s16_s10, 6144  ;;  %p958_p4 = scmp.lt.s32.totalorder %s16_s10, %s16_s10 }
   0xa   :  { %p954_p3 = scmp.ne.s32.totalorder %s16_s10, %s953_s18  ;;  %p959_p5 = scmp.lt.s32.totalorder %s953_s18, %s953_s18 }
   0xc   :  { %p960_p6 = por %p959_p5, %p958_p4 }
   0xe   :  { %p961_p7 = pnand %p960_p6, %p954_p3 }
  0x10   :  { %964 = shalt.err (!%p961_p7)
}
  0x11   :  { %s1016_s19 = smov 128   ;;  %s1017_s20 = smov 8  }
  0x12   :  { %21 = dma.hbm_to_vmem [thread:$0]  %s1080_s0, 6144, %s16_s10, [#allocation4], %s1016_s19, %s1016_s19, %s1017_s20  }
  0x13   :  { %s1018_s23 = smov [#allocation6]   ;;  %s965_s27 = scalar_lea.hbm %s1081_s1, 2048 }
  0x14   :  { %s27_s24 = sshll.u32 %s1018_s23, 4  ;;  %p966_p8 = scmp.ne.s32.totalorder %s1081_s1, %s965_s27  ;;  %s28_s24 = int_to_ptr.vmem [resolvable:$true] %s27_s24 }
  0x15   :  { %p969_p9 = scmp.lt.u32.totalorder %s965_s27, %s1081_s1 }
  0x17   :  { %p971_p10 = pnand %p969_p9, %p966_p8 }
  0x19   :  { %974 = shalt.err (!%p971_p10)
}
  0x1a   :  { %s975_s4 = scalar_lea.vmem %s28_s24, 2048  ;;  %p980_p12 = scmp.lt.s32.totalorder %s28_s24, %s28_s24 }
  0x1b   :  { %p976_p11 = scmp.ne.s32.totalorder %s28_s24, %s975_s4  ;;  %p981_p13 = scmp.lt.s32.totalorder %s975_s4, %s975_s4 }
  0x1d   :  { %p982_p0 = por %p981_p13, %p980_p12 }
  0x1f   :  { %p983_p1 = pnand %p982_p0, %p976_p11 }
  0x21   :  { %986 = shalt.err (!%p983_p1)
}
  0x22   :  { %33 = dma.hbm_to_vmem [thread:$0]  %s1081_s1, 2048, %s28_s24, [#allocation7], %s1016_s19, %s1016_s19, %s1017_s20  }
  0x23   :  { %1009 = dma.done.wait [#allocation4], 6144  }
  0x24   :  { %1010 = vsyncadd [#allocation4], 4294961152 }
  0x25   :  { %1011 = dma.done.wait [#allocation7], 2048  }
  0x26   :  { %1012 = vsyncadd [#allocation7], 4294965248  ;;  %v188_v0 = vld [vmem:[#allocation6] sm:$0xff]  ;;  %v189_v1 = vld [vmem:[#allocation6 + $0x8] sm:$0xff]  ;;  %s1019_s1 = smov [#allocation8]  }
  0x27   :  { %v190_v2 = vld [vmem:[#allocation6 + $0x10] sm:$0xff]  ;;  %v890_v3 = vpack.c.bf16 %v189_v1, %v188_v0  ;;  %v191_v4 = vld [vmem:[#allocation6 + $0x18] sm:$0xff]  ;;  %v192_v6 = vld [vmem:[#allocation6 + $0x20] sm:$0xff]  ;;  %s709_s6 = sshll.u32 %s1019_s1, 4  ;;  %s710_s6 = int_to_ptr.vmem [resolvable:$true] %s709_s6 }
  0x28   :  { %v894_v5 = vpack.c.bf16 %v191_v4, %v190_v2  ;;  %v193_v7 = vld [vmem:[#allocation6 + $0x28] sm:$0xff]  ;;  %v140_v9 = vld [vmem:[#allocation3] sm:$0xff]  ;;  %v194_v11 = vld [vmem:[#allocation6 + $0x30] sm:$0xff]  ;;  %s987_s7 = scalar_lea.vmem %s710_s6, 6144  ;;  %p992_p3 = scmp.lt.s32.totalorder %s710_s6, %s710_s6 }
  0x29   :  { %891 = vmatprep.subr.bf16.mxu0 %v890_v3  ;;  %922 = vmatprep.subr.bf16.mxu1 %v890_v3  ;;  %v898_v8 = vpack.c.bf16 %v193_v7, %v192_v6  ;;  %v164_v10 = vld [vmem:[#allocation3 + $0xc0] sm:$0xff]  ;;  %v195_v12 = vld [vmem:[#allocation6 + $0x38] sm:$0xff]  ;;  %v197_v15 = vld [vmem:[#allocation6 + $0x48] sm:$0xff]  ;;  %p988_p2 = scmp.ne.s32.totalorder %s710_s6, %s987_s7  ;;  %p993_p4 = scmp.lt.s32.totalorder %s987_s7, %s987_s7 }
  0x2a   :  { %893 = vmatpush3.bf16.msra.mxu0 %v890_v3  ;;  %930 = vmatpush3.bf16.msra.mxu1 %v890_v3  ;;  %v902_v13 = vpack.c.bf16 %v195_v12, %v194_v11  ;;  %v196_v14 = vld [vmem:[#allocation6 + $0x40] sm:$0xff]  ;;  %v198_v17 = vld [vmem:[#allocation6 + $0x50] sm:$0xff]  ;;  %v199_v18 = vld [vmem:[#allocation6 + $0x58] sm:$0xff] }
  0x2b   :  { %895 = vmatprep.subr.bf16.mxu0 %v894_v5  ;;  %923 = vmatprep.subr.bf16.mxu1 %v894_v5  ;;  %v906_v16 = vpack.c.bf16 %v197_v15, %v196_v14  ;;  %v910_v19 = vpack.c.bf16 %v199_v18, %v198_v17  ;;  %v200_v20 = vld [vmem:[#allocation6 + $0x60] sm:$0xff]  ;;  %v201_v21 = vld [vmem:[#allocation6 + $0x68] sm:$0xff]  ;;  %v202_v23 = vld [vmem:[#allocation6 + $0x70] sm:$0xff]  ;;  %p994_p5 = por %p993_p4, %p992_p3 }
  0x2c   :  { %818 = vmatprep.mubr.f32.mxu0 %v140_v9  ;;  %854 = vmatprep.mubr.f32.mxu1 %v164_v10  ;;  %v914_v22 = vpack.c.bf16 %v201_v21, %v200_v20  ;;  %v203_v24 = vld [vmem:[#allocation6 + $0x78] sm:$0xff]  ;;  %v141_v26 = vld [vmem:[#allocation3 + $0x8] sm:$0xff]  ;;  %v142_v28 = vld [vmem:[#allocation3 + $0x10] sm:$0xff] }
  0x2d   :  { %v918_v25 = vpack.c.bf16 %v203_v24, %v202_v23  ;;  %v165_v27 = vld [vmem:[#allocation3 + $0xc8] sm:$0xff]  ;;  %v166_v29 = vld [vmem:[#allocation3 + $0xd0] sm:$0xff]  ;;  %v143_v30 = vld [vmem:[#allocation3 + $0x18] sm:$0xff]  ;;  %p995_p6 = pnand %p994_p5, %p988_p2 }
  0x2e   :  { %897 = vmatpush3.bf16.msra.mxu0 %v894_v5  ;;  %931 = vmatpush3.bf16.msra.mxu1 %v894_v5  ;;  %v167_v31 = vld [vmem:[#allocation3 + $0xd8] sm:$0xff]  ;;  %v144_v32 = vld [vmem:[#allocation3 + $0x20] sm:$0xff]  ;;  %v145_v34 = vld [vmem:[#allocation3 + $0x28] sm:$0xff] }
  0x2f   :  { %899 = vmatprep.subr.bf16.mxu0 %v898_v8  ;;  %924 = vmatprep.subr.bf16.mxu1 %v898_v8  ;;  %v168_v33 = vld [vmem:[#allocation3 + $0xe0] sm:$0xff]  ;;  %v169_v35 = vld [vmem:[#allocation3 + $0xe8] sm:$0xff]  ;;  %v146_v36 = vld [vmem:[#allocation3 + $0x30] sm:$0xff] }
  0x30   :  { %v170_v37 = vld [vmem:[#allocation3 + $0xf0] sm:$0xff]  ;;  %v147_v38 = vld [vmem:[#allocation3 + $0x38] sm:$0xff]  ;;  %v148_v40 = vld [vmem:[#allocation3 + $0x40] sm:$0xff] }
  0x31   :  { %v171_v39 = vld [vmem:[#allocation3 + $0xf8] sm:$0xff]  ;;  %v172_v41 = vld [vmem:[#allocation3 + $0x100] sm:$0xff]  ;;  %v149_v42 = vld [vmem:[#allocation3 + $0x48] sm:$0xff] }
  0x32   :  { %901 = vmatpush3.bf16.msra.mxu0 %v898_v8  ;;  %932 = vmatpush3.bf16.msra.mxu1 %v898_v8  ;;  %v173_v43 = vld [vmem:[#allocation3 + $0x108] sm:$0xff]  ;;  %v150_v44 = vld [vmem:[#allocation3 + $0x50] sm:$0xff]  ;;  %v151_v46 = vld [vmem:[#allocation3 + $0x58] sm:$0xff] }
  0x33   :  { %903 = vmatprep.subr.bf16.mxu0 %v902_v13  ;;  %925 = vmatprep.subr.bf16.mxu1 %v902_v13  ;;  %v174_v45 = vld [vmem:[#allocation3 + $0x110] sm:$0xff]  ;;  %v175_v47 = vld [vmem:[#allocation3 + $0x118] sm:$0xff]  ;;  %v152_v48 = vld [vmem:[#allocation3 + $0x60] sm:$0xff] }
  0x34   :  { %v176_v49 = vld [vmem:[#allocation3 + $0x120] sm:$0xff]  ;;  %v153_v50 = vld [vmem:[#allocation3 + $0x68] sm:$0xff]  ;;  %v154_v52 = vld [vmem:[#allocation3 + $0x70] sm:$0xff] }
  0x35   :  { %v177_v51 = vld [vmem:[#allocation3 + $0x128] sm:$0xff]  ;;  %v178_v53 = vld [vmem:[#allocation3 + $0x130] sm:$0xff]  ;;  %v155_v54 = vld [vmem:[#allocation3 + $0x78] sm:$0xff] }
  0x36   :  { %905 = vmatpush3.bf16.msra.mxu0 %v902_v13  ;;  %933 = vmatpush3.bf16.msra.mxu1 %v902_v13  ;;  %v179_v55 = vld [vmem:[#allocation3 + $0x138] sm:$0xff]  ;;  %v156_v56 = vld [vmem:[#allocation3 + $0x80] sm:$0xff]  ;;  %v157_v58 = vld [vmem:[#allocation3 + $0x88] sm:$0xff] }
  0x37   :  { %907 = vmatprep.subr.bf16.mxu0 %v906_v16  ;;  %926 = vmatprep.subr.bf16.mxu1 %v906_v16  ;;  %v180_v57 = vld [vmem:[#allocation3 + $0x140] sm:$0xff]  ;;  %v181_v59 = vld [vmem:[#allocation3 + $0x148] sm:$0xff]  ;;  %v158_v60 = vld [vmem:[#allocation3 + $0x90] sm:$0xff] }
  0x38   :  { %v182_v61 = vld [vmem:[#allocation3 + $0x150] sm:$0xff]  ;;  %v159_v62 = vld [vmem:[#allocation3 + $0x98] sm:$0xff]  ;;  %v160_v0 = vld [vmem:[#allocation3 + $0xa0] sm:$0xff] }
  0x39   :  { %v183_v63 = vld [vmem:[#allocation3 + $0x158] sm:$0xff]  ;;  %v184_v1 = vld [vmem:[#allocation3 + $0x160] sm:$0xff]  ;;  %v161_v2 = vld [vmem:[#allocation3 + $0xa8] sm:$0xff] }
  0x3a   :  { %909 = vmatpush3.bf16.msra.mxu0 %v906_v16  ;;  %934 = vmatpush3.bf16.msra.mxu1 %v906_v16  ;;  %v185_v3 = vld [vmem:[#allocation3 + $0x168] sm:$0xff]  ;;  %v162_v4 = vld [vmem:[#allocation3 + $0xb0] sm:$0xff]  ;;  %v163_v6 = vld [vmem:[#allocation3 + $0xb8] sm:$0xff] }
  0x3b   :  { %911 = vmatprep.subr.bf16.mxu0 %v910_v19  ;;  %927 = vmatprep.subr.bf16.mxu1 %v910_v19  ;;  %v186_v5 = vld [vmem:[#allocation3 + $0x170] sm:$0xff]  ;;  %v187_v7 = vld [vmem:[#allocation3 + $0x178] sm:$0xff] }
  0x3e   :  { %913 = vmatpush3.bf16.msra.mxu0 %v910_v19  ;;  %935 = vmatpush3.bf16.msra.mxu1 %v910_v19 }
  0x3f   :  { %915 = vmatprep.subr.bf16.mxu0 %v914_v22  ;;  %928 = vmatprep.subr.bf16.mxu1 %v914_v22 }
  0x42   :  { %917 = vmatpush3.bf16.msra.mxu0 %v914_v22  ;;  %936 = vmatpush3.bf16.msra.mxu1 %v914_v22 }
  0x43   :  { %919 = vmatprep.subr.bf16.mxu0 %v918_v25  ;;  %929 = vmatprep.subr.bf16.mxu1 %v918_v25 }
  0x46   :  { %921 = vmatpush3.bf16.msra.mxu0 %v918_v25  ;;  %937 = vmatpush3.bf16.msra.mxu1 %v918_v25 }
  0x49   :  { %819 = vmatmul.mubr.f32.vlgmr.msra.gmra.mrb[0].mxu0 %v141_v26  ;;  %855 = vmatmul.mubr.f32.vlgmr.msra.gmra.mrb[0].mxu1 %v165_v27 }
  0x4a   :  { %821 = vmatprep.mubr.f32.mxu0 %v142_v28  ;;  %857 = vmatprep.mubr.f32.mxu1 %v166_v29 }
  0x4d   :  { %822 = vmatmul.mubr.f32.gmra.mrb[2].mxu0 %v143_v30  ;;  %858 = vmatmul.mubr.f32.gmra.mrb[2].mxu1 %v167_v31 }
  0x4e   :  { %824 = vmatprep.mubr.f32.mxu0 %v144_v32  ;;  %860 = vmatprep.mubr.f32.mxu1 %v168_v33 }
  0x51   :  { %825 = vmatmul.mubr.f32.gmra.mrb[4].mxu0 %v145_v34  ;;  %861 = vmatmul.mubr.f32.gmra.mrb[4].mxu1 %v169_v35 }
  0x52   :  { %827 = vmatprep.mubr.f32.mxu0 %v146_v36  ;;  %863 = vmatprep.mubr.f32.mxu1 %v170_v37 }
  0x55   :  { %828 = vmatmul.mubr.f32.gmra.mrb[6].mxu0 %v147_v38  ;;  %864 = vmatmul.mubr.f32.gmra.mrb[6].mxu1 %v171_v39 }
  0x56   :  { %830 = vmatprep.mubr.f32.mxu0 %v148_v40  ;;  %866 = vmatprep.mubr.f32.mxu1 %v172_v41 }
  0x59   :  { %831 = vmatmul.mubr.f32.gmra.mrb[8].mxu0 %v149_v42  ;;  %867 = vmatmul.mubr.f32.gmra.mrb[8].mxu1 %v173_v43 }
  0x5a   :  { %833 = vmatprep.mubr.f32.mxu0 %v150_v44  ;;  %869 = vmatprep.mubr.f32.mxu1 %v174_v45 }
  0x5d   :  { %834 = vmatmul.mubr.f32.gmra.mrb[10].mxu0 %v151_v46  ;;  %870 = vmatmul.mubr.f32.gmra.mrb[10].mxu1 %v175_v47 }
  0x5e   :  { %836 = vmatprep.mubr.f32.mxu0 %v152_v48  ;;  %872 = vmatprep.mubr.f32.mxu1 %v176_v49 }
  0x61   :  { %837 = vmatmul.mubr.f32.gmra.mrb[12].mxu0 %v153_v50  ;;  %873 = vmatmul.mubr.f32.gmra.mrb[12].mxu1 %v177_v51 }
  0x62   :  { %839 = vmatprep.mubr.f32.mxu0 %v154_v52  ;;  %875 = vmatprep.mubr.f32.mxu1 %v178_v53 }
  0x65   :  { %840 = vmatmul.mubr.f32.gmra.mrb[14].mxu0 %v155_v54  ;;  %876 = vmatmul.mubr.f32.gmra.mrb[14].mxu1 %v179_v55 }
  0x66   :  { %842 = vmatprep.mubr.f32.mxu0 %v156_v56  ;;  %878 = vmatprep.mubr.f32.mxu1 %v180_v57 }
  0x69   :  { %843 = vmatmul.mubr.f32.gmra.mrb[16].mxu0 %v157_v58  ;;  %879 = vmatmul.mubr.f32.gmra.mrb[16].mxu1 %v181_v59 }
  0x6a   :  { %845 = vmatprep.mubr.f32.mxu0 %v158_v60  ;;  %881 = vmatprep.mubr.f32.mxu1 %v182_v61 }
  0x6d   :  { %846 = vmatmul.mubr.f32.gmra.mrb[18].mxu0 %v159_v62  ;;  %882 = vmatmul.mubr.f32.gmra.mrb[18].mxu1 %v183_v63 }
  0x6e   :  { %848 = vmatprep.mubr.f32.mxu0 %v160_v0  ;;  %884 = vmatprep.mubr.f32.mxu1 %v184_v1 }
  0x71   :  { %849 = vmatmul.mubr.f32.gmra.mrb[20].mxu0 %v161_v2  ;;  %885 = vmatmul.mubr.f32.gmra.mrb[20].mxu1 %v185_v3 }
  0x72   :  { %851 = vmatprep.mubr.f32.mxu0 %v162_v4  ;;  %887 = vmatprep.mubr.f32.mxu1 %v186_v5 }
  0x75   :  { %852 = vmatmul.mubr.f32.gmra.mrb[22].mxu0 %v163_v6  ;;  %888 = vmatmul.mubr.f32.gmra.mrb[22].mxu1 %v187_v7 }
 0x11c   :  { %v820_v8 = vpop.f32.mrb[0].mxu0  ;;  %v856_v9 = vpop.f32.mrb[0].mxu1 }
 0x11d   :  { %657 = vst [vmem:[#allocation8 + $0x8] sm:$0xff] %v820_v8  ;;  %681 = vst [vmem:[#allocation8 + $0xc8] sm:$0xff] %v856_v9  ;;  %v270_v10 = vpop.f32.mrb[1].mxu0  ;;  %v390_v11 = vpop.f32.mrb[1].mxu1 }
 0x11e   :  { %656 = vst [vmem:[#allocation8] sm:$0xff] %v270_v10  ;;  %680 = vst [vmem:[#allocation8 + $0xc0] sm:$0xff] %v390_v11 }
 0x120   :  { %v823_v12 = vpop.f32.mrb[2].mxu0  ;;  %v859_v13 = vpop.f32.mrb[2].mxu1 }
 0x121   :  { %659 = vst [vmem:[#allocation8 + $0x18] sm:$0xff] %v823_v12  ;;  %683 = vst [vmem:[#allocation8 + $0xd8] sm:$0xff] %v859_v13  ;;  %v280_v14 = vpop.f32.mrb[3].mxu0  ;;  %v400_v15 = vpop.f32.mrb[3].mxu1 }
 0x122   :  { %658 = vst [vmem:[#allocation8 + $0x10] sm:$0xff] %v280_v14  ;;  %682 = vst [vmem:[#allocation8 + $0xd0] sm:$0xff] %v400_v15 }
 0x124   :  { %v826_v16 = vpop.f32.mrb[4].mxu0  ;;  %v862_v17 = vpop.f32.mrb[4].mxu1 }
 0x125   :  { %661 = vst [vmem:[#allocation8 + $0x28] sm:$0xff] %v826_v16  ;;  %685 = vst [vmem:[#allocation8 + $0xe8] sm:$0xff] %v862_v17  ;;  %v290_v18 = vpop.f32.mrb[5].mxu0  ;;  %v410_v19 = vpop.f32.mrb[5].mxu1 }
 0x126   :  { %660 = vst [vmem:[#allocation8 + $0x20] sm:$0xff] %v290_v18  ;;  %684 = vst [vmem:[#allocation8 + $0xe0] sm:$0xff] %v410_v19 }
 0x128   :  { %v829_v20 = vpop.f32.mrb[6].mxu0  ;;  %v865_v21 = vpop.f32.mrb[6].mxu1 }
 0x129   :  { %663 = vst [vmem:[#allocation8 + $0x38] sm:$0xff] %v829_v20  ;;  %687 = vst [vmem:[#allocation8 + $0xf8] sm:$0xff] %v865_v21  ;;  %v300_v22 = vpop.f32.mrb[7].mxu0  ;;  %v420_v23 = vpop.f32.mrb[7].mxu1 }
 0x12a   :  { %662 = vst [vmem:[#allocation8 + $0x30] sm:$0xff] %v300_v22  ;;  %686 = vst [vmem:[#allocation8 + $0xf0] sm:$0xff] %v420_v23 }
 0x12c   :  { %v832_v24 = vpop.f32.mrb[8].mxu0  ;;  %v868_v25 = vpop.f32.mrb[8].mxu1 }
 0x12d   :  { %665 = vst [vmem:[#allocation8 + $0x48] sm:$0xff] %v832_v24  ;;  %689 = vst [vmem:[#allocation8 + $0x108] sm:$0xff] %v868_v25  ;;  %v310_v26 = vpop.f32.mrb[9].mxu0  ;;  %v430_v27 = vpop.f32.mrb[9].mxu1 }
 0x12e   :  { %664 = vst [vmem:[#allocation8 + $0x40] sm:$0xff] %v310_v26  ;;  %688 = vst [vmem:[#allocation8 + $0x100] sm:$0xff] %v430_v27 }
 0x130   :  { %v835_v28 = vpop.f32.mrb[10].mxu0  ;;  %v871_v29 = vpop.f32.mrb[10].mxu1 }
 0x131   :  { %667 = vst [vmem:[#allocation8 + $0x58] sm:$0xff] %v835_v28  ;;  %691 = vst [vmem:[#allocation8 + $0x118] sm:$0xff] %v871_v29  ;;  %v320_v30 = vpop.f32.mrb[11].mxu0  ;;  %v440_v31 = vpop.f32.mrb[11].mxu1 }
 0x132   :  { %666 = vst [vmem:[#allocation8 + $0x50] sm:$0xff] %v320_v30  ;;  %690 = vst [vmem:[#allocation8 + $0x110] sm:$0xff] %v440_v31 }
 0x134   :  { %v838_v32 = vpop.f32.mrb[12].mxu0  ;;  %v874_v33 = vpop.f32.mrb[12].mxu1 }
 0x135   :  { %669 = vst [vmem:[#allocation8 + $0x68] sm:$0xff] %v838_v32  ;;  %693 = vst [vmem:[#allocation8 + $0x128] sm:$0xff] %v874_v33  ;;  %v330_v34 = vpop.f32.mrb[13].mxu0  ;;  %v450_v35 = vpop.f32.mrb[13].mxu1 }
 0x136   :  { %668 = vst [vmem:[#allocation8 + $0x60] sm:$0xff] %v330_v34  ;;  %692 = vst [vmem:[#allocation8 + $0x120] sm:$0xff] %v450_v35 }
 0x138   :  { %v841_v36 = vpop.f32.mrb[14].mxu0  ;;  %v877_v37 = vpop.f32.mrb[14].mxu1 }
 0x139   :  { %671 = vst [vmem:[#allocation8 + $0x78] sm:$0xff] %v841_v36  ;;  %695 = vst [vmem:[#allocation8 + $0x138] sm:$0xff] %v877_v37  ;;  %v340_v38 = vpop.f32.mrb[15].mxu0  ;;  %v460_v39 = vpop.f32.mrb[15].mxu1 }
 0x13a   :  { %670 = vst [vmem:[#allocation8 + $0x70] sm:$0xff] %v340_v38  ;;  %694 = vst [vmem:[#allocation8 + $0x130] sm:$0xff] %v460_v39 }
 0x13c   :  { %v844_v40 = vpop.f32.mrb[16].mxu0  ;;  %v880_v41 = vpop.f32.mrb[16].mxu1 }
 0x13d   :  { %673 = vst [vmem:[#allocation8 + $0x88] sm:$0xff] %v844_v40  ;;  %697 = vst [vmem:[#allocation8 + $0x148] sm:$0xff] %v880_v41  ;;  %v350_v42 = vpop.f32.mrb[17].mxu0  ;;  %v470_v43 = vpop.f32.mrb[17].mxu1 }
 0x13e   :  { %672 = vst [vmem:[#allocation8 + $0x80] sm:$0xff] %v350_v42  ;;  %696 = vst [vmem:[#allocation8 + $0x140] sm:$0xff] %v470_v43 }
 0x140   :  { %v847_v44 = vpop.f32.mrb[18].mxu0  ;;  %v883_v45 = vpop.f32.mrb[18].mxu1 }
 0x141   :  { %675 = vst [vmem:[#allocation8 + $0x98] sm:$0xff] %v847_v44  ;;  %699 = vst [vmem:[#allocation8 + $0x158] sm:$0xff] %v883_v45  ;;  %v360_v46 = vpop.f32.mrb[19].mxu0  ;;  %v480_v47 = vpop.f32.mrb[19].mxu1 }
 0x142   :  { %674 = vst [vmem:[#allocation8 + $0x90] sm:$0xff] %v360_v46  ;;  %698 = vst [vmem:[#allocation8 + $0x150] sm:$0xff] %v480_v47 }
 0x144   :  { %v850_v48 = vpop.f32.mrb[20].mxu0  ;;  %v886_v49 = vpop.f32.mrb[20].mxu1 }
 0x145   :  { %677 = vst [vmem:[#allocation8 + $0xa8] sm:$0xff] %v850_v48  ;;  %701 = vst [vmem:[#allocation8 + $0x168] sm:$0xff] %v886_v49  ;;  %v370_v50 = vpop.f32.mrb[21].mxu0  ;;  %v490_v51 = vpop.f32.mrb[21].mxu1 }
 0x146   :  { %676 = vst [vmem:[#allocation8 + $0xa0] sm:$0xff] %v370_v50  ;;  %700 = vst [vmem:[#allocation8 + $0x160] sm:$0xff] %v490_v51 }
 0x148   :  { %v853_v52 = vpop.f32.mrb[22].mxu0  ;;  %v889_v53 = vpop.f32.mrb[22].mxu1 }
 0x149   :  { %679 = vst [vmem:[#allocation8 + $0xb8] sm:$0xff] %v853_v52  ;;  %703 = vst [vmem:[#allocation8 + $0x178] sm:$0xff] %v889_v53  ;;  %v380_v54 = vpop.f32.mrb[23].mxu0  ;;  %v500_v55 = vpop.f32.mrb[23].mxu1 }
 0x14a   :  { %678 = vst [vmem:[#allocation8 + $0xb0] sm:$0xff] %v380_v54  ;;  %702 = vst [vmem:[#allocation8 + $0x170] sm:$0xff] %v500_v55 }
 0x14b   :  { %998 = shalt.err (!%p995_p6)
}
 0x14c   :  { %s999_s10 = scalar_lea.hbm %s1082_s2, 6144 }
 0x14d   :  { %p1000_p7 = scmp.ne.s32.totalorder %s1082_s2, %s999_s10  ;;  %p1003_p8 = scmp.lt.u32.totalorder %s999_s10, %s1082_s2 }
 0x14f   :  { %p1005_p9 = pnand %p1003_p8, %p1000_p7 }
 0x151   :  { %1008 = shalt.err (!%p1005_p9)
}
 0x152   :  { %715 = dma.vmem_to_hbm [thread:$0]  %s710_s6, 6144, %s1082_s2, [#allocation5], %s1016_s19, %s1016_s19, %s1017_s20  }
 0x153   :  { %1013 = dma.done.wait [#allocation5], 6144  }
 0x154   :  { %1014 = vsyncadd [#allocation5], 4294961152 }
 0x155   :  { %719 = vsyncpa [#allocation4], 1 }
 0x156   :  { %720 = vsyncpa [#allocation7], 1 }
 0x157   :  { %721 = vsyncpa [#allocation5], 1 }

// kernel: transform_net_forward.11
= control target key start
LH: loop header
LB: loop body
LE: loop exit
PB: predicated region body
PF: predicated region fallthrough
CT: control target
= control target key end

     0   :  { %7 = vsyncpa [#allocation4], 0  ;;  %s471_s0 = inlined_call_operand.hbm [shape: f32[48,128], index: 0, kind: input, shape index: {}]   ;;  %s472_s1 = inlined_call_operand.hbm [shape: f32[128,128], index: 1, kind: input, shape index: {}]   ;;  %s473_s2 = inlined_call_operand.hbm [shape: f32[48,128], index: 2, kind: output, shape index: {}]  }
   0x1   :  { %8 = vsyncpa [#allocation7], 0 }
   0x2   :  { %9 = vsyncpa [#allocation5], 0  ;;  %s406_s9 = smov [#allocation3]   ;;  %s334_s13 = scalar_lea.hbm %s471_s0, 768 }
   0x3   :  { %s15_s10 = sshll.u32 %s406_s9, 4  ;;  %p335_p0 = scmp.ne.s32.totalorder %s471_s0, %s334_s13  ;;  %s16_s10 = int_to_ptr.vmem [resolvable:$true] %s15_s10 }
   0x4   :  { %p338_p1 = scmp.lt.u32.totalorder %s334_s13, %s471_s0 }
   0x6   :  { %p340_p2 = pnand %p338_p1, %p335_p0 }
   0x8   :  { %343 = shalt.err (!%p340_p2)
}
   0x9   :  { %s344_s18 = scalar_lea.vmem %s16_s10, 768  ;;  %p349_p4 = scmp.lt.s32.totalorder %s16_s10, %s16_s10 }
   0xa   :  { %p345_p3 = scmp.ne.s32.totalorder %s16_s10, %s344_s18  ;;  %p350_p5 = scmp.lt.s32.totalorder %s344_s18, %s344_s18 }
   0xc   :  { %p351_p6 = por %p350_p5, %p349_p4 }
   0xe   :  { %p352_p7 = pnand %p351_p6, %p345_p3 }
  0x10   :  { %355 = shalt.err (!%p352_p7)
}
  0x11   :  { %s407_s19 = smov 128   ;;  %s408_s20 = smov 8  }
  0x12   :  { %21 = dma.hbm_to_vmem [thread:$0]  %s471_s0, 768, %s16_s10, [#allocation4], %s407_s19, %s407_s19, %s408_s20  }
  0x13   :  { %s409_s23 = smov [#allocation6]   ;;  %s356_s27 = scalar_lea.hbm %s472_s1, 2048 }
  0x14   :  { %s27_s24 = sshll.u32 %s409_s23, 4  ;;  %p357_p8 = scmp.ne.s32.totalorder %s472_s1, %s356_s27  ;;  %s28_s24 = int_to_ptr.vmem [resolvable:$true] %s27_s24 }
  0x15   :  { %p360_p9 = scmp.lt.u32.totalorder %s356_s27, %s472_s1 }
  0x17   :  { %p362_p10 = pnand %p360_p9, %p357_p8 }
  0x19   :  { %365 = shalt.err (!%p362_p10)
}
  0x1a   :  { %s366_s4 = scalar_lea.vmem %s28_s24, 2048  ;;  %p371_p12 = scmp.lt.s32.totalorder %s28_s24, %s28_s24 }
  0x1b   :  { %p367_p11 = scmp.ne.s32.totalorder %s28_s24, %s366_s4  ;;  %p372_p13 = scmp.lt.s32.totalorder %s366_s4, %s366_s4 }
  0x1d   :  { %p373_p0 = por %p372_p13, %p371_p12 }
  0x1f   :  { %p374_p1 = pnand %p373_p0, %p367_p11 }
  0x21   :  { %377 = shalt.err (!%p374_p1)
}
  0x22   :  { %33 = dma.hbm_to_vmem [thread:$0]  %s472_s1, 2048, %s28_s24, [#allocation7], %s407_s19, %s407_s19, %s408_s20  }
  0x23   :  { %400 = dma.done.wait [#allocation4], 768  }
  0x24   :  { %401 = vsyncadd [#allocation4], 4294966528 }
  0x25   :  { %402 = dma.done.wait [#allocation7], 2048  }
  0x26   :  { %403 = vsyncadd [#allocation7], 4294965248  ;;  %v62_v0 = vld [vmem:[#allocation6] sm:$0xff]  ;;  %v63_v1 = vld [vmem:[#allocation6 + $0x8] sm:$0xff]  ;;  %s410_s1 = smov [#allocation8]  }
  0x27   :  { %v64_v2 = vld [vmem:[#allocation6 + $0x10] sm:$0xff]  ;;  %v281_v3 = vpack.c.bf16 %v63_v1, %v62_v0  ;;  %v65_v4 = vld [vmem:[#allocation6 + $0x18] sm:$0xff]  ;;  %v66_v6 = vld [vmem:[#allocation6 + $0x20] sm:$0xff]  ;;  %s205_s6 = sshll.u32 %s410_s1, 4  ;;  %s206_s6 = int_to_ptr.vmem [resolvable:$true] %s205_s6 }
  0x28   :  { %v285_v5 = vpack.c.bf16 %v65_v4, %v64_v2  ;;  %v67_v7 = vld [vmem:[#allocation6 + $0x28] sm:$0xff]  ;;  %v58_v9 = vld [vmem:[#allocation3 + $0x10] sm:$0xff]  ;;  %v68_v10 = vld [vmem:[#allocation6 + $0x30] sm:$0xff]  ;;  %s378_s7 = scalar_lea.vmem %s206_s6, 768  ;;  %p383_p3 = scmp.lt.s32.totalorder %s206_s6, %s206_s6 }
  0x29   :  { %313 = vmatprep.subr.bf16.mxu1 %v281_v3  ;;  %282 = vmatprep.subr.bf16.mxu0 %v281_v3  ;;  %v289_v8 = vpack.c.bf16 %v67_v7, %v66_v6  ;;  %v69_v11 = vld [vmem:[#allocation6 + $0x38] sm:$0xff]  ;;  %v56_v12 = vld [vmem:[#allocation3] sm:$0xff]  ;;  %v70_v14 = vld [vmem:[#allocation6 + $0x40] sm:$0xff]  ;;  %p379_p2 = scmp.ne.s32.totalorder %s206_s6, %s378_s7  ;;  %p384_p4 = scmp.lt.s32.totalorder %s378_s7, %s378_s7 }
  0x2a   :  { %321 = vmatpush3.bf16.msra.mxu1 %v281_v3  ;;  %284 = vmatpush3.bf16.msra.mxu0 %v281_v3  ;;  %v293_v13 = vpack.c.bf16 %v69_v11, %v68_v10  ;;  %v71_v15 = vld [vmem:[#allocation6 + $0x48] sm:$0xff]  ;;  %v72_v17 = vld [vmem:[#allocation6 + $0x50] sm:$0xff]  ;;  %v73_v18 = vld [vmem:[#allocation6 + $0x58] sm:$0xff] }
  0x2b   :  { %314 = vmatprep.subr.bf16.mxu1 %v285_v5  ;;  %286 = vmatprep.subr.bf16.mxu0 %v285_v5  ;;  %v297_v16 = vpack.c.bf16 %v71_v15, %v70_v14  ;;  %v301_v19 = vpack.c.bf16 %v73_v18, %v72_v17  ;;  %v74_v20 = vld [vmem:[#allocation6 + $0x60] sm:$0xff]  ;;  %v75_v21 = vld [vmem:[#allocation6 + $0x68] sm:$0xff]  ;;  %v76_v23 = vld [vmem:[#allocation6 + $0x70] sm:$0xff]  ;;  %p385_p5 = por %p384_p4, %p383_p3 }
  0x2c   :  { %275 = vmatprep.mubr.f32.mxu1 %v58_v9  ;;  %272 = vmatprep.mubr.f32.mxu0 %v56_v12  ;;  %v305_v22 = vpack.c.bf16 %v75_v21, %v74_v20  ;;  %v77_v24 = vld [vmem:[#allocation6 + $0x78] sm:$0xff]  ;;  %v59_v26 = vld [vmem:[#allocation3 + $0x18] sm:$0xff]  ;;  %v60_v28 = vld [vmem:[#allocation3 + $0x20] sm:$0xff] }
  0x2d   :  { %v309_v25 = vpack.c.bf16 %v77_v24, %v76_v23  ;;  %v57_v27 = vld [vmem:[#allocation3 + $0x8] sm:$0xff]  ;;  %p386_p6 = pnand %p385_p5, %p379_p2 }
  0x2e   :  { %322 = vmatpush3.bf16.msra.mxu1 %v285_v5  ;;  %288 = vmatpush3.bf16.msra.mxu0 %v285_v5  ;;  %v61_v29 = vld [vmem:[#allocation3 + $0x28] sm:$0xff] }
  0x2f   :  { %315 = vmatprep.subr.bf16.mxu1 %v289_v8  ;;  %290 = vmatprep.subr.bf16.mxu0 %v289_v8 }
  0x32   :  { %323 = vmatpush3.bf16.msra.mxu1 %v289_v8  ;;  %292 = vmatpush3.bf16.msra.mxu0 %v289_v8 }
  0x33   :  { %316 = vmatprep.subr.bf16.mxu1 %v293_v13  ;;  %294 = vmatprep.subr.bf16.mxu0 %v293_v13 }
  0x36   :  { %324 = vmatpush3.bf16.msra.mxu1 %v293_v13  ;;  %296 = vmatpush3.bf16.msra.mxu0 %v293_v13 }
  0x37   :  { %317 = vmatprep.subr.bf16.mxu1 %v297_v16  ;;  %298 = vmatprep.subr.bf16.mxu0 %v297_v16 }
  0x3a   :  { %325 = vmatpush3.bf16.msra.mxu1 %v297_v16  ;;  %300 = vmatpush3.bf16.msra.mxu0 %v297_v16 }
  0x3b   :  { %318 = vmatprep.subr.bf16.mxu1 %v301_v19  ;;  %302 = vmatprep.subr.bf16.mxu0 %v301_v19 }
  0x3e   :  { %326 = vmatpush3.bf16.msra.mxu1 %v301_v19  ;;  %304 = vmatpush3.bf16.msra.mxu0 %v301_v19 }
  0x3f   :  { %319 = vmatprep.subr.bf16.mxu1 %v305_v22  ;;  %306 = vmatprep.subr.bf16.mxu0 %v305_v22 }
  0x42   :  { %327 = vmatpush3.bf16.msra.mxu1 %v305_v22  ;;  %308 = vmatpush3.bf16.msra.mxu0 %v305_v22 }
  0x43   :  { %320 = vmatprep.subr.bf16.mxu1 %v309_v25  ;;  %310 = vmatprep.subr.bf16.mxu0 %v309_v25 }
  0x46   :  { %328 = vmatpush3.bf16.msra.mxu1 %v309_v25  ;;  %312 = vmatpush3.bf16.msra.mxu0 %v309_v25 }
  0x49   :  { %276 = vmatmul.mubr.f32.vlgmr.msra.gmra.mrb[0].mxu1 %v59_v26  ;;  %273 = vmatmul.mubr.f32.vlgmr.msra.gmra.mrb[0].mxu0 %v57_v27 }
  0x4a   :  { %278 = vmatprep.mubr.f32.mxu1 %v60_v28 }
  0x4d   :  { %279 = vmatmul.mubr.f32.gmra.mrb[2].mxu1 %v61_v29 }
 0x11c   :  { %v277_v30 = vpop.f32.mrb[0].mxu1  ;;  %v274_v31 = vpop.f32.mrb[0].mxu0 }
 0x11d   :  { %197 = vst [vmem:[#allocation8 + $0x18] sm:$0xff] %v277_v30  ;;  %v154_v32 = vpop.f32.mrb[1].mxu1  ;;  %195 = vst [vmem:[#allocation8 + $0x8] sm:$0xff] %v274_v31  ;;  %v144_v33 = vpop.f32.mrb[1].mxu0 }
 0x11e   :  { %196 = vst [vmem:[#allocation8 + $0x10] sm:$0xff] %v154_v32  ;;  %194 = vst [vmem:[#allocation8] sm:$0xff] %v144_v33 }
 0x120   :  { %v280_v34 = vpop.f32.mrb[2].mxu1 }
 0x121   :  { %199 = vst [vmem:[#allocation8 + $0x28] sm:$0xff] %v280_v34  ;;  %v164_v35 = vpop.f32.mrb[3].mxu1 }
 0x122   :  { %198 = vst [vmem:[#allocation8 + $0x20] sm:$0xff] %v164_v35 }
 0x123   :  { %389 = shalt.err (!%p386_p6)
}
 0x124   :  { %s390_s10 = scalar_lea.hbm %s473_s2, 768 }
 0x125   :  { %p391_p7 = scmp.ne.s32.totalorder %s473_s2, %s390_s10  ;;  %p394_p8 = scmp.lt.u32.totalorder %s390_s10, %s473_s2 }
 0x127   :  { %p396_p9 = pnand %p394_p8, %p391_p7 }
 0x129   :  { %399 = shalt.err (!%p396_p9)
}
 0x12a   :  { %211 = dma.vmem_to_hbm [thread:$0]  %s206_s6, 768, %s473_s2, [#allocation5], %s407_s19, %s407_s19, %s408_s20  }
 0x12b   :  { %404 = dma.done.wait [#allocation5], 768  }
 0x12c   :  { %405 = vsyncadd [#allocation5], 4294966528 }
 0x12d   :  { %215 = vsyncpa [#allocation4], 1 }
 0x12e   :  { %216 = vsyncpa [#allocation7], 1 }
 0x12f   :  { %217 = vsyncpa [#allocation5], 1 }

// kernel: transform_net_forward.12
= control target key start
LH: loop header
LB: loop body
LE: loop exit
PB: predicated region body
PF: predicated region fallthrough
CT: control target
= control target key end

     0   :  { %8 = vsyncpa [#allocation4], 0  ;;  %s722_s0 = inlined_call_operand.hbm [shape: bf16[128,128], index: 0, kind: input, shape index: {}]   ;;  %s723_s1 = inlined_call_operand.hbm [shape: bf16[128,128], index: 1, kind: input, shape index: {}]   ;;  %s724_s2 = inlined_call_operand.hbm [shape: f32[1,128], index: 2, kind: input, shape index: {}]   ;;  %s725_s3 = inlined_call_operand.hbm [shape: f32[128,128], index: 3, kind: output, shape index: {}]  }
   0x1   :  { %9 = vsyncpa [#allocation7], 0 }
   0x2   :  { %10 = vsyncpa [#allocation5], 0  ;;  %s639_s12 = smov [#allocation6]   ;;  %s640_s14 = smov [#allocation3]  }
   0x3   :  { %s28_s13 = sshll.u32 %s639_s12, 4  ;;  %s16_s15 = sshll.u32 %s640_s14, 4  ;;  %s29_s13 = int_to_ptr.vmem [resolvable:$true] %s28_s13  ;;  %s667_s15 = int_to_ptr.vmem [resolvable:$true] %s16_s15 }
   0x4   :  { %s545_s18 = scalar_lea.hbm %s723_s1, 1024 }
   0x5   :  { %p546_p0 = scmp.ne.s32.totalorder %s723_s1, %s545_s18  ;;  %p549_p1 = scmp.lt.u32.totalorder %s545_s18, %s723_s1 }
   0x7   :  { %p551_p2 = pnand %p549_p1, %p546_p0 }
   0x9   :  { %554 = shalt.err (!%p551_p2)
}
   0xa   :  { %s555_s23 = scalar_lea.vmem %s29_s13, 1024  ;;  %p560_p4 = scmp.lt.s32.totalorder %s29_s13, %s29_s13 }
   0xb   :  { %p556_p3 = scmp.ne.s32.totalorder %s29_s13, %s555_s23  ;;  %p561_p5 = scmp.lt.s32.totalorder %s555_s23, %s555_s23 }
   0xd   :  { %p562_p6 = por %p561_p5, %p560_p4 }
   0xf   :  { %p563_p7 = pnand %p562_p6, %p556_p3 }
  0x11   :  { %566 = shalt.err (!%p563_p7)
}
  0x12   :  { %s641_s24 = smov 64   ;;  %s642_s25 = smov 4  }
  0x13   :  { %34 = dma.hbm_to_vmem [thread:$0]  %s723_s1, 1024, %s29_s13, [#allocation7], %s641_s24, %s641_s24, %s642_s25  }
  0x14   :  { %s567_s30 = scalar_lea.hbm %s722_s0, 1024 }
  0x15   :  { %p568_p8 = scmp.ne.s32.totalorder %s722_s0, %s567_s30  ;;  %p571_p9 = scmp.lt.u32.totalorder %s567_s30, %s722_s0 }
  0x17   :  { %p573_p10 = pnand %p571_p9, %p568_p8 }
  0x19   :  { %576 = shalt.err (!%p573_p10)
}
  0x1a   :  { %s577_s8 = scalar_lea.vmem %s667_s15, 1024  ;;  %p582_p12 = scmp.lt.s32.totalorder %s667_s15, %s667_s15 }
  0x1b   :  { %p578_p11 = scmp.ne.s32.totalorder %s667_s15, %s577_s8  ;;  %p583_p13 = scmp.lt.s32.totalorder %s577_s8, %s577_s8 }
  0x1d   :  { %p584_p0 = por %p583_p13, %p582_p12 }
  0x1f   :  { %p585_p1 = pnand %p584_p0, %p578_p11 }
  0x21   :  { %588 = shalt.err (!%p585_p1)
}
  0x22   :  { %22 = dma.hbm_to_vmem [thread:$0]  %s722_s0, 1024, %s667_s15, [#allocation4], %s641_s24, %s641_s24, %s642_s25  }
  0x23   :  { %s643_s10 = smov [#allocation8]   ;;  %s589_s14 = scalar_lea.hbm %s724_s2, 16 }
  0x24   :  { %s41_s11 = sshll.u32 %s643_s10, 4  ;;  %p590_p2 = scmp.ne.s32.totalorder %s724_s2, %s589_s14  ;;  %s42_s11 = int_to_ptr.vmem [resolvable:$true] %s41_s11 }
  0x25   :  { %p593_p3 = scmp.lt.u32.totalorder %s589_s14, %s724_s2 }
  0x27   :  { %p595_p4 = pnand %p593_p3, %p590_p2 }
  0x29   :  { %598 = shalt.err (!%p595_p4)
}
  0x2a   :  { %s599_s20 = scalar_lea.vmem %s42_s11, 16  ;;  %s603_s0 = scalar_lea.vmem %s42_s11, 32 }
  0x2b   :  { %p600_p5 = scmp.ne.s32.totalorder %s42_s11, %s599_s20  ;;  %p604_p6 = scmp.lt.s32.totalorder %s42_s11, %s42_s11 }
  0x2c   :  { %p605_p7 = scmp.lt.s32.totalorder %s603_s0, %s599_s20 }
  0x2e   :  { %p606_p8 = por %p605_p7, %p604_p6 }
  0x30   :  { %p607_p9 = pnand %p606_p8, %p600_p5 }
  0x32   :  { %610 = shalt.err (!%p607_p9)
}
  0x33   :  { %44 = dma.hbm_to_vmem [thread:$0]  %s724_s2, 16, %s42_s11, [#allocation7]  }
  0x34   :  { %633 = dma.done.wait [#allocation4], 1024  }
  0x35   :  { %634 = vsyncadd [#allocation4], 4294966272 }
  0x36   :  { %635 = dma.done.wait [#allocation7], 1040  }
  0x37   :  { %636 = vsyncadd [#allocation7], 4294966256  ;;  %v529_v0 = vld [vmem:[#allocation6] sm:$0xff]   ;;  %v530_v1 = vld [vmem:[#allocation6 + $0x8] sm:$0xff]   ;;  %s644_s2 = smov [#allocation9]  }
  0x38   :  { %473 = vmatprep.subr.bf16.mxu0 %v529_v0  ;;  %505 = vmatprep.subr.bf16.mxu1 %v529_v0  ;;  %v531_v2 = vld [vmem:[#allocation6 + $0x10] sm:$0xff]   ;;  %v532_v3 = vld [vmem:[#allocation6 + $0x18] sm:$0xff]   ;;  %v537_v4 = vld [vmem:[#allocation3] sm:$0xff]   ;;  %s427_s22 = sshll.u32 %s644_s2, 4  ;;  %s428_s22 = int_to_ptr.vmem [resolvable:$true] %s427_s22 }
  0x39   :  { %474 = vmatpush3.bf16.msra.mxu0 %v529_v0  ;;  %513 = vmatpush3.bf16.msra.mxu1 %v529_v0  ;;  %v538_v5 = vld [vmem:[#allocation3 + $0x20] sm:$0xff]   ;;  %v534_v7 = vld [vmem:[#allocation6 + $0x28] sm:$0xff]   ;;  %v535_v8 = vld [vmem:[#allocation6 + $0x30] sm:$0xff]   ;;  %s611_s23 = scalar_lea.vmem %s428_s22, 2048  ;;  %p616_p11 = scmp.lt.s32.totalorder %s428_s22, %s428_s22 }
  0x3a   :  { %475 = vmatprep.subr.bf16.mxu0 %v530_v1  ;;  %506 = vmatprep.subr.bf16.mxu1 %v530_v1  ;;  %v533_v6 = vld [vmem:[#allocation6 + $0x20] sm:$0xff]   ;;  %v536_v9 = vld [vmem:[#allocation6 + $0x38] sm:$0xff]   ;;  %v539_v10 = vld [vmem:[#allocation3 + $0x8] sm:$0xff]   ;;  %p612_p10 = scmp.ne.s32.totalorder %s428_s22, %s611_s23  ;;  %p617_p12 = scmp.lt.s32.totalorder %s611_s23, %s611_s23 }
  0x3b   :  { %489 = vmatprep.mubr.bf16.mxu0 %v537_v4  ;;  %497 = vmatprep.mubr.bf16.mxu1 %v538_v5  ;;  %v540_v11 = vld [vmem:[#allocation3 + $0x28] sm:$0xff]   ;;  %v541_v12 = vld [vmem:[#allocation3 + $0x10] sm:$0xff]   ;;  %v543_v14 = vld [vmem:[#allocation3 + $0x18] sm:$0xff]  }
  0x3c   :  { %v542_v13 = vld [vmem:[#allocation3 + $0x30] sm:$0xff]   ;;  %v544_v15 = vld [vmem:[#allocation3 + $0x38] sm:$0xff]   ;;  %v456_v16 = vld [vmem:[#allocation8] ss:$0 sm:$0xff]  ;;  %p618_p13 = por %p617_p12, %p616_p11 }
  0x3d   :  { %476 = vmatpush3.bf16.msra.mxu0 %v530_v1  ;;  %514 = vmatpush3.bf16.msra.mxu1 %v530_v1 }
  0x3e   :  { %477 = vmatprep.subr.bf16.mxu0 %v531_v2  ;;  %507 = vmatprep.subr.bf16.mxu1 %v531_v2  ;;  %p619_p0 = pnand %p618_p13, %p612_p10 }
  0x41   :  { %478 = vmatpush3.bf16.msra.mxu0 %v531_v2  ;;  %515 = vmatpush3.bf16.msra.mxu1 %v531_v2 }
  0x42   :  { %479 = vmatprep.subr.bf16.mxu0 %v532_v3  ;;  %508 = vmatprep.subr.bf16.mxu1 %v532_v3 }
  0x45   :  { %480 = vmatpush3.bf16.msra.mxu0 %v532_v3  ;;  %516 = vmatpush3.bf16.msra.mxu1 %v532_v3 }
  0x46   :  { %481 = vmatprep.subr.bf16.mxu0 %v533_v6  ;;  %509 = vmatprep.subr.bf16.mxu1 %v533_v6 }
  0x49   :  { %482 = vmatpush3.bf16.msra.mxu0 %v533_v6  ;;  %517 = vmatpush3.bf16.msra.mxu1 %v533_v6 }
  0x4a   :  { %483 = vmatprep.subr.bf16.mxu0 %v534_v7  ;;  %510 = vmatprep.subr.bf16.mxu1 %v534_v7 }
  0x4d   :  { %484 = vmatpush3.bf16.msra.mxu0 %v534_v7  ;;  %518 = vmatpush3.bf16.msra.mxu1 %v534_v7 }
  0x4e   :  { %485 = vmatprep.subr.bf16.mxu0 %v535_v8  ;;  %511 = vmatprep.subr.bf16.mxu1 %v535_v8 }
  0x51   :  { %486 = vmatpush3.bf16.msra.mxu0 %v535_v8  ;;  %519 = vmatpush3.bf16.msra.mxu1 %v535_v8 }
  0x52   :  { %487 = vmatprep.subr.bf16.mxu0 %v536_v9  ;;  %512 = vmatprep.subr.bf16.mxu1 %v536_v9 }
  0x55   :  { %488 = vmatpush3.bf16.msra.mxu0 %v536_v9  ;;  %520 = vmatpush3.bf16.msra.mxu1 %v536_v9 }
  0x58   :  { %490 = vmatmul.mubr.bf16.vlgmr.msra.gmra.mrb[0].mxu0 %v539_v10  ;;  %498 = vmatmul.mubr.bf16.vlgmr.msra.gmra.mrb[0].mxu1 %v540_v11 }
  0x59   :  { %493 = vmatprep.mubr.bf16.mxu0 %v541_v12  ;;  %501 = vmatprep.mubr.bf16.mxu1 %v542_v13 }
  0x60   :  { %494 = vmatmul.mubr.bf16.gmra.mrb[4].mxu0 %v543_v14  ;;  %502 = vmatmul.mubr.bf16.gmra.mrb[4].mxu1 %v544_v15 }
 0x12b   :  { %v491_v17 = vpop.f32.mrb[0].mxu0  ;;  %v499_v18 = vpop.f32.mrb[0].mxu1 }
 0x12c   :  { %v376_v19 = vadd.f32 %v491_v17, %v456_v16  ;;  %v384_v20 = vadd.f32 %v499_v18, %v456_v16  ;;  %v253_v21 = vpop.f32.mrb[1].mxu0  ;;  %v285_v22 = vpop.f32.mrb[1].mxu1 }
 0x12d   :  { %v374_v23 = vadd.f32 %v456_v16, %v253_v21  ;;  %v382_v24 = vadd.f32 %v456_v16, %v285_v22  ;;  %v492_v25 = vpop.f32.mrb[2].mxu0  ;;  %v500_v26 = vpop.f32.mrb[2].mxu1 }
 0x12e   :  { %v392_v27 = vmax.f32 %v376_v19, 0.0  ;;  %v400_v28 = vmax.f32 %v384_v20, 0.0  ;;  %v377_v29 = vadd.f32 %v492_v25, %v456_v16  ;;  %v385_v30 = vadd.f32 %v500_v26, %v456_v16  ;;  %v256_v31 = vpop.f32.mrb[3].mxu0  ;;  %v288_v32 = vpop.f32.mrb[3].mxu1 }
 0x12f   :  { %v390_v33 = vmax.f32 %v374_v23, 0.0  ;;  %v398_v34 = vmax.f32 %v382_v24, 0.0  ;;  %v375_v35 = vadd.f32 %v456_v16, %v256_v31  ;;  %v383_v36 = vadd.f32 %v456_v16, %v288_v32 }
 0x130   :  { %408 = vst [vmem:[#allocation9 + $0x10] sm:$0xff] %v392_v27  ;;  %416 = vst [vmem:[#allocation9 + $0x50] sm:$0xff] %v400_v28  ;;  %v393_v37 = vmax.f32 %v377_v29, 0.0  ;;  %v401_v38 = vmax.f32 %v385_v30, 0.0 }
 0x131   :  { %406 = vst [vmem:[#allocation9] sm:$0xff] %v390_v33  ;;  %414 = vst [vmem:[#allocation9 + $0x40] sm:$0xff] %v398_v34  ;;  %v391_v39 = vmax.f32 %v375_v35, 0.0  ;;  %v399_v40 = vmax.f32 %v383_v36, 0.0 }
 0x132   :  { %409 = vst [vmem:[#allocation9 + $0x18] sm:$0xff] %v393_v37  ;;  %417 = vst [vmem:[#allocation9 + $0x58] sm:$0xff] %v401_v38 }
 0x133   :  { %407 = vst [vmem:[#allocation9 + $0x8] sm:$0xff] %v391_v39  ;;  %415 = vst [vmem:[#allocation9 + $0x48] sm:$0xff] %v399_v40  ;;  %v495_v41 = vpop.f32.mrb[4].mxu0  ;;  %v503_v42 = vpop.f32.mrb[4].mxu1 }
 0x134   :  { %v380_v43 = vadd.f32 %v495_v41, %v456_v16  ;;  %v388_v44 = vadd.f32 %v503_v42, %v456_v16  ;;  %v269_v45 = vpop.f32.mrb[5].mxu0  ;;  %v301_v46 = vpop.f32.mrb[5].mxu1 }
 0x135   :  { %v378_v47 = vadd.f32 %v456_v16, %v269_v45  ;;  %v386_v48 = vadd.f32 %v456_v16, %v301_v46  ;;  %v496_v49 = vpop.f32.mrb[6].mxu0  ;;  %v504_v50 = vpop.f32.mrb[6].mxu1 }
 0x136   :  { %v396_v51 = vmax.f32 %v380_v43, 0.0  ;;  %v404_v52 = vmax.f32 %v388_v44, 0.0  ;;  %v381_v53 = vadd.f32 %v496_v49, %v456_v16  ;;  %v389_v54 = vadd.f32 %v504_v50, %v456_v16  ;;  %v272_v55 = vpop.f32.mrb[7].mxu0  ;;  %v304_v56 = vpop.f32.mrb[7].mxu1 }
 0x137   :  { %v394_v57 = vmax.f32 %v378_v47, 0.0  ;;  %v402_v58 = vmax.f32 %v386_v48, 0.0  ;;  %v379_v59 = vadd.f32 %v456_v16, %v272_v55  ;;  %v387_v60 = vadd.f32 %v456_v16, %v304_v56 }
 0x138   :  { %412 = vst [vmem:[#allocation9 + $0x30] sm:$0xff] %v396_v51  ;;  %420 = vst [vmem:[#allocation9 + $0x70] sm:$0xff] %v404_v52  ;;  %v397_v61 = vmax.f32 %v381_v53, 0.0  ;;  %v405_v62 = vmax.f32 %v389_v54, 0.0 }
 0x139   :  { %410 = vst [vmem:[#allocation9 + $0x20] sm:$0xff] %v394_v57  ;;  %418 = vst [vmem:[#allocation9 + $0x60] sm:$0xff] %v402_v58  ;;  %v395_v63 = vmax.f32 %v379_v59, 0.0  ;;  %v403_v0 = vmax.f32 %v387_v60, 0.0 }
 0x13a   :  { %413 = vst [vmem:[#allocation9 + $0x38] sm:$0xff] %v397_v61  ;;  %421 = vst [vmem:[#allocation9 + $0x78] sm:$0xff] %v405_v62 }
 0x13b   :  { %411 = vst [vmem:[#allocation9 + $0x28] sm:$0xff] %v395_v63  ;;  %419 = vst [vmem:[#allocation9 + $0x68] sm:$0xff] %v403_v0 }
 0x13c   :  { %622 = shalt.err (!%p619_p0)
}
 0x13d   :  { %s623_s26 = scalar_lea.hbm %s725_s3, 2048 }
 0x13e   :  { %p624_p1 = scmp.ne.s32.totalorder %s725_s3, %s623_s26  ;;  %p627_p2 = scmp.lt.u32.totalorder %s623_s26, %s725_s3 }
 0x140   :  { %p629_p3 = pnand %p627_p2, %p624_p1 }
 0x142   :  { %632 = shalt.err (!%p629_p3)
}
 0x143   :  { %s645_s4 = smov 128   ;;  %s646_s5 = smov 8  }
 0x144   :  { %433 = dma.vmem_to_hbm [thread:$0]  %s428_s22, 2048, %s725_s3, [#allocation5], %s645_s4, %s645_s4, %s646_s5  }
 0x145   :  { %637 = dma.done.wait [#allocation5], 2048  }
 0x146   :  { %638 = vsyncadd [#allocation5], 4294965248 }
 0x147   :  { %437 = vsyncpa [#allocation4], 1 }
 0x148   :  { %438 = vsyncpa [#allocation7], 1 }
 0x149   :  { %439 = vsyncpa [#allocation5], 1 }

// kernel: transform_net_forward.14
= control target key start
LH: loop header
LB: loop body
LE: loop exit
PB: predicated region body
PF: predicated region fallthrough
CT: control target
= control target key end

     0   :  { %7 = vsyncpa [#allocation4], 0  ;;  %s500_s0 = inlined_call_operand.hbm [shape: f32[64,128], index: 0, kind: input, shape index: {}]   ;;  %s501_s1 = inlined_call_operand.hbm [shape: f32[128,128], index: 1, kind: input, shape index: {}]   ;;  %s502_s2 = inlined_call_operand.hbm [shape: f32[64,128], index: 2, kind: output, shape index: {}]  }
   0x1   :  { %8 = vsyncpa [#allocation7], 0 }
   0x2   :  { %9 = vsyncpa [#allocation5], 0  ;;  %s435_s9 = smov [#allocation3]   ;;  %s363_s13 = scalar_lea.hbm %s500_s0, 1024 }
   0x3   :  { %s15_s10 = sshll.u32 %s435_s9, 4  ;;  %p364_p0 = scmp.ne.s32.totalorder %s500_s0, %s363_s13  ;;  %s16_s10 = int_to_ptr.vmem [resolvable:$true] %s15_s10 }
   0x4   :  { %p367_p1 = scmp.lt.u32.totalorder %s363_s13, %s500_s0 }
   0x6   :  { %p369_p2 = pnand %p367_p1, %p364_p0 }
   0x8   :  { %372 = shalt.err (!%p369_p2)
}
   0x9   :  { %s373_s18 = scalar_lea.vmem %s16_s10, 1024  ;;  %p378_p4 = scmp.lt.s32.totalorder %s16_s10, %s16_s10 }
   0xa   :  { %p374_p3 = scmp.ne.s32.totalorder %s16_s10, %s373_s18  ;;  %p379_p5 = scmp.lt.s32.totalorder %s373_s18, %s373_s18 }
   0xc   :  { %p380_p6 = por %p379_p5, %p378_p4 }
   0xe   :  { %p381_p7 = pnand %p380_p6, %p374_p3 }
  0x10   :  { %384 = shalt.err (!%p381_p7)
}
  0x11   :  { %s436_s19 = smov 128   ;;  %s437_s20 = smov 8  }
  0x12   :  { %21 = dma.hbm_to_vmem [thread:$0]  %s500_s0, 1024, %s16_s10, [#allocation4], %s436_s19, %s436_s19, %s437_s20  }
  0x13   :  { %s438_s23 = smov [#allocation6]   ;;  %s385_s27 = scalar_lea.hbm %s501_s1, 2048 }
  0x14   :  { %s27_s24 = sshll.u32 %s438_s23, 4  ;;  %p386_p8 = scmp.ne.s32.totalorder %s501_s1, %s385_s27  ;;  %s28_s24 = int_to_ptr.vmem [resolvable:$true] %s27_s24 }
  0x15   :  { %p389_p9 = scmp.lt.u32.totalorder %s385_s27, %s501_s1 }
  0x17   :  { %p391_p10 = pnand %p389_p9, %p386_p8 }
  0x19   :  { %394 = shalt.err (!%p391_p10)
}
  0x1a   :  { %s395_s4 = scalar_lea.vmem %s28_s24, 2048  ;;  %p400_p12 = scmp.lt.s32.totalorder %s28_s24, %s28_s24 }
  0x1b   :  { %p396_p11 = scmp.ne.s32.totalorder %s28_s24, %s395_s4  ;;  %p401_p13 = scmp.lt.s32.totalorder %s395_s4, %s395_s4 }
  0x1d   :  { %p402_p0 = por %p401_p13, %p400_p12 }
  0x1f   :  { %p403_p1 = pnand %p402_p0, %p396_p11 }
  0x21   :  { %406 = shalt.err (!%p403_p1)
}
  0x22   :  { %33 = dma.hbm_to_vmem [thread:$0]  %s501_s1, 2048, %s28_s24, [#allocation7], %s436_s19, %s436_s19, %s437_s20  }
  0x23   :  { %429 = dma.done.wait [#allocation4], 1024  }
  0x24   :  { %430 = vsyncadd [#allocation4], 4294966272 }
  0x25   :  { %431 = dma.done.wait [#allocation7], 2048  }
  0x26   :  { %432 = vsyncadd [#allocation7], 4294965248  ;;  %v68_v0 = vld [vmem:[#allocation6] sm:$0xff]  ;;  %v69_v1 = vld [vmem:[#allocation6 + $0x8] sm:$0xff]  ;;  %s439_s1 = smov [#allocation8]  }
  0x27   :  { %v70_v2 = vld [vmem:[#allocation6 + $0x10] sm:$0xff]  ;;  %v310_v3 = vpack.c.bf16 %v69_v1, %v68_v0  ;;  %v71_v4 = vld [vmem:[#allocation6 + $0x18] sm:$0xff]  ;;  %v72_v6 = vld [vmem:[#allocation6 + $0x20] sm:$0xff]  ;;  %s229_s6 = sshll.u32 %s439_s1, 4  ;;  %s230_s6 = int_to_ptr.vmem [resolvable:$true] %s229_s6 }
  0x28   :  { %v314_v5 = vpack.c.bf16 %v71_v4, %v70_v2  ;;  %v73_v7 = vld [vmem:[#allocation6 + $0x28] sm:$0xff]  ;;  %v60_v9 = vld [vmem:[#allocation3] sm:$0xff]  ;;  %v74_v11 = vld [vmem:[#allocation6 + $0x30] sm:$0xff]  ;;  %s407_s7 = scalar_lea.vmem %s230_s6, 1024  ;;  %p412_p3 = scmp.lt.s32.totalorder %s230_s6, %s230_s6 }
  0x29   :  { %311 = vmatprep.subr.bf16.mxu0 %v310_v3  ;;  %342 = vmatprep.subr.bf16.mxu1 %v310_v3  ;;  %v318_v8 = vpack.c.bf16 %v73_v7, %v72_v6  ;;  %v64_v10 = vld [vmem:[#allocation3 + $0x20] sm:$0xff]  ;;  %v75_v12 = vld [vmem:[#allocation6 + $0x38] sm:$0xff]  ;;  %v77_v15 = vld [vmem:[#allocation6 + $0x48] sm:$0xff]  ;;  %p408_p2 = scmp.ne.s32.totalorder %s230_s6, %s407_s7  ;;  %p413_p4 = scmp.lt.s32.totalorder %s407_s7, %s407_s7 }
  0x2a   :  { %313 = vmatpush3.bf16.msra.mxu0 %v310_v3  ;;  %350 = vmatpush3.bf16.msra.mxu1 %v310_v3  ;;  %v322_v13 = vpack.c.bf16 %v75_v12, %v74_v11  ;;  %v76_v14 = vld [vmem:[#allocation6 + $0x40] sm:$0xff]  ;;  %v78_v17 = vld [vmem:[#allocation6 + $0x50] sm:$0xff]  ;;  %v79_v18 = vld [vmem:[#allocation6 + $0x58] sm:$0xff] }
  0x2b   :  { %315 = vmatprep.subr.bf16.mxu0 %v314_v5  ;;  %343 = vmatprep.subr.bf16.mxu1 %v314_v5  ;;  %v326_v16 = vpack.c.bf16 %v77_v15, %v76_v14  ;;  %v330_v19 = vpack.c.bf16 %v79_v18, %v78_v17  ;;  %v80_v20 = vld [vmem:[#allocation6 + $0x60] sm:$0xff]  ;;  %v81_v21 = vld [vmem:[#allocation6 + $0x68] sm:$0xff]  ;;  %v82_v23 = vld [vmem:[#allocation6 + $0x70] sm:$0xff]  ;;  %p414_p5 = por %p413_p4, %p412_p3 }
  0x2c   :  { %298 = vmatprep.mubr.f32.mxu0 %v60_v9  ;;  %304 = vmatprep.mubr.f32.mxu1 %v64_v10  ;;  %v334_v22 = vpack.c.bf16 %v81_v21, %v80_v20  ;;  %v83_v24 = vld [vmem:[#allocation6 + $0x78] sm:$0xff]  ;;  %v61_v26 = vld [vmem:[#allocation3 + $0x8] sm:$0xff]  ;;  %v62_v28 = vld [vmem:[#allocation3 + $0x10] sm:$0xff] }
  0x2d   :  { %v338_v25 = vpack.c.bf16 %v83_v24, %v82_v23  ;;  %v65_v27 = vld [vmem:[#allocation3 + $0x28] sm:$0xff]  ;;  %v66_v29 = vld [vmem:[#allocation3 + $0x30] sm:$0xff]  ;;  %v63_v30 = vld [vmem:[#allocation3 + $0x18] sm:$0xff]  ;;  %p415_p6 = pnand %p414_p5, %p408_p2 }
  0x2e   :  { %317 = vmatpush3.bf16.msra.mxu0 %v314_v5  ;;  %351 = vmatpush3.bf16.msra.mxu1 %v314_v5  ;;  %v67_v31 = vld [vmem:[#allocation3 + $0x38] sm:$0xff] }
  0x2f   :  { %319 = vmatprep.subr.bf16.mxu0 %v318_v8  ;;  %344 = vmatprep.subr.bf16.mxu1 %v318_v8 }
  0x32   :  { %321 = vmatpush3.bf16.msra.mxu0 %v318_v8  ;;  %352 = vmatpush3.bf16.msra.mxu1 %v318_v8 }
  0x33   :  { %323 = vmatprep.subr.bf16.mxu0 %v322_v13  ;;  %345 = vmatprep.subr.bf16.mxu1 %v322_v13 }
  0x36   :  { %325 = vmatpush3.bf16.msra.mxu0 %v322_v13  ;;  %353 = vmatpush3.bf16.msra.mxu1 %v322_v13 }
  0x37   :  { %327 = vmatprep.subr.bf16.mxu0 %v326_v16  ;;  %346 = vmatprep.subr.bf16.mxu1 %v326_v16 }
  0x3a   :  { %329 = vmatpush3.bf16.msra.mxu0 %v326_v16  ;;  %354 = vmatpush3.bf16.msra.mxu1 %v326_v16 }
  0x3b   :  { %331 = vmatprep.subr.bf16.mxu0 %v330_v19  ;;  %347 = vmatprep.subr.bf16.mxu1 %v330_v19 }
  0x3e   :  { %333 = vmatpush3.bf16.msra.mxu0 %v330_v19  ;;  %355 = vmatpush3.bf16.msra.mxu1 %v330_v19 }
  0x3f   :  { %335 = vmatprep.subr.bf16.mxu0 %v334_v22  ;;  %348 = vmatprep.subr.bf16.mxu1 %v334_v22 }
  0x42   :  { %337 = vmatpush3.bf16.msra.mxu0 %v334_v22  ;;  %356 = vmatpush3.bf16.msra.mxu1 %v334_v22 }
  0x43   :  { %339 = vmatprep.subr.bf16.mxu0 %v338_v25  ;;  %349 = vmatprep.subr.bf16.mxu1 %v338_v25 }
  0x46   :  { %341 = vmatpush3.bf16.msra.mxu0 %v338_v25  ;;  %357 = vmatpush3.bf16.msra.mxu1 %v338_v25 }
  0x49   :  { %299 = vmatmul.mubr.f32.vlgmr.msra.gmra.mrb[0].mxu0 %v61_v26  ;;  %305 = vmatmul.mubr.f32.vlgmr.msra.gmra.mrb[0].mxu1 %v65_v27 }
  0x4a   :  { %301 = vmatprep.mubr.f32.mxu0 %v62_v28  ;;  %307 = vmatprep.mubr.f32.mxu1 %v66_v29 }
  0x4d   :  { %302 = vmatmul.mubr.f32.gmra.mrb[2].mxu0 %v63_v30  ;;  %308 = vmatmul.mubr.f32.gmra.mrb[2].mxu1 %v67_v31 }
 0x11c   :  { %v300_v32 = vpop.f32.mrb[0].mxu0  ;;  %v306_v33 = vpop.f32.mrb[0].mxu1 }
 0x11d   :  { %217 = vst [vmem:[#allocation8 + $0x8] sm:$0xff] %v300_v32  ;;  %221 = vst [vmem:[#allocation8 + $0x28] sm:$0xff] %v306_v33  ;;  %v150_v34 = vpop.f32.mrb[1].mxu0  ;;  %v170_v35 = vpop.f32.mrb[1].mxu1 }
 0x11e   :  { %216 = vst [vmem:[#allocation8] sm:$0xff] %v150_v34  ;;  %220 = vst [vmem:[#allocation8 + $0x20] sm:$0xff] %v170_v35 }
 0x120   :  { %v303_v36 = vpop.f32.mrb[2].mxu0  ;;  %v309_v37 = vpop.f32.mrb[2].mxu1 }
 0x121   :  { %219 = vst [vmem:[#allocation8 + $0x18] sm:$0xff] %v303_v36  ;;  %223 = vst [vmem:[#allocation8 + $0x38] sm:$0xff] %v309_v37  ;;  %v160_v38 = vpop.f32.mrb[3].mxu0  ;;  %v180_v39 = vpop.f32.mrb[3].mxu1 }
 0x122   :  { %218 = vst [vmem:[#allocation8 + $0x10] sm:$0xff] %v160_v38  ;;  %222 = vst [vmem:[#allocation8 + $0x30] sm:$0xff] %v180_v39 }
 0x123   :  { %418 = shalt.err (!%p415_p6)
}
 0x124   :  { %s419_s10 = scalar_lea.hbm %s502_s2, 1024 }
 0x125   :  { %p420_p7 = scmp.ne.s32.totalorder %s502_s2, %s419_s10  ;;  %p423_p8 = scmp.lt.u32.totalorder %s419_s10, %s502_s2 }
 0x127   :  { %p425_p9 = pnand %p423_p8, %p420_p7 }
 0x129   :  { %428 = shalt.err (!%p425_p9)
}
 0x12a   :  { %235 = dma.vmem_to_hbm [thread:$0]  %s230_s6, 1024, %s502_s2, [#allocation5], %s436_s19, %s436_s19, %s437_s20  }
 0x12b   :  { %433 = dma.done.wait [#allocation5], 1024  }
 0x12c   :  { %434 = vsyncadd [#allocation5], 4294966272 }
 0x12d   :  { %239 = vsyncpa [#allocation4], 1 }
 0x12e   :  { %240 = vsyncpa [#allocation7], 1 }
 0x12f   :  { %241 = vsyncpa [#allocation5], 1 }

// kernel: transform_net_forward.13
= control target key start
LH: loop header
LB: loop body
LE: loop exit
PB: predicated region body
PF: predicated region fallthrough
CT: control target
= control target key end

     0   :  { %8 = vsyncpa [#allocation4], 0  ;;  %s706_s0 = inlined_call_operand.hbm [shape: bf16[128,128], index: 0, kind: input, shape index: {}]   ;;  %s707_s1 = inlined_call_operand.hbm [shape: bf16[128,128], index: 1, kind: input, shape index: {}]   ;;  %s708_s2 = inlined_call_operand.hbm [shape: f32[1,128], index: 2, kind: input, shape index: {}]   ;;  %s709_s3 = inlined_call_operand.hbm [shape: f32[128,128], index: 3, kind: output, shape index: {}]  }
   0x1   :  { %9 = vsyncpa [#allocation7], 0 }
   0x2   :  { %10 = vsyncpa [#allocation5], 0  ;;  %s623_s12 = smov [#allocation6]   ;;  %s624_s14 = smov [#allocation3]  }
   0x3   :  { %s28_s13 = sshll.u32 %s623_s12, 4  ;;  %s16_s15 = sshll.u32 %s624_s14, 4  ;;  %s29_s13 = int_to_ptr.vmem [resolvable:$true] %s28_s13  ;;  %s651_s15 = int_to_ptr.vmem [resolvable:$true] %s16_s15 }
   0x4   :  { %s529_s18 = scalar_lea.hbm %s707_s1, 1024 }
   0x5   :  { %p530_p0 = scmp.ne.s32.totalorder %s707_s1, %s529_s18  ;;  %p533_p1 = scmp.lt.u32.totalorder %s529_s18, %s707_s1 }
   0x7   :  { %p535_p2 = pnand %p533_p1, %p530_p0 }
   0x9   :  { %538 = shalt.err (!%p535_p2)
}
   0xa   :  { %s539_s23 = scalar_lea.vmem %s29_s13, 1024  ;;  %p544_p4 = scmp.lt.s32.totalorder %s29_s13, %s29_s13 }
   0xb   :  { %p540_p3 = scmp.ne.s32.totalorder %s29_s13, %s539_s23  ;;  %p545_p5 = scmp.lt.s32.totalorder %s539_s23, %s539_s23 }
   0xd   :  { %p546_p6 = por %p545_p5, %p544_p4 }
   0xf   :  { %p547_p7 = pnand %p546_p6, %p540_p3 }
  0x11   :  { %550 = shalt.err (!%p547_p7)
}
  0x12   :  { %s625_s24 = smov 64   ;;  %s626_s25 = smov 4  }
  0x13   :  { %34 = dma.hbm_to_vmem [thread:$0]  %s707_s1, 1024, %s29_s13, [#allocation7], %s625_s24, %s625_s24, %s626_s25  }
  0x14   :  { %s551_s30 = scalar_lea.hbm %s706_s0, 1024 }
  0x15   :  { %p552_p8 = scmp.ne.s32.totalorder %s706_s0, %s551_s30  ;;  %p555_p9 = scmp.lt.u32.totalorder %s551_s30, %s706_s0 }
  0x17   :  { %p557_p10 = pnand %p555_p9, %p552_p8 }
  0x19   :  { %560 = shalt.err (!%p557_p10)
}
  0x1a   :  { %s561_s8 = scalar_lea.vmem %s651_s15, 1024  ;;  %p566_p12 = scmp.lt.s32.totalorder %s651_s15, %s651_s15 }
  0x1b   :  { %p562_p11 = scmp.ne.s32.totalorder %s651_s15, %s561_s8  ;;  %p567_p13 = scmp.lt.s32.totalorder %s561_s8, %s561_s8 }
  0x1d   :  { %p568_p0 = por %p567_p13, %p566_p12 }
  0x1f   :  { %p569_p1 = pnand %p568_p0, %p562_p11 }
  0x21   :  { %572 = shalt.err (!%p569_p1)
}
  0x22   :  { %22 = dma.hbm_to_vmem [thread:$0]  %s706_s0, 1024, %s651_s15, [#allocation4], %s625_s24, %s625_s24, %s626_s25  }
  0x23   :  { %s627_s10 = smov [#allocation8]   ;;  %s573_s14 = scalar_lea.hbm %s708_s2, 16 }
  0x24   :  { %s41_s11 = sshll.u32 %s627_s10, 4  ;;  %p574_p2 = scmp.ne.s32.totalorder %s708_s2, %s573_s14  ;;  %s42_s11 = int_to_ptr.vmem [resolvable:$true] %s41_s11 }
  0x25   :  { %p577_p3 = scmp.lt.u32.totalorder %s573_s14, %s708_s2 }
  0x27   :  { %p579_p4 = pnand %p577_p3, %p574_p2 }
  0x29   :  { %582 = shalt.err (!%p579_p4)
}
  0x2a   :  { %s583_s20 = scalar_lea.vmem %s42_s11, 16  ;;  %s587_s0 = scalar_lea.vmem %s42_s11, 32 }
  0x2b   :  { %p584_p5 = scmp.ne.s32.totalorder %s42_s11, %s583_s20  ;;  %p588_p6 = scmp.lt.s32.totalorder %s42_s11, %s42_s11 }
  0x2c   :  { %p589_p7 = scmp.lt.s32.totalorder %s587_s0, %s583_s20 }
  0x2e   :  { %p590_p8 = por %p589_p7, %p588_p6 }
  0x30   :  { %p591_p9 = pnand %p590_p8, %p584_p5 }
  0x32   :  { %594 = shalt.err (!%p591_p9)
}
  0x33   :  { %44 = dma.hbm_to_vmem [thread:$0]  %s708_s2, 16, %s42_s11, [#allocation7]  }
  0x34   :  { %617 = dma.done.wait [#allocation4], 1024  }
  0x35   :  { %618 = vsyncadd [#allocation4], 4294966272 }
  0x36   :  { %619 = dma.done.wait [#allocation7], 1040  }
  0x37   :  { %620 = vsyncadd [#allocation7], 4294966256  ;;  %v513_v0 = vld [vmem:[#allocation6] sm:$0xff]   ;;  %v514_v1 = vld [vmem:[#allocation6 + $0x8] sm:$0xff]   ;;  %s628_s2 = smov [#allocation9]  }
  0x38   :  { %457 = vmatprep.subr.bf16.mxu0 %v513_v0  ;;  %489 = vmatprep.subr.bf16.mxu1 %v513_v0  ;;  %v515_v2 = vld [vmem:[#allocation6 + $0x10] sm:$0xff]   ;;  %v516_v3 = vld [vmem:[#allocation6 + $0x18] sm:$0xff]   ;;  %v521_v4 = vld [vmem:[#allocation3] sm:$0xff]   ;;  %s411_s22 = sshll.u32 %s628_s2, 4  ;;  %s412_s22 = int_to_ptr.vmem [resolvable:$true] %s411_s22 }
  0x39   :  { %458 = vmatpush3.bf16.msra.mxu0 %v513_v0  ;;  %497 = vmatpush3.bf16.msra.mxu1 %v513_v0  ;;  %v522_v5 = vld [vmem:[#allocation3 + $0x20] sm:$0xff]   ;;  %v518_v7 = vld [vmem:[#allocation6 + $0x28] sm:$0xff]   ;;  %v519_v8 = vld [vmem:[#allocation6 + $0x30] sm:$0xff]   ;;  %s595_s23 = scalar_lea.vmem %s412_s22, 2048  ;;  %p600_p11 = scmp.lt.s32.totalorder %s412_s22, %s412_s22 }
  0x3a   :  { %459 = vmatprep.subr.bf16.mxu0 %v514_v1  ;;  %490 = vmatprep.subr.bf16.mxu1 %v514_v1  ;;  %v517_v6 = vld [vmem:[#allocation6 + $0x20] sm:$0xff]   ;;  %v520_v9 = vld [vmem:[#allocation6 + $0x38] sm:$0xff]   ;;  %v523_v10 = vld [vmem:[#allocation3 + $0x8] sm:$0xff]   ;;  %p596_p10 = scmp.ne.s32.totalorder %s412_s22, %s595_s23  ;;  %p601_p12 = scmp.lt.s32.totalorder %s595_s23, %s595_s23 }
  0x3b   :  { %473 = vmatprep.mubr.bf16.mxu0 %v521_v4  ;;  %481 = vmatprep.mubr.bf16.mxu1 %v522_v5  ;;  %v524_v11 = vld [vmem:[#allocation3 + $0x28] sm:$0xff]   ;;  %v525_v12 = vld [vmem:[#allocation3 + $0x10] sm:$0xff]   ;;  %v527_v14 = vld [vmem:[#allocation3 + $0x18] sm:$0xff]  }
  0x3c   :  { %v526_v13 = vld [vmem:[#allocation3 + $0x30] sm:$0xff]   ;;  %v528_v15 = vld [vmem:[#allocation3 + $0x38] sm:$0xff]   ;;  %v440_v16 = vld [vmem:[#allocation8] ss:$0 sm:$0xff]  ;;  %p602_p13 = por %p601_p12, %p600_p11 }
  0x3d   :  { %460 = vmatpush3.bf16.msra.mxu0 %v514_v1  ;;  %498 = vmatpush3.bf16.msra.mxu1 %v514_v1 }
  0x3e   :  { %461 = vmatprep.subr.bf16.mxu0 %v515_v2  ;;  %491 = vmatprep.subr.bf16.mxu1 %v515_v2  ;;  %p603_p0 = pnand %p602_p13, %p596_p10 }
  0x41   :  { %462 = vmatpush3.bf16.msra.mxu0 %v515_v2  ;;  %499 = vmatpush3.bf16.msra.mxu1 %v515_v2 }
  0x42   :  { %463 = vmatprep.subr.bf16.mxu0 %v516_v3  ;;  %492 = vmatprep.subr.bf16.mxu1 %v516_v3 }
  0x45   :  { %464 = vmatpush3.bf16.msra.mxu0 %v516_v3  ;;  %500 = vmatpush3.bf16.msra.mxu1 %v516_v3 }
  0x46   :  { %465 = vmatprep.subr.bf16.mxu0 %v517_v6  ;;  %493 = vmatprep.subr.bf16.mxu1 %v517_v6 }
  0x49   :  { %466 = vmatpush3.bf16.msra.mxu0 %v517_v6  ;;  %501 = vmatpush3.bf16.msra.mxu1 %v517_v6 }
  0x4a   :  { %467 = vmatprep.subr.bf16.mxu0 %v518_v7  ;;  %494 = vmatprep.subr.bf16.mxu1 %v518_v7 }
  0x4d   :  { %468 = vmatpush3.bf16.msra.mxu0 %v518_v7  ;;  %502 = vmatpush3.bf16.msra.mxu1 %v518_v7 }
  0x4e   :  { %469 = vmatprep.subr.bf16.mxu0 %v519_v8  ;;  %495 = vmatprep.subr.bf16.mxu1 %v519_v8 }
  0x51   :  { %470 = vmatpush3.bf16.msra.mxu0 %v519_v8  ;;  %503 = vmatpush3.bf16.msra.mxu1 %v519_v8 }
  0x52   :  { %471 = vmatprep.subr.bf16.mxu0 %v520_v9  ;;  %496 = vmatprep.subr.bf16.mxu1 %v520_v9 }
  0x55   :  { %472 = vmatpush3.bf16.msra.mxu0 %v520_v9  ;;  %504 = vmatpush3.bf16.msra.mxu1 %v520_v9 }
  0x58   :  { %474 = vmatmul.mubr.bf16.vlgmr.msra.gmra.mrb[0].mxu0 %v523_v10  ;;  %482 = vmatmul.mubr.bf16.vlgmr.msra.gmra.mrb[0].mxu1 %v524_v11 }
  0x59   :  { %477 = vmatprep.mubr.bf16.mxu0 %v525_v12  ;;  %485 = vmatprep.mubr.bf16.mxu1 %v526_v13 }
  0x60   :  { %478 = vmatmul.mubr.bf16.gmra.mrb[4].mxu0 %v527_v14  ;;  %486 = vmatmul.mubr.bf16.gmra.mrb[4].mxu1 %v528_v15 }
 0x12b   :  { %v475_v17 = vpop.f32.mrb[0].mxu0  ;;  %v483_v18 = vpop.f32.mrb[0].mxu1 }
 0x12c   :  { %v376_v19 = vadd.f32 %v475_v17, %v440_v16  ;;  %v384_v20 = vadd.f32 %v483_v18, %v440_v16  ;;  %v253_v21 = vpop.f32.mrb[1].mxu0  ;;  %v285_v22 = vpop.f32.mrb[1].mxu1 }
 0x12d   :  { %v374_v23 = vadd.f32 %v440_v16, %v253_v21  ;;  %v382_v24 = vadd.f32 %v440_v16, %v285_v22  ;;  %v476_v25 = vpop.f32.mrb[2].mxu0  ;;  %v484_v26 = vpop.f32.mrb[2].mxu1 }
 0x12e   :  { %392 = vst [vmem:[#allocation9 + $0x10] sm:$0xff] %v376_v19  ;;  %400 = vst [vmem:[#allocation9 + $0x50] sm:$0xff] %v384_v20  ;;  %v377_v27 = vadd.f32 %v476_v25, %v440_v16  ;;  %v385_v28 = vadd.f32 %v484_v26, %v440_v16  ;;  %v256_v29 = vpop.f32.mrb[3].mxu0  ;;  %v288_v30 = vpop.f32.mrb[3].mxu1 }
 0x12f   :  { %390 = vst [vmem:[#allocation9] sm:$0xff] %v374_v23  ;;  %398 = vst [vmem:[#allocation9 + $0x40] sm:$0xff] %v382_v24  ;;  %v375_v31 = vadd.f32 %v440_v16, %v256_v29  ;;  %v383_v32 = vadd.f32 %v440_v16, %v288_v30 }
 0x130   :  { %393 = vst [vmem:[#allocation9 + $0x18] sm:$0xff] %v377_v27  ;;  %401 = vst [vmem:[#allocation9 + $0x58] sm:$0xff] %v385_v28 }
 0x131   :  { %391 = vst [vmem:[#allocation9 + $0x8] sm:$0xff] %v375_v31  ;;  %399 = vst [vmem:[#allocation9 + $0x48] sm:$0xff] %v383_v32 }
 0x133   :  { %v479_v33 = vpop.f32.mrb[4].mxu0  ;;  %v487_v34 = vpop.f32.mrb[4].mxu1 }
 0x134   :  { %v380_v35 = vadd.f32 %v479_v33, %v440_v16  ;;  %v388_v36 = vadd.f32 %v487_v34, %v440_v16  ;;  %v269_v37 = vpop.f32.mrb[5].mxu0  ;;  %v301_v38 = vpop.f32.mrb[5].mxu1 }
 0x135   :  { %v378_v39 = vadd.f32 %v440_v16, %v269_v37  ;;  %v386_v40 = vadd.f32 %v440_v16, %v301_v38  ;;  %v480_v41 = vpop.f32.mrb[6].mxu0  ;;  %v488_v42 = vpop.f32.mrb[6].mxu1 }
 0x136   :  { %396 = vst [vmem:[#allocation9 + $0x30] sm:$0xff] %v380_v35  ;;  %404 = vst [vmem:[#allocation9 + $0x70] sm:$0xff] %v388_v36  ;;  %v381_v43 = vadd.f32 %v480_v41, %v440_v16  ;;  %v389_v44 = vadd.f32 %v488_v42, %v440_v16  ;;  %v272_v45 = vpop.f32.mrb[7].mxu0  ;;  %v304_v46 = vpop.f32.mrb[7].mxu1 }
 0x137   :  { %394 = vst [vmem:[#allocation9 + $0x20] sm:$0xff] %v378_v39  ;;  %402 = vst [vmem:[#allocation9 + $0x60] sm:$0xff] %v386_v40  ;;  %v379_v47 = vadd.f32 %v440_v16, %v272_v45  ;;  %v387_v48 = vadd.f32 %v440_v16, %v304_v46 }
 0x138   :  { %397 = vst [vmem:[#allocation9 + $0x38] sm:$0xff] %v381_v43  ;;  %405 = vst [vmem:[#allocation9 + $0x78] sm:$0xff] %v389_v44 }
 0x139   :  { %395 = vst [vmem:[#allocation9 + $0x28] sm:$0xff] %v379_v47  ;;  %403 = vst [vmem:[#allocation9 + $0x68] sm:$0xff] %v387_v48 }
 0x13a   :  { %606 = shalt.err (!%p603_p0)
}
 0x13b   :  { %s607_s26 = scalar_lea.hbm %s709_s3, 2048 }
 0x13c   :  { %p608_p1 = scmp.ne.s32.totalorder %s709_s3, %s607_s26  ;;  %p611_p2 = scmp.lt.u32.totalorder %s607_s26, %s709_s3 }
 0x13e   :  { %p613_p3 = pnand %p611_p2, %p608_p1 }
 0x140   :  { %616 = shalt.err (!%p613_p3)
}
 0x141   :  { %s629_s4 = smov 128   ;;  %s630_s5 = smov 8  }
 0x142   :  { %417 = dma.vmem_to_hbm [thread:$0]  %s412_s22, 2048, %s709_s3, [#allocation5], %s629_s4, %s629_s4, %s630_s5  }
 0x143   :  { %621 = dma.done.wait [#allocation5], 2048  }
 0x144   :  { %622 = vsyncadd [#allocation5], 4294965248 }
 0x145   :  { %421 = vsyncpa [#allocation4], 1 }
 0x146   :  { %422 = vsyncpa [#allocation7], 1 }
 0x147   :  { %423 = vsyncpa [#allocation5], 1 }

// kernel: transform_net_forward.16
= control target key start
LH: loop header
LB: loop body
LE: loop exit
PB: predicated region body
PF: predicated region fallthrough
CT: control target
= control target key end

     0   :  { %7 = vsyncpa [#allocation4], 0  ;;  %s515_s0 = inlined_call_operand.hbm [shape: f32[64,128], index: 0, kind: input, shape index: {}]   ;;  %s516_s1 = inlined_call_operand.hbm [shape: f32[128,256], index: 1, kind: input, shape index: {}]   ;;  %s517_s2 = inlined_call_operand.hbm [shape: f32[64,256], index: 2, kind: output, shape index: {}]  }
   0x1   :  { %8 = vsyncpa [#allocation7], 0 }
   0x2   :  { %9 = vsyncpa [#allocation5], 0  ;;  %s442_s9 = smov [#allocation3]   ;;  %s370_s13 = scalar_lea.hbm %s515_s0, 1024 }
   0x3   :  { %s15_s10 = sshll.u32 %s442_s9, 4  ;;  %p371_p0 = scmp.ne.s32.totalorder %s515_s0, %s370_s13  ;;  %s16_s10 = int_to_ptr.vmem [resolvable:$true] %s15_s10 }
   0x4   :  { %p374_p1 = scmp.lt.u32.totalorder %s370_s13, %s515_s0 }
   0x6   :  { %p376_p2 = pnand %p374_p1, %p371_p0 }
   0x8   :  { %379 = shalt.err (!%p376_p2)
}
   0x9   :  { %s380_s18 = scalar_lea.vmem %s16_s10, 1024  ;;  %p385_p4 = scmp.lt.s32.totalorder %s16_s10, %s16_s10 }
   0xa   :  { %p381_p3 = scmp.ne.s32.totalorder %s16_s10, %s380_s18  ;;  %p386_p5 = scmp.lt.s32.totalorder %s380_s18, %s380_s18 }
   0xc   :  { %p387_p6 = por %p386_p5, %p385_p4 }
   0xe   :  { %p388_p7 = pnand %p387_p6, %p381_p3 }
  0x10   :  { %391 = shalt.err (!%p388_p7)
}
  0x11   :  { %s443_s19 = smov 128   ;;  %s444_s20 = smov 8  }
  0x12   :  { %21 = dma.hbm_to_vmem [thread:$0]  %s515_s0, 1024, %s16_s10, [#allocation4], %s443_s19, %s443_s19, %s444_s20  }
  0x13   :  { %s445_s23 = smov [#allocation6]   ;;  %s392_s27 = scalar_lea.hbm %s516_s1, 4096 }
  0x14   :  { %s27_s24 = sshll.u32 %s445_s23, 4  ;;  %p393_p8 = scmp.ne.s32.totalorder %s516_s1, %s392_s27  ;;  %s28_s24 = int_to_ptr.vmem [resolvable:$true] %s27_s24 }
  0x15   :  { %p396_p9 = scmp.lt.u32.totalorder %s392_s27, %s516_s1 }
  0x17   :  { %p398_p10 = pnand %p396_p9, %p393_p8 }
  0x19   :  { %401 = shalt.err (!%p398_p10)
}
  0x1a   :  { %s402_s4 = scalar_lea.vmem %s28_s24, 4096  ;;  %p407_p12 = scmp.lt.s32.totalorder %s28_s24, %s28_s24 }
  0x1b   :  { %p403_p11 = scmp.ne.s32.totalorder %s28_s24, %s402_s4  ;;  %p408_p13 = scmp.lt.s32.totalorder %s402_s4, %s402_s4 }
  0x1d   :  { %p409_p0 = por %p408_p13, %p407_p12 }
  0x1f   :  { %p410_p1 = pnand %p409_p0, %p403_p11 }
  0x21   :  { %413 = shalt.err (!%p410_p1)
}
  0x22   :  { %s446_s0 = smov 256   ;;  %s447_s5 = smov 16  }
  0x23   :  { %33 = dma.hbm_to_vmem [thread:$0]  %s516_s1, 4096, %s28_s24, [#allocation7], %s446_s0, %s446_s0, %s447_s5  }
  0x24   :  { %436 = dma.done.wait [#allocation4], 1024  }
  0x25   :  { %437 = vsyncadd [#allocation4], 4294966272 }
  0x26   :  { %438 = dma.done.wait [#allocation7], 4096  }
  0x27   :  { %439 = vsyncadd [#allocation7], 4294963200  ;;  %v448_v0 = vmov 0.0   ;;  %v85_v1 = vld [vmem:[#allocation6 + $0x8] sm:$0xff]  ;;  %v87_v2 = vld [vmem:[#allocation6 + $0x18] sm:$0xff]  ;;  %s449_s1 = smov [#allocation8]  }
  0x28   :  { %180 = vmatprep.mubr.f32.mxu0 %v448_v0  ;;  %204 = vmatprep.mubr.f32.mxu1 %v448_v0  ;;  %v84_v3 = vld [vmem:[#allocation6] sm:$0xff]  ;;  %v314_v4 = vpack.c.bf16 %v87_v2, %v85_v1  ;;  %v86_v5 = vld [vmem:[#allocation6 + $0x10] sm:$0xff]  ;;  %v89_v6 = vld [vmem:[#allocation6 + $0x28] sm:$0xff]  ;;  %s301_s8 = sshll.u32 %s449_s1, 4  ;;  %s302_s8 = int_to_ptr.vmem [resolvable:$true] %s301_s8 }
  0x29   :  { %v91_v7 = vld [vmem:[#allocation6 + $0x38] sm:$0xff]  ;;  %v316_v8 = vpack.c.bf16 %v86_v5, %v84_v3  ;;  %v88_v10 = vld [vmem:[#allocation6 + $0x20] sm:$0xff]  ;;  %v90_v11 = vld [vmem:[#allocation6 + $0x30] sm:$0xff]  ;;  %s414_s9 = scalar_lea.vmem %s302_s8, 2048  ;;  %p419_p3 = scmp.lt.s32.totalorder %s302_s8, %s302_s8 }
  0x2a   :  { %v318_v9 = vpack.c.bf16 %v91_v7, %v89_v6  ;;  %v93_v12 = vld [vmem:[#allocation6 + $0x48] sm:$0xff]  ;;  %315 = vmatprep.subr.bf16.mxu0 %v314_v4  ;;  %346 = vmatprep.subr.bf16.mxu1 %v314_v4  ;;  %v95_v13 = vld [vmem:[#allocation6 + $0x58] sm:$0xff]  ;;  %v320_v14 = vpack.c.bf16 %v90_v11, %v88_v10  ;;  %v92_v16 = vld [vmem:[#allocation6 + $0x40] sm:$0xff]  ;;  %p415_p2 = scmp.ne.s32.totalorder %s302_s8, %s414_s9  ;;  %p420_p4 = scmp.lt.s32.totalorder %s414_s9, %s414_s9 }
  0x2b   :  { %317 = vmatpush1.bf16.msra.mxu0 %v316_v8  ;;  %354 = vmatpush1.bf16.msra.mxu1 %v316_v8  ;;  %v322_v15 = vpack.c.bf16 %v95_v13, %v93_v12  ;;  %v94_v17 = vld [vmem:[#allocation6 + $0x50] sm:$0xff]  ;;  %v97_v18 = vld [vmem:[#allocation6 + $0x68] sm:$0xff]  ;;  %v99_v19 = vld [vmem:[#allocation6 + $0x78] sm:$0xff] }
  0x2c   :  { %319 = vmatprep.subr.bf16.mxu0 %v318_v9  ;;  %347 = vmatprep.subr.bf16.mxu1 %v318_v9  ;;  %v324_v20 = vpack.c.bf16 %v94_v17, %v92_v16  ;;  %v326_v21 = vpack.c.bf16 %v99_v19, %v97_v18  ;;  %v96_v22 = vld [vmem:[#allocation6 + $0x60] sm:$0xff]  ;;  %v98_v23 = vld [vmem:[#allocation6 + $0x70] sm:$0xff]  ;;  %v101_v24 = vld [vmem:[#allocation6 + $0x88] sm:$0xff]  ;;  %p421_p5 = por %p420_p4, %p419_p3 }
  0x2d   :  { %v103_v25 = vld [vmem:[#allocation6 + $0x98] sm:$0xff]  ;;  %v328_v26 = vpack.c.bf16 %v98_v23, %v96_v22  ;;  %v100_v28 = vld [vmem:[#allocation6 + $0x80] sm:$0xff]  ;;  %v102_v29 = vld [vmem:[#allocation6 + $0x90] sm:$0xff] }
  0x2e   :  { %v330_v27 = vpack.c.bf16 %v103_v25, %v101_v24  ;;  %v105_v30 = vld [vmem:[#allocation6 + $0xa8] sm:$0xff]  ;;  %v107_v31 = vld [vmem:[#allocation6 + $0xb8] sm:$0xff]  ;;  %v332_v32 = vpack.c.bf16 %v102_v29, %v100_v28  ;;  %v104_v34 = vld [vmem:[#allocation6 + $0xa0] sm:$0xff]  ;;  %p422_p6 = pnand %p421_p5, %p415_p2 }
  0x2f   :  { %321 = vmatpush1.bf16.msra.mxu0 %v320_v14  ;;  %355 = vmatpush1.bf16.msra.mxu1 %v320_v14  ;;  %v334_v33 = vpack.c.bf16 %v107_v31, %v105_v30  ;;  %v106_v35 = vld [vmem:[#allocation6 + $0xb0] sm:$0xff]  ;;  %v109_v36 = vld [vmem:[#allocation6 + $0xc8] sm:$0xff]  ;;  %v111_v37 = vld [vmem:[#allocation6 + $0xd8] sm:$0xff] }
  0x30   :  { %323 = vmatprep.subr.bf16.mxu0 %v322_v15  ;;  %348 = vmatprep.subr.bf16.mxu1 %v322_v15  ;;  %v336_v38 = vpack.c.bf16 %v106_v35, %v104_v34  ;;  %v338_v39 = vpack.c.bf16 %v111_v37, %v109_v36  ;;  %v108_v40 = vld [vmem:[#allocation6 + $0xc0] sm:$0xff]  ;;  %v110_v41 = vld [vmem:[#allocation6 + $0xd0] sm:$0xff]  ;;  %v113_v42 = vld [vmem:[#allocation6 + $0xe8] sm:$0xff] }
  0x31   :  { %v115_v43 = vld [vmem:[#allocation6 + $0xf8] sm:$0xff]  ;;  %v340_v44 = vpack.c.bf16 %v110_v41, %v108_v40  ;;  %v112_v46 = vld [vmem:[#allocation6 + $0xe0] sm:$0xff]  ;;  %v114_v47 = vld [vmem:[#allocation6 + $0xf0] sm:$0xff] }
  0x32   :  { %v342_v45 = vpack.c.bf16 %v115_v43, %v113_v42  ;;  %v344_v48 = vpack.c.bf16 %v114_v47, %v112_v46  ;;  %v76_v49 = vld [vmem:[#allocation3] sm:$0xff]  ;;  %v77_v51 = vld [vmem:[#allocation3 + $0x8] sm:$0xff]  ;;  %v78_v53 = vld [vmem:[#allocation3 + $0x10] sm:$0xff] }
  0x33   :  { %325 = vmatpush1.bf16.msra.mxu0 %v324_v20  ;;  %356 = vmatpush1.bf16.msra.mxu1 %v324_v20  ;;  %v80_v50 = vld [vmem:[#allocation3 + $0x20] sm:$0xff]  ;;  %v81_v52 = vld [vmem:[#allocation3 + $0x28] sm:$0xff]  ;;  %v82_v54 = vld [vmem:[#allocation3 + $0x30] sm:$0xff] }
  0x34   :  { %327 = vmatprep.subr.bf16.mxu0 %v326_v21  ;;  %349 = vmatprep.subr.bf16.mxu1 %v326_v21  ;;  %v79_v55 = vld [vmem:[#allocation3 + $0x18] sm:$0xff] }
  0x35   :  { %v83_v56 = vld [vmem:[#allocation3 + $0x38] sm:$0xff] }
  0x37   :  { %329 = vmatpush1.bf16.msra.mxu0 %v328_v26  ;;  %357 = vmatpush1.bf16.msra.mxu1 %v328_v26 }
  0x38   :  { %331 = vmatprep.subr.bf16.mxu0 %v330_v27  ;;  %350 = vmatprep.subr.bf16.mxu1 %v330_v27 }
  0x3b   :  { %333 = vmatpush1.bf16.msra.mxu0 %v332_v32  ;;  %358 = vmatpush1.bf16.msra.mxu1 %v332_v32 }
  0x3c   :  { %335 = vmatprep.subr.bf16.mxu0 %v334_v33  ;;  %351 = vmatprep.subr.bf16.mxu1 %v334_v33 }
  0x3f   :  { %337 = vmatpush1.bf16.msra.mxu0 %v336_v38  ;;  %359 = vmatpush1.bf16.msra.mxu1 %v336_v38 }
  0x40   :  { %339 = vmatprep.subr.bf16.mxu0 %v338_v39  ;;  %352 = vmatprep.subr.bf16.mxu1 %v338_v39 }
  0x43   :  { %341 = vmatpush1.bf16.msra.mxu0 %v340_v44  ;;  %360 = vmatpush1.bf16.msra.mxu1 %v340_v44 }
  0x44   :  { %343 = vmatprep.subr.bf16.mxu0 %v342_v45  ;;  %353 = vmatprep.subr.bf16.mxu1 %v342_v45 }
  0x47   :  { %345 = vmatpush1.bf16.msra.mxu0 %v344_v48  ;;  %361 = vmatpush1.bf16.msra.mxu1 %v344_v48 }
  0x4a   :  { %181 = vmatmul.mubr.f32.vlgmr.msra.gmra.mrb[0].mxu0 %v76_v49  ;;  %205 = vmatmul.mubr.f32.vlgmr.msra.gmra.mrb[0].mxu1 %v80_v50 }
  0x4b   :  { %186 = vmatprep.mubr.f32.mxu0 %v448_v0  ;;  %210 = vmatprep.mubr.f32.mxu1 %v448_v0 }
  0x4e   :  { %187 = vmatmul.mubr.f32.gmra.mrb[2].mxu0 %v77_v51  ;;  %211 = vmatmul.mubr.f32.gmra.mrb[2].mxu1 %v81_v52 }
  0x4f   :  { %192 = vmatprep.mubr.f32.mxu0 %v448_v0  ;;  %216 = vmatprep.mubr.f32.mxu1 %v448_v0 }
  0x52   :  { %193 = vmatmul.mubr.f32.gmra.mrb[4].mxu0 %v78_v53  ;;  %217 = vmatmul.mubr.f32.gmra.mrb[4].mxu1 %v82_v54 }
  0x53   :  { %198 = vmatprep.mubr.f32.mxu0 %v448_v0  ;;  %222 = vmatprep.mubr.f32.mxu1 %v448_v0 }
  0x56   :  { %199 = vmatmul.mubr.f32.gmra.mrb[6].mxu0 %v79_v55  ;;  %223 = vmatmul.mubr.f32.gmra.mrb[6].mxu1 %v83_v56 }
 0x11d   :  { %v182_v57 = vpop.f32.mrb[0].mxu0  ;;  %v206_v58 = vpop.f32.mrb[0].mxu1 }
 0x11e   :  { %280 = vst [vmem:[#allocation8] sm:$0xff] %v182_v57  ;;  %288 = vst [vmem:[#allocation8 + $0x40] sm:$0xff] %v206_v58  ;;  %v184_v59 = vpop.f32.mrb[1].mxu0  ;;  %v208_v60 = vpop.f32.mrb[1].mxu1 }
 0x11f   :  { %281 = vst [vmem:[#allocation8 + $0x8] sm:$0xff] %v184_v59  ;;  %289 = vst [vmem:[#allocation8 + $0x48] sm:$0xff] %v208_v60 }
 0x121   :  { %v188_v61 = vpop.f32.mrb[2].mxu0  ;;  %v212_v62 = vpop.f32.mrb[2].mxu1 }
 0x122   :  { %282 = vst [vmem:[#allocation8 + $0x10] sm:$0xff] %v188_v61  ;;  %290 = vst [vmem:[#allocation8 + $0x50] sm:$0xff] %v212_v62  ;;  %v190_v63 = vpop.f32.mrb[3].mxu0  ;;  %v214_v1 = vpop.f32.mrb[3].mxu1 }
 0x123   :  { %283 = vst [vmem:[#allocation8 + $0x18] sm:$0xff] %v190_v63  ;;  %291 = vst [vmem:[#allocation8 + $0x58] sm:$0xff] %v214_v1 }
 0x125   :  { %v194_v0 = vpop.f32.mrb[4].mxu0  ;;  %v218_v2 = vpop.f32.mrb[4].mxu1 }
 0x126   :  { %284 = vst [vmem:[#allocation8 + $0x20] sm:$0xff] %v194_v0  ;;  %292 = vst [vmem:[#allocation8 + $0x60] sm:$0xff] %v218_v2  ;;  %v196_v3 = vpop.f32.mrb[5].mxu0  ;;  %v220_v4 = vpop.f32.mrb[5].mxu1 }
 0x127   :  { %285 = vst [vmem:[#allocation8 + $0x28] sm:$0xff] %v196_v3  ;;  %293 = vst [vmem:[#allocation8 + $0x68] sm:$0xff] %v220_v4 }
 0x129   :  { %v200_v5 = vpop.f32.mrb[6].mxu0  ;;  %v224_v6 = vpop.f32.mrb[6].mxu1 }
 0x12a   :  { %286 = vst [vmem:[#allocation8 + $0x30] sm:$0xff] %v200_v5  ;;  %294 = vst [vmem:[#allocation8 + $0x70] sm:$0xff] %v224_v6  ;;  %v202_v7 = vpop.f32.mrb[7].mxu0  ;;  %v226_v8 = vpop.f32.mrb[7].mxu1 }
 0x12b   :  { %287 = vst [vmem:[#allocation8 + $0x38] sm:$0xff] %v202_v7  ;;  %295 = vst [vmem:[#allocation8 + $0x78] sm:$0xff] %v226_v8 }
 0x12c   :  { %425 = shalt.err (!%p422_p6)
}
 0x12d   :  { %s426_s12 = scalar_lea.hbm %s517_s2, 2048 }
 0x12e   :  { %p427_p7 = scmp.ne.s32.totalorder %s517_s2, %s426_s12  ;;  %p430_p8 = scmp.lt.u32.totalorder %s426_s12, %s517_s2 }
 0x130   :  { %p432_p9 = pnand %p430_p8, %p427_p7 }
 0x132   :  { %435 = shalt.err (!%p432_p9)
}
 0x133   :  { %307 = dma.vmem_to_hbm [thread:$0]  %s302_s8, 2048, %s517_s2, [#allocation5], %s446_s0, %s446_s0, %s447_s5  }
 0x134   :  { %440 = dma.done.wait [#allocation5], 2048  }
 0x135   :  { %441 = vsyncadd [#allocation5], 4294965248 }
 0x136   :  { %311 = vsyncpa [#allocation4], 1 }
 0x137   :  { %312 = vsyncpa [#allocation7], 1 }
 0x138   :  { %313 = vsyncpa [#allocation5], 1 }

// kernel: transform_net_forward.15
= control target key start
LH: loop header
LB: loop body
LE: loop exit
PB: predicated region body
PF: predicated region fallthrough
CT: control target
= control target key end

     0   :  { %s3236_s0 = inlined_call_operand.hbm [shape: f32[2,112,128], index: 0, kind: input, shape index: {}]   ;;  %s3237_s1 = inlined_call_operand.hbm [shape: f32[112,128], index: 1, kind: input, shape index: {}]   ;;  %s3238_s2 = inlined_call_operand.hbm [shape: f32[2,64,128], index: 2, kind: input, shape index: {}]   ;;  %s3239_s3 = inlined_call_operand.hbm [shape: f32[2,64,128], index: 3, kind: input, shape index: {}]   ;;  %s3240_s4 = inlined_call_operand.hbm [shape: bf16[4,128,128], index: 4, kind: input, shape index: {}]   ;;  %s3241_s5 = inlined_call_operand.hbm [shape: f32[4,1,128], index: 5, kind: input, shape index: {}]   ;;  %s3242_s6 = inlined_call_operand.hbm [shape: f32[2,112,128], index: 6, kind: output, shape index: {}]  }
   0x1   :  { %3263 = sst [smem:[#allocation24_spill]] %s3236_s0 }
   0x2   :  { %3264 = sst [smem:[#allocation25_spill]] %s3237_s1 }
   0x3   :  { %3265 = sst [smem:[#allocation26_spill]] %s3238_s2 }
   0x4   :  { %3266 = sst [smem:[#allocation27_spill]] %s3242_s6 }
   0x5   :  { %11 = vsyncpa [#allocation3], 0 }
   0x6   :  { %13 = vsyncpa [#allocation3 + $0x1], 0 }
   0x7   :  { %14 = vsyncpa [#allocation6], 0 }
   0x8   :  { %15 = vsyncpa [#allocation11], 0 }
   0x9   :  { %16 = vsyncpa [#allocation4], 0 }
   0xa   :  { %18 = vsyncpa [#allocation4 + $0x1], 0  ;;  %s2538_s21 = smov 0   ;;  %s2540_s22 = smov 0  }
   0xb   :  { %s2542_s23 = smov 0   ;;  %s2544_s24 = smov 0  }
   0xc LB: > { %3267 = sst [smem:[#allocation19_spill]] %s2472_s21  ;;  %s2559_s25 = sadd.s32 1, %s2484_s24   ;;  %s2484_s24 = sphi %s2544_s24, %s3304_s24   ;;  %s2480_s23 = sphi %s2542_s23, %s3306_s23   ;;  %s2476_s22 = sphi %s2540_s22, %s3308_s22   ;;  %s2472_s21 = sphi %s2538_s21, %s3307_s21  }
   0xd   : > { %3268 = sst [smem:[#allocation20_spill]] %s2480_s23  ;;  %s31_s26 = sadd.s32 1, %s2480_s23 }
   0xe   : > { %3269 = sst [smem:[#allocation21_spill]] %s2559_s25  ;;  %s28_s27 = ssub.s32 %s2484_s24, %s2559_s25 }
   0xf   : > { %p3243_p0 = scmp.ne.s32.totalorder %s2480_s23, %s2476_s22  ;;  %p29_p1 = scmp.eq.s32.totalorder %s28_s27, 0 }
  0x10   : > { %p39_p2 = scmp.eq.s32.totalorder %s2484_s24, 0  ;;  %p2076_p5 = scmp.lt.s32.totalorder %s2484_s24, 2 }
  0x11   : > { %s2568_s28 = scalar_select %p29_p1, %s2480_s23, %s31_s26  }
  0x12   : > { %p40_p3 = por %p39_p2, %p3243_p0  ;;  %s248_s29 = sand.u32 1, %s2484_s24  }
  0x13   : > { %3270 = sst [smem:[#allocation22_spill]] %s2568_s28  ;;  %s250_s30 = sand.u32 1, %s2480_s23  }
  0x14   : > { %s2025_s7 = smul.u32 112, %s250_s30  ;;  %p2577_p6 = pnand %p2076_p5, %p40_p3 }
  0x15   : > { %s2026_s9 = smul.u32 1792, %s2484_s24  ;;  %s2582_s10 = sshll.u32 %s250_s30, 6 }
  0x16   : > { %s3271_s8 = scalar_select %p2577_p6, 1, 0 }
  0x17   : > { %s3272_s0 = sld [smem:[#allocation24_spill]]  ;;  %s252_s14 = scalar_lea.vmem [#allocation2], %s2025_s7 }
  0x18   : > { %s259_s15 = sshll.u32 %s252_s14, 4  ;;  %s2591_s16 = scalar_lea.sflag [#allocation3], %s248_s29  ;;  %s2589_s15 = int_to_ptr.vmem [resolvable:$true] %s259_s15 }
  0x19   : > { %p2597_p8 = pneg %p2577_p6 }
  0x1b   : > { %s3273_s18 = scalar_select %p2597_p8, 1, 0 }
  0x1d   : > { %s2587_s13 = scalar_lea.hbm %s3272_s0, %s2026_s9  ;;  %s2233_s26 = scalar_lea.hbm %s3272_s0, 3584 }
  0x1e   : > { %s2228_s17 = scalar_lea.hbm %s2587_s13, 1792  ;;  %p2234_p11 = scmp.lt.u32.totalorder %s2587_s13, %s3272_s0 }
  0x1f   : > { %p2229_p7 = scmp.ne.s32.totalorder %s2587_s13, %s2228_s17  ;;  %p2235_p12 = scmp.lt.u32.totalorder %s2233_s26, %s2228_s17 }
  0x20   : > { %p2237_p1 = scmp.lt.u32.totalorder %s2228_s17, %s2587_s13 }
  0x21   : > { %p2231_p9 = pnand %p2597_p8, %p2229_p7  ;;  %p2236_p13 = por %p2235_p12, %p2234_p11 }
  0x23   : > { %p2232_p10 = pneg %p2231_p9  ;;  %p2238_p2 = por %p2237_p1, %p2236_p13 }
  0x25   : > { %p2239_p3 = pnand %p2238_p2, %p2232_p10 }
  0x27   : > { %2242 = shalt.err (!%p2239_p3)
}
  0x28   : > { %s2243_s29 = scalar_lea.vmem %s2589_s15, 1792  ;;  %s2486_s7 = smov [#allocation2]  }
  0x29   : > { %p2244_p5 = scmp.ne.s32.totalorder %s2589_s15, %s2243_s29  ;;  %s2248_s9 = sshll.u32 %s2486_s7, 4  ;;  %s2249_s9 = int_to_ptr.vmem [resolvable:$false] %s2248_s9 }
  0x2a   : > { %s2250_s11 = scalar_lea.vmem %s2249_s9, 3584  ;;  %p2251_p4 = scmp.lt.s32.totalorder %s2589_s15, %s2249_s9 }
  0x2b   : > { %p2246_p7 = pnand %p2244_p5, %p2597_p8  ;;  %p2252_p0 = scmp.lt.s32.totalorder %s2250_s11, %s2243_s29 }
  0x2d   : > { %p2247_p9 = pneg %p2246_p7  ;;  %p2253_p11 = por %p2252_p0, %p2251_p4 }
  0x2f   : > { %p2254_p12 = pnand %p2253_p11, %p2247_p9 }
  0x31   : > { %2257 = shalt.err (!%p2254_p12)
}
  0x32   : > { %s3244_s12 = smov 128   ;;  %s3246_s14 = smov 8  }
  0x33   : > { %2062 = dma.hbm_to_vmem [thread:$0]  (!%p2577_p6), %s2587_s13, 1792, %s2589_s15, %s2591_s16, %s3244_s12, %s3244_s12, %s3246_s14  }
  0x34   : > { %s2625_s17 = sadd.s32 4294967295, %s2484_s24   ;;  %s1666_s19 = sadd.s32 4294967294, %s2484_s24  }
  0x35   : > { %p44_p0 = scmp.ne.s32.totalorder %s2476_s22, %s2472_s21  ;;  %p3249_p4 = scmp.eq.s32.totalorder %s2625_s17, 0 }
  0x36   : > { %p183_p10 = scmp.eq.s32.totalorder %s2625_s17, 1  ;;  %p189_p13 = scmp.eq.s32.totalorder %s1666_s19, 1 }
  0x37   : > { %p1667_p1 = scmp.ge.s32.totalorder %s2484_s24, 1  ;;  %p2635_p2 = por %p3249_p4, %p44_p0 }
  0x38   : > { %p3275_p3 = scmp.ne.s32.totalorder %s2480_s23, %s2476_s22  ;;  %p2646_p7 = por %p189_p13, %p44_p0 }
  0x39   : > { %s3274_s20 = scalar_select %p2635_p2, 1, 0 }
  0x3a   : > { %p2642_p5 = por %p183_p10, %p3275_p3  ;;  %p196_p9 = scmp.lt.s32.totalorder %s2484_s24, 3 }
  0x3b   : > { %s3277_s15 = scalar_select %p2646_p7, 1, 0 }
  0x3c   : > { %s3276_s13 = scalar_select %p2642_p5, 1, 0 }
  0x3d   : > { %3278 = sst [smem:[#allocation23_spill]] %s3277_s15  ;;  %p2651_p11 = pnand %p1667_p1, %p196_p9 }
  0x3e   : > { %s2489_s27 = smov [#allocation5]   ;;  %s3248_s29 = sshll.u32 %s2484_s24, 10 }
  0x3f   : > { %s3279_s26 = scalar_select %p2651_p11, 1, 0 }
  0x40   : > { %s208_s30 = sshll.u32 %s2489_s27, 4  ;;  %p2049_p12 = pneg %p2651_p11  ;;  %s2655_s30 = int_to_ptr.vmem [resolvable:$true] %s208_s30 }
  0x41   : > { %s3280_s2 = sld [smem:[#allocation26_spill]]  ;;  %s273_s19 = scalar_lea.vmem [#allocation7], %s2582_s10 }
  0x42   : > { %s280_s12 = sshll.u32 %s273_s19, 4  ;;  %p2670_p0 = pnand %p2049_p12, %p3249_p4  ;;  %s2674_s12 = int_to_ptr.vmem [resolvable:$true] %s280_s12 }
  0x44   : > { %s3281_s27 = scalar_select %p2670_p0, 1, 0 }
  0x47   : > { %s2665_s11 = scalar_lea.hbm %s3280_s2, %s3248_s29  ;;  %s2263_s29 = scalar_lea.hbm %s3280_s2, 2048 }
  0x48   : > { %s2258_s14 = scalar_lea.hbm %s2665_s11, 1024  ;;  %p2264_p3 = scmp.lt.u32.totalorder %s2665_s11, %s3280_s2 }
  0x49   : > { %p2259_p10 = scmp.ne.s32.totalorder %s2665_s11, %s2258_s14  ;;  %p2265_p9 = scmp.lt.u32.totalorder %s2263_s29, %s2258_s14 }
  0x4a   : > { %p2267_p4 = scmp.lt.u32.totalorder %s2258_s14, %s2665_s11 }
  0x4b   : > { %p2261_p13 = pnand %p2259_p10, %p2597_p8  ;;  %p2266_p12 = por %p2265_p9, %p2264_p3 }
  0x4d   : > { %p2262_p1 = pneg %p2261_p13  ;;  %p2268_p7 = por %p2267_p4, %p2266_p12 }
  0x4f   : > { %p2269_p5 = pnand %p2268_p7, %p2262_p1 }
  0x51   : > { %2272 = shalt.err (!%p2269_p5)
}
  0x52   : > { %s2273_s19 = scalar_lea.vmem %s2674_s12, 1024  ;;  %s2490_s7 = smov [#allocation7]  }
  0x53   : > { %p2274_p10 = scmp.ne.s32.totalorder %s2674_s12, %s2273_s19  ;;  %s2278_s9 = sshll.u32 %s2490_s7, 4  ;;  %s2279_s9 = int_to_ptr.vmem [resolvable:$false] %s2278_s9 }
  0x54   : > { %s2280_s0 = scalar_lea.vmem %s2279_s9, 2048  ;;  %p2281_p11 = scmp.lt.s32.totalorder %s2674_s12, %s2279_s9 }
  0x55   : > { %p2276_p13 = pnand %p2274_p10, %p2597_p8  ;;  %p2282_p0 = scmp.lt.s32.totalorder %s2280_s0, %s2273_s19 }
  0x57   : > { %p2277_p2 = pneg %p2276_p13  ;;  %p2283_p3 = por %p2282_p0, %p2281_p11 }
  0x59   : > { %p2284_p9 = pnand %p2283_p3, %p2277_p2 }
  0x5b   : > { %2287 = shalt.err (!%p2284_p9)
}
  0x5c   : > { %s3282_s28 = smov 8   ;;  %s3283_s14 = smov 128  }
  0x5d   : > { %2065 = dma.hbm_to_vmem [thread:$0]  (!%p2577_p6), %s2665_s11, 1024, %s2674_s12, %s2591_s16, %s3283_s14, %s3283_s14, %s3282_s28  }
  0x5e   : > { %s3284_s1 = sld [smem:[#allocation25_spill]]  ;;  %p3285_p2 = scmp.ne.s32.totalorder %s3281_s27, 0 }
  0x60   : > { %p2709_p5 = pneg %p3285_p2 }
  0x64   : > { %s2288_s7 = scalar_lea.hbm %s3284_s1, 1792 }
  0x65   : > { %p2289_p4 = scmp.ne.s32.totalorder %s3284_s1, %s2288_s7  ;;  %p2295_p0 = scmp.lt.u32.totalorder %s2288_s7, %s3284_s1 }
  0x67   : > { %p2291_p7 = pnand %p2709_p5, %p2289_p4 }
  0x69   : > { %p2292_p11 = pneg %p2291_p7 }
  0x6b   : > { %p2297_p1 = pnand %p2295_p0, %p2292_p11 }
  0x6d   : > { %2300 = shalt.err (!%p2297_p1)
}
  0x6e   : > { %s2301_s2 = scalar_lea.vmem %s2655_s30, 1792  ;;  %p2309_p3 = scmp.lt.s32.totalorder %s2655_s30, %s2655_s30 }
  0x6f   : > { %p2302_p12 = scmp.ne.s32.totalorder %s2655_s30, %s2301_s2  ;;  %p2310_p9 = scmp.lt.s32.totalorder %s2301_s2, %s2301_s2 }
  0x71   : > { %p2304_p10 = pnand %p2302_p12, %p2709_p5  ;;  %p2311_p4 = por %p2310_p9, %p2309_p3 }
  0x73   : > { %p2305_p13 = pneg %p2304_p10 }
  0x75   : > { %p2312_p7 = pnand %p2311_p4, %p2305_p13 }
  0x77   : > { %2315 = shalt.err (!%p2312_p7)
}
  0x78   : > { %2052 = dma.hbm_to_vmem [thread:$0]  (!%p3285_p2), %s3284_s1, 1792, %s2655_s30, [#allocation6], %s3283_s14, %s3283_s14, %s3282_s28  }
  0x79   : > { %s2491_s12 = smov [#allocation9]   ;;  %s2316_s9 = scalar_lea.hbm %s3240_s4, 4096 }
  0x7a   : > { %s221_s11 = sshll.u32 %s2491_s12, 4  ;;  %p2317_p11 = scmp.ne.s32.totalorder %s3240_s4, %s2316_s9  ;;  %s222_s11 = int_to_ptr.vmem [resolvable:$true] %s221_s11 }
  0x7b   : > { %p2323_p12 = scmp.lt.u32.totalorder %s2316_s9, %s3240_s4 }
  0x7c   : > { %p2319_p0 = pnand %p2317_p11, %p2709_p5 }
  0x7e   : > { %p2320_p1 = pneg %p2319_p0 }
  0x80   : > { %p2325_p10 = pnand %p2323_p12, %p2320_p1 }
  0x82   : > { %2328 = shalt.err (!%p2325_p10)
}
  0x83   : > { %s2329_s30 = scalar_lea.vmem %s222_s11, 4096  ;;  %p2337_p4 = scmp.lt.s32.totalorder %s222_s11, %s222_s11 }
  0x84   : > { %p2330_p13 = scmp.ne.s32.totalorder %s222_s11, %s2329_s30  ;;  %p2338_p7 = scmp.lt.s32.totalorder %s2329_s30, %s2329_s30 }
  0x86   : > { %p2332_p3 = pnand %p2330_p13, %p2709_p5  ;;  %p2339_p6 = por %p2338_p7, %p2337_p4 }
  0x88   : > { %p2333_p9 = pneg %p2332_p3 }
  0x8a   : > { %p2340_p8 = pnand %p2339_p6, %p2333_p9 }
  0x8c   : > { %2343 = shalt.err (!%p2340_p8)
}
  0x8d   : > { %s2492_s23 = smov 64   ;;  %s2493_s25 = smov 4  }
  0x8e   : > { %2055 = dma.hbm_to_vmem [thread:$0]  (!%p3285_p2), %s3240_s4, 4096, %s222_s11, [#allocation6], %s2492_s23, %s2492_s23, %s2493_s25  }
  0x8f   : > { %s2494_s12 = smov [#allocation10]   ;;  %s2344_s0 = scalar_lea.hbm %s3241_s5, 64 }
  0x90   : > { %s234_s29 = sshll.u32 %s2494_s12, 4  ;;  %p2345_p6 = scmp.ne.s32.totalorder %s3241_s5, %s2344_s0  ;;  %s235_s29 = int_to_ptr.vmem [resolvable:$true] %s234_s29 }
  0x91   : > { %p2351_p0 = scmp.lt.u32.totalorder %s2344_s0, %s3241_s5 }
  0x92   : > { %p2347_p8 = pnand %p2345_p6, %p2709_p5 }
  0x94   : > { %p2348_p11 = pneg %p2347_p8 }
  0x96   : > { %p2353_p1 = pnand %p2351_p0, %p2348_p11 }
  0x98   : > { %2356 = shalt.err (!%p2353_p1)
}
  0x99   : > { %s2357_s11 = scalar_lea.vmem %s235_s29, 64  ;;  %p2365_p3 = scmp.lt.s32.totalorder %s235_s29, %s235_s29 }
  0x9a   : > { %p2358_p12 = scmp.ne.s32.totalorder %s235_s29, %s2357_s11  ;;  %p2366_p9 = scmp.lt.s32.totalorder %s2357_s11, %s2357_s11 }
  0x9c   : > { %p2360_p10 = pnand %p2358_p12, %p2709_p5  ;;  %p2367_p4 = por %p2366_p9, %p2365_p3 }
  0x9e   : > { %p2361_p13 = pneg %p2360_p10 }
  0xa0   : > { %p2368_p7 = pnand %p2367_p4, %p2361_p13 }
  0xa2   : > { %2371 = shalt.err (!%p2368_p7)
}
  0xa3   : > { %s2495_s23 = smov 16   ;;  %s2496_s1 = smov 1  }
  0xa4   : > { %2058 = dma.hbm_to_vmem [thread:$0]  (!%p3285_p2), %s3241_s5, 64, %s235_s29, [#allocation11], %s2495_s23, %s2495_s23, %s2496_s1  }
  0xa5   : > { %s3287_s21 = sshll.u32 %s2484_s24, 10  ;;  %s294_s7 = scalar_lea.vmem [#allocation8], %s2582_s10 }
  0xa6   : > { %s2774_s12 = scalar_lea.hbm %s3239_s3, %s3287_s21  ;;  %s301_s9 = sshll.u32 %s294_s7, 4  ;;  %s2777_s9 = int_to_ptr.vmem [resolvable:$true] %s301_s9 }
  0xa7   : > { %s2372_s0 = scalar_lea.hbm %s2774_s12, 1024  ;;  %p3288_p6 = scmp.ne.s32.totalorder %s3273_s18, 0 }
  0xa8   : > { %p2373_p5 = scmp.ne.s32.totalorder %s2774_s12, %s2372_s0  ;;  %s2377_s2 = scalar_lea.hbm %s3239_s3, 2048 }
  0xa9   : > { %p2378_p2 = scmp.lt.u32.totalorder %s2774_s12, %s3239_s3  ;;  %p2379_p0 = scmp.lt.u32.totalorder %s2377_s2, %s2372_s0 }
  0xaa   : > { %p2375_p8 = pnand %p2373_p5, %p3288_p6  ;;  %p2381_p12 = scmp.lt.u32.totalorder %s2372_s0, %s2774_s12 }
  0xab   : > { %p2380_p1 = por %p2379_p0, %p2378_p2 }
  0xac   : > { %p2376_p11 = pneg %p2375_p8 }
  0xad   : > { %p2382_p10 = por %p2381_p12, %p2380_p1 }
  0xaf   : > { %p2383_p13 = pnand %p2382_p10, %p2376_p11 }
  0xb1   : > { %2386 = shalt.err (!%p2383_p13)
}
  0xb2   : > { %s2387_s10 = scalar_lea.vmem %s2777_s9, 1024  ;;  %s2497_s23 = smov [#allocation8]  }
  0xb3   : > { %p2388_p3 = scmp.ne.s32.totalorder %s2777_s9, %s2387_s10  ;;  %s2392_s1 = sshll.u32 %s2497_s23, 4  ;;  %s2393_s1 = int_to_ptr.vmem [resolvable:$false] %s2392_s1 }
  0xb4   : > { %s2394_s6 = scalar_lea.vmem %s2393_s1, 2048  ;;  %p2395_p7 = scmp.lt.s32.totalorder %s2777_s9, %s2393_s1 }
  0xb5   : > { %p2390_p9 = pnand %p2388_p3, %p3288_p6  ;;  %p2396_p5 = scmp.lt.s32.totalorder %s2394_s6, %s2387_s10 }
  0xb7   : > { %p2391_p4 = pneg %p2390_p9  ;;  %p2397_p8 = por %p2396_p5, %p2395_p7 }
  0xb9   : > { %p2398_p2 = pnand %p2397_p8, %p2391_p4 }
  0xbb   : > { %2401 = shalt.err (!%p2398_p2)
}
  0xbc   : > { %p3289_p11 = scmp.ne.s32.totalorder %s3271_s8, 0  ;;  %p3290_p6 = scmp.ne.s32.totalorder %s3279_s26, 0 }
  0xbd   : > { %s315_s18 = sand.u32 (!%p3290_p6), 1, %s2625_s17   ;;  %s2808_s25 = sand.u32 (!%p3290_p6), 1, %s2476_s22  }
  0xbe   : > { %2068 = dma.hbm_to_vmem [thread:$0]  (!%p3289_p11), %s2774_s12, 1024, %s2777_s9, %s2591_s16, %s3283_s14, %s3283_s14, %s3282_s28  }
  0xbf   : > { %313 = sbr.rel (%p3290_p6) target bundleno = 1373 (0x55d), region = 44  ;;  %s316_s8 = scalar_lea.sflag (!%p3290_p6), [#allocation3], %s315_s18 }
  0xc0   : > { %s2027_s21 = smul.u32 (!%p3290_p6), 112, %s2808_s25  ;;  %p3291_p0 = scmp.ne.s32.totalorder (!%p3290_p6), %s3274_s20, 0 }
  0xc2   : > { %s2813_s19 = scalar_lea.vmem (!%p3290_p6), [#allocation2], %s2027_s21 }
  0xc6   : > { %2447 = dma.done.wait (%p3291_p0), %s316_s8, 1792  }
  0xc7   : > { %2449 = vsyncadd (%p3291_p0), %s316_s8, 4294965504  ;;  %p3292_p1 = scmp.eq.s32.totalorder %s2625_s17, 0 }
  0xc9   : > { %2451 = dma.done.wait (%p3292_p1), [#allocation6], 1792   ;;  %p3293_p12 = pmov %p3292_p1 }
  0xca   : > { %s1681_s16 = sshll.u32 %s2808_s25, 6 }
  0xcb   : > { %2453 = vsyncadd (%p3293_p12), [#allocation6], 4294965504  ;;  %s2824_s26 = scalar_lea.vmem [#allocation7], %s1681_s16 }
  0xcc   : > { %2455 = dma.done.wait (%p3291_p0), %s316_s8, 2048  }
  0xcd   : > { %2457 = vsyncadd (%p3291_p0), %s316_s8, 4294965248  ;;  %s2830_s28 = scalar_lea.vmem [#allocation8], %s1681_s16  ;;  %p3294_p10 = pmov %p3292_p1 }
  0xce   : > { %p3295_p13 = pmov %p3292_p1 }
  0xcf   : > { %2459 = dma.done.wait (%p3294_p10), [#allocation6], 4096  }
  0xd0   : > { %2461 = vsyncadd (%p3295_p13), [#allocation6], 4294963200  ;;  %p3296_p3 = pmov %p3292_p1 }
  0xd1   : > { %p3297_p9 = pmov %p3292_p1 }
  0xd2   : > { %2463 = dma.done.wait (%p3296_p3), [#allocation11], 64  }
  0xd3   : > { %2465 = vsyncadd (%p3297_p9), [#allocation11], 4294967232  ;;  %v2498_v0 = vmov 0.0   ;;  %vm2499_vm0 = vmmov 0   ;;  %v2126_v1 = vld [vmem:[#allocation9 + $0x40] sm:$0xff]   ;;  %v2127_v2 = vld [vmem:[#allocation9 + $0x48] sm:$0xff]  }
  0xd4   : > { %1809 = vmatprep.subr.bf16.mxu0 %v2498_v0  ;;  %1825 = vmatprep.mubr.msk.bf16.mxu0 %vm2499_vm0, %v2498_v0  ;;  %v2128_v3 = vld [vmem:[#allocation9 + $0x50] sm:$0xff]   ;;  %v2129_v4 = vld [vmem:[#allocation9 + $0x58] sm:$0xff]   ;;  %v2844_v5 = vld [vmem:[%s2824_s26] sm:$0xff]  ;;  %vm1037_vm2 = vcmask 523264   ;;  %s3144_s20 = scalar_lea.vmem [#allocation12], %s2027_s21  ;;  %s2028_s14 = smul.u32 1792, %s2625_s17 }
  0xd5   : > { %1853 = vmatprep.subr.bf16.mxu1 %v2126_v1  ;;  %v2847_v6 = vld [vmem:[%s2824_s26 + $0x8] sm:$0xff]  ;;  %v446_v7 = vld [vmem:[%s2830_s28] sm:$0xff]  ;;  %v2853_v10 = vld [vmem:[%s2824_s26 + $0x10] sm:$0xff]  ;;  %s1524_s15 = sshll.u32 %s3144_s20, 4  ;;  %s3298_s9 = sld [smem:[#allocation27_spill]]  ;;  %s3189_s15 = int_to_ptr.vmem [resolvable:$true] %s1524_s15 }
  0xd6   : > { %1854 = vmatpush3.bf16.msra.mxu1 %v2126_v1  ;;  %v447_v8 = vld [vmem:[%s2830_s28 + $0x8] sm:$0xff]  ;;  %v454_v9 = vadd.f32 %v446_v7, %v2844_v5  ;;  %v2856_v11 = vld [vmem:[%s2824_s26 + $0x18] sm:$0xff]  ;;  %v2134_v14 = vld [vmem:[#allocation9] sm:$0xff]   ;;  %s1511_s17 = scalar_lea.sflag [#allocation4], %s2808_s25  ;;  %s2402_s27 = scalar_lea.vmem %s3189_s15, 1792 }
  0xd7   : > { %1855 = vmatprep.subr.bf16.mxu1 %v2127_v2  ;;  %v455_v12 = vadd.f32 %v447_v8, %v2847_v6  ;;  %v467_v13 = vpack.c.bf16 %v2856_v11, %v2853_v10  ;;  %v2130_v15 = vld [vmem:[#allocation9 + $0x60] sm:$0xff]   ;;  %1810 = vmatpush3.bf16.msra.mxu0 %v2134_v14  ;;  %v2135_v17 = vld [vmem:[#allocation9 + $0x8] sm:$0xff]   ;;  %v2136_v19 = vld [vmem:[#allocation9 + $0x10] sm:$0xff]   ;;  %p2403_p4 = scmp.ne.s32.totalorder %s3189_s15, %s2402_s27  ;;  %p3299_p7 = scmp.ne.s32.totalorder %s3276_s13, 0 }
  0xd8   : > { %1811 = vmatprep.subr.bf16.mxu0 %v2498_v0  ;;  %v2131_v18 = vld [vmem:[#allocation9 + $0x68] sm:$0xff]   ;;  %v2132_v20 = vld [vmem:[#allocation9 + $0x70] sm:$0xff]   ;;  %v2137_v21 = vld [vmem:[#allocation9 + $0x18] sm:$0xff]   ;;  %s2500_s29 = smov [#allocation12]  }
  0xd9   : > { %v462_v16 = vpack.c.bf16 %v455_v12, %v454_v9  ;;  %v2133_v22 = vld [vmem:[#allocation9 + $0x78] sm:$0xff]   ;;  %v448_v23 = vld [vmem:[%s2830_s28 + $0x10] sm:$0xff]  ;;  %v2867_v25 = vld [vmem:[%s2824_s26 + $0x20] sm:$0xff]  ;;  %p2404_p5 = pnand %p2403_p4, %p3299_p7  ;;  %s2406_s2 = sshll.u32 %s2500_s29, 4  ;;  %s2407_s2 = int_to_ptr.vmem [resolvable:$false] %s2406_s2 }
  0xda   : > { %1856 = vmatpush3.bf16.msra.mxu1 %v2127_v2  ;;  %v449_v24 = vld [vmem:[%s2830_s28 + $0x18] sm:$0xff]  ;;  %v2870_v26 = vld [vmem:[%s2824_s26 + $0x28] sm:$0xff]  ;;  %v450_v27 = vld [vmem:[%s2830_s28 + $0x20] sm:$0xff]  ;;  %v456_v30 = vadd.f32 %v448_v23, %v2853_v10  ;;  %s2408_s30 = scalar_lea.vmem %s2407_s2, 3584  ;;  %p2409_p2 = scmp.lt.s32.totalorder %s3189_s15, %s2407_s2 }
  0xdb   : > { %1857 = vmatprep.subr.bf16.mxu1 %v2128_v3  ;;  %1869 = vmatprep.mubr.bf16.mxu1 %v462_v16  ;;  %v451_v28 = vld [vmem:[%s2830_s28 + $0x28] sm:$0xff]  ;;  %v2138_v29 = vld [vmem:[#allocation9 + $0x20] sm:$0xff]   ;;  %v457_v31 = vadd.f32 %v449_v24, %v2856_v11  ;;  %v458_v32 = vadd.f32 %v450_v27, %v2867_v25  ;;  %v2880_v34 = vld [vmem:[%s2824_s26 + $0x30] sm:$0xff]  ;;  %s3187_s0 = scalar_lea.hbm %s3298_s9, %s2028_s14  ;;  %p2405_p8 = pneg %p2404_p5 }
  0xdc   : > { %1812 = vmatpush3.bf16.msra.mxu0 %v2135_v17  ;;  %v459_v33 = vadd.f32 %v451_v28, %v2870_v26  ;;  %v2883_v35 = vld [vmem:[%s2824_s26 + $0x38] sm:$0xff]  ;;  %v2139_v36 = vld [vmem:[#allocation9 + $0x28] sm:$0xff]   ;;  %v452_v38 = vld [vmem:[%s2830_s28 + $0x30] sm:$0xff]  ;;  %p2410_p11 = scmp.lt.s32.totalorder %s2408_s30, %s2402_s27 }
  0xdd   : > { %1813 = vmatprep.subr.bf16.mxu0 %v2498_v0  ;;  %v463_v37 = vpack.c.bf16 %v457_v31, %v456_v30  ;;  %v453_v39 = vld [vmem:[%s2830_s28 + $0x38] sm:$0xff]  ;;  %v2140_v41 = vld [vmem:[#allocation9 + $0x30] sm:$0xff]   ;;  %v460_v46 = vadd.f32 %v452_v38, %v2880_v34  ;;  %v413_v55 = vld [vmem:[#allocation5 + $0x10] sm:$0xff] }
  0xde   : > { %1858 = vmatpush3.bf16.msra.mxu1 %v2128_v3  ;;  %v464_v40 = vpack.c.bf16 %v459_v33, %v458_v32  ;;  %v389_v42 = vld [vmem:[%s2813_s19] sm:$0xff]  ;;  %v390_v43 = vld [vmem:[%s2813_s19 + $0x8] sm:$0xff]  ;;  %v461_v47 = vadd.f32 %v453_v39, %v2883_v35  ;;  %v391_v52 = vld [vmem:[%s2813_s19 + $0x10] sm:$0xff]  ;;  %p2411_p6 = por %p2410_p11, %p2409_p2 }
  0xdf   : > { %1859 = vmatprep.subr.bf16.mxu1 %v2129_v4  ;;  %v411_v44 = vld [vmem:[#allocation5] sm:$0xff]  ;;  %v412_v45 = vld [vmem:[#allocation5 + $0x8] sm:$0xff]  ;;  %v414_v56 = vld [vmem:[#allocation5 + $0x18] sm:$0xff]  ;;  %v427_v57 = vadd.f32 %v413_v55, %v391_v52 }
  0xe0   : > { %1814 = vmatpush3.bf16.msra.mxu0 %v2136_v19  ;;  %v2141_v48 = vld [vmem:[#allocation9 + $0x38] sm:$0xff]   ;;  %v425_v49 = vadd.f32 %v411_v44, %v389_v42  ;;  %v426_v50 = vadd.f32 %v412_v45, %v390_v43  ;;  %v465_v51 = vpack.c.bf16 %v461_v47, %v460_v46  ;;  %v393_v60 = vld [vmem:[%s2813_s19 + $0x20] sm:$0xff]  ;;  %v418_v9 = vld [vmem:[#allocation5 + $0x38] sm:$0xff]  ;;  %v466_v43 = vpack.c.bf16 %v2847_v6, %v2844_v5  ;;  %p2412_p0 = pnand %p2411_p6, %p2405_p8 }
  0xe1   : > { %1815 = vmatprep.subr.bf16.mxu0 %v2498_v0  ;;  %v392_v53 = vld [vmem:[%s2813_s19 + $0x18] sm:$0xff]  ;;  %v394_v61 = vld [vmem:[%s2813_s19 + $0x28] sm:$0xff]  ;;  %v415_v62 = vld [vmem:[#allocation5 + $0x20] sm:$0xff]  ;;  %v468_v6 = vpack.c.bf16 %v2870_v26, %v2867_v25 }
  0xe2   : > { %1860 = vmatpush3.bf16.msra.mxu1 %v2129_v4  ;;  %v439_v54 = vpack.c.bf16 %v426_v50, %v425_v49  ;;  %v428_v58 = vadd.f32 %v414_v56, %v392_v53  ;;  %v416_v63 = vld [vmem:[#allocation5 + $0x28] sm:$0xff]  ;;  %v429_v1 = vadd.f32 %v415_v62, %v393_v60  ;;  %v395_v4 = vld [vmem:[%s2813_s19 + $0x30] sm:$0xff]  ;;  %v397_v16 = vld [vmem:[%s2813_s19 + $0x40] sm:$0xff]  ;;  %v469_v49 = vpack.c.bf16 %v2883_v35, %v2880_v34 }
  0xe3   : > { %1861 = vmatprep.subr.bf16.mxu1 %v2130_v15  ;;  %v430_v2 = vadd.f32 %v416_v63, %v394_v61  ;;  %v396_v7 = vld [vmem:[%s2813_s19 + $0x38] sm:$0xff]  ;;  %v417_v8 = vld [vmem:[#allocation5 + $0x30] sm:$0xff]  ;;  %v398_v17 = vld [vmem:[%s2813_s19 + $0x48] sm:$0xff] }
  0xe4   : > { %1816 = vmatpush3.bf16.msra.mxu0 %v2137_v21  ;;  %v440_v59 = vpack.c.bf16 %v428_v58, %v427_v57  ;;  %v431_v12 = vadd.f32 %v417_v8, %v395_v4  ;;  %v432_v14 = vadd.f32 %v418_v9, %v396_v7  ;;  %v420_v19 = vld [vmem:[#allocation5 + $0x48] sm:$0xff]  ;;  %v399_v23 = vld [vmem:[%s2813_s19 + $0x50] sm:$0xff]  ;;  %v422_v28 = vld [vmem:[#allocation5 + $0x58] sm:$0xff] }
  0xe5   : > { %1817 = vmatprep.subr.bf16.mxu0 %v2498_v0  ;;  %v441_v3 = vpack.c.bf16 %v430_v2, %v429_v1  ;;  %v434_v21 = vadd.f32 %v420_v19, %v398_v17  ;;  %v400_v24 = vld [vmem:[%s2813_s19 + $0x58] sm:$0xff]  ;;  %v421_v27 = vld [vmem:[#allocation5 + $0x50] sm:$0xff]  ;;  %v402_v33 = vld [vmem:[%s2813_s19 + $0x68] sm:$0xff] }
  0xe6   : > { %1862 = vmatpush3.bf16.msra.mxu1 %v2130_v15  ;;  %v442_v15 = vpack.c.bf16 %v432_v14, %v431_v12  ;;  %v436_v30 = vadd.f32 %v422_v28, %v400_v24  ;;  %v401_v32 = vld [vmem:[%s2813_s19 + $0x60] sm:$0xff]  ;;  %v2143_v42 = vld [vmem:[#allocation9 + $0x88] sm:$0xff]   ;;  %v2145_v45 = vld [vmem:[#allocation9 + $0x98] sm:$0xff]  }
  0xe7   : > { %1863 = vmatprep.subr.bf16.mxu1 %v2131_v18  ;;  %v2144_v44 = vld [vmem:[#allocation9 + $0x90] sm:$0xff]   ;;  %v2146_v46 = vld [vmem:[#allocation9 + $0xa0] sm:$0xff]   ;;  %v2147_v47 = vld [vmem:[#allocation9 + $0xa8] sm:$0xff]  }
  0xe8   : > { %1818 = vmatpush3.bf16.msra.mxu0 %v2138_v29  ;;  %v435_v29 = vadd.f32 %v421_v27, %v399_v23  ;;  %v2149_v5 = vld [vmem:[#allocation9 + $0xb8] sm:$0xff]  }
  0xe9   : > { %1819 = vmatprep.subr.bf16.mxu0 %v2498_v0 }
  0xea   : > { %1864 = vmatpush3.bf16.msra.mxu1 %v2131_v18  ;;  %v419_v18 = vld [vmem:[#allocation5 + $0x40] sm:$0xff]  ;;  %v444_v31 = vpack.c.bf16 %v436_v30, %v435_v29 }
  0xeb   : > { %1865 = vmatprep.subr.bf16.mxu1 %v2132_v20 }
  0xec   : > { %1820 = vmatpush3.bf16.msra.mxu0 %v2139_v36  ;;  %v423_v36 = vld [vmem:[#allocation5 + $0x60] sm:$0xff] }
  0xed   : > { %1821 = vmatprep.subr.bf16.mxu0 %v2498_v0  ;;  %v437_v38 = vadd.f32 %v423_v36, %v401_v32 }
  0xee   : > { %1866 = vmatpush3.bf16.msra.mxu1 %v2132_v20  ;;  %v433_v20 = vadd.f32 %v419_v18, %v397_v16 }
  0xef   : > { %1867 = vmatprep.subr.bf16.mxu1 %v2133_v22 }
  0xf0   : > { %1822 = vmatpush3.bf16.msra.mxu0 %v2140_v41  ;;  %v2142_v41 = vld [vmem:[#allocation9 + $0x80] sm:$0xff]  }
  0xf1   : > { %1823 = vmatprep.subr.bf16.mxu0 %v2498_v0 }
  0xf2   : > { %1868 = vmatpush3.bf16.msra.mxu1 %v2133_v22  ;;  %v443_v22 = vpack.c.bf16 %v434_v21, %v433_v20 }
  0xf3   : > { %1877 = vmatprep.subr.bf16.mxu1 %v2142_v41 }
  0xf4   : > { %1824 = vmatpush3.bf16.msra.mxu0 %v2141_v48  ;;  %v2148_v48 = vld [vmem:[#allocation9 + $0xb0] sm:$0xff]  }
  0xf5   : > { %1870 = vmatmul.mubr.bf16.vlgmr.msra.gmra.mrb[0].mxu1 %v463_v37  ;;  %1901 = vmatprep.subr.bf16.mxu0 %v2498_v0  ;;  %v424_v37 = vld [vmem:[#allocation5 + $0x68] sm:$0xff] }
  0xf6   : > { %1873 = vmatprep.mubr.bf16.mxu1 %v464_v40  ;;  %v438_v39 = vadd.f32 %v424_v37, %v402_v33  ;;  %1878 = vmatpush3.bf16.msra.mxu1 %v2142_v41 }
  0xf7   : > { %1826 = vmatmul.mubr.bf16.vlgmr.msra.gmra.mrb[0].mxu0 %v439_v54  ;;  %1879 = vmatprep.subr.bf16.mxu1 %v2143_v42 }
  0xf8   : > { %1829 = vmatprep.mubr.msk.bf16.mxu0 %vm2499_vm0, %v2498_v0  ;;  %v445_v40 = vpack.c.bf16 %v438_v39, %v437_v38 }
  0xfa   : > { %1880 = vmatpush3.bf16.msra.mxu1 %v2143_v42 }
  0xfb   : > { %1881 = vmatprep.subr.bf16.mxu1 %v2144_v44 }
  0xfd   : > { %1874 = vmatmul.mubr.bf16.gmra.mrb[4].mxu1 %v465_v51  ;;  %v1694_v51 = vld [vmem:[#allocation10 + $0x1] ss:$0 sm:$0xff] }
  0xfe   : > { %1893 = vmatprep.mubr.bf16.mxu1 %v466_v43  ;;  %1882 = vmatpush3.bf16.msra.mxu1 %v2144_v44 }
  0xff   : > { %1830 = vmatmul.mubr.bf16.gmra.mrb[4].mxu0 %v440_v59  ;;  %1883 = vmatprep.subr.bf16.mxu1 %v2145_v45 }
 0x100   : > { %1833 = vmatprep.mubr.msk.bf16.mxu0 %vm2499_vm0, %v2498_v0 }
 0x102   : > { %1884 = vmatpush3.bf16.msra.mxu1 %v2145_v45 }
 0x103   : > { %1885 = vmatprep.subr.bf16.mxu1 %v2146_v46 }
 0x106   : > { %1886 = vmatpush3.bf16.msra.mxu1 %v2146_v46 }
 0x107   : > { %1834 = vmatmul.mubr.bf16.gmra.mrb[8].mxu0 %v441_v3  ;;  %1887 = vmatprep.subr.bf16.mxu1 %v2147_v47 }
 0x108   : > { %1837 = vmatprep.mubr.msk.bf16.mxu0 %vm2499_vm0, %v2498_v0 }
 0x10a   : > { %1888 = vmatpush3.bf16.msra.mxu1 %v2147_v47 }
 0x10b   : > { %1889 = vmatprep.subr.bf16.mxu1 %v2148_v48 }
 0x10e   : > { %1890 = vmatpush3.bf16.msra.mxu1 %v2148_v48 }
 0x10f   : > { %1838 = vmatmul.mubr.bf16.gmra.mrb[12].mxu0 %v442_v15  ;;  %1891 = vmatprep.subr.bf16.mxu1 %v2149_v5 }
 0x110   : > { %1841 = vmatprep.mubr.msk.bf16.mxu0 %vm2499_vm0, %v2498_v0 }
 0x112   : > { %1892 = vmatpush3.bf16.msra.mxu1 %v2149_v5 }
 0x113   : > { %2017 = vmatprep.subr.bf16.mxu1 %v2498_v0 }
 0x115   : > { %1894 = vmatmul.mubr.bf16.vlgmr.msra.gmra.mrb[8].mxu1 %v467_v13  ;;  %v2933_v13 = vld [vmem:[#allocation10] ss:$0 sm:$0xff] }
 0x116   : > { %1897 = vmatprep.mubr.bf16.mxu1 %v468_v6 }
 0x117   : > { %1842 = vmatmul.mubr.bf16.gmra.mrb[16].mxu0 %v443_v22 }
 0x118   : > { %1845 = vmatprep.mubr.msk.bf16.mxu0 %vm2499_vm0, %v2498_v0 }
 0x11d   : > { %1898 = vmatmul.mubr.bf16.gmra.mrb[12].mxu1 %v469_v49 }
 0x11e   : > { %1957 = vmatprep.mubr.msk.bf16.mxu1 %vm2499_vm0, %v2498_v0 }
 0x11f   : > { %1846 = vmatmul.mubr.bf16.gmra.mrb[20].mxu0 %v444_v31 }
 0x120   : > { %1849 = vmatprep.mubr.msk.bf16.mxu0 %vm2499_vm0, %v2498_v0 }
 0x127   : > { %1850 = vmatmul.mubr.bf16.gmra.mrb[24].mxu0 %v445_v40 }
 0x128   : > { %1909 = vmatprep.mubr.msk.bf16.mxu0 %vm2499_vm0, %v2498_v0 }
 0x1c8   : > { %v1871_v50 = vpop.f32.mrb[0].mxu1 }
 0x1c9   : > { %v737_v52 = vpop.f32.mrb[1].mxu1  ;;  %v746_v54 = vadd.f32 %v1871_v50, %v1694_v51 }
 0x1ca   : > { %v1872_v53 = vpop.f32.mrb[2].mxu1  ;;  %v738_v55 = vadd.f32 %v1694_v51, %v737_v52  ;;  %v575_v60 = vpop.f32.mrb[0].mxu0 }
 0x1cb   : > { %v749_v25 = vadd.f32 %v1872_v53, %v1694_v51  ;;  %v740_v26 = vpop.f32.mrb[3].mxu1  ;;  %v576_v63 = vadd.f32 %v2933_v13, %v575_v60  ;;  %v1827_v1 = vpop.f32.mrb[1].mxu0 }
 0x1cc   : > { %v741_v56 = vadd.f32 %v1694_v51, %v740_v26  ;;  %v578_v3 = vpop.f32.mrb[2].mxu0 }
 0x1cd   : > { %v914_v57 = vpack.c.bf16 %v749_v25, %v746_v54  ;;  %v579_v7 = vadd.f32 %v2933_v13, %v578_v3  ;;  %v1828_v8 = vpop.f32.mrb[3].mxu0 }
 0x1ce   : > { %v913_v10 = vpack.c.bf16 %v741_v56, %v738_v55  ;;  %v2967_v56 = vld [vmem:[#allocation10 + $0x2] ss:$0 sm:$0xff] }
 0x1cf   : > { %v906_v12 = vpack.c.bf16 %v579_v7, %v576_v63 }
 0x1d0   : > { %1902 = vmatpush3.bf16.xpose.msra.mxu0 %v913_v10  ;;  %v1875_v11 = vpop.f32.mrb[4].mxu1 }
 0x1d1   : > { %1903 = vmatprep.subr.bf16.mxu0 %v2498_v0  ;;  %v762_v34 = vadd.f32 %v1875_v11, %v1694_v51  ;;  %v753_v35 = vpop.f32.mrb[5].mxu1 }
 0x1d2   : > { %v754_v58 = vadd.f32 %v1694_v51, %v753_v35  ;;  %v1876_v59 = vpop.f32.mrb[6].mxu1  ;;  %v583_v14 = vpop.f32.mrb[4].mxu0 }
 0x1d3   : > { %v765_v61 = vadd.f32 %v1876_v59, %v1694_v51  ;;  %v756_v62 = vpop.f32.mrb[7].mxu1  ;;  %v584_v15 = vadd.f32 %v2933_v13, %v583_v14  ;;  %v1831_v16 = vpop.f32.mrb[5].mxu0 }
 0x1d4   : > { %v757_v2 = vadd.f32 %v1694_v51, %v756_v62  ;;  %v586_v17 = vpop.f32.mrb[6].mxu0  ;;  %v1020_v62 = vlaneseq }
 0x1d5   : > { %v916_v4 = vpack.c.bf16 %v765_v61, %v762_v34  ;;  %v587_v18 = vadd.f32 %v2933_v13, %v586_v17  ;;  %v1832_v19 = vpop.f32.mrb[7].mxu0 }
 0x1d6   : > { %v915_v9 = vpack.c.bf16 %v757_v2, %v754_v58  ;;  %v2977_v63 = vand.u32 127, %v1020_v62 }
 0x1d7   : > { %v907_v20 = vpack.c.bf16 %v587_v18, %v584_v15 }
 0x1d8   : > { %1904 = vmatpush3.bf16.xpose.msra.mxu0 %v914_v57  ;;  %vm1022_vm1 = vcmp.lt.s32.totalorder %v2977_v63, 64 }
 0x1d9   : > { %1905 = vmatprep.subr.bf16.mxu0 %v2498_v0 }
 0x1da   : > { %v591_v21 = vpop.f32.mrb[8].mxu0 }
 0x1db   : > { %v592_v22 = vadd.f32 %v2933_v13, %v591_v21  ;;  %v1835_v23 = vpop.f32.mrb[9].mxu0 }
 0x1dc   : > { %v594_v24 = vpop.f32.mrb[10].mxu0 }
 0x1dd   : > { %v595_v27 = vadd.f32 %v2933_v13, %v594_v24  ;;  %v1836_v28 = vpop.f32.mrb[11].mxu0 }
 0x1df   : > { %v908_v29 = vpack.c.bf16 %v595_v27, %v592_v22 }
 0x1e0   : > { %1906 = vmatpush3.bf16.xpose.msra.mxu0 %v915_v9 }
 0x1e1   : > { %1907 = vmatprep.subr.bf16.mxu0 %v2498_v0 }
 0x1e2   : > { %v599_v30 = vpop.f32.mrb[12].mxu0 }
 0x1e3   : > { %v600_v31 = vadd.f32 %v2933_v13, %v599_v30  ;;  %v1839_v32 = vpop.f32.mrb[13].mxu0 }
 0x1e4   : > { %v602_v33 = vpop.f32.mrb[14].mxu0 }
 0x1e5   : > { %v603_v36 = vadd.f32 %v2933_v13, %v602_v33  ;;  %v1840_v37 = vpop.f32.mrb[15].mxu0 }
 0x1e7   : > { %v909_v38 = vpack.c.bf16 %v603_v36, %v600_v31 }
 0x1e8   : > { %1908 = vmatpush3.bf16.xpose.msra.mxu0 %v916_v4  ;;  %v1895_v57 = vpop.f32.mrb[8].mxu1 }
 0x1e9   : > { %1937 = vmatprep.subr.bf16.mxu0 %v2498_v0  ;;  %v884_v10 = vadd.f32 %v1895_v57, %v2967_v56  ;;  %v875_v11 = vpop.f32.mrb[9].mxu1 }
 0x1ea   : > { %v607_v39 = vpop.f32.mrb[16].mxu0  ;;  %v1896_v34 = vpop.f32.mrb[10].mxu1 }
 0x1eb   : > { %v608_v40 = vadd.f32 %v2933_v13, %v607_v39  ;;  %v1843_v41 = vpop.f32.mrb[17].mxu0  ;;  %v887_v35 = vadd.f32 %v1896_v34, %v2967_v56  ;;  %v878_v58 = vpop.f32.mrb[11].mxu1 }
 0x1ec   : > { %v610_v42 = vpop.f32.mrb[18].mxu0  ;;  %v879_v59 = vadd.f32 %v2967_v56, %v878_v58 }
 0x1ed   : > { %v611_v43 = vadd.f32 %v2933_v13, %v610_v42  ;;  %v1844_v44 = vpop.f32.mrb[19].mxu0  ;;  %v1172_v60 = vpack.c.bf16 %v887_v35, %v884_v10 }
 0x1ef   : > { %1910 = vmatmul.mubr.bf16.vlgmr.msra.gmra.mrb[28].mxu0 %v906_v12  ;;  %v910_v45 = vpack.c.bf16 %v611_v43, %v608_v40 }
 0x1f0   : > { %1913 = vmatprep.mubr.msk.bf16.mxu0 %vm2499_vm0, %v2498_v0  ;;  %v1899_v32 = vpop.f32.mrb[12].mxu1 }
 0x1f2   : > { %v615_v46 = vpop.f32.mrb[20].mxu0 }
 0x1f3   : > { %v616_v47 = vadd.f32 %v2933_v13, %v615_v46  ;;  %v1847_v48 = vpop.f32.mrb[21].mxu0 }
 0x1f4   : > { %v618_v5 = vpop.f32.mrb[22].mxu0 }
 0x1f5   : > { %v619_v6 = vadd.f32 %v2933_v13, %v618_v5  ;;  %v1848_v49 = vpop.f32.mrb[23].mxu0 }
 0x1f7   : > { %1914 = vmatmul.mubr.bf16.gmra.mrb[32].mxu0 %v907_v20  ;;  %v911_v50 = vpack.c.bf16 %v619_v6, %v616_v47  ;;  %v900_v47 = vadd.f32 %v1899_v32, %v2967_v56 }
 0x1f8   : > { %1917 = vmatprep.mubr.msk.bf16.mxu0 %vm2499_vm0, %v2498_v0 }
 0x1fa   : > { %v623_v51 = vpop.f32.mrb[24].mxu0 }
 0x1fb   : > { %v624_v52 = vadd.f32 %v2933_v13, %v623_v51  ;;  %v1851_v53 = vpop.f32.mrb[25].mxu0 }
 0x1fc   : > { %v626_v54 = vpop.f32.mrb[26].mxu0 }
 0x1fd   : > { %v627_v25 = vadd.f32 %v2933_v13, %v626_v54  ;;  %v1852_v26 = vpop.f32.mrb[27].mxu0  ;;  %v876_v13 = vadd.f32 %v2967_v56, %v875_v11 }
 0x1ff   : > { %1918 = vmatmul.mubr.bf16.gmra.mrb[36].mxu0 %v908_v29  ;;  %v912_v55 = vpack.c.bf16 %v627_v25, %v624_v52  ;;  %v1171_v61 = vpack.c.bf16 %v879_v59, %v876_v13 }
 0x200   : > { %1921 = vmatprep.mubr.msk.bf16.mxu0 %vm2499_vm0, %v2498_v0 }
 0x201   : > { %1938 = vmatpush3.bf16.msra.mxu0 %v1171_v61  ;;  %2021 = vmatpush3.bf16.msra.mxu1 %v1171_v61 }
 0x202   : > { %1939 = vmatprep.subr.bf16.mxu0 %v2498_v0  ;;  %2018 = vmatprep.subr.bf16.mxu1 %v2498_v0 }
 0x205   : > { %1940 = vmatpush3.bf16.msra.mxu0 %v1172_v60  ;;  %2022 = vmatpush3.bf16.msra.mxu1 %v1172_v60 }
 0x206   : > { %1941 = vmatprep.subr.bf16.mxu0 %v2498_v0  ;;  %2019 = vmatprep.subr.bf16.mxu1 %v2498_v0 }
 0x207   : > { %1922 = vmatmul.mubr.bf16.gmra.mrb[40].mxu0 %v909_v38  ;;  %v891_v38 = vpop.f32.mrb[13].mxu1 }
 0x208   : > { %1925 = vmatprep.mubr.msk.bf16.mxu0 %vm2499_vm0, %v2498_v0  ;;  %v1900_v40 = vpop.f32.mrb[14].mxu1  ;;  %v892_v44 = vadd.f32 %v2967_v56, %v891_v38 }
 0x209   : > { %v894_v42 = vpop.f32.mrb[15].mxu1 }
 0x20f   : > { %1926 = vmatmul.mubr.bf16.gmra.mrb[44].mxu0 %v910_v45  ;;  %v895_v45 = vadd.f32 %v2967_v56, %v894_v42 }
 0x210   : > { %1929 = vmatprep.mubr.msk.bf16.mxu0 %vm2499_vm0, %v2498_v0 }
 0x211   : > { %v1173_v48 = vpack.c.bf16 %v895_v45, %v892_v44 }
 0x213   : > { %1942 = vmatpush3.bf16.msra.mxu0 %v1173_v48  ;;  %2023 = vmatpush3.bf16.msra.mxu1 %v1173_v48 }
 0x214   : > { %1943 = vmatprep.subr.bf16.mxu0 %v2498_v0  ;;  %2020 = vmatprep.subr.bf16.mxu1 %v2498_v0 }
 0x217   : > { %1930 = vmatmul.mubr.bf16.gmra.mrb[48].mxu0 %v911_v50  ;;  %v903_v50 = vadd.f32 %v1900_v40, %v2967_v56 }
 0x218   : > { %1933 = vmatprep.mubr.msk.bf16.mxu0 %vm2499_vm0, %v2498_v0 }
 0x219   : > { %v1174_v25 = vpack.c.bf16 %v903_v50, %v900_v47 }
 0x21b   : > { %1944 = vmatpush3.bf16.msra.mxu0 %v1174_v25  ;;  %2024 = vmatpush3.bf16.msra.mxu1 %v1174_v25 }
 0x21c   : > { %1973 = vmatprep.subr.bf16.mxu1 %v2498_v0 }
 0x21f   : > { %1934 = vmatmul.mubr.bf16.gmra.mrb[52].mxu0 %v912_v55 }
 0x220   : > { %1945 = vmatprep.mubr.msk.bf16.mxu0 %vm2499_vm0, %v2498_v0 }
 0x2c2   : > { %v951_v1 = vpop.f32.mrb[28].mxu0 }
 0x2c3   : > { %v1006_v2 = vmul.f32 0.17677669, %v951_v1  ;;  %v1911_v3 = vpop.f32.mrb[29].mxu0 }
 0x2c4   : > { %v954_v4 = vpop.f32.mrb[30].mxu0 }
 0x2c5   : > { %v1007_v7 = vmul.f32 0.17677669, %v954_v4  ;;  %v2982_v8 = vsel %vm1022_vm1, %v1006_v2, -1e+30  ;;  %v1912_v9 = vpop.f32.mrb[31].mxu0 }
 0x2c6   : > { %v1038_v12 = vsel %vm1037_vm2, %v2982_v8, -inf }
 0x2c7   : > { %1039 = vmax.xlane.f32.xlu0 %v1038_v12  ;;  %v2988_v14 = vsel %vm1022_vm1, %v1007_v7, -1e+30 }
 0x2c8   : > { %v1041_v16 = vsel %vm1037_vm2, %v2988_v14, -inf }
 0x2ca   : > { %v959_v15 = vpop.f32.mrb[32].mxu0 }
 0x2cb   : > { %v1008_v17 = vmul.f32 0.17677669, %v959_v15  ;;  %1042 = vmax.xlane.f32.xlu0 %v1041_v16  ;;  %v1915_v18 = vpop.f32.mrb[33].mxu0 }
 0x2cc   : > { %v962_v19 = vpop.f32.mrb[34].mxu0 }
 0x2cd   : > { %v1009_v20 = vmul.f32 0.17677669, %v962_v19  ;;  %v2994_v21 = vsel %vm1022_vm1, %v1008_v17, -1e+30  ;;  %v1916_v22 = vpop.f32.mrb[35].mxu0 }
 0x2ce   : > { %v1044_v23 = vsel %vm1037_vm2, %v2994_v21, -inf }
 0x2cf   : > { %1045 = vmax.xlane.f32.xlu1 %v1044_v23  ;;  %v3000_v24 = vsel %vm1022_vm1, %v1009_v20, -1e+30 }
 0x2d0   : > { %v1047_v28 = vsel %vm1037_vm2, %v3000_v24, -inf }
 0x2d2   : > { %v967_v27 = vpop.f32.mrb[36].mxu0 }
 0x2d3   : > { %v1010_v29 = vmul.f32 0.17677669, %v967_v27  ;;  %1048 = vmax.xlane.f32.xlu1 %v1047_v28  ;;  %v1919_v30 = vpop.f32.mrb[37].mxu0 }
 0x2d4   : > { %v970_v31 = vpop.f32.mrb[38].mxu0 }
 0x2d5   : > { %v1011_v33 = vmul.f32 0.17677669, %v970_v31  ;;  %v3006_v36 = vsel %vm1022_vm1, %v1010_v29, -1e+30  ;;  %v1920_v37 = vpop.f32.mrb[39].mxu0 }
 0x2d6   : > { %v1050_v39 = vsel %vm1037_vm2, %v3006_v36, -inf }
 0x2d7   : > { %1051 = vmax.xlane.f32.xlu0 %v1050_v39  ;;  %v3012_v41 = vsel %vm1022_vm1, %v1011_v33, -1e+30 }
 0x2d8   : > { %v1053_v43 = vsel %vm1037_vm2, %v3012_v41, -inf }
 0x2d9   : > { %1054 = vmax.xlane.f32.xlu1 %v1053_v43 }
 0x2da   : > { %v975_v46 = vpop.f32.mrb[40].mxu0 }
 0x2db   : > { %v1012_v5 = vmul.f32 0.17677669, %v975_v46  ;;  %v1923_v6 = vpop.f32.mrb[41].mxu0 }
 0x2dc   : > { %v978_v49 = vpop.f32.mrb[42].mxu0 }
 0x2dd   : > { %v1013_v51 = vmul.f32 0.17677669, %v978_v49  ;;  %v3022_v52 = vsel %vm1022_vm1, %v1012_v5, -1e+30  ;;  %v1924_v53 = vpop.f32.mrb[43].mxu0 }
 0x2de   : > { %v1056_v54 = vsel %vm1037_vm2, %v3022_v52, -inf }
 0x2df   : > { %1057 = vmax.xlane.f32.xlu0 %v1056_v54  ;;  %v3030_v26 = vsel %vm1022_vm1, %v1013_v51, -1e+30 }
 0x2e0   : > { %v1059_v55 = vsel %vm1037_vm2, %v3030_v26, -inf }
 0x2e1   : > { %1060 = vmax.xlane.f32.xlu1 %v1059_v55 }
 0x2e2   : > { %v983_v56 = vpop.f32.mrb[44].mxu0 }
 0x2e3   : > { %v1014_v57 = vmul.f32 0.17677669, %v983_v56  ;;  %v1927_v10 = vpop.f32.mrb[45].mxu0 }
 0x2e4   : > { %v986_v11 = vpop.f32.mrb[46].mxu0 }
 0x2e5   : > { %v1015_v13 = vmul.f32 0.17677669, %v986_v11  ;;  %v3037_v34 = vsel %vm1022_vm1, %v1014_v57, -1e+30  ;;  %v1928_v35 = vpop.f32.mrb[47].mxu0 }
 0x2e6   : > { %v1062_v58 = vsel %vm1037_vm2, %v3037_v34, -inf }
 0x2e7   : > { %1063 = vmax.xlane.f32.xlu0 %v1062_v58  ;;  %v3043_v59 = vsel %vm1022_vm1, %v1015_v13, -1e+30 }
 0x2e8   : > { %v1065_v60 = vsel %vm1037_vm2, %v3043_v59, -inf }
 0x2e9   : > { %1066 = vmax.xlane.f32.xlu1 %v1065_v60 }
 0x2ea   : > { %v991_v61 = vpop.f32.mrb[48].mxu0 }
 0x2eb   : > { %v1016_v62 = vmul.f32 0.17677669, %v991_v61  ;;  %v1931_v1 = vpop.f32.mrb[49].mxu0 }
 0x2ec   : > { %v994_v2 = vpop.f32.mrb[50].mxu0 }
 0x2ed   : > { %v1017_v3 = vmul.f32 0.17677669, %v994_v2  ;;  %v3049_v4 = vsel %vm1022_vm1, %v1016_v62, -1e+30  ;;  %v1932_v7 = vpop.f32.mrb[51].mxu0 }
 0x2ee   : > { %v1068_v9 = vsel %vm1037_vm2, %v3049_v4, -inf }
 0x2ef   : > { %1069 = vmax.xlane.f32.xlu0 %v1068_v9  ;;  %v3055_v12 = vsel %vm1022_vm1, %v1017_v3, -1e+30 }
 0x2f0   : > { %v1071_v15 = vsel %vm1037_vm2, %v3055_v12, -inf }
 0x2f1   : > { %1072 = vmax.xlane.f32.xlu1 %v1071_v15 }
 0x2f2   : > { %v999_v16 = vpop.f32.mrb[52].mxu0 }
 0x2f3   : > { %v1018_v17 = vmul.f32 0.17677669, %v999_v16  ;;  %v1935_v18 = vpop.f32.mrb[53].mxu0 }
 0x2f4   : > { %v1002_v19 = vpop.f32.mrb[54].mxu0 }
 0x2f5   : > { %v1019_v20 = vmul.f32 0.17677669, %v1002_v19  ;;  %v3061_v22 = vsel %vm1022_vm1, %v1018_v17, -1e+30  ;;  %v1936_v23 = vpop.f32.mrb[55].mxu0 }
 0x2f6   : > { %v1074_v27 = vsel %vm1037_vm2, %v3061_v22, -inf }
 0x2f7   : > { %1075 = vmax.xlane.f32.xlu0 %v1074_v27  ;;  %v3067_v28 = vsel %vm1022_vm1, %v1019_v20, -1e+30 }
 0x2f8   : > { %v1077_v29 = vsel %vm1037_vm2, %v3067_v28, -inf }
 0x2f9   : > { %1078 = vmax.xlane.f32.xlu1 %v1077_v29 }
 0x354   : > { %v1040_v30 = vpop.xlane.xlu0 %1039 }
 0x355   : > { %v1080_v31 = vsub.f32 %v2982_v8, %v1040_v30 }
 0x357   : > { %v1094_v32 = vmul.f32 1.442695, %v1080_v31 }
 0x358   : > { %v1043_v33 = vpop.xlane.xlu0 %1042 }
 0x359   : > { %2158 = vpow2.f32 %v1094_v32  ;;  %v1081_v37 = vsub.f32 %v2988_v14, %v1043_v33 }
 0x35b   : > { %v1096_v38 = vmul.f32 1.442695, %v1081_v37 }
 0x35c   : > { %v1046_v39 = vpop.xlane.xlu1 %1045 }
 0x35d   : > { %2160 = vpow2.f32 %v1096_v38  ;;  %v1082_v40 = vsub.f32 %v2994_v21, %v1046_v39 }
 0x35f   : > { %v1098_v63 = vmul.f32 1.442695, %v1082_v40 }
 0x360   : > { %v1049_v42 = vpop.xlane.xlu1 %1048 }
 0x361   : > { %2162 = vpow2.f32 %v1098_v63  ;;  %v1083_v43 = vsub.f32 %v3000_v24, %v1049_v42 }
 0x363   : > { %v2159_v44 = vpop.eup %2158  ;;  %v1100_v45 = vmul.f32 1.442695, %v1083_v43 }
 0x364   : > { %v1052_v46 = vpop.xlane.xlu0 %1051  ;;  %v1122_v8 = vsel %vm1037_vm2, %v2159_v44, 0.0 }
 0x365   : > { %2164 = vpow2.f32 %v1100_v45  ;;  %v1084_v47 = vsub.f32 %v3006_v36, %v1052_v46  ;;  %1123 = vadd.xlane.f32.xlu0 %v1122_v8  ;;  %v2150_v8 = vld [vmem:[#allocation9 + $0xc0] sm:$0xff]  }
 0x366   : > { %v1055_v14 = vpop.xlane.xlu1 %1054 }
 0x367   : > { %v2161_v48 = vpop.eup %2160  ;;  %v1102_v5 = vmul.f32 1.442695, %v1084_v47  ;;  %v1085_v6 = vsub.f32 %v3012_v41, %v1055_v14  ;;  %v2151_v47 = vld [vmem:[#allocation9 + $0xc8] sm:$0xff]   ;;  %v2152_v14 = vld [vmem:[#allocation9 + $0xd0] sm:$0xff]  }
 0x368   : > { %v1164_v21 = vpack.c.bf16 %v2161_v48, %v2159_v44  ;;  %v1125_v49 = vsel %vm1037_vm2, %v2161_v48, 0.0  ;;  %v2153_v48 = vld [vmem:[#allocation9 + $0xd8] sm:$0xff]  }
 0x369   : > { %2166 = vpow2.f32 %v1102_v5  ;;  %v1104_v50 = vmul.f32 1.442695, %v1085_v6  ;;  %1126 = vadd.xlane.f32.xlu1 %v1125_v49  ;;  %v2154_v5 = vld [vmem:[#allocation9 + $0xe0] sm:$0xff]   ;;  %v2155_v6 = vld [vmem:[#allocation9 + $0xe8] sm:$0xff]   ;;  %v2157_v49 = vld [vmem:[#allocation9 + $0xf8] sm:$0xff]  }
 0x36a   : > { %1946 = vmatmul.mubr.msk.bf16.vlgmr.msra.gmra.mrb[56].mxu0 %vm1037_vm2, %v1164_v21  ;;  %v2156_v21 = vld [vmem:[#allocation9 + $0xf0] sm:$0xff]  }
 0x36b   : > { %v2163_v24 = vpop.eup %2162  ;;  %2168 = vpow2.f32 %v1104_v50  ;;  %1949 = vmatprep.mubr.msk.bf16.mxu0 %vm2499_vm0, %v2498_v0 }
 0x36c   : > { %v1058_v36 = vpop.xlane.xlu0 %1057  ;;  %v1128_v51 = vsel %vm1037_vm2, %v2163_v24, 0.0 }
 0x36d   : > { %v1086_v53 = vsub.f32 %v3022_v52, %v1058_v36  ;;  %1129 = vadd.xlane.f32.xlu0 %v1128_v51 }
 0x36e   : > { %v1061_v41 = vpop.xlane.xlu1 %1060 }
 0x36f   : > { %v2165_v54 = vpop.eup %2164  ;;  %v1106_v25 = vmul.f32 1.442695, %v1086_v53  ;;  %v1087_v55 = vsub.f32 %v3030_v26, %v1061_v41 }
 0x370   : > { %v1131_v56 = vsel %vm1037_vm2, %v2165_v54, 0.0  ;;  %v1165_v57 = vpack.c.bf16 %v2165_v54, %v2163_v24 }
 0x371   : > { %2170 = vpow2.f32 %v1106_v25  ;;  %v1108_v10 = vmul.f32 1.442695, %v1087_v55  ;;  %1132 = vadd.xlane.f32.xlu1 %v1131_v56 }
 0x372   : > { %1950 = vmatmul.mubr.msk.bf16.gmra.mrb[60].mxu0 %vm1037_vm2, %v1165_v57 }
 0x373   : > { %v2167_v11 = vpop.eup %2166  ;;  %2172 = vpow2.f32 %v1108_v10  ;;  %1953 = vmatprep.mubr.msk.bf16.mxu0 %vm2499_vm0, %v2498_v0 }
 0x374   : > { %v1064_v52 = vpop.xlane.xlu0 %1063  ;;  %v1134_v13 = vsel %vm1037_vm2, %v2167_v11, 0.0 }
 0x375   : > { %v2169_v35 = vpop.eup %2168  ;;  %v1088_v58 = vsub.f32 %v3037_v34, %v1064_v52  ;;  %1135 = vadd.xlane.f32.xlu0 %v1134_v13 }
 0x376   : > { %v1067_v26 = vpop.xlane.xlu1 %1066  ;;  %v1137_v60 = vsel %vm1037_vm2, %v2169_v35, 0.0  ;;  %v1166_v1 = vpack.c.bf16 %v2169_v35, %v2167_v11 }
 0x377   : > { %v1110_v61 = vmul.f32 1.442695, %v1088_v58  ;;  %v1089_v62 = vsub.f32 %v3043_v59, %v1067_v26  ;;  %1138 = vadd.xlane.f32.xlu1 %v1137_v60 }
 0x379   : > { %2174 = vpow2.f32 %v1110_v61  ;;  %v1112_v2 = vmul.f32 1.442695, %v1089_v62 }
 0x37a   : > { %1954 = vmatmul.mubr.msk.bf16.gmra.mrb[64].mxu0 %vm1037_vm2, %v1166_v1 }
 0x37b   : > { %v2171_v3 = vpop.eup %2170  ;;  %2176 = vpow2.f32 %v1112_v2 }
 0x37c   : > { %v1070_v7 = vpop.xlane.xlu0 %1069  ;;  %v1140_v9 = vsel %vm1037_vm2, %v2171_v3, 0.0 }
 0x37d   : > { %v2173_v15 = vpop.eup %2172  ;;  %v1090_v34 = vsub.f32 %v3049_v4, %v1070_v7  ;;  %1141 = vadd.xlane.f32.xlu0 %v1140_v9 }
 0x37e   : > { %v1167_v16 = vpack.c.bf16 %v2173_v15, %v2171_v3  ;;  %v1073_v17 = vpop.xlane.xlu1 %1072  ;;  %v1143_v18 = vsel %vm1037_vm2, %v2173_v15, 0.0 }
 0x37f   : > { %v1114_v59 = vmul.f32 1.442695, %v1090_v34  ;;  %v1091_v19 = vsub.f32 %v3055_v12, %v1073_v17  ;;  %1144 = vadd.xlane.f32.xlu1 %v1143_v18 }
 0x380   : > { %1958 = vmatmul.mubr.msk.bf16.vlgmr.msra.gmra.mrb[16].mxu1 %vm1037_vm2, %v1167_v16 }
 0x381   : > { %2178 = vpow2.f32 %v1114_v59  ;;  %v1116_v20 = vmul.f32 1.442695, %v1091_v19  ;;  %1961 = vmatprep.mubr.msk.bf16.mxu1 %vm2499_vm0, %v2498_v0  ;;  %1974 = vmatpush3.bf16.msra.mxu1 %v2150_v8 }
 0x382   : > { %1975 = vmatprep.subr.bf16.mxu1 %v2498_v0 }
 0x383   : > { %v2175_v23 = vpop.eup %2174  ;;  %2180 = vpow2.f32 %v1116_v20 }
 0x384   : > { %v1076_v27 = vpop.xlane.xlu0 %1075  ;;  %v1146_v4 = vsel %vm1037_vm2, %v2175_v23, 0.0 }
 0x385   : > { %v2177_v29 = vpop.eup %2176  ;;  %v1092_v30 = vsub.f32 %v3061_v22, %v1076_v27  ;;  %1147 = vadd.xlane.f32.xlu0 %v1146_v4  ;;  %1976 = vmatpush3.bf16.msra.mxu1 %v2151_v47 }
 0x386   : > { %v1079_v31 = vpop.xlane.xlu1 %1078  ;;  %v1149_v12 = vsel %vm1037_vm2, %v2177_v29, 0.0  ;;  %v1168_v32 = vpack.c.bf16 %v2177_v29, %v2175_v23  ;;  %1977 = vmatprep.subr.bf16.mxu1 %v2498_v0 }
 0x387   : > { %v1118_v33 = vmul.f32 1.442695, %v1092_v30  ;;  %v1093_v37 = vsub.f32 %v3067_v28, %v1079_v31  ;;  %1150 = vadd.xlane.f32.xlu1 %v1149_v12 }
 0x388   : > { %1962 = vmatmul.mubr.msk.bf16.gmra.mrb[20].mxu1 %vm1037_vm2, %v1168_v32 }
 0x389   : > { %2182 = vpow2.f32 %v1118_v33  ;;  %v1120_v38 = vmul.f32 1.442695, %v1093_v37  ;;  %1965 = vmatprep.mubr.msk.bf16.mxu1 %vm2499_vm0, %v2498_v0  ;;  %1978 = vmatpush3.bf16.msra.mxu1 %v2152_v14 }
 0x38a   : > { %1979 = vmatprep.subr.bf16.mxu1 %v2498_v0 }
 0x38b   : > { %v2179_v39 = vpop.eup %2178  ;;  %2184 = vpow2.f32 %v1120_v38 }
 0x38c   : > { %v1152_v22 = vsel %vm1037_vm2, %v2179_v39, 0.0 }
 0x38d   : > { %v2181_v40 = vpop.eup %2180  ;;  %1153 = vadd.xlane.f32.xlu0 %v1152_v22  ;;  %1980 = vmatpush3.bf16.msra.mxu1 %v2153_v48 }
 0x38e   : > { %v1155_v63 = vsel %vm1037_vm2, %v2181_v40, 0.0  ;;  %v1169_v42 = vpack.c.bf16 %v2181_v40, %v2179_v39  ;;  %1981 = vmatprep.subr.bf16.mxu1 %v2498_v0 }
 0x38f   : > { %1156 = vadd.xlane.f32.xlu1 %v1155_v63 }
 0x390   : > { %1966 = vmatmul.mubr.msk.bf16.gmra.mrb[24].mxu1 %vm1037_vm2, %v1169_v42 }
 0x391   : > { %1969 = vmatprep.mubr.msk.bf16.mxu1 %vm2499_vm0, %v2498_v0  ;;  %1982 = vmatpush3.bf16.msra.mxu1 %v2154_v5 }
 0x392   : > { %1983 = vmatprep.subr.bf16.mxu1 %v2498_v0 }
 0x393   : > { %v2183_v28 = vpop.eup %2182 }
 0x394   : > { %v1158_v43 = vsel %vm1037_vm2, %v2183_v28, 0.0 }
 0x395   : > { %v2185_v44 = vpop.eup %2184  ;;  %1159 = vadd.xlane.f32.xlu0 %v1158_v43  ;;  %1984 = vmatpush3.bf16.msra.mxu1 %v2155_v6 }
 0x396   : > { %v1161_v45 = vsel %vm1037_vm2, %v2185_v44, 0.0  ;;  %v1170_v46 = vpack.c.bf16 %v2185_v44, %v2183_v28  ;;  %1985 = vmatprep.subr.bf16.mxu1 %v2498_v0 }
 0x397   : > { %1162 = vadd.xlane.f32.xlu1 %v1161_v45 }
 0x398   : > { %1970 = vmatmul.mubr.msk.bf16.gmra.mrb[28].mxu1 %vm1037_vm2, %v1170_v46 }
 0x399   : > { %1989 = vmatprep.mubr.msk.bf16.mxu1 %vm2499_vm0, %v2498_v0  ;;  %1986 = vmatpush3.bf16.msra.mxu1 %v2156_v21 }
 0x39a   : > { %1987 = vmatprep.subr.bf16.mxu1 %v2498_v0 }
 0x39d   : > { %1988 = vmatpush3.bf16.msra.mxu1 %v2157_v49 }
 0x3f2   : > { %v1124_v50 = vpop.xlane.xlu0 %1123 }
 0x3f3   : > { %2186 = vrcp.f32 %v1124_v50 }
 0x3f6   : > { %v1127_v24 = vpop.xlane.xlu1 %1126 }
 0x3f7   : > { %2188 = vrcp.f32 %v1127_v24 }
 0x3fa   : > { %v1130_v36 = vpop.xlane.xlu0 %1129 }
 0x3fb   : > { %2190 = vrcp.f32 %v1130_v36 }
 0x3fd   : > { %v2187_v41 = vpop.eup %2186 }
 0x3fe   : > { %v1133_v51 = vpop.xlane.xlu1 %1132 }
 0x3ff   : > { %2192 = vrcp.f32 %v1133_v51 }
 0x401   : > { %v2189_v25 = vpop.eup %2188 }
 0x402   : > { %v1136_v11 = vpop.xlane.xlu0 %1135 }
 0x403   : > { %2194 = vrcp.f32 %v1136_v11 }
 0x404   : > { %v1139_v52 = vpop.xlane.xlu1 %1138 }
 0x405   : > { %2196 = vrcp.f32 %v1139_v52  ;;  %v2191_v58 = vpop.eup %2190 }
 0x409   : > { %v2193_v60 = vpop.eup %2192 }
 0x40a   : > { %v1142_v61 = vpop.xlane.xlu0 %1141 }
 0x40b   : > { %2198 = vrcp.f32 %v1142_v61  ;;  %v2214_v61 = vld [vmem:[%s2813_s19] sm:$0xff] }
 0x40c   : > { %v1145_v1 = vpop.xlane.xlu1 %1144 }
 0x40d   : > { %2200 = vrcp.f32 %v1145_v1  ;;  %v2195_v34 = vpop.eup %2194 }
 0x40f   : > { %v2197_v17 = vpop.eup %2196 }
 0x412   : > { %v1148_v18 = vpop.xlane.xlu0 %1147 }
 0x413   : > { %2202 = vrcp.f32 %v1148_v18 }
 0x414   : > { %v1151_v19 = vpop.xlane.xlu1 %1150 }
 0x415   : > { %2204 = vrcp.f32 %v1151_v19  ;;  %v2199_v30 = vpop.eup %2198  ;;  %v2217_v19 = vld [vmem:[%s2813_s19 + $0x18] sm:$0xff] }
 0x417   : > { %v2201_v12 = vpop.eup %2200 }
 0x41a   : > { %v1154_v39 = vpop.xlane.xlu0 %1153 }
 0x41b   : > { %2206 = vrcp.f32 %v1154_v39 }
 0x41c   : > { %v1157_v22 = vpop.xlane.xlu1 %1156 }
 0x41d   : > { %2208 = vrcp.f32 %v1157_v22  ;;  %v2203_v42 = vpop.eup %2202 }
 0x41f   : > { %v2205_v43 = vpop.eup %2204 }
 0x422   : > { %v1160_v47 = vpop.xlane.xlu0 %1159 }
 0x423   : > { %2210 = vrcp.f32 %v1160_v47 }
 0x424   : > { %v1163_v14 = vpop.xlane.xlu1 %1162 }
 0x425   : > { %2212 = vrcp.f32 %v1163_v14  ;;  %v2207_v6 = vpop.eup %2206 }
 0x427   : > { %v2209_v49 = vpop.eup %2208 }
 0x43d   : > { %v1230_v53 = vpop.f32.mrb[56].mxu0 }
 0x43e   : > { %v1947_v54 = vpop.f32.mrb[57].mxu0  ;;  %v1299_v56 = vmul.f32 %v2187_v41, %v1230_v53 }
 0x43f   : > { %v1233_v55 = vpop.f32.mrb[58].mxu0  ;;  %v2211_v54 = vpop.eup %2210 }
 0x440   : > { %v1300_v57 = vmul.f32 %v2189_v25, %v1233_v55  ;;  %v1948_v10 = vpop.f32.mrb[59].mxu0  ;;  %v2213_v55 = vpop.eup %2212 }
 0x442   : > { %v1313_v13 = vpack.c.bf16 %v1300_v57, %v1299_v56 }
 0x444   : > { %1990 = vmatmul.mubr.bf16.vlgmr.msra.gmra.mrb[32].mxu1 %v1313_v13  ;;  %v3137_v13 = vld [vmem:[#allocation10 + $0x3] ss:$0 sm:$0xff] }
 0x445   : > { %v1238_v35 = vpop.f32.mrb[60].mxu0  ;;  %1993 = vmatprep.mubr.msk.bf16.mxu1 %vm2499_vm0, %v2498_v0 }
 0x446   : > { %v1951_v26 = vpop.f32.mrb[61].mxu0  ;;  %v1301_v2 = vmul.f32 %v2191_v58, %v1238_v35 }
 0x447   : > { %v1241_v62 = vpop.f32.mrb[62].mxu0 }
 0x448   : > { %v1302_v3 = vmul.f32 %v2193_v60, %v1241_v62  ;;  %v1952_v7 = vpop.f32.mrb[63].mxu0 }
 0x44a   : > { %v1314_v9 = vpack.c.bf16 %v1302_v3, %v1301_v2  ;;  %v2215_v2 = vld [vmem:[%s2813_s19 + $0x8] sm:$0xff] }
 0x44c   : > { %1994 = vmatmul.mubr.bf16.gmra.mrb[36].mxu1 %v1314_v9 }
 0x44d   : > { %v1246_v15 = vpop.f32.mrb[64].mxu0  ;;  %1997 = vmatprep.mubr.msk.bf16.mxu1 %vm2499_vm0, %v2498_v0 }
 0x44e   : > { %v1955_v16 = vpop.f32.mrb[65].mxu0  ;;  %v1303_v20 = vmul.f32 %v2195_v34, %v1246_v15 }
 0x44f   : > { %v1249_v59 = vpop.f32.mrb[66].mxu0  ;;  %v2216_v16 = vld [vmem:[%s2813_s19 + $0x10] sm:$0xff] }
 0x450   : > { %v1304_v23 = vmul.f32 %v2197_v17, %v1249_v59  ;;  %v1956_v27 = vpop.f32.mrb[67].mxu0 }
 0x452   : > { %v1315_v4 = vpack.c.bf16 %v1304_v23, %v1303_v20 }
 0x453   : > { %v1254_v29 = vpop.f32.mrb[16].mxu1 }
 0x454   : > { %v1959_v31 = vpop.f32.mrb[17].mxu1  ;;  %1998 = vmatmul.mubr.bf16.gmra.mrb[40].mxu1 %v1315_v4  ;;  %v1305_v33 = vmul.f32 %v2199_v30, %v1254_v29  ;;  %v2218_v30 = vld [vmem:[%s2813_s19 + $0x20] sm:$0xff] }
 0x455   : > { %v1257_v32 = vpop.f32.mrb[18].mxu1  ;;  %2001 = vmatprep.mubr.msk.bf16.mxu1 %vm2499_vm0, %v2498_v0 }
 0x456   : > { %v1306_v37 = vmul.f32 %v2201_v12, %v1257_v32  ;;  %v1960_v38 = vpop.f32.mrb[19].mxu1 }
 0x458   : > { %v1316_v40 = vpack.c.bf16 %v1306_v37, %v1305_v33  ;;  %v2219_v33 = vld [vmem:[%s2813_s19 + $0x28] sm:$0xff] }
 0x45b   : > { %v1262_v63 = vpop.f32.mrb[20].mxu1 }
 0x45c   : > { %v1963_v28 = vpop.f32.mrb[21].mxu1  ;;  %2002 = vmatmul.mubr.bf16.gmra.mrb[44].mxu1 %v1316_v40  ;;  %v1307_v45 = vmul.f32 %v2203_v42, %v1262_v63  ;;  %v2220_v63 = vld [vmem:[%s2813_s19 + $0x30] sm:$0xff] }
 0x45d   : > { %v1265_v44 = vpop.f32.mrb[22].mxu1  ;;  %2005 = vmatprep.mubr.msk.bf16.mxu1 %vm2499_vm0, %v2498_v0 }
 0x45e   : > { %v1308_v46 = vmul.f32 %v2205_v43, %v1265_v44  ;;  %v1964_v8 = vpop.f32.mrb[23].mxu1  ;;  %v2221_v44 = vld [vmem:[%s2813_s19 + $0x38] sm:$0xff] }
 0x460   : > { %v1317_v48 = vpack.c.bf16 %v1308_v46, %v1307_v45 }
 0x463   : > { %v1270_v5 = vpop.f32.mrb[24].mxu1 }
 0x464   : > { %v1967_v21 = vpop.f32.mrb[25].mxu1  ;;  %2006 = vmatmul.mubr.bf16.gmra.mrb[48].mxu1 %v1317_v48  ;;  %v1309_v24 = vmul.f32 %v2207_v6, %v1270_v5  ;;  %v2222_v48 = vld [vmem:[%s2813_s19 + $0x40] sm:$0xff] }
 0x465   : > { %v1273_v50 = vpop.f32.mrb[26].mxu1  ;;  %2009 = vmatprep.mubr.msk.bf16.mxu1 %vm2499_vm0, %v2498_v0 }
 0x466   : > { %v1310_v36 = vmul.f32 %v2209_v49, %v1273_v50  ;;  %v1968_v51 = vpop.f32.mrb[27].mxu1  ;;  %v2223_v49 = vld [vmem:[%s2813_s19 + $0x48] sm:$0xff] }
 0x468   : > { %v1318_v53 = vpack.c.bf16 %v1310_v36, %v1309_v24 }
 0x46b   : > { %v1278_v41 = vpop.f32.mrb[28].mxu1 }
 0x46c   : > { %v1971_v25 = vpop.f32.mrb[29].mxu1  ;;  %2010 = vmatmul.mubr.bf16.gmra.mrb[52].mxu1 %v1318_v53  ;;  %v1311_v57 = vmul.f32 %v2211_v54, %v1278_v41  ;;  %v2224_v41 = vld [vmem:[%s2813_s19 + $0x50] sm:$0xff] }
 0x46d   : > { %v1281_v56 = vpop.f32.mrb[30].mxu1  ;;  %2013 = vmatprep.mubr.msk.bf16.mxu1 %vm2499_vm0, %v2498_v0 }
 0x46e   : > { %v1312_v10 = vmul.f32 %v2213_v55, %v1281_v56  ;;  %v1972_v11 = vpop.f32.mrb[31].mxu1  ;;  %v2225_v56 = vld [vmem:[%s2813_s19 + $0x58] sm:$0xff] }
 0x470   : > { %v1319_v52 = vpack.c.bf16 %v1312_v10, %v1311_v57 }
 0x474   : > { %2014 = vmatmul.mubr.bf16.gmra.mrb[56].mxu1 %v1319_v52 }
 0x517   : > { %v1427_v35 = vpop.f32.mrb[32].mxu1 }
 0x518   : > { %v1428_v58 = vadd.f32 %v3137_v13, %v1427_v35  ;;  %v1991_v26 = vpop.f32.mrb[33].mxu1 }
 0x519   : > { %v1430_v60 = vpop.f32.mrb[34].mxu1 }
 0x51a   : > { %v1482_v62 = vadd.f32 %v2214_v61, %v1428_v58  ;;  %v1431_v1 = vadd.f32 %v3137_v13, %v1430_v60  ;;  %v1992_v0 = vpop.f32.mrb[35].mxu1  ;;  %v2226_v58 = vld [vmem:[%s2813_s19 + $0x60] sm:$0xff] }
 0x51c   : > { %1496 = vst [vmem:[%s3144_s20] sm:$0xff] %v1482_v62  ;;  %v1483_v3 = vadd.f32 %v2215_v2, %v1431_v1  ;;  %v2227_v62 = vld [vmem:[%s2813_s19 + $0x68] sm:$0xff] }
 0x51e   : > { %1497 = vst [vmem:[%s3144_s20 + $0x8] sm:$0xff] %v1483_v3 }
 0x51f   : > { %v1435_v7 = vpop.f32.mrb[36].mxu1 }
 0x520   : > { %v1436_v9 = vadd.f32 %v3137_v13, %v1435_v7  ;;  %v1995_v15 = vpop.f32.mrb[37].mxu1 }
 0x521   : > { %v1438_v34 = vpop.f32.mrb[38].mxu1 }
 0x522   : > { %v1484_v17 = vadd.f32 %v2216_v16, %v1436_v9  ;;  %v1439_v18 = vadd.f32 %v3137_v13, %v1438_v34  ;;  %v1996_v59 = vpop.f32.mrb[39].mxu1 }
 0x524   : > { %1498 = vst [vmem:[%s3144_s20 + $0x10] sm:$0xff] %v1484_v17  ;;  %v1485_v20 = vadd.f32 %v2217_v19, %v1439_v18 }
 0x526   : > { %1499 = vst [vmem:[%s3144_s20 + $0x18] sm:$0xff] %v1485_v20 }
 0x527   : > { %v1443_v23 = vpop.f32.mrb[40].mxu1 }
 0x528   : > { %v1444_v27 = vadd.f32 %v3137_v13, %v1443_v23  ;;  %v1999_v4 = vpop.f32.mrb[41].mxu1 }
 0x529   : > { %v1446_v29 = vpop.f32.mrb[42].mxu1 }
 0x52a   : > { %v1486_v31 = vadd.f32 %v2218_v30, %v1444_v27  ;;  %v1447_v12 = vadd.f32 %v3137_v13, %v1446_v29  ;;  %v2000_v32 = vpop.f32.mrb[43].mxu1 }
 0x52c   : > { %1500 = vst [vmem:[%s3144_s20 + $0x20] sm:$0xff] %v1486_v31  ;;  %v1487_v37 = vadd.f32 %v2219_v33, %v1447_v12 }
 0x52e   : > { %1501 = vst [vmem:[%s3144_s20 + $0x28] sm:$0xff] %v1487_v37 }
 0x52f   : > { %v1451_v38 = vpop.f32.mrb[44].mxu1 }
 0x530   : > { %v1452_v39 = vadd.f32 %v3137_v13, %v1451_v38  ;;  %v2003_v22 = vpop.f32.mrb[45].mxu1 }
 0x531   : > { %v1454_v40 = vpop.f32.mrb[46].mxu1 }
 0x532   : > { %v1488_v42 = vadd.f32 %v2220_v63, %v1452_v39  ;;  %v1455_v28 = vadd.f32 %v3137_v13, %v1454_v40  ;;  %v2004_v43 = vpop.f32.mrb[47].mxu1 }
 0x534   : > { %1502 = vst [vmem:[%s3144_s20 + $0x30] sm:$0xff] %v1488_v42  ;;  %v1489_v45 = vadd.f32 %v2221_v44, %v1455_v28 }
 0x536   : > { %1503 = vst [vmem:[%s3144_s20 + $0x38] sm:$0xff] %v1489_v45 }
 0x537   : > { %v1459_v46 = vpop.f32.mrb[48].mxu1 }
 0x538   : > { %v1460_v8 = vadd.f32 %v3137_v13, %v1459_v46  ;;  %v2007_v47 = vpop.f32.mrb[49].mxu1 }
 0x539   : > { %v1462_v14 = vpop.f32.mrb[50].mxu1 }
 0x53a   : > { %v1490_v5 = vadd.f32 %v2222_v48, %v1460_v8  ;;  %v1463_v6 = vadd.f32 %v3137_v13, %v1462_v14  ;;  %v2008_v21 = vpop.f32.mrb[51].mxu1 }
 0x53c   : > { %1504 = vst [vmem:[%s3144_s20 + $0x40] sm:$0xff] %v1490_v5  ;;  %v1491_v50 = vadd.f32 %v2223_v49, %v1463_v6 }
 0x53e   : > { %1505 = vst [vmem:[%s3144_s20 + $0x48] sm:$0xff] %v1491_v50 }
 0x53f   : > { %v1467_v24 = vpop.f32.mrb[52].mxu1 }
 0x540   : > { %v1468_v36 = vadd.f32 %v3137_v13, %v1467_v24  ;;  %v2011_v51 = vpop.f32.mrb[53].mxu1 }
 0x541   : > { %v1470_v53 = vpop.f32.mrb[54].mxu1 }
 0x542   : > { %v1492_v54 = vadd.f32 %v2224_v41, %v1468_v36  ;;  %v1471_v25 = vadd.f32 %v3137_v13, %v1470_v53  ;;  %v2012_v55 = vpop.f32.mrb[55].mxu1 }
 0x544   : > { %1506 = vst [vmem:[%s3144_s20 + $0x50] sm:$0xff] %v1492_v54  ;;  %v1493_v57 = vadd.f32 %v2225_v56, %v1471_v25 }
 0x546   : > { %1507 = vst [vmem:[%s3144_s20 + $0x58] sm:$0xff] %v1493_v57 }
 0x547   : > { %v1475_v10 = vpop.f32.mrb[56].mxu1 }
 0x548   : > { %v1476_v11 = vadd.f32 %v3137_v13, %v1475_v10  ;;  %v2015_v52 = vpop.f32.mrb[57].mxu1 }
 0x549   : > { %v1478_v35 = vpop.f32.mrb[58].mxu1 }
 0x54a   : > { %v1494_v26 = vadd.f32 %v2226_v58, %v1476_v11  ;;  %v1479_v60 = vadd.f32 %v3137_v13, %v1478_v35  ;;  %v2016_v61 = vpop.f32.mrb[59].mxu1 }
 0x54c   : > { %1508 = vst [vmem:[%s3144_s20 + $0x60] sm:$0xff] %v1494_v26  ;;  %v1495_v1 = vadd.f32 %v2227_v62, %v1479_v60 }
 0x54e   : > { %1509 = vst [vmem:[%s3144_s20 + $0x68] sm:$0xff] %v1495_v1 }
 0x54f   : > { %2415 = shalt.err (!%p2412_p0)
}
 0x550   : > { %s2416_s11 = scalar_lea.hbm %s3187_s0, 1792  ;;  %s2420_s1 = scalar_lea.hbm %s3298_s9, 3584 }
 0x551   : > { %p2417_p1 = scmp.ne.s32.totalorder %s3187_s0, %s2416_s11  ;;  %p2421_p13 = scmp.lt.u32.totalorder %s3187_s0, %s3298_s9 }
 0x552   : > { %p2422_p3 = scmp.lt.u32.totalorder %s2420_s1, %s2416_s11  ;;  %p2424_p4 = scmp.lt.u32.totalorder %s2416_s11, %s3187_s0 }
 0x553   : > { %p2418_p12 = pnand %p2417_p1, %p3299_p7 }
 0x554   : > { %p2423_p9 = por %p2422_p3, %p2421_p13 }
 0x555   : > { %p2419_p10 = pneg %p2418_p12 }
 0x556   : > { %p2425_p5 = por %p2424_p4, %p2423_p9 }
 0x558   : > { %p2426_p8 = pnand %p2425_p5, %p2419_p10 }
 0x55a   : > { %2429 = shalt.err (!%p2426_p8)
}
 0x55b   : > { %s2501_s21 = smov 128   ;;  %s2502_s8 = smov 8  }
 0x55c   : > { %2047 = dma.vmem_to_hbm [thread:$0]  (%p3299_p7), %s3189_s15, 1792, %s3187_s0, %s1511_s17, %s2501_s21, %s2501_s21, %s2502_s8  }
 0x55d PF: > { %s3300_s19 = sld [smem:[#allocation19_spill]]  ;;  %s3301_s16 = sld [smem:[#allocation23_spill]] }
 0x55e   : > { %p3303_p11 = scmp.ge.s32.totalorder %s2484_s24, 2 }
 0x563   : > { %s1539_s26 = sand.u32 1, %s3300_s19   ;;  %p3302_p2 = scmp.ne.s32.totalorder %s3301_s16, 0 }
 0x564   : > { %s1540_s28 = scalar_lea.sflag [#allocation4], %s1539_s26 }
 0x565   : > { %p2070_p6 = pnand %p3303_p11, %p3302_p2 }
 0x567   : > { %2467 = dma.done.wait (!%p2070_p6), %s1540_s28, 1792  }
 0x568   : > { %2469 = vsyncadd (!%p2070_p6), %s1540_s28, 4294965504  ;;  %s3304_s24 = sld [smem:[#allocation21_spill]]  ;;  %s3305_s20 = sld [smem:[#allocation20_spill]] }
 0x569   : > { %s3306_s23 = sld [smem:[#allocation22_spill]]  ;;  %s3307_s21 = smov %s2476_s22 }
 0x56e   : > { %p21_p0 = scmp.ge.s32.totalorder %s3304_s24, 4   ;;  %s3308_s22 = smov %s3305_s20 }
 0x570   :  { %23 = sbr.rel (!%p21_p0) target bundleno = 12 (0xc), region = 129 }
 0x577   :  { %1545 = vsyncpa [#allocation3], 1 }
 0x578   :  { %1547 = vsyncpa [#allocation3 + $0x1], 1 }
 0x579   :  { %1548 = vsyncpa [#allocation6], 1 }
 0x57a   :  { %1549 = vsyncpa [#allocation11], 1 }
 0x57b   :  { %1550 = vsyncpa [#allocation4], 1 }
 0x57c   :  { %1552 = vsyncpa [#allocation4 + $0x1], 1 }

// kernel: transform_net_forward.18
= control target key start
LH: loop header
LB: loop body
LE: loop exit
PB: predicated region body
PF: predicated region fallthrough
CT: control target
= control target key end

     0   :  { %7 = vsyncpa [#allocation4], 0  ;;  %s442_s0 = inlined_call_operand.hbm [shape: f32[32,128], index: 0, kind: input, shape index: {}]   ;;  %s443_s1 = inlined_call_operand.hbm [shape: f32[128,128], index: 1, kind: input, shape index: {}]   ;;  %s444_s2 = inlined_call_operand.hbm [shape: f32[32,128], index: 2, kind: output, shape index: {}]  }
   0x1   :  { %8 = vsyncpa [#allocation7], 0 }
   0x2   :  { %9 = vsyncpa [#allocation5], 0  ;;  %s377_s9 = smov [#allocation3]   ;;  %s305_s13 = scalar_lea.hbm %s442_s0, 512 }
   0x3   :  { %s15_s10 = sshll.u32 %s377_s9, 4  ;;  %p306_p0 = scmp.ne.s32.totalorder %s442_s0, %s305_s13  ;;  %s16_s10 = int_to_ptr.vmem [resolvable:$true] %s15_s10 }
   0x4   :  { %p309_p1 = scmp.lt.u32.totalorder %s305_s13, %s442_s0 }
   0x6   :  { %p311_p2 = pnand %p309_p1, %p306_p0 }
   0x8   :  { %314 = shalt.err (!%p311_p2)
}
   0x9   :  { %s315_s18 = scalar_lea.vmem %s16_s10, 512  ;;  %p320_p4 = scmp.lt.s32.totalorder %s16_s10, %s16_s10 }
   0xa   :  { %p316_p3 = scmp.ne.s32.totalorder %s16_s10, %s315_s18  ;;  %p321_p5 = scmp.lt.s32.totalorder %s315_s18, %s315_s18 }
   0xc   :  { %p322_p6 = por %p321_p5, %p320_p4 }
   0xe   :  { %p323_p7 = pnand %p322_p6, %p316_p3 }
  0x10   :  { %326 = shalt.err (!%p323_p7)
}
  0x11   :  { %s378_s19 = smov 128   ;;  %s379_s20 = smov 8  }
  0x12   :  { %21 = dma.hbm_to_vmem [thread:$0]  %s442_s0, 512, %s16_s10, [#allocation4], %s378_s19, %s378_s19, %s379_s20  }
  0x13   :  { %s380_s23 = smov [#allocation6]   ;;  %s327_s27 = scalar_lea.hbm %s443_s1, 2048 }
  0x14   :  { %s27_s24 = sshll.u32 %s380_s23, 4  ;;  %p328_p8 = scmp.ne.s32.totalorder %s443_s1, %s327_s27  ;;  %s28_s24 = int_to_ptr.vmem [resolvable:$true] %s27_s24 }
  0x15   :  { %p331_p9 = scmp.lt.u32.totalorder %s327_s27, %s443_s1 }
  0x17   :  { %p333_p10 = pnand %p331_p9, %p328_p8 }
  0x19   :  { %336 = shalt.err (!%p333_p10)
}
  0x1a   :  { %s337_s4 = scalar_lea.vmem %s28_s24, 2048  ;;  %p342_p12 = scmp.lt.s32.totalorder %s28_s24, %s28_s24 }
  0x1b   :  { %p338_p11 = scmp.ne.s32.totalorder %s28_s24, %s337_s4  ;;  %p343_p13 = scmp.lt.s32.totalorder %s337_s4, %s337_s4 }
  0x1d   :  { %p344_p0 = por %p343_p13, %p342_p12 }
  0x1f   :  { %p345_p1 = pnand %p344_p0, %p338_p11 }
  0x21   :  { %348 = shalt.err (!%p345_p1)
}
  0x22   :  { %33 = dma.hbm_to_vmem [thread:$0]  %s443_s1, 2048, %s28_s24, [#allocation7], %s378_s19, %s378_s19, %s379_s20  }
  0x23   :  { %371 = dma.done.wait [#allocation4], 512  }
  0x24   :  { %372 = vsyncadd [#allocation4], 4294966784 }
  0x25   :  { %373 = dma.done.wait [#allocation7], 2048  }
  0x26   :  { %374 = vsyncadd [#allocation7], 4294965248  ;;  %v56_v0 = vld [vmem:[#allocation6] sm:$0xff]  ;;  %v57_v1 = vld [vmem:[#allocation6 + $0x8] sm:$0xff]  ;;  %s381_s1 = smov [#allocation8]  }
  0x27   :  { %v58_v2 = vld [vmem:[#allocation6 + $0x10] sm:$0xff]  ;;  %v252_v3 = vpack.c.bf16 %v57_v1, %v56_v0  ;;  %v59_v4 = vld [vmem:[#allocation6 + $0x18] sm:$0xff]  ;;  %v60_v6 = vld [vmem:[#allocation6 + $0x20] sm:$0xff]  ;;  %s181_s6 = sshll.u32 %s381_s1, 4  ;;  %s182_s6 = int_to_ptr.vmem [resolvable:$true] %s181_s6 }
  0x28   :  { %v256_v5 = vpack.c.bf16 %v59_v4, %v58_v2  ;;  %v61_v7 = vld [vmem:[#allocation6 + $0x28] sm:$0xff]  ;;  %v52_v9 = vld [vmem:[#allocation3] sm:$0xff]  ;;  %v54_v10 = vld [vmem:[#allocation3 + $0x10] sm:$0xff]  ;;  %s349_s7 = scalar_lea.vmem %s182_s6, 512  ;;  %p354_p3 = scmp.lt.s32.totalorder %s182_s6, %s182_s6 }
  0x29   :  { %253 = vmatprep.subr.bf16.mxu0 %v252_v3  ;;  %284 = vmatprep.subr.bf16.mxu1 %v252_v3  ;;  %v260_v8 = vpack.c.bf16 %v61_v7, %v60_v6  ;;  %v62_v11 = vld [vmem:[#allocation6 + $0x30] sm:$0xff]  ;;  %v63_v12 = vld [vmem:[#allocation6 + $0x38] sm:$0xff]  ;;  %v64_v14 = vld [vmem:[#allocation6 + $0x40] sm:$0xff]  ;;  %p350_p2 = scmp.ne.s32.totalorder %s182_s6, %s349_s7  ;;  %p355_p4 = scmp.lt.s32.totalorder %s349_s7, %s349_s7 }
  0x2a   :  { %255 = vmatpush3.bf16.msra.mxu0 %v252_v3  ;;  %292 = vmatpush3.bf16.msra.mxu1 %v252_v3  ;;  %v264_v13 = vpack.c.bf16 %v63_v12, %v62_v11  ;;  %v65_v15 = vld [vmem:[#allocation6 + $0x48] sm:$0xff]  ;;  %v66_v17 = vld [vmem:[#allocation6 + $0x50] sm:$0xff]  ;;  %v67_v18 = vld [vmem:[#allocation6 + $0x58] sm:$0xff] }
  0x2b   :  { %257 = vmatprep.subr.bf16.mxu0 %v256_v5  ;;  %285 = vmatprep.subr.bf16.mxu1 %v256_v5  ;;  %v268_v16 = vpack.c.bf16 %v65_v15, %v64_v14  ;;  %v272_v19 = vpack.c.bf16 %v67_v18, %v66_v17  ;;  %v68_v20 = vld [vmem:[#allocation6 + $0x60] sm:$0xff]  ;;  %v69_v21 = vld [vmem:[#allocation6 + $0x68] sm:$0xff]  ;;  %v70_v23 = vld [vmem:[#allocation6 + $0x70] sm:$0xff]  ;;  %p356_p5 = por %p355_p4, %p354_p3 }
  0x2c   :  { %246 = vmatprep.mubr.f32.mxu0 %v52_v9  ;;  %249 = vmatprep.mubr.f32.mxu1 %v54_v10  ;;  %v276_v22 = vpack.c.bf16 %v69_v21, %v68_v20  ;;  %v71_v24 = vld [vmem:[#allocation6 + $0x78] sm:$0xff]  ;;  %v53_v26 = vld [vmem:[#allocation3 + $0x8] sm:$0xff] }
  0x2d   :  { %v280_v25 = vpack.c.bf16 %v71_v24, %v70_v23  ;;  %v55_v27 = vld [vmem:[#allocation3 + $0x18] sm:$0xff]  ;;  %p357_p6 = pnand %p356_p5, %p350_p2 }
  0x2e   :  { %259 = vmatpush3.bf16.msra.mxu0 %v256_v5  ;;  %293 = vmatpush3.bf16.msra.mxu1 %v256_v5 }
  0x2f   :  { %261 = vmatprep.subr.bf16.mxu0 %v260_v8  ;;  %286 = vmatprep.subr.bf16.mxu1 %v260_v8 }
  0x32   :  { %263 = vmatpush3.bf16.msra.mxu0 %v260_v8  ;;  %294 = vmatpush3.bf16.msra.mxu1 %v260_v8 }
  0x33   :  { %265 = vmatprep.subr.bf16.mxu0 %v264_v13  ;;  %287 = vmatprep.subr.bf16.mxu1 %v264_v13 }
  0x36   :  { %267 = vmatpush3.bf16.msra.mxu0 %v264_v13  ;;  %295 = vmatpush3.bf16.msra.mxu1 %v264_v13 }
  0x37   :  { %269 = vmatprep.subr.bf16.mxu0 %v268_v16  ;;  %288 = vmatprep.subr.bf16.mxu1 %v268_v16 }
  0x3a   :  { %271 = vmatpush3.bf16.msra.mxu0 %v268_v16  ;;  %296 = vmatpush3.bf16.msra.mxu1 %v268_v16 }
  0x3b   :  { %273 = vmatprep.subr.bf16.mxu0 %v272_v19  ;;  %289 = vmatprep.subr.bf16.mxu1 %v272_v19 }
  0x3e   :  { %275 = vmatpush3.bf16.msra.mxu0 %v272_v19  ;;  %297 = vmatpush3.bf16.msra.mxu1 %v272_v19 }
  0x3f   :  { %277 = vmatprep.subr.bf16.mxu0 %v276_v22  ;;  %290 = vmatprep.subr.bf16.mxu1 %v276_v22 }
  0x42   :  { %279 = vmatpush3.bf16.msra.mxu0 %v276_v22  ;;  %298 = vmatpush3.bf16.msra.mxu1 %v276_v22 }
  0x43   :  { %281 = vmatprep.subr.bf16.mxu0 %v280_v25  ;;  %291 = vmatprep.subr.bf16.mxu1 %v280_v25 }
  0x46   :  { %283 = vmatpush3.bf16.msra.mxu0 %v280_v25  ;;  %299 = vmatpush3.bf16.msra.mxu1 %v280_v25 }
  0x49   :  { %247 = vmatmul.mubr.f32.vlgmr.msra.gmra.mrb[0].mxu0 %v53_v26  ;;  %250 = vmatmul.mubr.f32.vlgmr.msra.gmra.mrb[0].mxu1 %v55_v27 }
 0x11c   :  { %v248_v28 = vpop.f32.mrb[0].mxu0  ;;  %v251_v29 = vpop.f32.mrb[0].mxu1 }
 0x11d   :  { %173 = vst [vmem:[#allocation8 + $0x8] sm:$0xff] %v248_v28  ;;  %175 = vst [vmem:[#allocation8 + $0x18] sm:$0xff] %v251_v29  ;;  %v138_v30 = vpop.f32.mrb[1].mxu0  ;;  %v148_v31 = vpop.f32.mrb[1].mxu1 }
 0x11e   :  { %172 = vst [vmem:[#allocation8] sm:$0xff] %v138_v30  ;;  %174 = vst [vmem:[#allocation8 + $0x10] sm:$0xff] %v148_v31 }
 0x11f   :  { %360 = shalt.err (!%p357_p6)
}
 0x120   :  { %s361_s10 = scalar_lea.hbm %s444_s2, 512 }
 0x121   :  { %p362_p7 = scmp.ne.s32.totalorder %s444_s2, %s361_s10  ;;  %p365_p8 = scmp.lt.u32.totalorder %s361_s10, %s444_s2 }
 0x123   :  { %p367_p9 = pnand %p365_p8, %p362_p7 }
 0x125   :  { %370 = shalt.err (!%p367_p9)
}
 0x126   :  { %187 = dma.vmem_to_hbm [thread:$0]  %s182_s6, 512, %s444_s2, [#allocation5], %s378_s19, %s378_s19, %s379_s20  }
 0x127   :  { %375 = dma.done.wait [#allocation5], 512  }
 0x128   :  { %376 = vsyncadd [#allocation5], 4294966784 }
 0x129   :  { %191 = vsyncpa [#allocation4], 1 }
 0x12a   :  { %192 = vsyncpa [#allocation7], 1 }
 0x12b   :  { %193 = vsyncpa [#allocation5], 1 }

// kernel: transform_net_forward.19
= control target key start
LH: loop header
LB: loop body
LE: loop exit
PB: predicated region body
PF: predicated region fallthrough
CT: control target
= control target key end

     0   :  { %7 = vsyncpa [#allocation4], 0  ;;  %s848_s0 = inlined_call_operand.hbm [shape: f32[256,128], index: 0, kind: input, shape index: {}]   ;;  %s849_s1 = inlined_call_operand.hbm [shape: f32[128,128], index: 1, kind: input, shape index: {}]   ;;  %s850_s2 = inlined_call_operand.hbm [shape: f32[256,128], index: 2, kind: output, shape index: {}]  }
   0x1   :  { %8 = vsyncpa [#allocation7], 0 }
   0x2   :  { %9 = vsyncpa [#allocation5], 0  ;;  %s783_s9 = smov [#allocation3]   ;;  %s711_s13 = scalar_lea.hbm %s848_s0, 4096 }
   0x3   :  { %s15_s10 = sshll.u32 %s783_s9, 4  ;;  %p712_p0 = scmp.ne.s32.totalorder %s848_s0, %s711_s13  ;;  %s16_s10 = int_to_ptr.vmem [resolvable:$true] %s15_s10 }
   0x4   :  { %p715_p1 = scmp.lt.u32.totalorder %s711_s13, %s848_s0 }
   0x6   :  { %p717_p2 = pnand %p715_p1, %p712_p0 }
   0x8   :  { %720 = shalt.err (!%p717_p2)
}
   0x9   :  { %s721_s18 = scalar_lea.vmem %s16_s10, 4096  ;;  %p726_p4 = scmp.lt.s32.totalorder %s16_s10, %s16_s10 }
   0xa   :  { %p722_p3 = scmp.ne.s32.totalorder %s16_s10, %s721_s18  ;;  %p727_p5 = scmp.lt.s32.totalorder %s721_s18, %s721_s18 }
   0xc   :  { %p728_p6 = por %p727_p5, %p726_p4 }
   0xe   :  { %p729_p7 = pnand %p728_p6, %p722_p3 }
  0x10   :  { %732 = shalt.err (!%p729_p7)
}
  0x11   :  { %s784_s19 = smov 128   ;;  %s785_s20 = smov 8  }
  0x12   :  { %21 = dma.hbm_to_vmem [thread:$0]  %s848_s0, 4096, %s16_s10, [#allocation4], %s784_s19, %s784_s19, %s785_s20  }
  0x13   :  { %s786_s23 = smov [#allocation6]   ;;  %s733_s27 = scalar_lea.hbm %s849_s1, 2048 }
  0x14   :  { %s27_s24 = sshll.u32 %s786_s23, 4  ;;  %p734_p8 = scmp.ne.s32.totalorder %s849_s1, %s733_s27  ;;  %s28_s24 = int_to_ptr.vmem [resolvable:$true] %s27_s24 }
  0x15   :  { %p737_p9 = scmp.lt.u32.totalorder %s733_s27, %s849_s1 }
  0x17   :  { %p739_p10 = pnand %p737_p9, %p734_p8 }
  0x19   :  { %742 = shalt.err (!%p739_p10)
}
  0x1a   :  { %s743_s4 = scalar_lea.vmem %s28_s24, 2048  ;;  %p748_p12 = scmp.lt.s32.totalorder %s28_s24, %s28_s24 }
  0x1b   :  { %p744_p11 = scmp.ne.s32.totalorder %s28_s24, %s743_s4  ;;  %p749_p13 = scmp.lt.s32.totalorder %s743_s4, %s743_s4 }
  0x1d   :  { %p750_p0 = por %p749_p13, %p748_p12 }
  0x1f   :  { %p751_p1 = pnand %p750_p0, %p744_p11 }
  0x21   :  { %754 = shalt.err (!%p751_p1)
}
  0x22   :  { %33 = dma.hbm_to_vmem [thread:$0]  %s849_s1, 2048, %s28_s24, [#allocation7], %s784_s19, %s784_s19, %s785_s20  }
  0x23   :  { %777 = dma.done.wait [#allocation4], 4096  }
  0x24   :  { %778 = vsyncadd [#allocation4], 4294963200 }
  0x25   :  { %779 = dma.done.wait [#allocation7], 2048  }
  0x26   :  { %780 = vsyncadd [#allocation7], 4294965248  ;;  %v140_v0 = vld [vmem:[#allocation6] sm:$0xff]  ;;  %v141_v1 = vld [vmem:[#allocation6 + $0x8] sm:$0xff]  ;;  %s787_s1 = smov [#allocation8]  }
  0x27   :  { %v142_v2 = vld [vmem:[#allocation6 + $0x10] sm:$0xff]  ;;  %v658_v3 = vpack.c.bf16 %v141_v1, %v140_v0  ;;  %v143_v4 = vld [vmem:[#allocation6 + $0x18] sm:$0xff]  ;;  %v144_v6 = vld [vmem:[#allocation6 + $0x20] sm:$0xff]  ;;  %s517_s6 = sshll.u32 %s787_s1, 4  ;;  %s518_s6 = int_to_ptr.vmem [resolvable:$true] %s517_s6 }
  0x28   :  { %v662_v5 = vpack.c.bf16 %v143_v4, %v142_v2  ;;  %v145_v7 = vld [vmem:[#allocation6 + $0x28] sm:$0xff]  ;;  %v108_v9 = vld [vmem:[#allocation3] sm:$0xff]  ;;  %v146_v11 = vld [vmem:[#allocation6 + $0x30] sm:$0xff]  ;;  %s755_s7 = scalar_lea.vmem %s518_s6, 4096  ;;  %p760_p3 = scmp.lt.s32.totalorder %s518_s6, %s518_s6 }
  0x29   :  { %659 = vmatprep.subr.bf16.mxu0 %v658_v3  ;;  %690 = vmatprep.subr.bf16.mxu1 %v658_v3  ;;  %v666_v8 = vpack.c.bf16 %v145_v7, %v144_v6  ;;  %v124_v10 = vld [vmem:[#allocation3 + $0x80] sm:$0xff]  ;;  %v147_v12 = vld [vmem:[#allocation6 + $0x38] sm:$0xff]  ;;  %v149_v15 = vld [vmem:[#allocation6 + $0x48] sm:$0xff]  ;;  %p756_p2 = scmp.ne.s32.totalorder %s518_s6, %s755_s7  ;;  %p761_p4 = scmp.lt.s32.totalorder %s755_s7, %s755_s7 }
  0x2a   :  { %661 = vmatpush3.bf16.msra.mxu0 %v658_v3  ;;  %698 = vmatpush3.bf16.msra.mxu1 %v658_v3  ;;  %v670_v13 = vpack.c.bf16 %v147_v12, %v146_v11  ;;  %v148_v14 = vld [vmem:[#allocation6 + $0x40] sm:$0xff]  ;;  %v150_v17 = vld [vmem:[#allocation6 + $0x50] sm:$0xff]  ;;  %v151_v18 = vld [vmem:[#allocation6 + $0x58] sm:$0xff] }
  0x2b   :  { %663 = vmatprep.subr.bf16.mxu0 %v662_v5  ;;  %691 = vmatprep.subr.bf16.mxu1 %v662_v5  ;;  %v674_v16 = vpack.c.bf16 %v149_v15, %v148_v14  ;;  %v678_v19 = vpack.c.bf16 %v151_v18, %v150_v17  ;;  %v152_v20 = vld [vmem:[#allocation6 + $0x60] sm:$0xff]  ;;  %v153_v21 = vld [vmem:[#allocation6 + $0x68] sm:$0xff]  ;;  %v154_v23 = vld [vmem:[#allocation6 + $0x70] sm:$0xff]  ;;  %p762_p5 = por %p761_p4, %p760_p3 }
  0x2c   :  { %610 = vmatprep.mubr.f32.mxu0 %v108_v9  ;;  %634 = vmatprep.mubr.f32.mxu1 %v124_v10  ;;  %v682_v22 = vpack.c.bf16 %v153_v21, %v152_v20  ;;  %v155_v24 = vld [vmem:[#allocation6 + $0x78] sm:$0xff]  ;;  %v109_v26 = vld [vmem:[#allocation3 + $0x8] sm:$0xff]  ;;  %v110_v28 = vld [vmem:[#allocation3 + $0x10] sm:$0xff] }
  0x2d   :  { %v686_v25 = vpack.c.bf16 %v155_v24, %v154_v23  ;;  %v125_v27 = vld [vmem:[#allocation3 + $0x88] sm:$0xff]  ;;  %v126_v29 = vld [vmem:[#allocation3 + $0x90] sm:$0xff]  ;;  %v111_v30 = vld [vmem:[#allocation3 + $0x18] sm:$0xff]  ;;  %p763_p6 = pnand %p762_p5, %p756_p2 }
  0x2e   :  { %665 = vmatpush3.bf16.msra.mxu0 %v662_v5  ;;  %699 = vmatpush3.bf16.msra.mxu1 %v662_v5  ;;  %v127_v31 = vld [vmem:[#allocation3 + $0x98] sm:$0xff]  ;;  %v112_v32 = vld [vmem:[#allocation3 + $0x20] sm:$0xff]  ;;  %v113_v34 = vld [vmem:[#allocation3 + $0x28] sm:$0xff] }
  0x2f   :  { %667 = vmatprep.subr.bf16.mxu0 %v666_v8  ;;  %692 = vmatprep.subr.bf16.mxu1 %v666_v8  ;;  %v128_v33 = vld [vmem:[#allocation3 + $0xa0] sm:$0xff]  ;;  %v129_v35 = vld [vmem:[#allocation3 + $0xa8] sm:$0xff]  ;;  %v114_v36 = vld [vmem:[#allocation3 + $0x30] sm:$0xff] }
  0x30   :  { %v130_v37 = vld [vmem:[#allocation3 + $0xb0] sm:$0xff]  ;;  %v115_v38 = vld [vmem:[#allocation3 + $0x38] sm:$0xff]  ;;  %v116_v40 = vld [vmem:[#allocation3 + $0x40] sm:$0xff] }
  0x31   :  { %v131_v39 = vld [vmem:[#allocation3 + $0xb8] sm:$0xff]  ;;  %v132_v41 = vld [vmem:[#allocation3 + $0xc0] sm:$0xff]  ;;  %v117_v42 = vld [vmem:[#allocation3 + $0x48] sm:$0xff] }
  0x32   :  { %669 = vmatpush3.bf16.msra.mxu0 %v666_v8  ;;  %700 = vmatpush3.bf16.msra.mxu1 %v666_v8  ;;  %v133_v43 = vld [vmem:[#allocation3 + $0xc8] sm:$0xff]  ;;  %v118_v44 = vld [vmem:[#allocation3 + $0x50] sm:$0xff]  ;;  %v119_v46 = vld [vmem:[#allocation3 + $0x58] sm:$0xff] }
  0x33   :  { %671 = vmatprep.subr.bf16.mxu0 %v670_v13  ;;  %693 = vmatprep.subr.bf16.mxu1 %v670_v13  ;;  %v134_v45 = vld [vmem:[#allocation3 + $0xd0] sm:$0xff]  ;;  %v135_v47 = vld [vmem:[#allocation3 + $0xd8] sm:$0xff]  ;;  %v120_v48 = vld [vmem:[#allocation3 + $0x60] sm:$0xff] }
  0x34   :  { %v136_v49 = vld [vmem:[#allocation3 + $0xe0] sm:$0xff]  ;;  %v121_v50 = vld [vmem:[#allocation3 + $0x68] sm:$0xff]  ;;  %v122_v52 = vld [vmem:[#allocation3 + $0x70] sm:$0xff] }
  0x35   :  { %v137_v51 = vld [vmem:[#allocation3 + $0xe8] sm:$0xff]  ;;  %v138_v53 = vld [vmem:[#allocation3 + $0xf0] sm:$0xff]  ;;  %v123_v54 = vld [vmem:[#allocation3 + $0x78] sm:$0xff] }
  0x36   :  { %673 = vmatpush3.bf16.msra.mxu0 %v670_v13  ;;  %701 = vmatpush3.bf16.msra.mxu1 %v670_v13  ;;  %v139_v55 = vld [vmem:[#allocation3 + $0xf8] sm:$0xff] }
  0x37   :  { %675 = vmatprep.subr.bf16.mxu0 %v674_v16  ;;  %694 = vmatprep.subr.bf16.mxu1 %v674_v16 }
  0x3a   :  { %677 = vmatpush3.bf16.msra.mxu0 %v674_v16  ;;  %702 = vmatpush3.bf16.msra.mxu1 %v674_v16 }
  0x3b   :  { %679 = vmatprep.subr.bf16.mxu0 %v678_v19  ;;  %695 = vmatprep.subr.bf16.mxu1 %v678_v19 }
  0x3e   :  { %681 = vmatpush3.bf16.msra.mxu0 %v678_v19  ;;  %703 = vmatpush3.bf16.msra.mxu1 %v678_v19 }
  0x3f   :  { %683 = vmatprep.subr.bf16.mxu0 %v682_v22  ;;  %696 = vmatprep.subr.bf16.mxu1 %v682_v22 }
  0x42   :  { %685 = vmatpush3.bf16.msra.mxu0 %v682_v22  ;;  %704 = vmatpush3.bf16.msra.mxu1 %v682_v22 }
  0x43   :  { %687 = vmatprep.subr.bf16.mxu0 %v686_v25  ;;  %697 = vmatprep.subr.bf16.mxu1 %v686_v25 }
  0x46   :  { %689 = vmatpush3.bf16.msra.mxu0 %v686_v25  ;;  %705 = vmatpush3.bf16.msra.mxu1 %v686_v25 }
  0x49   :  { %611 = vmatmul.mubr.f32.vlgmr.msra.gmra.mrb[0].mxu0 %v109_v26  ;;  %635 = vmatmul.mubr.f32.vlgmr.msra.gmra.mrb[0].mxu1 %v125_v27 }
  0x4a   :  { %613 = vmatprep.mubr.f32.mxu0 %v110_v28  ;;  %637 = vmatprep.mubr.f32.mxu1 %v126_v29 }
  0x4d   :  { %614 = vmatmul.mubr.f32.gmra.mrb[2].mxu0 %v111_v30  ;;  %638 = vmatmul.mubr.f32.gmra.mrb[2].mxu1 %v127_v31 }
  0x4e   :  { %616 = vmatprep.mubr.f32.mxu0 %v112_v32  ;;  %640 = vmatprep.mubr.f32.mxu1 %v128_v33 }
  0x51   :  { %617 = vmatmul.mubr.f32.gmra.mrb[4].mxu0 %v113_v34  ;;  %641 = vmatmul.mubr.f32.gmra.mrb[4].mxu1 %v129_v35 }
  0x52   :  { %619 = vmatprep.mubr.f32.mxu0 %v114_v36  ;;  %643 = vmatprep.mubr.f32.mxu1 %v130_v37 }
  0x55   :  { %620 = vmatmul.mubr.f32.gmra.mrb[6].mxu0 %v115_v38  ;;  %644 = vmatmul.mubr.f32.gmra.mrb[6].mxu1 %v131_v39 }
  0x56   :  { %622 = vmatprep.mubr.f32.mxu0 %v116_v40  ;;  %646 = vmatprep.mubr.f32.mxu1 %v132_v41 }
  0x59   :  { %623 = vmatmul.mubr.f32.gmra.mrb[8].mxu0 %v117_v42  ;;  %647 = vmatmul.mubr.f32.gmra.mrb[8].mxu1 %v133_v43 }
  0x5a   :  { %625 = vmatprep.mubr.f32.mxu0 %v118_v44  ;;  %649 = vmatprep.mubr.f32.mxu1 %v134_v45 }
  0x5d   :  { %626 = vmatmul.mubr.f32.gmra.mrb[10].mxu0 %v119_v46  ;;  %650 = vmatmul.mubr.f32.gmra.mrb[10].mxu1 %v135_v47 }
  0x5e   :  { %628 = vmatprep.mubr.f32.mxu0 %v120_v48  ;;  %652 = vmatprep.mubr.f32.mxu1 %v136_v49 }
  0x61   :  { %629 = vmatmul.mubr.f32.gmra.mrb[12].mxu0 %v121_v50  ;;  %653 = vmatmul.mubr.f32.gmra.mrb[12].mxu1 %v137_v51 }
  0x62   :  { %631 = vmatprep.mubr.f32.mxu0 %v122_v52  ;;  %655 = vmatprep.mubr.f32.mxu1 %v138_v53 }
  0x65   :  { %632 = vmatmul.mubr.f32.gmra.mrb[14].mxu0 %v123_v54  ;;  %656 = vmatmul.mubr.f32.gmra.mrb[14].mxu1 %v139_v55 }
 0x11c   :  { %v612_v56 = vpop.f32.mrb[0].mxu0  ;;  %v636_v57 = vpop.f32.mrb[0].mxu1 }
 0x11d   :  { %481 = vst [vmem:[#allocation8 + $0x8] sm:$0xff] %v612_v56  ;;  %497 = vst [vmem:[#allocation8 + $0x88] sm:$0xff] %v636_v57  ;;  %v222_v58 = vpop.f32.mrb[1].mxu0  ;;  %v302_v59 = vpop.f32.mrb[1].mxu1 }
 0x11e   :  { %480 = vst [vmem:[#allocation8] sm:$0xff] %v222_v58  ;;  %496 = vst [vmem:[#allocation8 + $0x80] sm:$0xff] %v302_v59 }
 0x120   :  { %v615_v60 = vpop.f32.mrb[2].mxu0  ;;  %v639_v61 = vpop.f32.mrb[2].mxu1 }
 0x121   :  { %483 = vst [vmem:[#allocation8 + $0x18] sm:$0xff] %v615_v60  ;;  %499 = vst [vmem:[#allocation8 + $0x98] sm:$0xff] %v639_v61  ;;  %v232_v62 = vpop.f32.mrb[3].mxu0  ;;  %v312_v63 = vpop.f32.mrb[3].mxu1 }
 0x122   :  { %482 = vst [vmem:[#allocation8 + $0x10] sm:$0xff] %v232_v62  ;;  %498 = vst [vmem:[#allocation8 + $0x90] sm:$0xff] %v312_v63 }
 0x124   :  { %v618_v0 = vpop.f32.mrb[4].mxu0  ;;  %v642_v1 = vpop.f32.mrb[4].mxu1 }
 0x125   :  { %485 = vst [vmem:[#allocation8 + $0x28] sm:$0xff] %v618_v0  ;;  %501 = vst [vmem:[#allocation8 + $0xa8] sm:$0xff] %v642_v1  ;;  %v242_v2 = vpop.f32.mrb[5].mxu0  ;;  %v322_v3 = vpop.f32.mrb[5].mxu1 }
 0x126   :  { %484 = vst [vmem:[#allocation8 + $0x20] sm:$0xff] %v242_v2  ;;  %500 = vst [vmem:[#allocation8 + $0xa0] sm:$0xff] %v322_v3 }
 0x128   :  { %v621_v4 = vpop.f32.mrb[6].mxu0  ;;  %v645_v5 = vpop.f32.mrb[6].mxu1 }
 0x129   :  { %487 = vst [vmem:[#allocation8 + $0x38] sm:$0xff] %v621_v4  ;;  %503 = vst [vmem:[#allocation8 + $0xb8] sm:$0xff] %v645_v5  ;;  %v252_v6 = vpop.f32.mrb[7].mxu0  ;;  %v332_v7 = vpop.f32.mrb[7].mxu1 }
 0x12a   :  { %486 = vst [vmem:[#allocation8 + $0x30] sm:$0xff] %v252_v6  ;;  %502 = vst [vmem:[#allocation8 + $0xb0] sm:$0xff] %v332_v7 }
 0x12c   :  { %v624_v8 = vpop.f32.mrb[8].mxu0  ;;  %v648_v9 = vpop.f32.mrb[8].mxu1 }
 0x12d   :  { %489 = vst [vmem:[#allocation8 + $0x48] sm:$0xff] %v624_v8  ;;  %505 = vst [vmem:[#allocation8 + $0xc8] sm:$0xff] %v648_v9  ;;  %v262_v10 = vpop.f32.mrb[9].mxu0  ;;  %v342_v11 = vpop.f32.mrb[9].mxu1 }
 0x12e   :  { %488 = vst [vmem:[#allocation8 + $0x40] sm:$0xff] %v262_v10  ;;  %504 = vst [vmem:[#allocation8 + $0xc0] sm:$0xff] %v342_v11 }
 0x130   :  { %v627_v12 = vpop.f32.mrb[10].mxu0  ;;  %v651_v13 = vpop.f32.mrb[10].mxu1 }
 0x131   :  { %491 = vst [vmem:[#allocation8 + $0x58] sm:$0xff] %v627_v12  ;;  %507 = vst [vmem:[#allocation8 + $0xd8] sm:$0xff] %v651_v13  ;;  %v272_v14 = vpop.f32.mrb[11].mxu0  ;;  %v352_v15 = vpop.f32.mrb[11].mxu1 }
 0x132   :  { %490 = vst [vmem:[#allocation8 + $0x50] sm:$0xff] %v272_v14  ;;  %506 = vst [vmem:[#allocation8 + $0xd0] sm:$0xff] %v352_v15 }
 0x134   :  { %v630_v16 = vpop.f32.mrb[12].mxu0  ;;  %v654_v17 = vpop.f32.mrb[12].mxu1 }
 0x135   :  { %493 = vst [vmem:[#allocation8 + $0x68] sm:$0xff] %v630_v16  ;;  %509 = vst [vmem:[#allocation8 + $0xe8] sm:$0xff] %v654_v17  ;;  %v282_v18 = vpop.f32.mrb[13].mxu0  ;;  %v362_v19 = vpop.f32.mrb[13].mxu1 }
 0x136   :  { %492 = vst [vmem:[#allocation8 + $0x60] sm:$0xff] %v282_v18  ;;  %508 = vst [vmem:[#allocation8 + $0xe0] sm:$0xff] %v362_v19 }
 0x138   :  { %v633_v20 = vpop.f32.mrb[14].mxu0  ;;  %v657_v21 = vpop.f32.mrb[14].mxu1 }
 0x139   :  { %495 = vst [vmem:[#allocation8 + $0x78] sm:$0xff] %v633_v20  ;;  %511 = vst [vmem:[#allocation8 + $0xf8] sm:$0xff] %v657_v21  ;;  %v292_v22 = vpop.f32.mrb[15].mxu0  ;;  %v372_v23 = vpop.f32.mrb[15].mxu1 }
 0x13a   :  { %494 = vst [vmem:[#allocation8 + $0x70] sm:$0xff] %v292_v22  ;;  %510 = vst [vmem:[#allocation8 + $0xf0] sm:$0xff] %v372_v23 }
 0x13b   :  { %766 = shalt.err (!%p763_p6)
}
 0x13c   :  { %s767_s10 = scalar_lea.hbm %s850_s2, 4096 }
 0x13d   :  { %p768_p7 = scmp.ne.s32.totalorder %s850_s2, %s767_s10  ;;  %p771_p8 = scmp.lt.u32.totalorder %s767_s10, %s850_s2 }
 0x13f   :  { %p773_p9 = pnand %p771_p8, %p768_p7 }
 0x141   :  { %776 = shalt.err (!%p773_p9)
}
 0x142   :  { %523 = dma.vmem_to_hbm [thread:$0]  %s518_s6, 4096, %s850_s2, [#allocation5], %s784_s19, %s784_s19, %s785_s20  }
 0x143   :  { %781 = dma.done.wait [#allocation5], 4096  }
 0x144   :  { %782 = vsyncadd [#allocation5], 4294963200 }
 0x145   :  { %527 = vsyncpa [#allocation4], 1 }
 0x146   :  { %528 = vsyncpa [#allocation7], 1 }
 0x147   :  { %529 = vsyncpa [#allocation5], 1 }

// kernel: transform_net_forward.17
= control target key start
LH: loop header
LB: loop body
LE: loop exit
PB: predicated region body
PF: predicated region fallthrough
CT: control target
= control target key end

     0   :  { %s2558_s0 = inlined_call_operand.hbm [shape: bf16[128,1536], index: 0, kind: input, shape index: {}]   ;;  %s2559_s1 = inlined_call_operand.hbm [shape: bf16[1536,128], index: 1, kind: input, shape index: {}]   ;;  %s2560_s2 = inlined_call_operand.hbm [shape: f32[1,128], index: 2, kind: input, shape index: {}]   ;;  %s2561_s3 = inlined_call_operand.hbm [shape: bf16[128,128], index: 3, kind: input, shape index: {}]   ;;  %s2562_s4 = inlined_call_operand.hbm [shape: f32[1,128], index: 4, kind: input, shape index: {}]   ;;  %s2563_s5 = inlined_call_operand.hbm [shape: f32[128,128], index: 5, kind: output, shape index: {}]  }
   0x1   :  { %2570 = sst [smem:[#allocation18_spill]] %s2558_s0 }
   0x2   :  { %2571 = sst [smem:[#allocation19_spill]] %s2560_s2 }
   0x3   :  { %10 = vsyncpa [#allocation4], 0 }
   0x4   :  { %12 = vsyncpa [#allocation4 + $0x1], 0 }
   0x5   :  { %13 = vsyncpa [#allocation7], 0 }
   0x6   :  { %15 = vsyncpa [#allocation7 + $0x1], 0 }
   0x7   :  { %16 = vsyncpa [#allocation10], 0 }
   0x8   :  { %17 = vsyncpa [#allocation5], 0  ;;  %s2193_s18 = smov 0   ;;  %s2195_s19 = smov 0  }
   0x9   :  { %s2197_s20 = smov 0   ;;  %s2199_s21 = smov 0  }
   0xa   :  { %s2201_s22 = smov 0   ;;  %s2203_s23 = smov 0  }
   0xb LB: > { %s2222_s24 = sadd.s32 4294967295, %s2147_s23   ;;  %p51_p0 = scmp.ne.s32.totalorder %s2135_s20, %s2131_s19  ;;  %s2147_s23 = sphi %s2203_s23, %s23_s23   ;;  %s2143_s22 = sphi %s2201_s22, %s2593_s22   ;;  %s2139_s21 = sphi %s2199_s21, %s2592_s21   ;;  %s2135_s20 = sphi %s2197_s20, %s2591_s20   ;;  %s2131_s19 = sphi %s2195_s19, %s2590_s19   ;;  %s2127_s18 = sphi %s2193_s18, %s2589_s18  }
   0xc   : > { %p52_p1 = scmp.eq.s32.totalorder %s2147_s23, 0  ;;  %p57_p2 = scmp.ne.s32.totalorder %s2131_s19, %s2127_s18 }
   0xd   : > { %p2564_p3 = scmp.eq.s32.totalorder %s2222_s24, 0  ;;  %p1426_p5 = scmp.ge.s32.totalorder %s2147_s23, 1 }
   0xe   : > { %p53_p4 = por %p52_p1, %p51_p0  ;;  %p183_p7 = scmp.lt.s32.totalorder %s2147_s23, 4 }
   0xf   : > { %p2233_p6 = por %p2564_p3, %p57_p2  ;;  %s2149_s28 = smov [#allocation8]  }
  0x10   : > { %p2238_p8 = pnand %p1426_p5, %p183_p7  ;;  %s196_s29 = sshll.u32 %s2149_s28, 4  ;;  %s197_s29 = int_to_ptr.vmem [resolvable:$true] %s196_s29 }
  0x11   : > { %s2572_s26 = scalar_select %p2233_p6, 1, 0 }
  0x12   : > { %s2573_s27 = scalar_select %p2238_p8, 1, 0 }
  0x13   : > { %p1737_p9 = pneg %p2238_p8  ;;  %p1757_p10 = scmp.lt.s32.totalorder %s2147_s23, 3 }
  0x14   : > { %s2150_s7 = smov [#allocation9]   ;;  %s2576_s2 = sld [smem:[#allocation19_spill]] }
  0x15   : > { %p2247_p11 = pnand %p1737_p9, %p2564_p3  ;;  %p2251_p12 = pnand %p1757_p10, %p53_p4 }
  0x16   : > { %s206_s8 = sshll.u32 %s2150_s7, 4  ;;  %s207_s8 = int_to_ptr.vmem [resolvable:$true] %s206_s8 }
  0x17   : > { %s2575_s6 = scalar_select %p2251_p12, 1, 0 }
  0x18   : > { %p2263_p0 = pneg %p2247_p11 }
  0x1a   : > { %s1911_s11 = scalar_lea.hbm %s2576_s2, 16 }
  0x1b   : > { %p1912_p13 = scmp.ne.s32.totalorder %s2576_s2, %s1911_s11  ;;  %p1918_p4 = scmp.lt.u32.totalorder %s1911_s11, %s2576_s2 }
  0x1d   : > { %p1914_p1 = pnand %p2263_p0, %p1912_p13 }
  0x1f   : > { %p1915_p2 = pneg %p1914_p1 }
  0x21   : > { %p1920_p5 = pnand %p1918_p4, %p1915_p2 }
  0x23   : > { %1923 = shalt.err (!%p1920_p5)
}
  0x24   : > { %s1924_s17 = scalar_lea.vmem %s197_s29, 16  ;;  %s1931_s18 = scalar_lea.vmem %s197_s29, 32 }
  0x25   : > { %p1925_p7 = scmp.ne.s32.totalorder %s197_s29, %s1924_s17  ;;  %p1932_p3 = scmp.lt.s32.totalorder %s197_s29, %s197_s29 }
  0x26   : > { %p1933_p6 = scmp.lt.s32.totalorder %s1931_s18, %s1924_s17 }
  0x27   : > { %p1927_p9 = pnand %p1925_p7, %p2263_p0 }
  0x28   : > { %p1934_p8 = por %p1933_p6, %p1932_p3 }
  0x29   : > { %p1928_p10 = pneg %p1927_p9 }
  0x2b   : > { %p1935_p12 = pnand %p1934_p8, %p1928_p10 }
  0x2d   : > { %1938 = shalt.err (!%p1935_p12)
}
  0x2e   : > { %1740 = dma.hbm_to_vmem [thread:$0]  (!%p2247_p11), %s2576_s2, 16, %s197_s29, [#allocation7]  }
  0x2f   : > { %s1939_s11 = scalar_lea.hbm %s2561_s3, 1024 }
  0x30   : > { %p1940_p13 = scmp.ne.s32.totalorder %s2561_s3, %s1939_s11  ;;  %p1946_p8 = scmp.lt.u32.totalorder %s1939_s11, %s2561_s3 }
  0x32   : > { %p1942_p3 = pnand %p1940_p13, %p2263_p0 }
  0x34   : > { %p1943_p6 = pneg %p1942_p3 }
  0x36   : > { %p1948_p12 = pnand %p1946_p8, %p1943_p6 }
  0x38   : > { %1951 = shalt.err (!%p1948_p12)
}
  0x39   : > { %s1952_s17 = scalar_lea.vmem %s207_s8, 1024  ;;  %p1960_p5 = scmp.lt.s32.totalorder %s207_s8, %s207_s8 }
  0x3a   : > { %p1953_p1 = scmp.ne.s32.totalorder %s207_s8, %s1952_s17  ;;  %p1961_p7 = scmp.lt.s32.totalorder %s1952_s17, %s1952_s17 }
  0x3c   : > { %p1955_p2 = pnand %p1953_p1, %p2263_p0  ;;  %p1962_p9 = por %p1961_p7, %p1960_p5 }
  0x3e   : > { %p1956_p4 = pneg %p1955_p2 }
  0x40   : > { %p1963_p10 = pnand %p1962_p9, %p1956_p4 }
  0x42   : > { %1966 = shalt.err (!%p1963_p10)
}
  0x43   : > { %s2568_s29 = smov 64   ;;  %s2569_s18 = smov 4  }
  0x44   : > { %1743 = dma.hbm_to_vmem [thread:$0]  (!%p2247_p11), %s2561_s3, 1024, %s207_s8, [#allocation10], %s2568_s29, %s2568_s29, %s2569_s18  }
  0x45   : > { %s2153_s9 = smov [#allocation11]   ;;  %s1967_s13 = scalar_lea.hbm %s2562_s4, 16 }
  0x46   : > { %s220_s10 = sshll.u32 %s2153_s9, 4  ;;  %p1968_p13 = scmp.ne.s32.totalorder %s2562_s4, %s1967_s13  ;;  %s221_s10 = int_to_ptr.vmem [resolvable:$true] %s220_s10 }
  0x47   : > { %p1974_p8 = scmp.lt.u32.totalorder %s1967_s13, %s2562_s4 }
  0x48   : > { %p1970_p3 = pnand %p1968_p13, %p2263_p0 }
  0x4a   : > { %p1971_p6 = pneg %p1970_p3 }
  0x4c   : > { %p1976_p12 = pnand %p1974_p8, %p1971_p6 }
  0x4e   : > { %1979 = shalt.err (!%p1976_p12)
}
  0x4f   : > { %s1980_s8 = scalar_lea.vmem %s221_s10, 16  ;;  %s1987_s28 = scalar_lea.vmem %s221_s10, 32 }
  0x50   : > { %p1981_p1 = scmp.ne.s32.totalorder %s221_s10, %s1980_s8  ;;  %p1988_p5 = scmp.lt.s32.totalorder %s221_s10, %s221_s10 }
  0x51   : > { %p1989_p7 = scmp.lt.s32.totalorder %s1987_s28, %s1980_s8 }
  0x52   : > { %p1983_p2 = pnand %p1981_p1, %p2263_p0 }
  0x53   : > { %p1990_p9 = por %p1989_p7, %p1988_p5 }
  0x54   : > { %p1984_p4 = pneg %p1983_p2 }
  0x56   : > { %p1991_p10 = pnand %p1990_p9, %p1984_p4 }
  0x58   : > { %1994 = shalt.err (!%p1991_p10)
}
  0x59   : > { %1746 = dma.hbm_to_vmem [thread:$0]  (!%p2247_p11), %s2562_s4, 16, %s221_s10, [#allocation10]  }
  0x5a   : > { %s32_s25 = sadd.s32 1, %s2143_s22  ;;  %s231_s14 = sand.u32 1, %s2135_s20  }
  0x5b   : > { %p33_p0 = scmp.ge.s32.totalorder %s32_s25, 3  ;;  %s2320_s11 = sshll.u32 %s231_s14, 8 }
  0x5c   : > { %s1523_s30 = sshll.u32 %s2143_s22, 8  ;;  %s2578_s0 = sld [smem:[#allocation18_spill]] }
  0x5d   : > { %s2595_s25 = smov (%p33_p0, %s32_s25), 0  ;;  %s235_s16 = scalar_lea.vmem [#allocation3], %s2320_s11 }
  0x5e   : > { %s40_s10 = ssub.s32 %s2143_s22, %s2595_s25  ;;  %s245_s17 = sshll.u32 %s235_s16, 4  ;;  %s2333_s17 = int_to_ptr.vmem [resolvable:$true] %s245_s17 }
  0x5f   : > { %p42_p11 = scmp.eq.s32.totalorder %s40_s10, 0  ;;  %s2579_s8 = sadd.s32 1, %s2135_s20 }
  0x60   : > { %s255_s7 = sand.u32 1, %s2147_s23   ;;  %s2341_s9 = scalar_lea.sflag [#allocation4], %s231_s14 }
  0x61   : > { %s2338_s28 = scalar_select %p42_p11, %s2135_s20, %s2579_s8  }
  0x62   : > { %s2328_s15 = scalar_lea.hbm %s2578_s0, %s1523_s30  ;;  %p2580_p3 = scmp.ne.s32.totalorder %s2575_s6, 0 }
  0x63   : > { %s1995_s12 = scalar_lea.hbm %s2328_s15, 4096  ;;  %s2000_s10 = scalar_lea.hbm %s2578_s0, 12288 }
  0x64   : > { %p1996_p13 = scmp.ne.s32.totalorder %s2328_s15, %s1995_s12  ;;  %p1997_p6 = pneg %p2580_p3 }
  0x65   : > { %p2001_p1 = scmp.lt.u32.totalorder %s2328_s15, %s2578_s0  ;;  %p2002_p2 = scmp.lt.u32.totalorder %s2000_s10, %s1995_s12 }
  0x66   : > { %p1998_p8 = pnand %p1997_p6, %p1996_p13  ;;  %p2004_p5 = scmp.lt.u32.totalorder %s1995_s12, %s2328_s15 }
  0x67   : > { %p2003_p4 = por %p2002_p2, %p2001_p1 }
  0x68   : > { %p1999_p12 = pneg %p1998_p8 }
  0x69   : > { %p2005_p7 = por %p2004_p5, %p2003_p4 }
  0x6b   : > { %p2006_p9 = pnand %p2005_p7, %p1999_p12 }
  0x6d   : > { %2009 = shalt.err (!%p2006_p9)
}
  0x6e   : > { %s2010_s14 = scalar_lea.vmem %s2333_s17, 4096  ;;  %s2154_s8 = smov [#allocation3]  }
  0x6f   : > { %p2011_p10 = scmp.ne.s32.totalorder %s2333_s17, %s2010_s14  ;;  %s2015_s30 = sshll.u32 %s2154_s8, 4  ;;  %s2016_s30 = int_to_ptr.vmem [resolvable:$false] %s2015_s30 }
  0x70   : > { %s2017_s29 = scalar_lea.vmem %s2016_s30, 8192  ;;  %p2018_p13 = scmp.lt.s32.totalorder %s2333_s17, %s2016_s30 }
  0x71   : > { %p2013_p0 = pnand %p2011_p10, %p1997_p6  ;;  %p2019_p8 = scmp.lt.s32.totalorder %s2017_s29, %s2010_s14 }
  0x73   : > { %p2014_p11 = pneg %p2013_p0  ;;  %p2020_p1 = por %p2019_p8, %p2018_p13 }
  0x75   : > { %p2021_p2 = pnand %p2020_p1, %p2014_p11 }
  0x77   : > { %2024 = shalt.err (!%p2021_p2)
}
  0x78   : > { %s2155_s12 = smov 768   ;;  %s2156_s13 = smov 256  }
  0x79   : > { %s2157_s10 = smov 16   ;;  %s1524_s16 = sshll.u32 %s2143_s22, 12 }
  0x7a   : > { %1750 = dma.hbm_to_vmem [thread:$0]  (!%p2580_p3), %s2328_s15, 4096, %s2333_s17, %s2341_s9, %s2155_s12, %s2156_s13, %s2157_s10  }
  0x7b   : > { %s259_s8 = scalar_lea.vmem [#allocation6], %s2320_s11  ;;  %s2374_s18 = scalar_lea.hbm %s2559_s1, %s1524_s16 }
  0x7c   : > { %s266_s30 = sshll.u32 %s259_s8, 4  ;;  %s2380_s0 = scalar_lea.sflag [#allocation7], %s255_s7  ;;  %s2376_s30 = int_to_ptr.vmem [resolvable:$true] %s266_s30 }
  0x7d   : > { %s2025_s2 = scalar_lea.hbm %s2374_s18, 4096  ;;  %s2030_s17 = scalar_lea.hbm %s2559_s1, 12288 }
  0x7e   : > { %p2026_p12 = scmp.ne.s32.totalorder %s2374_s18, %s2025_s2  ;;  %p2031_p7 = scmp.lt.u32.totalorder %s2374_s18, %s2559_s1 }
  0x7f   : > { %p2032_p9 = scmp.lt.u32.totalorder %s2030_s17, %s2025_s2  ;;  %p2034_p0 = scmp.lt.u32.totalorder %s2025_s2, %s2374_s18 }
  0x80   : > { %p2028_p4 = pnand %p2026_p12, %p1997_p6 }
  0x81   : > { %p2033_p10 = por %p2032_p9, %p2031_p7 }
  0x82   : > { %p2029_p5 = pneg %p2028_p4 }
  0x83   : > { %p2035_p11 = por %p2034_p0, %p2033_p10 }
  0x85   : > { %p2036_p13 = pnand %p2035_p11, %p2029_p5 }
  0x87   : > { %2039 = shalt.err (!%p2036_p13)
}
  0x88   : > { %s2040_s7 = scalar_lea.vmem %s2376_s30, 4096  ;;  %s2158_s13 = smov [#allocation6]  }
  0x89   : > { %p2041_p8 = scmp.ne.s32.totalorder %s2376_s30, %s2040_s7  ;;  %s2045_s10 = sshll.u32 %s2158_s13, 4  ;;  %s2046_s10 = int_to_ptr.vmem [resolvable:$false] %s2045_s10 }
  0x8a   : > { %s2047_s16 = scalar_lea.vmem %s2046_s10, 8192  ;;  %p2048_p12 = scmp.lt.s32.totalorder %s2376_s30, %s2046_s10 }
  0x8b   : > { %p2043_p1 = pnand %p2041_p8, %p1997_p6  ;;  %p2049_p4 = scmp.lt.s32.totalorder %s2047_s16, %s2040_s7 }
  0x8d   : > { %p2044_p2 = pneg %p2043_p1  ;;  %p2050_p7 = por %p2049_p4, %p2048_p12 }
  0x8f   : > { %p2051_p9 = pnand %p2050_p7, %p2044_p2 }
  0x91   : > { %2054 = shalt.err (!%p2051_p9)
}
  0x92   : > { %s2581_s2 = smov 4   ;;  %s2582_s8 = smov 64  }
  0x93   : > { %1753 = dma.hbm_to_vmem [thread:$0]  (!%p2580_p3), %s2374_s18, 4096, %s2376_s30, %s2380_s0, %s2582_s8, %s2582_s8, %s2581_s2  }
  0x94   : > { %p2583_p6 = scmp.ne.s32.totalorder %s2573_s27, 0 }
  0x95   : > { %s280_s14 = sand.u32 (!%p2583_p6), 1, %s2131_s19   ;;  %p2584_p5 = scmp.ne.s32.totalorder (!%p2583_p6), %s2572_s26, 0 }
  0x96   : > { %278 = sbr.rel (%p2583_p6) target bundleno = 747 (0x2eb), region = 40  ;;  %s1438_s29 = sshll.u32 (!%p2583_p6), %s280_s14, 8 }
  0x97   : > { %s281_s11 = scalar_lea.sflag (!%p2583_p6), [#allocation4], %s280_s14  ;;  %s2412_s15 = scalar_lea.vmem (!%p2583_p6), [#allocation3], %s1438_s29 }
  0x9d   : > { %2106 = dma.done.wait (%p2584_p5), %s281_s11, 4096  }
  0x9e   : > { %2108 = vsyncadd (%p2584_p5), %s281_s11, 4294963200  ;;  %s289_s6 = sand.u32 1, %s2222_s24   ;;  %s2419_s0 = scalar_lea.vmem [#allocation6], %s1438_s29 }
  0x9f   : > { %s290_s17 = scalar_lea.sflag [#allocation7], %s289_s6 }
  0xa0   : > { %2110 = dma.done.wait (%p2584_p5), %s290_s17, 4096  }
  0xa1   : > { %2112 = vsyncadd (%p2584_p5), %s290_s17, 4294963200  ;;  %p2585_p3 = scmp.eq.s32.totalorder %s2222_s24, 0 }
  0xa3   : > { %2114 = dma.done.wait (%p2585_p3), [#allocation7], 16   ;;  %p2586_p10 = pmov %p2585_p3 }
  0xa4   : > { %p2587_p0 = pmov %p2585_p3 }
  0xa5   : > { %2116 = vsyncadd (%p2586_p10), [#allocation7], 4294967280 }
  0xa6   : > { %2118 = dma.done.wait (%p2587_p0), [#allocation10], 1040   ;;  %p2588_p11 = pmov %p2587_p0 }
  0xa7   : > { %p1443_p13 = scmp.ne.s32.totalorder %s2139_s21, 0 }
  0xa8   : > { %2120 = vsyncadd (%p2588_p11), [#allocation10], 4294966256  ;;  %v2159_v0 = vmov (!%p1443_p13), 0.0  }
  0xa9   : > { %340 = sbr.rel (%p1443_p13) target bundleno = 177 (0xb1), region = 64  ;;  %341 = vst [vmem:[#allocation2] sm:$0xff] (!%p1443_p13), %v2159_v0  ;;  %342 = vst [vmem:[#allocation2 + $0x8] sm:$0xff] (!%p1443_p13), %v2159_v0 }
  0xaa   : > { %343 = vst [vmem:[#allocation2 + $0x10] sm:$0xff] (!%p1443_p13), %v2159_v0  ;;  %344 = vst [vmem:[#allocation2 + $0x18] sm:$0xff] (!%p1443_p13), %v2159_v0 }
  0xab   : > { %345 = vst [vmem:[#allocation2 + $0x20] sm:$0xff] (!%p1443_p13), %v2159_v0  ;;  %346 = vst [vmem:[#allocation2 + $0x28] sm:$0xff] (!%p1443_p13), %v2159_v0 }
  0xac   : > { %347 = vst [vmem:[#allocation2 + $0x30] sm:$0xff] (!%p1443_p13), %v2159_v0  ;;  %348 = vst [vmem:[#allocation2 + $0x38] sm:$0xff] (!%p1443_p13), %v2159_v0 }
  0xad   : > { %349 = vst [vmem:[#allocation2 + $0x40] sm:$0xff] (!%p1443_p13), %v2159_v0  ;;  %350 = vst [vmem:[#allocation2 + $0x48] sm:$0xff] (!%p1443_p13), %v2159_v0 }
  0xae   : > { %351 = vst [vmem:[#allocation2 + $0x50] sm:$0xff] (!%p1443_p13), %v2159_v0  ;;  %352 = vst [vmem:[#allocation2 + $0x58] sm:$0xff] (!%p1443_p13), %v2159_v0 }
  0xaf   : > { %353 = vst [vmem:[#allocation2 + $0x60] sm:$0xff] (!%p1443_p13), %v2159_v0  ;;  %354 = vst [vmem:[#allocation2 + $0x68] sm:$0xff] (!%p1443_p13), %v2159_v0 }
  0xb0   : > { %355 = vst [vmem:[#allocation2 + $0x70] sm:$0xff] %v2159_v0  ;;  %356 = vst [vmem:[#allocation2 + $0x78] sm:$0xff] %v2159_v0 }
  0xb1 PF: > { %v1823_v1 = vld [vmem:[%s2419_s0 + $0x40] sm:$0xff]   ;;  %v1827_v5 = vld [vmem:[%s2419_s0 + $0x48] sm:$0xff]   ;;  %v1831_v9 = vld [vmem:[%s2419_s0 + $0x50] sm:$0xff]   ;;  %p1508_p8 = scmp.ne.s32.totalorder %s2139_s21, 2 }
  0xb2   : > { %v1824_v2 = vld [vmem:[%s2419_s0 + $0xc0] sm:$0xff]   ;;  %1525 = vmatprep.subr.bf16.mxu0 %v1823_v1  ;;  %v1828_v6 = vld [vmem:[%s2419_s0 + $0xc8] sm:$0xff]   ;;  %v1832_v10 = vld [vmem:[%s2419_s0 + $0xd0] sm:$0xff]  }
  0xb3   : > { %v1825_v3 = vld [vmem:[%s2419_s0] sm:$0xff]   ;;  %1589 = vmatprep.subr.bf16.mxu1 %v1824_v2  ;;  %v1829_v7 = vld [vmem:[%s2419_s0 + $0x8] sm:$0xff]   ;;  %v1833_v11 = vld [vmem:[%s2419_s0 + $0x10] sm:$0xff]  }
  0xb4   : > { %v1826_v4 = vld [vmem:[%s2419_s0 + $0x80] sm:$0xff]   ;;  %1526 = vmatpush3.bf16.msra.mxu0 %v1825_v3  ;;  %v1830_v8 = vld [vmem:[%s2419_s0 + $0x88] sm:$0xff]   ;;  %v1834_v12 = vld [vmem:[%s2419_s0 + $0x90] sm:$0xff]  }
  0xb5   : > { %1590 = vmatpush3.bf16.msra.mxu1 %v1826_v4  ;;  %1527 = vmatprep.subr.bf16.mxu0 %v1827_v5  ;;  %v1835_v13 = vld [vmem:[%s2419_s0 + $0x58] sm:$0xff]   ;;  %v1839_v17 = vld [vmem:[%s2419_s0 + $0x60] sm:$0xff]   ;;  %v1843_v21 = vld [vmem:[%s2419_s0 + $0x68] sm:$0xff]  }
  0xb6   : > { %1591 = vmatprep.subr.bf16.mxu1 %v1828_v6  ;;  %v1836_v14 = vld [vmem:[%s2419_s0 + $0xd8] sm:$0xff]   ;;  %v1840_v18 = vld [vmem:[%s2419_s0 + $0xe0] sm:$0xff]   ;;  %v1844_v22 = vld [vmem:[%s2419_s0 + $0xe8] sm:$0xff]  }
  0xb7   : > { %v1837_v15 = vld [vmem:[%s2419_s0 + $0x18] sm:$0xff]   ;;  %v1841_v19 = vld [vmem:[%s2419_s0 + $0x20] sm:$0xff]   ;;  %v1845_v23 = vld [vmem:[%s2419_s0 + $0x28] sm:$0xff]  }
  0xb8   : > { %1528 = vmatpush3.bf16.msra.mxu0 %v1829_v7  ;;  %v1838_v16 = vld [vmem:[%s2419_s0 + $0x98] sm:$0xff]   ;;  %v1842_v20 = vld [vmem:[%s2419_s0 + $0xa0] sm:$0xff]   ;;  %v1846_v24 = vld [vmem:[%s2419_s0 + $0xa8] sm:$0xff]  }
  0xb9   : > { %1592 = vmatpush3.bf16.msra.mxu1 %v1830_v8  ;;  %1529 = vmatprep.subr.bf16.mxu0 %v1831_v9  ;;  %v1847_v25 = vld [vmem:[%s2419_s0 + $0x70] sm:$0xff]   ;;  %v1851_v29 = vld [vmem:[%s2419_s0 + $0x78] sm:$0xff]  }
  0xba   : > { %1593 = vmatprep.subr.bf16.mxu1 %v1832_v10  ;;  %v1848_v26 = vld [vmem:[%s2419_s0 + $0xf0] sm:$0xff]   ;;  %v1852_v30 = vld [vmem:[%s2419_s0 + $0xf8] sm:$0xff]   ;;  %v357_v10 = vld [vmem:[#allocation2] sm:$0xff] }
  0xbb   : > { %v1849_v27 = vld [vmem:[%s2419_s0 + $0x30] sm:$0xff]   ;;  %v1853_v31 = vld [vmem:[%s2419_s0 + $0x38] sm:$0xff]  }
  0xbc   : > { %1530 = vmatpush3.bf16.msra.mxu0 %v1833_v11  ;;  %v1850_v28 = vld [vmem:[%s2419_s0 + $0xb0] sm:$0xff]   ;;  %v1854_v32 = vld [vmem:[%s2419_s0 + $0xb8] sm:$0xff]  }
  0xbd   : > { %1594 = vmatpush3.bf16.msra.mxu1 %v1834_v12  ;;  %1531 = vmatprep.subr.bf16.mxu0 %v1835_v13  ;;  %v1855_v33 = vld [vmem:[%s2412_s15] ss:$16 sps:$4 sm:$0xff]   ;;  %v1857_v34 = vld [vmem:[%s2412_s15 + $0x4] ss:$16 sps:$4 sm:$0xff]   ;;  %v1858_v35 = vld [vmem:[%s2412_s15 + $0x8] ss:$16 sps:$4 sm:$0xff]  }
  0xbe   : > { %1595 = vmatprep.subr.bf16.mxu1 %v1836_v14  ;;  %v1860_v36 = vld [vmem:[%s2412_s15 + $0xc] ss:$16 sps:$4 sm:$0xff]   ;;  %853 = vmatprep.mubr.bf16.mxu0 %v1857_v34  ;;  %v1861_v37 = vld [vmem:[%s2412_s15 + $0x24] ss:$16 sps:$4 sm:$0xff]   ;;  %v1865_v39 = vld [vmem:[%s2412_s15 + $0x20] ss:$16 sps:$4 sm:$0xff]  }
  0xbf   : > { %950 = vmatprep.mubr.bf16.mxu1 %v1860_v36  ;;  %v1863_v38 = vld [vmem:[%s2412_s15 + $0x2c] ss:$16 sps:$4 sm:$0xff]   ;;  %v1866_v40 = vld [vmem:[%s2412_s15 + $0x28] ss:$16 sps:$4 sm:$0xff]   ;;  %v1867_v41 = vld [vmem:[%s2412_s15 + $0x44] ss:$16 sps:$4 sm:$0xff]  }
  0xc0   : > { %1532 = vmatpush3.bf16.msra.mxu0 %v1837_v15  ;;  %v1869_v42 = vld [vmem:[%s2412_s15 + $0x4c] ss:$16 sps:$4 sm:$0xff]   ;;  %v1871_v43 = vld [vmem:[%s2412_s15 + $0x40] ss:$16 sps:$4 sm:$0xff]   ;;  %v1872_v44 = vld [vmem:[%s2412_s15 + $0x48] ss:$16 sps:$4 sm:$0xff]  }
  0xc1   : > { %1596 = vmatpush3.bf16.msra.mxu1 %v1838_v16  ;;  %1533 = vmatprep.subr.bf16.mxu0 %v1839_v17  ;;  %v1873_v45 = vld [vmem:[%s2412_s15 + $0x64] ss:$16 sps:$4 sm:$0xff]   ;;  %v1875_v46 = vld [vmem:[%s2412_s15 + $0x6c] ss:$16 sps:$4 sm:$0xff]   ;;  %v1877_v47 = vld [vmem:[%s2412_s15 + $0x60] ss:$16 sps:$4 sm:$0xff]  }
  0xc2   : > { %1597 = vmatprep.subr.bf16.mxu1 %v1840_v18  ;;  %v1878_v48 = vld [vmem:[%s2412_s15 + $0x68] ss:$16 sps:$4 sm:$0xff]   ;;  %v1879_v49 = vld [vmem:[%s2412_s15 + $0x84] ss:$16 sps:$4 sm:$0xff]   ;;  %v1881_v50 = vld [vmem:[%s2412_s15 + $0x8c] ss:$16 sps:$4 sm:$0xff]  }
  0xc3   : > { %v1883_v51 = vld [vmem:[%s2412_s15 + $0x80] ss:$16 sps:$4 sm:$0xff]   ;;  %v1884_v52 = vld [vmem:[%s2412_s15 + $0x88] ss:$16 sps:$4 sm:$0xff]   ;;  %v1885_v53 = vld [vmem:[%s2412_s15 + $0xa4] ss:$16 sps:$4 sm:$0xff]  }
  0xc4   : > { %1534 = vmatpush3.bf16.msra.mxu0 %v1841_v19  ;;  %v1887_v54 = vld [vmem:[%s2412_s15 + $0xac] ss:$16 sps:$4 sm:$0xff]   ;;  %v1889_v55 = vld [vmem:[%s2412_s15 + $0xa0] ss:$16 sps:$4 sm:$0xff]   ;;  %v1890_v56 = vld [vmem:[%s2412_s15 + $0xa8] ss:$16 sps:$4 sm:$0xff]  }
  0xc5   : > { %1598 = vmatpush3.bf16.msra.mxu1 %v1842_v20  ;;  %1535 = vmatprep.subr.bf16.mxu0 %v1843_v21  ;;  %v1891_v57 = vld [vmem:[%s2412_s15 + $0xc4] ss:$16 sps:$4 sm:$0xff]   ;;  %v1893_v58 = vld [vmem:[%s2412_s15 + $0xcc] ss:$16 sps:$4 sm:$0xff]   ;;  %v1895_v59 = vld [vmem:[%s2412_s15 + $0xc0] ss:$16 sps:$4 sm:$0xff]  }
  0xc6   : > { %1599 = vmatprep.subr.bf16.mxu1 %v1844_v22  ;;  %v1896_v60 = vld [vmem:[%s2412_s15 + $0xc8] ss:$16 sps:$4 sm:$0xff]   ;;  %v1897_v61 = vld [vmem:[%s2412_s15 + $0xe4] ss:$16 sps:$4 sm:$0xff]   ;;  %v1899_v62 = vld [vmem:[%s2412_s15 + $0xec] ss:$16 sps:$4 sm:$0xff]  }
  0xc7   : > { %v1901_v63 = vld [vmem:[%s2412_s15 + $0xe0] ss:$16 sps:$4 sm:$0xff]   ;;  %v1902_v0 = vld [vmem:[%s2412_s15 + $0xe8] ss:$16 sps:$4 sm:$0xff]  }
  0xc8   : > { %1536 = vmatpush3.bf16.msra.mxu0 %v1845_v23  ;;  %v358_v15 = vld [vmem:[#allocation2 + $0x8] sm:$0xff] }
  0xc9   : > { %1600 = vmatpush3.bf16.msra.mxu1 %v1846_v24  ;;  %1537 = vmatprep.subr.bf16.mxu0 %v1847_v25 }
  0xca   : > { %1601 = vmatprep.subr.bf16.mxu1 %v1848_v26 }
  0xcc   : > { %1538 = vmatpush3.bf16.msra.mxu0 %v1849_v27 }
  0xcd   : > { %1602 = vmatpush3.bf16.msra.mxu1 %v1850_v28  ;;  %1539 = vmatprep.subr.bf16.mxu0 %v1851_v29  ;;  %v359_v28 = vld [vmem:[#allocation2 + $0x10] sm:$0xff] }
  0xce   : > { %1603 = vmatprep.subr.bf16.mxu1 %v1852_v30 }
  0xd0   : > { %1540 = vmatpush3.bf16.msra.mxu0 %v1853_v31 }
  0xd1   : > { %1604 = vmatpush3.bf16.msra.mxu1 %v1854_v32 }
  0xd3   : > { %854 = vmatmul.mubr.bf16.vlgmr.msra.gmra.mrb[0].mxu0 %v1855_v33  ;;  %v360_v33 = vld [vmem:[#allocation2 + $0x18] sm:$0xff] }
  0xd4   : > { %951 = vmatmul.mubr.bf16.vlgmr.msra.gmra.mrb[0].mxu1 %v1858_v35  ;;  %861 = vmatprep.mubr.bf16.mxu0 %v1861_v37 }
  0xd5   : > { %958 = vmatprep.mubr.bf16.mxu1 %v1863_v38 }
  0xdb   : > { %862 = vmatmul.mubr.bf16.gmra.mrb[4].mxu0 %v1865_v39 }
  0xdc   : > { %959 = vmatmul.mubr.bf16.gmra.mrb[4].mxu1 %v1866_v40  ;;  %869 = vmatprep.mubr.bf16.mxu0 %v1867_v41 }
  0xdd   : > { %966 = vmatprep.mubr.bf16.mxu1 %v1869_v42 }
  0xe3   : > { %870 = vmatmul.mubr.bf16.gmra.mrb[8].mxu0 %v1871_v43 }
  0xe4   : > { %967 = vmatmul.mubr.bf16.gmra.mrb[8].mxu1 %v1872_v44  ;;  %877 = vmatprep.mubr.bf16.mxu0 %v1873_v45 }
  0xe5   : > { %974 = vmatprep.mubr.bf16.mxu1 %v1875_v46  ;;  %v361_v46 = vld [vmem:[#allocation2 + $0x20] sm:$0xff] }
  0xeb   : > { %878 = vmatmul.mubr.bf16.gmra.mrb[12].mxu0 %v1877_v47 }
  0xec   : > { %975 = vmatmul.mubr.bf16.gmra.mrb[12].mxu1 %v1878_v48  ;;  %885 = vmatprep.mubr.bf16.mxu0 %v1879_v49 }
  0xed   : > { %982 = vmatprep.mubr.bf16.mxu1 %v1881_v50 }
  0xf3   : > { %886 = vmatmul.mubr.bf16.gmra.mrb[16].mxu0 %v1883_v51  ;;  %v362_v51 = vld [vmem:[#allocation2 + $0x28] sm:$0xff] }
  0xf4   : > { %983 = vmatmul.mubr.bf16.gmra.mrb[16].mxu1 %v1884_v52  ;;  %893 = vmatprep.mubr.bf16.mxu0 %v1885_v53 }
  0xf5   : > { %990 = vmatprep.mubr.bf16.mxu1 %v1887_v54 }
  0xfb   : > { %894 = vmatmul.mubr.bf16.gmra.mrb[20].mxu0 %v1889_v55 }
  0xfc   : > { %991 = vmatmul.mubr.bf16.gmra.mrb[20].mxu1 %v1890_v56  ;;  %901 = vmatprep.mubr.bf16.mxu0 %v1891_v57 }
  0xfd   : > { %998 = vmatprep.mubr.bf16.mxu1 %v1893_v58 }
 0x103   : > { %902 = vmatmul.mubr.bf16.gmra.mrb[24].mxu0 %v1895_v59 }
 0x104   : > { %999 = vmatmul.mubr.bf16.gmra.mrb[24].mxu1 %v1896_v60  ;;  %909 = vmatprep.mubr.bf16.mxu0 %v1897_v61 }
 0x105   : > { %1006 = vmatprep.mubr.bf16.mxu1 %v1899_v62 }
 0x10b   : > { %910 = vmatmul.mubr.bf16.gmra.mrb[28].mxu0 %v1901_v63 }
 0x10c   : > { %1007 = vmatmul.mubr.bf16.gmra.mrb[28].mxu1 %v1902_v0  ;;  %v363_v0 = vld [vmem:[#allocation2 + $0x30] sm:$0xff] }
 0x1a6   : > { %v1541_v1 = vpop.f32.mrb[0].mxu0 }
 0x1a7   : > { %v1605_v2 = vpop.f32.mrb[0].mxu1  ;;  %v1542_v3 = vpop.f32.mrb[1].mxu0 }
 0x1a8   : > { %v1543_v4 = vadd.f32 %v1542_v3, %v1541_v1  ;;  %v1606_v5 = vpop.f32.mrb[1].mxu1  ;;  %v1544_v6 = vpop.f32.mrb[2].mxu0 }
 0x1a9   : > { %v1607_v7 = vadd.f32 %v1606_v5, %v1605_v2  ;;  %v1608_v8 = vpop.f32.mrb[2].mxu1  ;;  %v1545_v9 = vpop.f32.mrb[3].mxu0  ;;  %v364_v5 = vld [vmem:[#allocation2 + $0x38] sm:$0xff] }
 0x1aa   : > { %v1546_v11 = vadd.f32 %v1545_v9, %v1544_v6  ;;  %v1609_v12 = vpop.f32.mrb[3].mxu1 }
 0x1ab   : > { %v953_v13 = vadd.f32 %v1607_v7, %v1543_v4  ;;  %v1610_v14 = vadd.f32 %v1609_v12, %v1608_v8 }
 0x1ad   : > { %v1015_v16 = vadd.f32 %v953_v13, %v357_v10  ;;  %v956_v17 = vadd.f32 %v1610_v14, %v1546_v11 }
 0x1ae   : > { %v1547_v18 = vpop.f32.mrb[4].mxu0 }
 0x1af   : > { %1031 = vst [vmem:[#allocation2] sm:$0xff] %v1015_v16  ;;  %v1016_v19 = vadd.f32 %v956_v17, %v358_v15  ;;  %v1611_v20 = vpop.f32.mrb[4].mxu1  ;;  %v1548_v21 = vpop.f32.mrb[5].mxu0 }
 0x1b0   : > { %v1549_v22 = vadd.f32 %v1548_v21, %v1547_v18  ;;  %v1612_v23 = vpop.f32.mrb[5].mxu1  ;;  %v1550_v24 = vpop.f32.mrb[6].mxu0  ;;  %v365_v18 = vld [vmem:[#allocation2 + $0x40] sm:$0xff] }
 0x1b1   : > { %1032 = vst [vmem:[#allocation2 + $0x8] sm:$0xff] %v1016_v19  ;;  %v1613_v25 = vadd.f32 %v1612_v23, %v1611_v20  ;;  %v1614_v26 = vpop.f32.mrb[6].mxu1  ;;  %v1551_v27 = vpop.f32.mrb[7].mxu0  ;;  %v366_v23 = vld [vmem:[#allocation2 + $0x48] sm:$0xff] }
 0x1b2   : > { %v1552_v29 = vadd.f32 %v1551_v27, %v1550_v24  ;;  %v1615_v30 = vpop.f32.mrb[7].mxu1 }
 0x1b3   : > { %v961_v31 = vadd.f32 %v1613_v25, %v1549_v22  ;;  %v1616_v32 = vadd.f32 %v1615_v30, %v1614_v26 }
 0x1b5   : > { %v1017_v34 = vadd.f32 %v961_v31, %v359_v28  ;;  %v964_v35 = vadd.f32 %v1616_v32, %v1552_v29 }
 0x1b6   : > { %v1553_v36 = vpop.f32.mrb[8].mxu0 }
 0x1b7   : > { %1033 = vst [vmem:[#allocation2 + $0x10] sm:$0xff] %v1017_v34  ;;  %v1018_v37 = vadd.f32 %v964_v35, %v360_v33  ;;  %v1617_v38 = vpop.f32.mrb[8].mxu1  ;;  %v1554_v39 = vpop.f32.mrb[9].mxu0 }
 0x1b8   : > { %v1555_v40 = vadd.f32 %v1554_v39, %v1553_v36  ;;  %v1618_v41 = vpop.f32.mrb[9].mxu1  ;;  %v1556_v42 = vpop.f32.mrb[10].mxu0  ;;  %v367_v36 = vld [vmem:[#allocation2 + $0x50] sm:$0xff] }
 0x1b9   : > { %1034 = vst [vmem:[#allocation2 + $0x18] sm:$0xff] %v1018_v37  ;;  %v1619_v43 = vadd.f32 %v1618_v41, %v1617_v38  ;;  %v1620_v44 = vpop.f32.mrb[10].mxu1  ;;  %v1557_v45 = vpop.f32.mrb[11].mxu0  ;;  %v368_v41 = vld [vmem:[#allocation2 + $0x58] sm:$0xff] }
 0x1ba   : > { %v1558_v47 = vadd.f32 %v1557_v45, %v1556_v42  ;;  %v1621_v48 = vpop.f32.mrb[11].mxu1 }
 0x1bb   : > { %v969_v49 = vadd.f32 %v1619_v43, %v1555_v40  ;;  %v1622_v50 = vadd.f32 %v1621_v48, %v1620_v44 }
 0x1bd   : > { %v1019_v52 = vadd.f32 %v969_v49, %v361_v46  ;;  %v972_v53 = vadd.f32 %v1622_v50, %v1558_v47 }
 0x1be   : > { %v1559_v54 = vpop.f32.mrb[12].mxu0 }
 0x1bf   : > { %1035 = vst [vmem:[#allocation2 + $0x20] sm:$0xff] %v1019_v52  ;;  %v1020_v55 = vadd.f32 %v972_v53, %v362_v51  ;;  %v1623_v56 = vpop.f32.mrb[12].mxu1  ;;  %v1560_v57 = vpop.f32.mrb[13].mxu0 }
 0x1c0   : > { %v1561_v58 = vadd.f32 %v1560_v57, %v1559_v54  ;;  %v1624_v59 = vpop.f32.mrb[13].mxu1  ;;  %v1562_v60 = vpop.f32.mrb[14].mxu0  ;;  %v369_v54 = vld [vmem:[#allocation2 + $0x60] sm:$0xff] }
 0x1c1   : > { %1036 = vst [vmem:[#allocation2 + $0x28] sm:$0xff] %v1020_v55  ;;  %v1625_v61 = vadd.f32 %v1624_v59, %v1623_v56  ;;  %v1626_v62 = vpop.f32.mrb[14].mxu1  ;;  %v1563_v63 = vpop.f32.mrb[15].mxu0  ;;  %v370_v59 = vld [vmem:[#allocation2 + $0x68] sm:$0xff] }
 0x1c2   : > { %v1564_v1 = vadd.f32 %v1563_v63, %v1562_v60  ;;  %v1627_v2 = vpop.f32.mrb[15].mxu1 }
 0x1c3   : > { %v977_v3 = vadd.f32 %v1625_v61, %v1561_v58  ;;  %v1628_v4 = vadd.f32 %v1627_v2, %v1626_v62 }
 0x1c5   : > { %v1021_v6 = vadd.f32 %v977_v3, %v363_v0  ;;  %v980_v7 = vadd.f32 %v1628_v4, %v1564_v1 }
 0x1c6   : > { %v1565_v8 = vpop.f32.mrb[16].mxu0 }
 0x1c7   : > { %1037 = vst [vmem:[#allocation2 + $0x30] sm:$0xff] %v1021_v6  ;;  %v1022_v9 = vadd.f32 %v980_v7, %v364_v5  ;;  %v1629_v10 = vpop.f32.mrb[16].mxu1  ;;  %v1566_v11 = vpop.f32.mrb[17].mxu0 }
 0x1c8   : > { %v1567_v12 = vadd.f32 %v1566_v11, %v1565_v8  ;;  %v1630_v13 = vpop.f32.mrb[17].mxu1  ;;  %v1568_v14 = vpop.f32.mrb[18].mxu0  ;;  %v371_v8 = vld [vmem:[#allocation2 + $0x70] sm:$0xff] }
 0x1c9   : > { %1038 = vst [vmem:[#allocation2 + $0x38] sm:$0xff] %v1022_v9  ;;  %v1631_v15 = vadd.f32 %v1630_v13, %v1629_v10  ;;  %v1632_v16 = vpop.f32.mrb[18].mxu1  ;;  %v1569_v17 = vpop.f32.mrb[19].mxu0  ;;  %v372_v13 = vld [vmem:[#allocation2 + $0x78] sm:$0xff] }
 0x1ca   : > { %v1570_v19 = vadd.f32 %v1569_v17, %v1568_v14  ;;  %v1633_v20 = vpop.f32.mrb[19].mxu1  ;;  %v1903_v17 = vld [vmem:[#allocation9] sm:$0xff] (!%p1508_p8)  }
 0x1cb   : > { %v985_v21 = vadd.f32 %v1631_v15, %v1567_v12  ;;  %v1634_v22 = vadd.f32 %v1633_v20, %v1632_v16  ;;  %1669 = vmatprep.subr.bf16.mxu0 (!%p1508_p8), %v1903_v17  ;;  %1701 = vmatprep.subr.bf16.mxu1 (!%p1508_p8), %v1903_v17  ;;  %v1906_v20 = vld [vmem:[#allocation9 + $0x18] sm:$0xff] (!%p1508_p8)  }
 0x1cc   : > { %1670 = vmatpush3.bf16.msra.mxu0 (!%p1508_p8), %v1903_v17  ;;  %1709 = vmatpush3.bf16.msra.mxu1 (!%p1508_p8), %v1903_v17 }
 0x1cd   : > { %v1023_v24 = vadd.f32 %v985_v21, %v365_v18  ;;  %v988_v25 = vadd.f32 %v1634_v22, %v1570_v19  ;;  %v1904_v18 = vld [vmem:[#allocation9 + $0x8] sm:$0xff] (!%p1508_p8)   ;;  %v1905_v19 = vld [vmem:[#allocation9 + $0x10] sm:$0xff] (!%p1508_p8)   ;;  %v1051_v21 = vld [vmem:[#allocation2] sm:$0xff] (!%p1508_p8) }
 0x1ce   : > { %v1571_v26 = vpop.f32.mrb[20].mxu0  ;;  %1671 = vmatprep.subr.bf16.mxu0 (!%p1508_p8), %v1904_v18  ;;  %1702 = vmatprep.subr.bf16.mxu1 (!%p1508_p8), %v1904_v18  ;;  %v1052_v22 = vld [vmem:[#allocation2 + $0x8] sm:$0xff] (!%p1508_p8) }
 0x1cf   : > { %1039 = vst [vmem:[#allocation2 + $0x40] sm:$0xff] %v1023_v24  ;;  %v1024_v27 = vadd.f32 %v988_v25, %v366_v23  ;;  %v1635_v28 = vpop.f32.mrb[20].mxu1  ;;  %v1572_v29 = vpop.f32.mrb[21].mxu0  ;;  %v2499_v23 = vld [vmem:[#allocation8] ss:$0 sm:$0xff] (!%p1508_p8) }
 0x1d0   : > { %v1573_v30 = vadd.f32 %v1572_v29, %v1571_v26  ;;  %v1636_v31 = vpop.f32.mrb[21].mxu1  ;;  %v1574_v32 = vpop.f32.mrb[22].mxu0  ;;  %1672 = vmatpush3.bf16.msra.mxu0 (!%p1508_p8), %v1904_v18  ;;  %1710 = vmatpush3.bf16.msra.mxu1 (!%p1508_p8), %v1904_v18  ;;  %v1074_v24 = vadd.f32 (!%p1508_p8), %v2499_v23, %v1051_v21  ;;  %v1075_v25 = vadd.f32 (!%p1508_p8), %v2499_v23, %v1052_v22  ;;  %v1510_v18 = vld [vmem:[#allocation11] ss:$0 sm:$0xff] (!%p1508_p8) }
 0x1d1   : > { %1040 = vst [vmem:[#allocation2 + $0x48] sm:$0xff] %v1024_v27  ;;  %v1637_v33 = vadd.f32 %v1636_v31, %v1635_v28  ;;  %v1638_v34 = vpop.f32.mrb[22].mxu1  ;;  %v1575_v35 = vpop.f32.mrb[23].mxu0  ;;  %1673 = vmatprep.subr.bf16.mxu0 (!%p1508_p8), %v1905_v19  ;;  %1703 = vmatprep.subr.bf16.mxu1 (!%p1508_p8), %v1905_v19 }
 0x1d2   : > { %v1576_v37 = vadd.f32 %v1575_v35, %v1574_v32  ;;  %v1639_v38 = vpop.f32.mrb[23].mxu1  ;;  %v1091_v31 = vmax.f32 (!%p1508_p8), %v1075_v25, 0.0  ;;  %v1907_v32 = vld [vmem:[#allocation9 + $0x20] sm:$0xff] (!%p1508_p8)  }
 0x1d3   : > { %v993_v39 = vadd.f32 %v1637_v33, %v1573_v30  ;;  %v1640_v40 = vadd.f32 %v1639_v38, %v1638_v34  ;;  %v1090_v30 = vmax.f32 (!%p1508_p8), %v1074_v24, 0.0  ;;  %v1909_v38 = vld [vmem:[#allocation9 + $0x30] sm:$0xff] (!%p1508_p8)  }
 0x1d4   : > { %1674 = vmatpush3.bf16.msra.mxu0 (!%p1508_p8), %v1905_v19  ;;  %1711 = vmatpush3.bf16.msra.mxu1 (!%p1508_p8), %v1905_v19 }
 0x1d5   : > { %v1025_v42 = vadd.f32 %v993_v39, %v367_v36  ;;  %v996_v43 = vadd.f32 %v1640_v40, %v1576_v37  ;;  %1675 = vmatprep.subr.bf16.mxu0 (!%p1508_p8), %v1906_v20  ;;  %1704 = vmatprep.subr.bf16.mxu1 (!%p1508_p8), %v1906_v20  ;;  %v1106_v35 = vpack.c.bf16 (!%p1508_p8), %v1091_v31, %v1090_v30  ;;  %v1908_v37 = vld [vmem:[#allocation9 + $0x28] sm:$0xff] (!%p1508_p8)   ;;  %v1054_v40 = vld [vmem:[#allocation2 + $0x18] sm:$0xff] (!%p1508_p8) }
 0x1d6   : > { %v1577_v44 = vpop.f32.mrb[24].mxu0  ;;  %v1059_v26 = vld [vmem:[#allocation2 + $0x40] sm:$0xff] (!%p1508_p8)  ;;  %v1053_v39 = vld [vmem:[#allocation2 + $0x10] sm:$0xff] (!%p1508_p8) }
 0x1d7   : > { %1041 = vst [vmem:[#allocation2 + $0x50] sm:$0xff] %v1025_v42  ;;  %v1026_v45 = vadd.f32 %v996_v43, %v368_v41  ;;  %v1641_v46 = vpop.f32.mrb[24].mxu1  ;;  %v1578_v47 = vpop.f32.mrb[25].mxu0  ;;  %v1082_v28 = vadd.f32 (!%p1508_p8), %v2499_v23, %v1059_v26  ;;  %1685 = vmatprep.mubr.bf16.mxu0 (!%p1508_p8), %v1106_v35  ;;  %v1055_v43 = vld [vmem:[#allocation2 + $0x20] sm:$0xff] (!%p1508_p8) }
 0x1d8   : > { %v1579_v48 = vadd.f32 %v1578_v47, %v1577_v44  ;;  %v1642_v49 = vpop.f32.mrb[25].mxu1  ;;  %v1580_v50 = vpop.f32.mrb[26].mxu0  ;;  %v1060_v27 = vld [vmem:[#allocation2 + $0x48] sm:$0xff] (!%p1508_p8)  ;;  %1676 = vmatpush3.bf16.msra.mxu0 (!%p1508_p8), %v1906_v20  ;;  %1712 = vmatpush3.bf16.msra.mxu1 (!%p1508_p8), %v1906_v20  ;;  %v1076_v47 = vadd.f32 (!%p1508_p8), %v2499_v23, %v1053_v39 }
 0x1d9   : > { %1042 = vst [vmem:[#allocation2 + $0x58] sm:$0xff] %v1026_v45  ;;  %v1643_v51 = vadd.f32 %v1642_v49, %v1641_v46  ;;  %v1644_v52 = vpop.f32.mrb[26].mxu1  ;;  %v1581_v53 = vpop.f32.mrb[27].mxu0  ;;  %v1083_v29 = vadd.f32 (!%p1508_p8), %v2499_v23, %v1060_v27  ;;  %v1098_v33 = vmax.f32 (!%p1508_p8), %v1082_v28, 0.0  ;;  %1677 = vmatprep.subr.bf16.mxu0 (!%p1508_p8), %v1907_v32  ;;  %1705 = vmatprep.subr.bf16.mxu1 (!%p1508_p8), %v1907_v32  ;;  %v1056_v44 = vld [vmem:[#allocation2 + $0x28] sm:$0xff] (!%p1508_p8) }
 0x1da   : > { %v1582_v55 = vadd.f32 %v1581_v53, %v1580_v50  ;;  %v1645_v56 = vpop.f32.mrb[27].mxu1 }
 0x1db   : > { %v1001_v57 = vadd.f32 %v1643_v51, %v1579_v48  ;;  %v1646_v58 = vadd.f32 %v1645_v56, %v1644_v52  ;;  %v1099_v34 = vmax.f32 (!%p1508_p8), %v1083_v29, 0.0  ;;  %v1077_v48 = vadd.f32 (!%p1508_p8), %v2499_v23, %v1054_v40 }
 0x1dc   : > { %1678 = vmatpush3.bf16.msra.mxu0 (!%p1508_p8), %v1907_v32  ;;  %1713 = vmatpush3.bf16.msra.mxu1 (!%p1508_p8), %v1907_v32  ;;  %v1078_v51 = vadd.f32 (!%p1508_p8), %v2499_v23, %v1055_v43  ;;  %v1079_v52 = vadd.f32 (!%p1508_p8), %v2499_v23, %v1056_v44  ;;  %v1092_v56 = vmax.f32 (!%p1508_p8), %v1076_v47, 0.0 }
 0x1dd   : > { %v1027_v60 = vadd.f32 %v1001_v57, %v369_v54  ;;  %v1004_v61 = vadd.f32 %v1646_v58, %v1582_v55  ;;  %v1110_v36 = vpack.c.bf16 (!%p1508_p8), %v1099_v34, %v1098_v33  ;;  %1679 = vmatprep.subr.bf16.mxu0 (!%p1508_p8), %v1908_v37  ;;  %1706 = vmatprep.subr.bf16.mxu1 (!%p1508_p8), %v1908_v37  ;;  %v1910_v55 = vld [vmem:[#allocation9 + $0x38] sm:$0xff] (!%p1508_p8)   ;;  %v1093_v57 = vmax.f32 (!%p1508_p8), %v1077_v48, 0.0 }
 0x1de   : > { %v1583_v62 = vpop.f32.mrb[28].mxu0  ;;  %v1061_v41 = vld [vmem:[#allocation2 + $0x50] sm:$0xff] (!%p1508_p8) }
 0x1df   : > { %1043 = vst [vmem:[#allocation2 + $0x60] sm:$0xff] %v1027_v60  ;;  %v1028_v63 = vadd.f32 %v1004_v61, %v370_v59  ;;  %v1647_v0 = vpop.f32.mrb[28].mxu1  ;;  %v1584_v1 = vpop.f32.mrb[29].mxu0  ;;  %1693 = vmatprep.mubr.bf16.mxu1 (!%p1508_p8), %v1110_v36  ;;  %v1084_v49 = vadd.f32 (!%p1508_p8), %v2499_v23, %v1061_v41  ;;  %v1057_v60 = vld [vmem:[#allocation2 + $0x30] sm:$0xff] (!%p1508_p8)  ;;  %v1058_v61 = vld [vmem:[#allocation2 + $0x38] sm:$0xff] (!%p1508_p8) }
 0x1e0   : > { %v1585_v2 = vadd.f32 %v1584_v1, %v1583_v62  ;;  %v1648_v3 = vpop.f32.mrb[29].mxu1  ;;  %v1586_v4 = vpop.f32.mrb[30].mxu0  ;;  %v1062_v42 = vld [vmem:[#allocation2 + $0x58] sm:$0xff] (!%p1508_p8)  ;;  %1680 = vmatpush3.bf16.msra.mxu0 (!%p1508_p8), %v1908_v37  ;;  %1714 = vmatpush3.bf16.msra.mxu1 (!%p1508_p8), %v1908_v37  ;;  %v1094_v62 = vmax.f32 (!%p1508_p8), %v1078_v51, 0.0 }
 0x1e1   : > { %1044 = vst [vmem:[#allocation2 + $0x68] sm:$0xff] %v1028_v63  ;;  %v1649_v5 = vadd.f32 %v1648_v3, %v1647_v0  ;;  %v1650_v6 = vpop.f32.mrb[30].mxu1  ;;  %v1587_v7 = vpop.f32.mrb[31].mxu0  ;;  %v1085_v50 = vadd.f32 (!%p1508_p8), %v2499_v23, %v1062_v42  ;;  %1681 = vmatprep.subr.bf16.mxu0 (!%p1508_p8), %v1909_v38  ;;  %1707 = vmatprep.subr.bf16.mxu1 (!%p1508_p8), %v1909_v38  ;;  %v1100_v58 = vmax.f32 (!%p1508_p8), %v1084_v49, 0.0  ;;  %v1095_v63 = vmax.f32 (!%p1508_p8), %v1079_v52, 0.0 }
 0x1e2   : > { %v1588_v9 = vadd.f32 %v1587_v7, %v1586_v4  ;;  %v1651_v10 = vpop.f32.mrb[31].mxu1  ;;  %v1107_v4 = vpack.c.bf16 (!%p1508_p8), %v1093_v57, %v1092_v56  ;;  %v1081_v7 = vadd.f32 (!%p1508_p8), %v2499_v23, %v1058_v61 }
 0x1e3   : > { %v1009_v11 = vadd.f32 %v1649_v5, %v1585_v2  ;;  %v1652_v12 = vadd.f32 %v1651_v10, %v1650_v6  ;;  %1050 = sbr.rel (%p1508_p8) target bundleno = 721 (0x2d1), region = 68  ;;  %v1101_v59 = vmax.f32 (!%p1508_p8), %v1085_v50, 0.0  ;;  %v1080_v5 = vadd.f32 (!%p1508_p8), %v2499_v23, %v1057_v60 }
 0x1e4   : > { %1682 = vmatpush3.bf16.msra.mxu0 (!%p1508_p8), %v1909_v38  ;;  %1715 = vmatpush3.bf16.msra.mxu1 (!%p1508_p8), %v1909_v38  ;;  %v1108_v10 = vpack.c.bf16 (!%p1508_p8), %v1095_v63, %v1094_v62 }
 0x1e5   : > { %v1029_v14 = vadd.f32 %v1009_v11, %v371_v8  ;;  %v1012_v15 = vadd.f32 %v1652_v12, %v1588_v9  ;;  %1683 = vmatprep.subr.bf16.mxu0 (!%p1508_p8), %v1910_v55  ;;  %1708 = vmatprep.subr.bf16.mxu1 (!%p1508_p8), %v1910_v55  ;;  %v1111_v6 = vpack.c.bf16 (!%p1508_p8), %v1101_v59, %v1100_v58  ;;  %v1096_v12 = vmax.f32 (!%p1508_p8), %v1080_v5, 0.0 }
 0x1e6   : > { %v1063_v45 = vld [vmem:[#allocation2 + $0x60] sm:$0xff] (!%p1508_p8) }
 0x1e7   : > { %1045 = vst [vmem:[#allocation2 + $0x70] sm:$0xff] %v1029_v14  ;;  %v1030_v16 = vadd.f32 %v1012_v15, %v372_v13  ;;  %v1086_v53 = vadd.f32 (!%p1508_p8), %v2499_v23, %v1063_v45  ;;  %v1097_v13 = vmax.f32 (!%p1508_p8), %v1081_v7, 0.0 }
 0x1e8   : > { %v1064_v46 = vld [vmem:[#allocation2 + $0x68] sm:$0xff] (!%p1508_p8)  ;;  %1684 = vmatpush3.bf16.msra.mxu0 (!%p1508_p8), %v1910_v55  ;;  %1716 = vmatpush3.bf16.msra.mxu1 (!%p1508_p8), %v1910_v55 }
 0x1e9   : > { %1046 = vst [vmem:[#allocation2 + $0x78] sm:$0xff] %v1030_v16  ;;  %v1087_v54 = vadd.f32 (!%p1508_p8), %v2499_v23, %v1064_v46  ;;  %v1102_v0 = vmax.f32 (!%p1508_p8), %v1086_v53, 0.0  ;;  %v1109_v16 = vpack.c.bf16 (!%p1508_p8), %v1097_v13, %v1096_v12 }
 0x1eb   : > { %v1103_v1 = vmax.f32 %v1087_v54, 0.0  ;;  %1686 = vmatmul.mubr.bf16.vlgmr.msra.gmra.mrb[0].mxu0 %v1107_v4  ;;  %1694 = vmatmul.mubr.bf16.vlgmr.msra.gmra.mrb[0].mxu1 %v1111_v6 }
 0x1ec   : > { %1689 = vmatprep.mubr.bf16.mxu0 %v1108_v10 }
 0x1ed   : > { %v1112_v11 = vpack.c.bf16 %v1103_v1, %v1102_v0 }
 0x1ee   : > { %v1065_v2 = vld [vmem:[#allocation2 + $0x70] sm:$0xff] }
 0x1ef   : > { %v1088_v8 = vadd.f32 %v2499_v23, %v1065_v2  ;;  %1697 = vmatprep.mubr.bf16.mxu1 %v1112_v11 }
 0x1f0   : > { %v1066_v3 = vld [vmem:[#allocation2 + $0x78] sm:$0xff] }
 0x1f1   : > { %v1089_v9 = vadd.f32 %v2499_v23, %v1066_v3  ;;  %v1104_v14 = vmax.f32 %v1088_v8, 0.0 }
 0x1f3   : > { %v1105_v15 = vmax.f32 %v1089_v9, 0.0  ;;  %1690 = vmatmul.mubr.bf16.gmra.mrb[4].mxu0 %v1109_v16 }
 0x1f5   : > { %v1113_v17 = vpack.c.bf16 %v1105_v15, %v1104_v14 }
 0x1f7   : > { %1698 = vmatmul.mubr.bf16.gmra.mrb[4].mxu1 %v1113_v17 }
 0x2be   : > { %v1687_v19 = vpop.f32.mrb[0].mxu0  ;;  %v1695_v20 = vpop.f32.mrb[0].mxu1 }
 0x2bf   : > { %v1228_v21 = vadd.f32 %v1687_v19, %v1510_v18  ;;  %v1260_v22 = vadd.f32 %v1695_v20, %v1510_v18  ;;  %v1219_v23 = vpop.f32.mrb[1].mxu0  ;;  %v1251_v24 = vpop.f32.mrb[1].mxu1 }
 0x2c0   : > { %v1220_v25 = vadd.f32 %v1510_v18, %v1219_v23  ;;  %v1252_v26 = vadd.f32 %v1510_v18, %v1251_v24  ;;  %v1688_v27 = vpop.f32.mrb[2].mxu0  ;;  %v1696_v28 = vpop.f32.mrb[2].mxu1 }
 0x2c1   : > { %1284 = vst [vmem:[#allocation12 + $0x10] sm:$0xff] %v1228_v21  ;;  %1292 = vst [vmem:[#allocation12 + $0x50] sm:$0xff] %v1260_v22  ;;  %v1231_v29 = vadd.f32 %v1688_v27, %v1510_v18  ;;  %v1263_v30 = vadd.f32 %v1696_v28, %v1510_v18  ;;  %v1222_v31 = vpop.f32.mrb[3].mxu0  ;;  %v1254_v32 = vpop.f32.mrb[3].mxu1 }
 0x2c2   : > { %1282 = vst [vmem:[#allocation12] sm:$0xff] %v1220_v25  ;;  %1290 = vst [vmem:[#allocation12 + $0x40] sm:$0xff] %v1252_v26  ;;  %v1223_v33 = vadd.f32 %v1510_v18, %v1222_v31  ;;  %v1255_v34 = vadd.f32 %v1510_v18, %v1254_v32 }
 0x2c3   : > { %1285 = vst [vmem:[#allocation12 + $0x18] sm:$0xff] %v1231_v29  ;;  %1293 = vst [vmem:[#allocation12 + $0x58] sm:$0xff] %v1263_v30 }
 0x2c4   : > { %1283 = vst [vmem:[#allocation12 + $0x8] sm:$0xff] %v1223_v33  ;;  %1291 = vst [vmem:[#allocation12 + $0x48] sm:$0xff] %v1255_v34 }
 0x2c6   : > { %v1691_v35 = vpop.f32.mrb[4].mxu0 }
 0x2c7   : > { %v1244_v37 = vadd.f32 %v1691_v35, %v1510_v18  ;;  %v1235_v39 = vpop.f32.mrb[5].mxu0 }
 0x2c8   : > { %v1236_v41 = vadd.f32 %v1510_v18, %v1235_v39  ;;  %v1692_v43 = vpop.f32.mrb[6].mxu0 }
 0x2c9   : > { %1288 = vst [vmem:[#allocation12 + $0x30] sm:$0xff] %v1244_v37  ;;  %v1247_v45 = vadd.f32 %v1692_v43, %v1510_v18  ;;  %v1238_v47 = vpop.f32.mrb[7].mxu0 }
 0x2ca   : > { %v1699_v36 = vpop.f32.mrb[4].mxu1  ;;  %1286 = vst [vmem:[#allocation12 + $0x20] sm:$0xff] %v1236_v41  ;;  %v1239_v49 = vadd.f32 %v1510_v18, %v1238_v47 }
 0x2cb   : > { %v1276_v38 = vadd.f32 %v1699_v36, %v1510_v18  ;;  %v1267_v40 = vpop.f32.mrb[5].mxu1  ;;  %1289 = vst [vmem:[#allocation12 + $0x38] sm:$0xff] %v1247_v45 }
 0x2cc   : > { %v1268_v42 = vadd.f32 %v1510_v18, %v1267_v40  ;;  %v1700_v44 = vpop.f32.mrb[6].mxu1  ;;  %1287 = vst [vmem:[#allocation12 + $0x28] sm:$0xff] %v1239_v49 }
 0x2cd   : > { %1296 = vst [vmem:[#allocation12 + $0x70] sm:$0xff] %v1276_v38  ;;  %v1279_v46 = vadd.f32 %v1700_v44, %v1510_v18  ;;  %v1270_v48 = vpop.f32.mrb[7].mxu1 }
 0x2ce   : > { %1294 = vst [vmem:[#allocation12 + $0x60] sm:$0xff] %v1268_v42  ;;  %v1271_v50 = vadd.f32 %v1510_v18, %v1270_v48 }
 0x2cf   : > { %1297 = vst [vmem:[#allocation12 + $0x78] sm:$0xff] %v1279_v46 }
 0x2d0   : > { %1295 = vst [vmem:[#allocation12 + $0x68] sm:$0xff] %v1271_v50 }
 0x2d1 PF: > { %p1761_p1 = scmp.eq.s32.totalorder %s2222_s24, 2  ;;  %s2160_s21 = smov [#allocation12]  }
 0x2d2   : > { %s1307_s26 = sshll.u32 %s2160_s21, 4  ;;  %s1308_s26 = int_to_ptr.vmem [resolvable:$true] %s1307_s26 }
 0x2d3   : > { %s2055_s27 = scalar_lea.vmem %s1308_s26, 2048  ;;  %p2062_p7 = scmp.lt.s32.totalorder %s1308_s26, %s1308_s26 }
 0x2d4   : > { %p2056_p2 = scmp.ne.s32.totalorder %s1308_s26, %s2055_s27  ;;  %p2063_p9 = scmp.lt.s32.totalorder %s2055_s27, %s2055_s27 }
 0x2d6   : > { %p2057_p12 = pnand %p2056_p2, %p1761_p1  ;;  %p2064_p6 = por %p2063_p9, %p2062_p7 }
 0x2d8   : > { %p2058_p4 = pneg %p2057_p12 }
 0x2da   : > { %p2065_p5 = pnand %p2064_p6, %p2058_p4 }
 0x2dc   : > { %2068 = shalt.err (!%p2065_p5)
}
 0x2dd   : > { %s2069_s9 = scalar_lea.hbm %s2563_s5, 2048 }
 0x2de   : > { %p2070_p3 = scmp.ne.s32.totalorder %s2563_s5, %s2069_s9  ;;  %p2075_p11 = scmp.lt.u32.totalorder %s2069_s9, %s2563_s5 }
 0x2e0   : > { %p2071_p10 = pnand %p2070_p3, %p1761_p1 }
 0x2e2   : > { %p2072_p0 = pneg %p2071_p10 }
 0x2e4   : > { %p2077_p13 = pnand %p2075_p11, %p2072_p0 }
 0x2e6   : > { %2080 = shalt.err (!%p2077_p13)
}
 0x2e7   : > { %s2161_s16 = smov 128   ;;  %s2162_s2 = smov 8  }
 0x2e8   : > { %1734 = dma.vmem_to_hbm [thread:$0]  (%p1761_p1), %s1308_s26, 2048, %s2563_s5, [#allocation5], %s2161_s16, %s2161_s16, %s2162_s2  }
 0x2e9   : > { %2122 = dma.done.wait (%p1761_p1), [#allocation5], 2048  }
 0x2ea   : > { %2124 = vsyncadd (%p1761_p1), [#allocation5], 4294965248 }
 0x2eb PF: > { %s23_s23 = sadd.s32 1, %s2147_s23   ;;  %s2589_s18 = smov %s2131_s19 }
 0x2ec   : > { %p20_p8 = scmp.ge.s32.totalorder %s23_s23, 5   ;;  %s2590_s19 = smov %s2135_s20 }
 0x2ed   : > { %s2591_s20 = smov %s2338_s28  ;;  %s2592_s21 = smov %s2143_s22 }
 0x2ee   : > { %s2593_s22 = smov %s2595_s25  ;;  %22 = sbr.rel (!%p20_p8) target bundleno = 11 (0xb), region = 111 }
 0x2f5   :  { %1323 = vsyncpa [#allocation4], 1 }
 0x2f6   :  { %1325 = vsyncpa [#allocation4 + $0x1], 1 }
 0x2f7   :  { %1326 = vsyncpa [#allocation7], 1 }
 0x2f8   :  { %1328 = vsyncpa [#allocation7 + $0x1], 1 }
 0x2f9   :  { %1329 = vsyncpa [#allocation10], 1 }
 0x2fa   :  { %1330 = vsyncpa [#allocation5], 1 }
 0x2fb   :  { %1332 = vsyncpa [#allocation5 + $0x1], 1 }

</bundles_post_ra>
